<compile_context>
chip_gen: v7x
topology: tpu7x:2x2x1
jax: 0.10.0
libtpu: 0.0.40
codegen_flags: <defaults>
</compile_context>

<pallas_src>
import math
import functools

import numpy as np
import jax
import jax.numpy as jnp
from jax import lax
from jax.experimental import pallas as pl
from jax.experimental.pallas import tpu as pltpu


def _relative_position_index(window_size):
    """Static (N, N) int index table; identical to the PyTorch buffer."""
    ws = window_size
    coords = np.stack(np.meshgrid(np.arange(ws), np.arange(ws), indexing="ij"))
    coords = coords.reshape(2, -1)                       # (2, N)
    rel = coords[:, :, None] - coords[:, None, :]        # (2, N, N)
    rel = rel.transpose(1, 2, 0).astype(np.int32)        # (N, N, 2)
    rel[:, :, 0] += ws - 1
    rel[:, :, 1] += ws - 1
    rel[:, :, 0] += 2 * ws - 1                           # NB: '+=' as in the source
    return rel.sum(-1)                                   # (N, N)


# ------------------------------ Pallas kernel --------------------------------

def _window_attn_kernel(q_ref, k_ref, v_ref, bias_ref, o_ref, *,
                        scale, n_heads, head_dim):
    # q/k/v: (BN, C) packed windows; bias: (n_heads, BN, BN) with block-diagonal
    # mask already folded in (-1e30 off-diagonal); o: (BN, C).
    q = q_ref[...]
    k = k_ref[...]
    v = v_ref[...]

    outs = []
    for h in range(n_heads):                 # static unroll over heads
        lo = h * head_dim
        hi = lo + head_dim
        qh = q[:, lo:hi]
        kh = k[:, lo:hi]
        vh = v[:, lo:hi]

        # (BN, D) @ (D, BN) -> (BN, BN), fp32 accumulate on the MXU
        s = jnp.einsum("nd,md->nm", qh, kh,
                       preferred_element_type=jnp.float32)
        s = s * scale + bias_ref[h]          # bias + block-diagonal mask
        s = s - jnp.max(s, axis=-1, keepdims=True)
        p = jnp.exp(s)                       # masked entries underflow to 0.0
        l = jnp.sum(p, axis=-1, keepdims=True)
        # attn_drop: rate 0.0 / eval mode -> identity
        oh = jnp.einsum("nm,md->nd", p.astype(v.dtype), vh,
                        preferred_element_type=jnp.float32)
        outs.append(oh / l)                  # normalize the small (BN, D) output

    # single store of the head-merged result
    o_ref[...] = jnp.concatenate(outs, axis=-1).astype(o_ref.dtype)


# --------------------------------- wrapper ------------------------------------

def window_attention_forward(qkv, params, *, window_size, n_heads,
                             qk_scale=None, mask=None, block_rows=128):
    # TODO(synk): attention-mask path (per-window additive mask) not implemented;
    # the module's forward defaults to mask=None.
    assert mask is None
    q, k, v = qkv[0], qkv[1], qkv[2]
    BS, H, W, C = q.shape
    ws = window_size
    N = ws * ws
    D = C // n_heads
    scale = float(qk_scale) if qk_scale is not None else float(D) ** -0.5

    def window_partition(x):                 # layout plumbing, stays in JAX
        x = x.reshape(BS, H // ws, ws, W // ws, ws, C)
        return jnp.transpose(x, (0, 1, 3, 2, 4, 5)).reshape(-1, N, C)

    qw, kw, vw = window_partition(q), window_partition(k), window_partition(v)
    B_ = qw.shape[0]

    # --- choose how many windows to pack per grid step ------------------------
    bw = max(1, block_rows // N)
    r = 8 // math.gcd(N, 8)                  # keep BN a multiple of 8 (sublanes)
    bw = ((bw + r - 1) // r) * r
    BN = bw * N
    nb = pl.cdiv(B_, bw)
    Bp = nb * bw
    if Bp != B_:
        pad = ((0, Bp - B_), (0, 0), (0, 0))
        qw, kw, vw = jnp.pad(qw, pad), jnp.pad(kw, pad), jnp.pad(vw, pad)

    # contiguous (free) reshape to 2-D slabs with C on the lane dim
    q2 = qw.reshape(Bp * N, C)
    k2 = kw.reshape(Bp * N, C)
    v2 = vw.reshape(Bp * N, C)

    # --- relative-position bias, tiled + block-diagonal mask (done once) ------
    idx = _relative_position_index(ws).reshape(-1)
    bias = params["relative_position_bias_table"][idx]
    bias = bias.reshape(N, N, n_heads)
    bias = jnp.transpose(bias, (2, 0, 1)).astype(jnp.float32)   # (n_heads, N, N)
    diag = jnp.kron(jnp.eye(bw, dtype=jnp.float32),
                    jnp.ones((N, N), jnp.float32))              # (BN, BN)
    bias_mask = jnp.where(diag[None] > 0.5,
                          jnp.tile(bias, (1, bw, bw)),
                          jnp.float32(-1e30))                   # (n_heads, BN, BN)

    kern = functools.partial(_window_attn_kernel, scale=scale,
                             n_heads=n_heads, head_dim=D)
    out = pl.pallas_call(
        kern,
        out_shape=jax.ShapeDtypeStruct((Bp * N, C), qw.dtype),
        grid_spec=pltpu.PrefetchScalarGridSpec(
            num_scalar_prefetch=0,
            grid=(nb,),
            in_specs=[
                pl.BlockSpec((BN, C), lambda i: (i, 0)),
                pl.BlockSpec((BN, C), lambda i: (i, 0)),
                pl.BlockSpec((BN, C), lambda i: (i, 0)),
                pl.BlockSpec((n_heads, BN, BN), lambda i: (0, 0, 0)),  # grid-invariant
            ],
            out_specs=pl.BlockSpec((BN, C), lambda i: (i, 0)),
        ),
        compiler_params=pltpu.CompilerParams(
            dimension_semantics=("parallel",)),
    )(q2, k2, v2, bias_mask)
    return out.reshape(Bp, N, C)[:B_]


# --------------------------- pure-JAX reference --------------------------------

def _reference_forward(qkv, params, *, window_size, n_heads, qk_scale=None):
    q, k, v = qkv[0], qkv[1], qkv[2]
    BS, H, W, C = q.shape
    ws = window_size
    N = ws * ws
    D = C // n_heads
    scale = qk_scale if qk_scale is not None else D ** -0.5

    def wp(x):
        x = x.reshape(BS, H // ws, ws, W // ws, ws, C)
        return jnp.transpose(x, (0, 1, 3, 2, 4, 5)).reshape(-1, N, C)

    q, k, v = wp(q), wp(k), wp(v)
    B_ = q.shape[0]

    def split(x):
        return jnp.transpose(x.reshape(B_, N, n_heads, D), (0, 2, 1, 3))

    q, k, v = split(q), split(k), split(v)
    attn = jnp.einsum("bhnd,bhmd->bhnm", q, k,
                      precision=lax.Precision.HIGHEST) * scale
    idx = _relative_position_index(ws).reshape(-1)
    bias = params["relative_position_bias_table"][idx].reshape(N, N, n_heads)
    attn = attn + jnp.transpose(bias, (2, 0, 1))[None]
    attn = jax.nn.softmax(attn, axis=-1)
    x = jnp.einsum("bhnm,bhmd->bhnd", attn, v, precision=lax.Precision.HIGHEST)
    return jnp.transpose(x, (0, 2, 1, 3)).reshape(B_, N, C)


# ------------------------------------ main -------------------------------------

if __name__ == "__main__":
    key = jax.random.PRNGKey(0)
    k_qkv, k_tab = jax.random.split(key)

    BS, H, W, C = 2, 16, 16, 32
    window_size, n_heads = 4, 4

    qkv = jax.random.normal(k_qkv, (3, BS, H, W, C), jnp.float32)
    params = {
        # trunc_normal(std=0.02) init; exact init law does not affect the forward
        "relative_position_bias_table": 0.02 * jax.random.normal(
            k_tab, ((2 * window_size - 1) ** 2, n_heads), jnp.float32),
    }

    fwd = jax.jit(functools.partial(window_attention_forward,
                                    window_size=window_size, n_heads=n_heads))
    out = jax.block_until_ready(fwd(qkv, params))
    B_ = BS * (H // window_size) * (W // window_size)
    assert out.shape == (B_, window_size ** 2, C), out.shape

    ref = jax.block_until_ready(
        _reference_forward(qkv, params, window_size=window_size, n_heads=n_heads))
    np.testing.assert_allclose(np.asarray(out), np.asarray(ref),
                               rtol=2e-3, atol=2e-3)

    print("KERNEL_OK")
</pallas_src>

<mosaic_0001>
module attributes {stable_mosaic.version = 11 : i64} {
  func.func @_window_attn_kernel(%arg0: i32, %arg1: memref<128x32xf32, #tpu.memory_space<vmem>>, %arg2: memref<128x32xf32, #tpu.memory_space<vmem>>, %arg3: memref<128x32xf32, #tpu.memory_space<vmem>>, %arg4: memref<4x128x128xf32, #tpu.memory_space<vmem>>, %arg5: memref<128x32xf32, #tpu.memory_space<vmem>>) attributes {dimension_semantics = [#tpu.dimension_semantics<parallel>], iteration_bounds = array<i64: 4>, scalar_prefetch = 0 : i64, scratch_operands = 0 : i64, tpu.core_type = #tpu.core_type<tc>, window_params = [{transform_indices = @transform_0, window_bounds = array<i64: 128, 32>}, {transform_indices = @transform_1, window_bounds = array<i64: 128, 32>}, {transform_indices = @transform_2, window_bounds = array<i64: 128, 32>}, {pipeline_mode = #tpu.pipeline_mode<synchronous>, transform_indices = @transform_3, window_bounds = array<i64: 4, 128, 128>}, {transform_indices = @transform_4, window_bounds = array<i64: 128, 32>}]} {
    %c0 = arith.constant 0 : index
    %c0_0 = arith.constant 0 : index
    %0 = vector.load %arg1[%c0, %c0_0] : memref<128x32xf32, #tpu.memory_space<vmem>>, vector<128x32xf32>
    %c0_1 = arith.constant 0 : index
    %c0_2 = arith.constant 0 : index
    %1 = vector.load %arg2[%c0_1, %c0_2] : memref<128x32xf32, #tpu.memory_space<vmem>>, vector<128x32xf32>
    %c0_3 = arith.constant 0 : index
    %c0_4 = arith.constant 0 : index
    %2 = vector.load %arg3[%c0_3, %c0_4] : memref<128x32xf32, #tpu.memory_space<vmem>>, vector<128x32xf32>
    %3 = vector.extract_strided_slice %0 {offsets = [0, 0], sizes = [128, 8], strides = [1, 1]} : vector<128x32xf32> to vector<128x8xf32>
    %4 = vector.extract_strided_slice %1 {offsets = [0, 0], sizes = [128, 8], strides = [1, 1]} : vector<128x32xf32> to vector<128x8xf32>
    %5 = vector.extract_strided_slice %2 {offsets = [0, 0], sizes = [128, 8], strides = [1, 1]} : vector<128x32xf32> to vector<128x8xf32>
    "tpu.trace_start"() <{level = 10 : i32, message = "nd,md->nm"}> : () -> ()
    %cst = arith.constant dense<0.000000e+00> : vector<128x128xf32>
    %6 = tpu.matmul %3, %4, %cst {dimension_numbers = #tpu.dot_dimension_numbers<[1], [1], [0], [0], [0, 0, 1, 0], [], []>} : vector<128x8xf32>, vector<128x8xf32>, vector<128x128xf32> -> vector<128x128xf32>
    "tpu.trace_stop"() : () -> ()
    %cst_5 = arith.constant 0.353553385 : f32
    %7 = vector.broadcast %cst_5 : f32 to vector<128x128xf32>
    %8 = arith.mulf %6, %7 : vector<128x128xf32>
    %c0_6 = arith.constant 0 : index
    %c0_7 = arith.constant 0 : index
    %c0_8 = arith.constant 0 : index
    %9 = vector.load %arg4[%c0_6, %c0_7, %c0_8] : memref<4x128x128xf32, #tpu.memory_space<vmem>>, vector<1x128x128xf32>
    %10 = vector.shape_cast %9 : vector<1x128x128xf32> to vector<128x128xf32>
    %11 = arith.addf %8, %10 : vector<128x128xf32>
    %cst_9 = arith.constant dense<0xFF800000> : vector<128xf32>
    %12 = vector.multi_reduction <maximumf>, %11, %cst_9 [1] : vector<128x128xf32> to vector<128xf32>
    %13 = vector.shape_cast %12 : vector<128xf32> to vector<128x1xf32>
    %14 = vector.broadcast %13 : vector<128x1xf32> to vector<128x128xf32>
    %15 = arith.subf %11, %14 : vector<128x128xf32>
    %16 = math.exp %15 : vector<128x128xf32>
    %cst_10 = arith.constant dense<0.000000e+00> : vector<128xf32>
    %17 = vector.multi_reduction <add>, %16, %cst_10 [1] : vector<128x128xf32> to vector<128xf32>
    %18 = vector.shape_cast %17 : vector<128xf32> to vector<128x1xf32>
    "tpu.trace_start"() <{level = 10 : i32, message = "nm,md->nd"}> : () -> ()
    %cst_11 = arith.constant dense<0.000000e+00> : vector<128x8xf32>
    %19 = tpu.matmul %16, %5, %cst_11 {dimension_numbers = #tpu.dot_dimension_numbers<[1], [0], [0], [1], [0, 0, 1, 1], [], []>} : vector<128x128xf32>, vector<128x8xf32>, vector<128x8xf32> -> vector<128x8xf32>
    "tpu.trace_stop"() : () -> ()
    %20 = vector.broadcast %18 : vector<128x1xf32> to vector<128x8xf32>
    %21 = arith.divf %19, %20 : vector<128x8xf32>
    %22 = vector.extract_strided_slice %0 {offsets = [0, 8], sizes = [128, 8], strides = [1, 1]} : vector<128x32xf32> to vector<128x8xf32>
    %23 = vector.extract_strided_slice %1 {offsets = [0, 8], sizes = [128, 8], strides = [1, 1]} : vector<128x32xf32> to vector<128x8xf32>
    %24 = vector.extract_strided_slice %2 {offsets = [0, 8], sizes = [128, 8], strides = [1, 1]} : vector<128x32xf32> to vector<128x8xf32>
    "tpu.trace_start"() <{level = 10 : i32, message = "nd,md->nm"}> : () -> ()
    %cst_12 = arith.constant dense<0.000000e+00> : vector<128x128xf32>
    %25 = tpu.matmul %22, %23, %cst_12 {dimension_numbers = #tpu.dot_dimension_numbers<[1], [1], [0], [0], [0, 0, 1, 0], [], []>} : vector<128x8xf32>, vector<128x8xf32>, vector<128x128xf32> -> vector<128x128xf32>
    "tpu.trace_stop"() : () -> ()
    %cst_13 = arith.constant 0.353553385 : f32
    %26 = vector.broadcast %cst_13 : f32 to vector<128x128xf32>
    %27 = arith.mulf %25, %26 : vector<128x128xf32>
    %c1 = arith.constant 1 : index
    %c0_14 = arith.constant 0 : index
    %c0_15 = arith.constant 0 : index
    %28 = vector.load %arg4[%c1, %c0_14, %c0_15] : memref<4x128x128xf32, #tpu.memory_space<vmem>>, vector<1x128x128xf32>
    %29 = vector.shape_cast %28 : vector<1x128x128xf32> to vector<128x128xf32>
    %30 = arith.addf %27, %29 : vector<128x128xf32>
    %cst_16 = arith.constant dense<0xFF800000> : vector<128xf32>
    %31 = vector.multi_reduction <maximumf>, %30, %cst_16 [1] : vector<128x128xf32> to vector<128xf32>
    %32 = vector.shape_cast %31 : vector<128xf32> to vector<128x1xf32>
    %33 = vector.broadcast %32 : vector<128x1xf32> to vector<128x128xf32>
    %34 = arith.subf %30, %33 : vector<128x128xf32>
    %35 = math.exp %34 : vector<128x128xf32>
    %cst_17 = arith.constant dense<0.000000e+00> : vector<128xf32>
    %36 = vector.multi_reduction <add>, %35, %cst_17 [1] : vector<128x128xf32> to vector<128xf32>
    %37 = vector.shape_cast %36 : vector<128xf32> to vector<128x1xf32>
    "tpu.trace_start"() <{level = 10 : i32, message = "nm,md->nd"}> : () -> ()
    %cst_18 = arith.constant dense<0.000000e+00> : vector<128x8xf32>
    %38 = tpu.matmul %35, %24, %cst_18 {dimension_numbers = #tpu.dot_dimension_numbers<[1], [0], [0], [1], [0, 0, 1, 1], [], []>} : vector<128x128xf32>, vector<128x8xf32>, vector<128x8xf32> -> vector<128x8xf32>
    "tpu.trace_stop"() : () -> ()
    %39 = vector.broadcast %37 : vector<128x1xf32> to vector<128x8xf32>
    %40 = arith.divf %38, %39 : vector<128x8xf32>
    %41 = vector.extract_strided_slice %0 {offsets = [0, 16], sizes = [128, 8], strides = [1, 1]} : vector<128x32xf32> to vector<128x8xf32>
    %42 = vector.extract_strided_slice %1 {offsets = [0, 16], sizes = [128, 8], strides = [1, 1]} : vector<128x32xf32> to vector<128x8xf32>
    %43 = vector.extract_strided_slice %2 {offsets = [0, 16], sizes = [128, 8], strides = [1, 1]} : vector<128x32xf32> to vector<128x8xf32>
    "tpu.trace_start"() <{level = 10 : i32, message = "nd,md->nm"}> : () -> ()
    %cst_19 = arith.constant dense<0.000000e+00> : vector<128x128xf32>
    %44 = tpu.matmul %41, %42, %cst_19 {dimension_numbers = #tpu.dot_dimension_numbers<[1], [1], [0], [0], [0, 0, 1, 0], [], []>} : vector<128x8xf32>, vector<128x8xf32>, vector<128x128xf32> -> vector<128x128xf32>
    "tpu.trace_stop"() : () -> ()
    %cst_20 = arith.constant 0.353553385 : f32
    %45 = vector.broadcast %cst_20 : f32 to vector<128x128xf32>
    %46 = arith.mulf %44, %45 : vector<128x128xf32>
    %c2 = arith.constant 2 : index
    %c0_21 = arith.constant 0 : index
    %c0_22 = arith.constant 0 : index
    %47 = vector.load %arg4[%c2, %c0_21, %c0_22] : memref<4x128x128xf32, #tpu.memory_space<vmem>>, vector<1x128x128xf32>
    %48 = vector.shape_cast %47 : vector<1x128x128xf32> to vector<128x128xf32>
    %49 = arith.addf %46, %48 : vector<128x128xf32>
    %cst_23 = arith.constant dense<0xFF800000> : vector<128xf32>
    %50 = vector.multi_reduction <maximumf>, %49, %cst_23 [1] : vector<128x128xf32> to vector<128xf32>
    %51 = vector.shape_cast %50 : vector<128xf32> to vector<128x1xf32>
    %52 = vector.broadcast %51 : vector<128x1xf32> to vector<128x128xf32>
    %53 = arith.subf %49, %52 : vector<128x128xf32>
    %54 = math.exp %53 : vector<128x128xf32>
    %cst_24 = arith.constant dense<0.000000e+00> : vector<128xf32>
    %55 = vector.multi_reduction <add>, %54, %cst_24 [1] : vector<128x128xf32> to vector<128xf32>
    %56 = vector.shape_cast %55 : vector<128xf32> to vector<128x1xf32>
    "tpu.trace_start"() <{level = 10 : i32, message = "nm,md->nd"}> : () -> ()
    %cst_25 = arith.constant dense<0.000000e+00> : vector<128x8xf32>
    %57 = tpu.matmul %54, %43, %cst_25 {dimension_numbers = #tpu.dot_dimension_numbers<[1], [0], [0], [1], [0, 0, 1, 1], [], []>} : vector<128x128xf32>, vector<128x8xf32>, vector<128x8xf32> -> vector<128x8xf32>
    "tpu.trace_stop"() : () -> ()
    %58 = vector.broadcast %56 : vector<128x1xf32> to vector<128x8xf32>
    %59 = arith.divf %57, %58 : vector<128x8xf32>
    %60 = vector.extract_strided_slice %0 {offsets = [0, 24], sizes = [128, 8], strides = [1, 1]} : vector<128x32xf32> to vector<128x8xf32>
    %61 = vector.extract_strided_slice %1 {offsets = [0, 24], sizes = [128, 8], strides = [1, 1]} : vector<128x32xf32> to vector<128x8xf32>
    %62 = vector.extract_strided_slice %2 {offsets = [0, 24], sizes = [128, 8], strides = [1, 1]} : vector<128x32xf32> to vector<128x8xf32>
    "tpu.trace_start"() <{level = 10 : i32, message = "nd,md->nm"}> : () -> ()
    %cst_26 = arith.constant dense<0.000000e+00> : vector<128x128xf32>
    %63 = tpu.matmul %60, %61, %cst_26 {dimension_numbers = #tpu.dot_dimension_numbers<[1], [1], [0], [0], [0, 0, 1, 0], [], []>} : vector<128x8xf32>, vector<128x8xf32>, vector<128x128xf32> -> vector<128x128xf32>
    "tpu.trace_stop"() : () -> ()
    %cst_27 = arith.constant 0.353553385 : f32
    %64 = vector.broadcast %cst_27 : f32 to vector<128x128xf32>
    %65 = arith.mulf %63, %64 : vector<128x128xf32>
    %c3 = arith.constant 3 : index
    %c0_28 = arith.constant 0 : index
    %c0_29 = arith.constant 0 : index
    %66 = vector.load %arg4[%c3, %c0_28, %c0_29] : memref<4x128x128xf32, #tpu.memory_space<vmem>>, vector<1x128x128xf32>
    %67 = vector.shape_cast %66 : vector<1x128x128xf32> to vector<128x128xf32>
    %68 = arith.addf %65, %67 : vector<128x128xf32>
    %cst_30 = arith.constant dense<0xFF800000> : vector<128xf32>
    %69 = vector.multi_reduction <maximumf>, %68, %cst_30 [1] : vector<128x128xf32> to vector<128xf32>
    %70 = vector.shape_cast %69 : vector<128xf32> to vector<128x1xf32>
    %71 = vector.broadcast %70 : vector<128x1xf32> to vector<128x128xf32>
    %72 = arith.subf %68, %71 : vector<128x128xf32>
    %73 = math.exp %72 : vector<128x128xf32>
    %cst_31 = arith.constant dense<0.000000e+00> : vector<128xf32>
    %74 = vector.multi_reduction <add>, %73, %cst_31 [1] : vector<128x128xf32> to vector<128xf32>
    %75 = vector.shape_cast %74 : vector<128xf32> to vector<128x1xf32>
    "tpu.trace_start"() <{level = 10 : i32, message = "nm,md->nd"}> : () -> ()
    %cst_32 = arith.constant dense<0.000000e+00> : vector<128x8xf32>
    %76 = tpu.matmul %73, %62, %cst_32 {dimension_numbers = #tpu.dot_dimension_numbers<[1], [0], [0], [1], [0, 0, 1, 1], [], []>} : vector<128x128xf32>, vector<128x8xf32>, vector<128x8xf32> -> vector<128x8xf32>
    "tpu.trace_stop"() : () -> ()
    %77 = vector.broadcast %75 : vector<128x1xf32> to vector<128x8xf32>
    %78 = arith.divf %76, %77 : vector<128x8xf32>
    %79 = tpu.concatenate %21, %40, %59, %78 in 1 : vector<128x8xf32>, vector<128x8xf32>, vector<128x8xf32>, vector<128x8xf32> -> vector<128x32xf32>
    %c0_33 = arith.constant 0 : index
    %c0_34 = arith.constant 0 : index
    %80 = vector.load %arg5[%c0_33, %c0_34] : memref<128x32xf32, #tpu.memory_space<vmem>>, vector<128x32xf32>
    tpu.vector_store %arg5[%c0_33, %c0_34], %79 {strides = array<i32>} : memref<128x32xf32, #tpu.memory_space<vmem>>, vector<128x32xf32>,
    return
  }
  func.func @transform_0(%arg0: i32) -> (i32, i32) {
    %c0_i32 = arith.constant 0 : i32
    %c0_i32_0 = arith.constant 0 : i32
    return %arg0, %c0_i32 : i32, i32
  }
  func.func @transform_1(%arg0: i32) -> (i32, i32) {
    %c0_i32 = arith.constant 0 : i32
    %c0_i32_0 = arith.constant 0 : i32
    return %arg0, %c0_i32 : i32, i32
  }
  func.func @transform_2(%arg0: i32) -> (i32, i32) {
    %c0_i32 = arith.constant 0 : i32
    %c0_i32_0 = arith.constant 0 : i32
    return %arg0, %c0_i32 : i32, i32
  }
  func.func @transform_3(%arg0: i32) -> (i32, i32, i32) {
    %c0_i32 = arith.constant 0 : i32
    %c0_i32_0 = arith.constant 0 : i32
    %c0_i32_1 = arith.constant 0 : i32
    %c0_i32_2 = arith.constant 0 : i32
    return %c0_i32, %c0_i32_0, %c0_i32_1 : i32, i32, i32
  }
  func.func @transform_4(%arg0: i32) -> (i32, i32) {
    %c0_i32 = arith.constant 0 : i32
    %c0_i32_0 = arith.constant 0 : i32
    return %arg0, %c0_i32 : i32, i32
  }
}

</mosaic_0001>

<bundles_post_ra>
// kernel: tile.9
= control target key start
LH: loop header
LB: loop body
LE: loop exit
PB: predicated region body
PF: predicated region fallthrough
CT: control target
= control target key end

     0   :  { %vm4_vm0 = vcmask 1047556   ;;  %s7029_s14 = smov 112   ;;  %vm6_vm1 = vcmask 130048   ;;  %vm583_vm2 = vcmask 1048448   ;;  %s7030_s3 = smov 96   ;;  %vm1286_vm3 = vcmask 917248   ;;  %s13126_s0 = inlined_call_operand.vmem [shape: f32[4,8,16,8,16], index: 0, kind: input, shape index: {}]   ;;  %s13127_s1 = inlined_call_operand.vmem [shape: f32[4,128,128], index: 1, kind: output, shape index: {}]  }
   0x1   :  { %v5690_v0 = vld [vmem:[%s13126_s0 + $0x207] ss:$8 sm:$0xf]   ;;  %s7031_s25 = smov 80   ;;  %vm1989_vm4 = vcmask 786048   ;;  %s7032_s16 = smov 64  }
   0x2   :  { %v5691_v1 = vld [vmem:[%s13126_s0 + $0x207] ss:$8 sm:$0xf0]   ;;  %vm2692_vm5 = vcmask 654848   ;;  %s7033_s8 = smov 48   ;;  %vm3395_vm6 = vcmask 523648  }
   0x3   :  { %v601_v2 = vsel %vm4_vm0, %v5691_v1, %v5690_v0  ;;  %v5685_v3 = vld [vmem:[%s13126_s0 + $0x7] ss:$8 sm:$0xf]   ;;  %s7034_s28 = smov 32   ;;  %vm4098_vm7 = vcmask 392448   ;;  %s7035_s19 = smov 16  }
   0x4   :  { %v5686_v4 = vld [vmem:[%s13126_s0 + $0x7] ss:$8 sm:$0xf0]   ;;  %602 = vrot.lane.b32.xlu1 %v601_v2, %s7029_s14  ;;  %vm4801_vm8 = vcmask 261248  }
   0x5   :  { %v580_v5 = vsel %vm4_vm0, %v5686_v4, %v5685_v3  ;;  %v5693_v6 = vld [vmem:[%s13126_s0 + $0x307] ss:$8 sm:$0xf]  }
   0x6   :  { %v5694_v7 = vld [vmem:[%s13126_s0 + $0x307] ss:$8 sm:$0xf0]   ;;  %581 = vrot.lane.b32.xlu0 %v580_v5, %s7029_s14 }
   0x7   :  { %v612_v8 = vsel %vm4_vm0, %v5694_v7, %v5693_v6  ;;  %v5687_v9 = vld [vmem:[%s13126_s0 + $0x107] ss:$8 sm:$0xf]  }
   0x8   :  { %v5688_v10 = vld [vmem:[%s13126_s0 + $0x107] ss:$8 sm:$0xf0]   ;;  %613 = vrot.lane.b32.xlu1 %v612_v8, %s7029_s14 }
   0x9   :  { %v590_v11 = vsel %vm4_vm0, %v5688_v10, %v5687_v9  ;;  %v5699_v12 = vld [vmem:[%s13126_s0 + $0x507] ss:$8 sm:$0xf]  }
   0xa   :  { %v5700_v13 = vld [vmem:[%s13126_s0 + $0x507] ss:$8 sm:$0xf0]   ;;  %591 = vrot.lane.b32.xlu0 %v590_v11, %s7029_s14 }
   0xb   :  { %v5696_v14 = vld [vmem:[%s13126_s0 + $0x407] ss:$8 sm:$0xf]   ;;  %v634_v16 = vsel %vm4_vm0, %v5700_v13, %v5699_v12 }
   0xc   :  { %v5697_v15 = vld [vmem:[%s13126_s0 + $0x407] ss:$8 sm:$0xf0]   ;;  %635 = vrot.lane.b32.xlu1 %v634_v16, %s7029_s14 }
   0xd   :  { %v623_v17 = vsel %vm4_vm0, %v5697_v15, %v5696_v14  ;;  %v5705_v18 = vld [vmem:[%s13126_s0 + $0x707] ss:$8 sm:$0xf]  }
   0xe   :  { %v5706_v19 = vld [vmem:[%s13126_s0 + $0x707] ss:$8 sm:$0xf0]   ;;  %624 = vrot.lane.b32.xlu0 %v623_v17, %s7029_s14 }
   0xf   :  { %v5702_v20 = vld [vmem:[%s13126_s0 + $0x607] ss:$8 sm:$0xf]   ;;  %v656_v22 = vsel %vm4_vm0, %v5706_v19, %v5705_v18 }
  0x10   :  { %v5703_v21 = vld [vmem:[%s13126_s0 + $0x607] ss:$8 sm:$0xf0]   ;;  %657 = vrot.lane.b32.xlu1 %v656_v22, %s7029_s14 }
  0x11   :  { %v645_v23 = vsel %vm4_vm0, %v5703_v21, %v5702_v20  ;;  %v5711_v24 = vld [vmem:[%s13126_s0 + $0x907] ss:$8 sm:$0xf]  }
  0x12   :  { %v5712_v25 = vld [vmem:[%s13126_s0 + $0x907] ss:$8 sm:$0xf0]   ;;  %646 = vrot.lane.b32.xlu0 %v645_v23, %s7029_s14 }
  0x13   :  { %v5708_v26 = vld [vmem:[%s13126_s0 + $0x807] ss:$8 sm:$0xf]   ;;  %v678_v28 = vsel %vm4_vm0, %v5712_v25, %v5711_v24 }
  0x14   :  { %v5709_v27 = vld [vmem:[%s13126_s0 + $0x807] ss:$8 sm:$0xf0]   ;;  %679 = vrot.lane.b32.xlu1 %v678_v28, %s7029_s14 }
  0x15   :  { %v667_v29 = vsel %vm4_vm0, %v5709_v27, %v5708_v26  ;;  %v5717_v30 = vld [vmem:[%s13126_s0 + $0xb07] ss:$8 sm:$0xf]  }
  0x16   :  { %v5718_v31 = vld [vmem:[%s13126_s0 + $0xb07] ss:$8 sm:$0xf0]   ;;  %668 = vrot.lane.b32.xlu0 %v667_v29, %s7029_s14 }
  0x17   :  { %v5714_v32 = vld [vmem:[%s13126_s0 + $0xa07] ss:$8 sm:$0xf]   ;;  %v700_v34 = vsel %vm4_vm0, %v5718_v31, %v5717_v30  ;;  %v5517_v30 = vld [vmem:[%s13126_s0 + $0x200] ss:$8 sm:$0xf]  }
  0x18   :  { %v5715_v33 = vld [vmem:[%s13126_s0 + $0xa07] ss:$8 sm:$0xf0]   ;;  %701 = vrot.lane.b32.xlu1 %v700_v34, %s7029_s14  ;;  %v5518_v31 = vld [vmem:[%s13126_s0 + $0x200] ss:$8 sm:$0xf0]  }
  0x19   :  { %v689_v35 = vsel %vm4_vm0, %v5715_v33, %v5714_v32  ;;  %v5723_v36 = vld [vmem:[%s13126_s0 + $0xd07] ss:$8 sm:$0xf]   ;;  %v76_v33 = vsel %vm4_vm0, %v5518_v31, %v5517_v30  ;;  %v2_v34 = vld [vmem:[%s13126_s0] ss:$8 sm:$0xf]  }
  0x1a   :  { %v5724_v37 = vld [vmem:[%s13126_s0 + $0xd07] ss:$8 sm:$0xf0]   ;;  %690 = vrot.lane.b32.xlu0 %v689_v35, %s7029_s14  ;;  %v3_v35 = vld [vmem:[%s13126_s0] ss:$8 sm:$0xf0]  }
  0x1b   :  { %v5720_v38 = vld [vmem:[%s13126_s0 + $0xc07] ss:$8 sm:$0xf]   ;;  %v722_v40 = vsel %vm4_vm0, %v5724_v37, %v5723_v36  ;;  %5519 = vst.msk [vmem:[%s13127_s1 + $0x40] sm:$0xff] %vm6_vm1, %v76_v33  }
  0x1c   :  { %v5721_v39 = vld [vmem:[%s13126_s0 + $0xc07] ss:$8 sm:$0xf0]   ;;  %723 = vrot.lane.b32.xlu1 %v722_v40, %s7029_s14  ;;  %v5613_v30 = vld [vmem:[%s13126_s0 + $0xa00] ss:$8 sm:$0xf]  }
  0x1d   :  { %v711_v41 = vsel %vm4_vm0, %v5721_v39, %v5720_v38  ;;  %v5729_v42 = vld [vmem:[%s13126_s0 + $0xf07] ss:$8 sm:$0xf]   ;;  %v5_v39 = vsel %vm4_vm0, %v3_v35, %v2_v34  ;;  %v5614_v34 = vld [vmem:[%s13126_s0 + $0xa00] ss:$8 sm:$0xf0]  }
  0x1e   :  { %v5730_v43 = vld [vmem:[%s13126_s0 + $0xf07] ss:$8 sm:$0xf0]   ;;  %712 = vrot.lane.b32.xlu0 %v711_v41, %s7029_s14  ;;  %7 = vst.msk [vmem:[%s13127_s1] sm:$0xff] %vm6_vm1, %v5_v39  }
  0x1f   :  { %v5726_v44 = vld [vmem:[%s13126_s0 + $0xe07] ss:$8 sm:$0xf]   ;;  %v744_v46 = vsel %vm4_vm0, %v5730_v43, %v5729_v42  ;;  %v5529_v42 = vld [vmem:[%s13126_s0 + $0x300] ss:$8 sm:$0xf]  }
  0x20   :  { %v5727_v45 = vld [vmem:[%s13126_s0 + $0xe07] ss:$8 sm:$0xf0]   ;;  %745 = vrot.lane.b32.xlu1 %v744_v46, %s7029_s14  ;;  %v5530_v43 = vld [vmem:[%s13126_s0 + $0x300] ss:$8 sm:$0xf0]  }
  0x21   :  { %v733_v47 = vsel %vm4_vm0, %v5727_v45, %v5726_v44  ;;  %v5735_v48 = vld [vmem:[%s13126_s0 + $0x147] ss:$8 sm:$0xf]   ;;  %v112_v45 = vsel %vm4_vm0, %v5530_v43, %v5529_v42  ;;  %v5505_v46 = vld [vmem:[%s13126_s0 + $0x100] ss:$8 sm:$0xf]  }
  0x22   :  { %v5736_v49 = vld [vmem:[%s13126_s0 + $0x147] ss:$8 sm:$0xf0]   ;;  %734 = vrot.lane.b32.xlu0 %v733_v47, %s7029_s14  ;;  %v5506_v47 = vld [vmem:[%s13126_s0 + $0x100] ss:$8 sm:$0xf0]  }
  0x23   :  { %v5732_v50 = vld [vmem:[%s13126_s0 + $0x47] ss:$8 sm:$0xf]   ;;  %v766_v52 = vsel %vm4_vm0, %v5736_v49, %v5735_v48  ;;  %5531 = vst.msk [vmem:[%s13127_s1 + $0x60] sm:$0xff] %vm6_vm1, %v112_v45  }
  0x24   :  { %v5733_v51 = vld [vmem:[%s13126_s0 + $0x47] ss:$8 sm:$0xf0]   ;;  %767 = vrot.lane.b32.xlu1 %v766_v52, %s7029_s14  ;;  %v5649_v39 = vld [vmem:[%s13126_s0 + $0xd00] ss:$8 sm:$0xf]  }
  0x25   :  { %v755_v53 = vsel %vm4_vm0, %v5733_v51, %v5732_v50  ;;  %v5741_v54 = vld [vmem:[%s13126_s0 + $0x347] ss:$8 sm:$0xf]   ;;  %v40_v51 = vsel %vm4_vm0, %v5506_v47, %v5505_v46  ;;  %v5637_v42 = vld [vmem:[%s13126_s0 + $0xc00] ss:$8 sm:$0xf]  }
  0x26   :  { %v5742_v55 = vld [vmem:[%s13126_s0 + $0x347] ss:$8 sm:$0xf0]   ;;  %756 = vrot.lane.b32.xlu0 %v755_v53, %s7029_s14  ;;  %5507 = vst.msk [vmem:[%s13127_s1 + $0x20] sm:$0xff] %vm6_vm1, %v40_v51  }
  0x27   :  { %v5738_v56 = vld [vmem:[%s13126_s0 + $0x247] ss:$8 sm:$0xf]   ;;  %v788_v58 = vsel %vm4_vm0, %v5742_v55, %v5741_v54  ;;  %v5553_v54 = vld [vmem:[%s13126_s0 + $0x500] ss:$8 sm:$0xf]  }
  0x28   :  { %v5739_v57 = vld [vmem:[%s13126_s0 + $0x247] ss:$8 sm:$0xf0]   ;;  %789 = vrot.lane.b32.xlu1 %v788_v58, %s7029_s14  ;;  %v5554_v55 = vld [vmem:[%s13126_s0 + $0x500] ss:$8 sm:$0xf0]  }
  0x29   :  { %v777_v59 = vsel %vm4_vm0, %v5739_v57, %v5738_v56  ;;  %v5747_v60 = vld [vmem:[%s13126_s0 + $0x547] ss:$8 sm:$0xf]   ;;  %v184_v57 = vsel %vm4_vm0, %v5554_v55, %v5553_v54  ;;  %v5541_v58 = vld [vmem:[%s13126_s0 + $0x400] ss:$8 sm:$0xf]  }
  0x2a   :  { %v5748_v61 = vld [vmem:[%s13126_s0 + $0x547] ss:$8 sm:$0xf0]   ;;  %778 = vrot.lane.b32.xlu0 %v777_v59, %s7029_s14  ;;  %v5542_v59 = vld [vmem:[%s13126_s0 + $0x400] ss:$8 sm:$0xf0]  }
  0x2b   :  { %v5744_v62 = vld [vmem:[%s13126_s0 + $0x447] ss:$8 sm:$0xf]   ;;  %v810_v0 = vsel %vm4_vm0, %v5748_v61, %v5747_v60  ;;  %5555 = vst.msk [vmem:[%s13127_s1 + $0xa0] sm:$0xff] %vm6_vm1, %v184_v57  }
  0x2c   :  { %v5745_v63 = vld [vmem:[%s13126_s0 + $0x447] ss:$8 sm:$0xf0]   ;;  %811 = vrot.lane.b32.xlu1 %v810_v0, %s7029_s14  ;;  %v5638_v46 = vld [vmem:[%s13126_s0 + $0xc00] ss:$8 sm:$0xf0]  }
  0x2d   :  { %v799_v1 = vsel %vm4_vm0, %v5745_v63, %v5744_v62  ;;  %v5753_v2 = vld [vmem:[%s13126_s0 + $0x747] ss:$8 sm:$0xf]   ;;  %v148_v63 = vsel %vm4_vm0, %v5542_v59, %v5541_v58  ;;  %v5673_v51 = vld [vmem:[%s13126_s0 + $0xf00] ss:$8 sm:$0xf]  }
  0x2e   :  { %v5754_v3 = vld [vmem:[%s13126_s0 + $0x747] ss:$8 sm:$0xf0]   ;;  %800 = vrot.lane.b32.xlu0 %v799_v1, %s7029_s14  ;;  %5543 = vst.msk [vmem:[%s13127_s1 + $0x80] sm:$0xff] %vm6_vm1, %v148_v63  }
  0x2f   :  { %v5750_v4 = vld [vmem:[%s13126_s0 + $0x647] ss:$8 sm:$0xf]   ;;  %v832_v6 = vsel %vm4_vm0, %v5754_v3, %v5753_v2  ;;  %v5577_v2 = vld [vmem:[%s13126_s0 + $0x700] ss:$8 sm:$0xf]  }
  0x30   :  { %v5751_v5 = vld [vmem:[%s13126_s0 + $0x647] ss:$8 sm:$0xf0]   ;;  %833 = vrot.lane.b32.xlu1 %v832_v6, %s7029_s14  ;;  %v5578_v3 = vld [vmem:[%s13126_s0 + $0x700] ss:$8 sm:$0xf0]  }
  0x31   :  { %v821_v7 = vsel %vm4_vm0, %v5751_v5, %v5750_v4  ;;  %v5759_v8 = vld [vmem:[%s13126_s0 + $0x947] ss:$8 sm:$0xf]   ;;  %v256_v5 = vsel %vm4_vm0, %v5578_v3, %v5577_v2  ;;  %v5565_v6 = vld [vmem:[%s13126_s0 + $0x600] ss:$8 sm:$0xf]  }
  0x32   :  { %v5760_v9 = vld [vmem:[%s13126_s0 + $0x947] ss:$8 sm:$0xf0]   ;;  %822 = vrot.lane.b32.xlu0 %v821_v7, %s7029_s14  ;;  %v5566_v7 = vld [vmem:[%s13126_s0 + $0x600] ss:$8 sm:$0xf0]  }
  0x33   :  { %v5756_v10 = vld [vmem:[%s13126_s0 + $0x847] ss:$8 sm:$0xf]   ;;  %v854_v12 = vsel %vm4_vm0, %v5760_v9, %v5759_v8  ;;  %5579 = vst.msk [vmem:[%s13127_s1 + $0xe0] sm:$0xff] %vm6_vm1, %v256_v5  }
  0x34   :  { %v5757_v11 = vld [vmem:[%s13126_s0 + $0x847] ss:$8 sm:$0xf0]   ;;  %855 = vrot.lane.b32.xlu1 %v854_v12, %s7029_s14  ;;  %v5661_v54 = vld [vmem:[%s13126_s0 + $0xe00] ss:$8 sm:$0xf]  }
  0x35   :  { %v843_v13 = vsel %vm4_vm0, %v5757_v11, %v5756_v10  ;;  %v5765_v14 = vld [vmem:[%s13126_s0 + $0xb47] ss:$8 sm:$0xf]   ;;  %v220_v11 = vsel %vm4_vm0, %v5566_v7, %v5565_v6  ;;  %v5662_v58 = vld [vmem:[%s13126_s0 + $0xe00] ss:$8 sm:$0xf0]  }
  0x36   :  { %v5766_v15 = vld [vmem:[%s13126_s0 + $0xb47] ss:$8 sm:$0xf0]   ;;  %844 = vrot.lane.b32.xlu0 %v843_v13, %s7029_s14  ;;  %5567 = vst.msk [vmem:[%s13127_s1 + $0xc0] sm:$0xff] %vm6_vm1, %v220_v11  }
  0x37   :  { %v5762_v16 = vld [vmem:[%s13126_s0 + $0xa47] ss:$8 sm:$0xf]   ;;  %v876_v18 = vsel %vm4_vm0, %v5766_v15, %v5765_v14  ;;  %v5601_v15 = vld [vmem:[%s13126_s0 + $0x900] ss:$8 sm:$0xf]  }
  0x38   :  { %v5763_v17 = vld [vmem:[%s13126_s0 + $0xa47] ss:$8 sm:$0xf0]   ;;  %877 = vrot.lane.b32.xlu1 %v876_v18, %s7029_s14  ;;  %v5589_v18 = vld [vmem:[%s13126_s0 + $0x800] ss:$8 sm:$0xf]  }
  0x39   :  { %v865_v19 = vsel %vm4_vm0, %v5763_v17, %v5762_v16  ;;  %v5771_v20 = vld [vmem:[%s13126_s0 + $0xd47] ss:$8 sm:$0xf]   ;;  %v5602_v17 = vld [vmem:[%s13126_s0 + $0x900] ss:$8 sm:$0xf0]  }
  0x3a   :  { %v5772_v21 = vld [vmem:[%s13126_s0 + $0xd47] ss:$8 sm:$0xf0]   ;;  %866 = vrot.lane.b32.xlu0 %v865_v19, %s7029_s14  ;;  %v5508_v63 = vld [vmem:[%s13126_s0 + $0x140] ss:$8 sm:$0xf]  }
  0x3b   :  { %v5768_v22 = vld [vmem:[%s13126_s0 + $0xc47] ss:$8 sm:$0xf]   ;;  %v898_v24 = vsel %vm4_vm0, %v5772_v21, %v5771_v20  ;;  %v328_v21 = vsel %vm4_vm0, %v5602_v17, %v5601_v15  ;;  %v5496_v2 = vld [vmem:[%s13126_s0 + $0x40] ss:$8 sm:$0xf]  }
  0x3c   :  { %v5769_v23 = vld [vmem:[%s13126_s0 + $0xc47] ss:$8 sm:$0xf0]   ;;  %899 = vrot.lane.b32.xlu1 %v898_v24, %s7029_s14  ;;  %5603 = vst.msk [vmem:[%s13127_s1 + $0x120] sm:$0xff] %vm6_vm1, %v328_v21  }
  0x3d   :  { %v887_v25 = vsel %vm4_vm0, %v5769_v23, %v5768_v22  ;;  %v5777_v26 = vld [vmem:[%s13126_s0 + $0xf47] ss:$8 sm:$0xf]   ;;  %v5590_v22 = vld [vmem:[%s13126_s0 + $0x800] ss:$8 sm:$0xf0]  }
  0x3e   :  { %v5778_v27 = vld [vmem:[%s13126_s0 + $0xf47] ss:$8 sm:$0xf0]   ;;  %888 = vrot.lane.b32.xlu0 %v887_v25, %s7029_s14  ;;  %v292_v25 = vsel %vm4_vm0, %v5590_v22, %v5589_v18  ;;  %v5497_v6 = vld [vmem:[%s13126_s0 + $0x40] ss:$8 sm:$0xf0]  }
  0x3f   :  { %v5774_v28 = vld [vmem:[%s13126_s0 + $0xe47] ss:$8 sm:$0xf]   ;;  %v920_v32 = vsel %vm4_vm0, %v5778_v27, %v5777_v26  ;;  %5591 = vst.msk [vmem:[%s13127_s1 + $0x100] sm:$0xff] %vm6_vm1, %v292_v25  }
  0x40   :  { %v5775_v29 = vld [vmem:[%s13126_s0 + $0xe47] ss:$8 sm:$0xf0]   ;;  %921 = vrot.lane.b32.xlu1 %v920_v32, %s7029_s14  ;;  %v5625_v27 = vld [vmem:[%s13126_s0 + $0xb00] ss:$8 sm:$0xf]  }
  0x41   :  { %v909_v36 = vsel %vm4_vm0, %v5775_v29, %v5774_v28  ;;  %v5783_v37 = vld [vmem:[%s13126_s0 + $0x187] ss:$8 sm:$0xf]   ;;  %v5626_v29 = vld [vmem:[%s13126_s0 + $0xb00] ss:$8 sm:$0xf0]  }
  0x42   :  { %v5784_v38 = vld [vmem:[%s13126_s0 + $0x187] ss:$8 sm:$0xf0]   ;;  %910 = vrot.lane.b32.xlu0 %v909_v36, %s7029_s14  ;;  %v400_v33 = vsel %vm4_vm0, %v5626_v29, %v5625_v27  ;;  %v5532_v11 = vld [vmem:[%s13126_s0 + $0x340] ss:$8 sm:$0xf]  }
  0x43   :  { %v5780_v40 = vld [vmem:[%s13126_s0 + $0x87] ss:$8 sm:$0xf]   ;;  %v942_v44 = vsel %vm4_vm0, %v5784_v38, %v5783_v37  ;;  %5627 = vst.msk [vmem:[%s13127_s1 + $0x160] sm:$0xff] %vm6_vm1, %v400_v33   ;;  %v364_v37 = vsel %vm4_vm0, %v5614_v34, %v5613_v30 }
  0x44   :  { %v5781_v41 = vld [vmem:[%s13126_s0 + $0x87] ss:$8 sm:$0xf0]   ;;  %943 = vrot.lane.b32.xlu1 %v942_v44, %s7029_s14  ;;  %5615 = vst.msk [vmem:[%s13127_s1 + $0x140] sm:$0xff] %vm6_vm1, %v364_v37  }
  0x45   :  { %v931_v48 = vsel %vm4_vm0, %v5781_v41, %v5780_v40  ;;  %v5789_v49 = vld [vmem:[%s13126_s0 + $0x387] ss:$8 sm:$0xf]   ;;  %v5650_v41 = vld [vmem:[%s13126_s0 + $0xd00] ss:$8 sm:$0xf0]  }
  0x46   :  { %v5790_v50 = vld [vmem:[%s13126_s0 + $0x387] ss:$8 sm:$0xf0]   ;;  %932 = vrot.lane.b32.xlu0 %v931_v48, %s7029_s14  ;;  %v472_v45 = vsel %vm4_vm0, %v5650_v41, %v5649_v39  ;;  %v5521_v18 = vld [vmem:[%s13126_s0 + $0x240] ss:$8 sm:$0xf0]  }
  0x47   :  { %v5786_v52 = vld [vmem:[%s13126_s0 + $0x287] ss:$8 sm:$0xf]   ;;  %v964_v56 = vsel %vm4_vm0, %v5790_v50, %v5789_v49  ;;  %5651 = vst.msk [vmem:[%s13127_s1 + $0x1a0] sm:$0xff] %vm6_vm1, %v472_v45   ;;  %v436_v49 = vsel %vm4_vm0, %v5638_v46, %v5637_v42 }
  0x48   :  { %v5787_v53 = vld [vmem:[%s13126_s0 + $0x287] ss:$8 sm:$0xf0]   ;;  %965 = vrot.lane.b32.xlu1 %v964_v56, %s7029_s14  ;;  %5639 = vst.msk [vmem:[%s13127_s1 + $0x180] sm:$0xff] %vm6_vm1, %v436_v49  }
  0x49   :  { %v953_v60 = vsel %vm4_vm0, %v5787_v53, %v5786_v52  ;;  %v5795_v61 = vld [vmem:[%s13126_s0 + $0x587] ss:$8 sm:$0xf]   ;;  %v5674_v53 = vld [vmem:[%s13126_s0 + $0xf00] ss:$8 sm:$0xf0]  }
  0x4a   :  { %v5796_v62 = vld [vmem:[%s13126_s0 + $0x587] ss:$8 sm:$0xf0]   ;;  %954 = vrot.lane.b32.xlu0 %v953_v60, %s7029_s14  ;;  %v544_v57 = vsel %vm4_vm0, %v5674_v53, %v5673_v51  ;;  %v5557_v25 = vld [vmem:[%s13126_s0 + $0x540] ss:$8 sm:$0xf0]  }
  0x4b   :  { %v5792_v0 = vld [vmem:[%s13126_s0 + $0x487] ss:$8 sm:$0xf]   ;;  %v986_v4 = vsel %vm4_vm0, %v5796_v62, %v5795_v61  ;;  %5675 = vst.msk [vmem:[%s13127_s1 + $0x1e0] sm:$0xff] %vm6_vm1, %v544_v57   ;;  %v508_v61 = vsel %vm4_vm0, %v5662_v58, %v5661_v54 }
  0x4c   :  { %v5793_v1 = vld [vmem:[%s13126_s0 + $0x487] ss:$8 sm:$0xf0]   ;;  %987 = vrot.lane.b32.xlu1 %v986_v4, %s7029_s14  ;;  %5663 = vst.msk [vmem:[%s13127_s1 + $0x1c0] sm:$0xff] %vm6_vm1, %v508_v61  }
  0x4d   :  { %v975_v8 = vsel %vm4_vm0, %v5793_v1, %v5792_v0  ;;  %v5801_v9 = vld [vmem:[%s13126_s0 + $0x787] ss:$8 sm:$0xf]   ;;  %v5509_v1 = vld [vmem:[%s13126_s0 + $0x140] ss:$8 sm:$0xf0]  }
  0x4e   :  { %v5802_v10 = vld [vmem:[%s13126_s0 + $0x787] ss:$8 sm:$0xf0]   ;;  %976 = vrot.lane.b32.xlu0 %v975_v8, %s7029_s14  ;;  %v49_v5 = vsel %vm4_vm0, %v5509_v1, %v5508_v63  ;;  %v5545_v30 = vld [vmem:[%s13126_s0 + $0x440] ss:$8 sm:$0xf0]  }
  0x4f   :  { %v5798_v12 = vld [vmem:[%s13126_s0 + $0x687] ss:$8 sm:$0xf]   ;;  %v1008_v16 = vsel %vm4_vm0, %v5802_v10, %v5801_v9  ;;  %5510 = vst.msk [vmem:[%s13127_s1 + $0x28] sm:$0xff] %vm6_vm1, %v49_v5   ;;  %v13_v9 = vsel %vm4_vm0, %v5497_v6, %v5496_v2 }
  0x50   :  { %v5799_v13 = vld [vmem:[%s13126_s0 + $0x687] ss:$8 sm:$0xf0]   ;;  %1009 = vrot.lane.b32.xlu1 %v1008_v16, %s7029_s14  ;;  %5498 = vst.msk [vmem:[%s13127_s1 + $0x8] sm:$0xff] %vm6_vm1, %v13_v9  }
  0x51   :  { %v5807_v14 = vld [vmem:[%s13126_s0 + $0x987] ss:$8 sm:$0xf]   ;;  %v997_v19 = vsel %vm4_vm0, %v5799_v13, %v5798_v12  ;;  %v5533_v13 = vld [vmem:[%s13126_s0 + $0x340] ss:$8 sm:$0xf0]  }
  0x52   :  { %v5808_v20 = vld [vmem:[%s13126_s0 + $0x987] ss:$8 sm:$0xf0]   ;;  %998 = vrot.lane.b32.xlu0 %v997_v19, %s7029_s14  ;;  %v121_v17 = vsel %vm4_vm0, %v5533_v13, %v5532_v11  ;;  %v5581_v37 = vld [vmem:[%s13126_s0 + $0x740] ss:$8 sm:$0xf0]  }
  0x53   :  { %v5804_v23 = vld [vmem:[%s13126_s0 + $0x887] ss:$8 sm:$0xf]   ;;  %v1030_v28 = vsel %vm4_vm0, %v5808_v20, %v5807_v14  ;;  %v5520_v14 = vld [vmem:[%s13126_s0 + $0x240] ss:$8 sm:$0xf]  }
  0x54   :  { %v5805_v24 = vld [vmem:[%s13126_s0 + $0x887] ss:$8 sm:$0xf0]   ;;  %1031 = vrot.lane.b32.xlu1 %v1030_v28, %s7029_s14  ;;  %5534 = vst.msk [vmem:[%s13127_s1 + $0x68] sm:$0xff] %vm6_vm1, %v121_v17   ;;  %v85_v21 = vsel %vm4_vm0, %v5521_v18, %v5520_v14 }
  0x55   :  { %v5813_v26 = vld [vmem:[%s13126_s0 + $0xb87] ss:$8 sm:$0xf]   ;;  %v1019_v31 = vsel %vm4_vm0, %v5805_v24, %v5804_v23  ;;  %5522 = vst.msk [vmem:[%s13127_s1 + $0x48] sm:$0xff] %vm6_vm1, %v85_v21  }
  0x56   :  { %v5814_v32 = vld [vmem:[%s13126_s0 + $0xb87] ss:$8 sm:$0xf0]   ;;  %1020 = vrot.lane.b32.xlu0 %v1019_v31, %s7029_s14  ;;  %v5556_v23 = vld [vmem:[%s13126_s0 + $0x540] ss:$8 sm:$0xf]  }
  0x57   :  { %v5810_v35 = vld [vmem:[%s13126_s0 + $0xa87] ss:$8 sm:$0xf]   ;;  %v1052_v40 = vsel %vm4_vm0, %v5814_v32, %v5813_v26  ;;  %v5544_v26 = vld [vmem:[%s13126_s0 + $0x440] ss:$8 sm:$0xf]   ;;  %v193_v29 = vsel %vm4_vm0, %v5557_v25, %v5556_v23 }
  0x58   :  { %v5811_v36 = vld [vmem:[%s13126_s0 + $0xa87] ss:$8 sm:$0xf0]   ;;  %1053 = vrot.lane.b32.xlu1 %v1052_v40, %s7029_s14  ;;  %5558 = vst.msk [vmem:[%s13127_s1 + $0xa8] sm:$0xff] %vm6_vm1, %v193_v29   ;;  %v157_v33 = vsel %vm4_vm0, %v5545_v30, %v5544_v26 }
  0x59   :  { %v5819_v38 = vld [vmem:[%s13126_s0 + $0xd87] ss:$8 sm:$0xf]   ;;  %v1041_v43 = vsel %vm4_vm0, %v5811_v36, %v5810_v35  ;;  %5546 = vst.msk [vmem:[%s13127_s1 + $0x88] sm:$0xff] %vm6_vm1, %v157_v33  }
  0x5a   :  { %v5820_v44 = vld [vmem:[%s13126_s0 + $0xd87] ss:$8 sm:$0xf0]   ;;  %1042 = vrot.lane.b32.xlu0 %v1041_v43, %s7029_s14  ;;  %v5580_v35 = vld [vmem:[%s13126_s0 + $0x740] ss:$8 sm:$0xf]  }
  0x5b   :  { %v5816_v47 = vld [vmem:[%s13126_s0 + $0xc87] ss:$8 sm:$0xf]   ;;  %v1074_v52 = vsel %vm4_vm0, %v5820_v44, %v5819_v38  ;;  %v5568_v38 = vld [vmem:[%s13126_s0 + $0x640] ss:$8 sm:$0xf]   ;;  %v265_v41 = vsel %vm4_vm0, %v5581_v37, %v5580_v35 }
  0x5c   :  { %v5817_v48 = vld [vmem:[%s13126_s0 + $0xc87] ss:$8 sm:$0xf0]   ;;  %1075 = vrot.lane.b32.xlu1 %v1074_v52, %s7029_s14  ;;  %v5569_v42 = vld [vmem:[%s13126_s0 + $0x640] ss:$8 sm:$0xf0]  }
  0x5d   :  { %v5825_v50 = vld [vmem:[%s13126_s0 + $0xf87] ss:$8 sm:$0xf]   ;;  %v1063_v55 = vsel %vm4_vm0, %v5817_v48, %v5816_v47  ;;  %5582 = vst.msk [vmem:[%s13127_s1 + $0xe8] sm:$0xff] %vm6_vm1, %v265_v41   ;;  %v229_v45 = vsel %vm4_vm0, %v5569_v42, %v5568_v38 }
  0x5e   :  { %v5826_v56 = vld [vmem:[%s13126_s0 + $0xf87] ss:$8 sm:$0xf0]   ;;  %1064 = vrot.lane.b32.xlu0 %v1063_v55, %s7029_s14  ;;  %5570 = vst.msk [vmem:[%s13127_s1 + $0xc8] sm:$0xff] %vm6_vm1, %v229_v45  }
  0x5f   :  { %v5822_v59 = vld [vmem:[%s13126_s0 + $0xe87] ss:$8 sm:$0xf]   ;;  %v1096_v0 = vsel %vm4_vm0, %v5826_v56, %v5825_v50  ;;  %v5604_v47 = vld [vmem:[%s13126_s0 + $0x940] ss:$8 sm:$0xf]  }
  0x60   :  { %v5823_v60 = vld [vmem:[%s13126_s0 + $0xe87] ss:$8 sm:$0xf0]   ;;  %1097 = vrot.lane.b32.xlu1 %v1096_v0, %s7029_s14  ;;  %v5605_v49 = vld [vmem:[%s13126_s0 + $0x940] ss:$8 sm:$0xf0]  }
  0x61   :  { %v5831_v62 = vld [vmem:[%s13126_s0 + $0x1c7] ss:$8 sm:$0xf]   ;;  %v1085_v3 = vsel %vm4_vm0, %v5823_v60, %v5822_v59  ;;  %v5592_v50 = vld [vmem:[%s13126_s0 + $0x840] ss:$8 sm:$0xf]   ;;  %v337_v53 = vsel %vm4_vm0, %v5605_v49, %v5604_v47 }
  0x62   :  { %v5832_v4 = vld [vmem:[%s13126_s0 + $0x1c7] ss:$8 sm:$0xf0]   ;;  %1086 = vrot.lane.b32.xlu0 %v1085_v3, %s7029_s14  ;;  %v5593_v54 = vld [vmem:[%s13126_s0 + $0x840] ss:$8 sm:$0xf0]  }
  0x63   :  { %v5828_v7 = vld [vmem:[%s13126_s0 + $0xc7] ss:$8 sm:$0xf]   ;;  %v1118_v12 = vsel %vm4_vm0, %v5832_v4, %v5831_v62  ;;  %5606 = vst.msk [vmem:[%s13127_s1 + $0x128] sm:$0xff] %vm6_vm1, %v337_v53   ;;  %v301_v57 = vsel %vm4_vm0, %v5593_v54, %v5592_v50 }
  0x64   :  { %v5829_v8 = vld [vmem:[%s13126_s0 + $0xc7] ss:$8 sm:$0xf0]   ;;  %1119 = vrot.lane.b32.xlu1 %v1118_v12, %s7029_s14  ;;  %5594 = vst.msk [vmem:[%s13127_s1 + $0x108] sm:$0xff] %vm6_vm1, %v301_v57  }
  0x65   :  { %v5837_v10 = vld [vmem:[%s13126_s0 + $0x3c7] ss:$8 sm:$0xf]   ;;  %v1107_v15 = vsel %vm4_vm0, %v5829_v8, %v5828_v7  ;;  %v5628_v59 = vld [vmem:[%s13126_s0 + $0xb40] ss:$8 sm:$0xf]  }
  0x66   :  { %v5838_v16 = vld [vmem:[%s13126_s0 + $0x3c7] ss:$8 sm:$0xf0]   ;;  %1108 = vrot.lane.b32.xlu0 %v1107_v15, %s7029_s14  ;;  %v5629_v61 = vld [vmem:[%s13126_s0 + $0xb40] ss:$8 sm:$0xf0]  }
  0x67   :  { %v5834_v19 = vld [vmem:[%s13126_s0 + $0x2c7] ss:$8 sm:$0xf]   ;;  %v1140_v24 = vsel %vm4_vm0, %v5838_v16, %v5837_v10  ;;  %v5616_v62 = vld [vmem:[%s13126_s0 + $0xa40] ss:$8 sm:$0xf]   ;;  %v409_v1 = vsel %vm4_vm0, %v5629_v61, %v5628_v59 }
  0x68   :  { %v5835_v20 = vld [vmem:[%s13126_s0 + $0x2c7] ss:$8 sm:$0xf0]   ;;  %1141 = vrot.lane.b32.xlu1 %v1140_v24, %s7029_s14  ;;  %v5617_v2 = vld [vmem:[%s13126_s0 + $0xa40] ss:$8 sm:$0xf0]  }
  0x69   :  { %v5843_v22 = vld [vmem:[%s13126_s0 + $0x5c7] ss:$8 sm:$0xf]   ;;  %v1129_v27 = vsel %vm4_vm0, %v5835_v20, %v5834_v19  ;;  %5630 = vst.msk [vmem:[%s13127_s1 + $0x168] sm:$0xff] %vm6_vm1, %v409_v1   ;;  %v373_v5 = vsel %vm4_vm0, %v5617_v2, %v5616_v62 }
  0x6a   :  { %v5844_v28 = vld [vmem:[%s13126_s0 + $0x5c7] ss:$8 sm:$0xf0]   ;;  %1130 = vrot.lane.b32.xlu0 %v1129_v27, %s7029_s14  ;;  %5618 = vst.msk [vmem:[%s13127_s1 + $0x148] sm:$0xff] %vm6_vm1, %v373_v5  }
  0x6b   :  { %v5840_v31 = vld [vmem:[%s13126_s0 + $0x4c7] ss:$8 sm:$0xf]   ;;  %v1162_v36 = vsel %vm4_vm0, %v5844_v28, %v5843_v22  ;;  %v5652_v7 = vld [vmem:[%s13126_s0 + $0xd40] ss:$8 sm:$0xf]  }
  0x6c   :  { %v5841_v32 = vld [vmem:[%s13126_s0 + $0x4c7] ss:$8 sm:$0xf0]   ;;  %1163 = vrot.lane.b32.xlu1 %v1162_v36, %s7029_s14  ;;  %v5653_v9 = vld [vmem:[%s13126_s0 + $0xd40] ss:$8 sm:$0xf0]  }
  0x6d   :  { %v5849_v34 = vld [vmem:[%s13126_s0 + $0x7c7] ss:$8 sm:$0xf]   ;;  %v1151_v39 = vsel %vm4_vm0, %v5841_v32, %v5840_v31  ;;  %v5640_v10 = vld [vmem:[%s13126_s0 + $0xc40] ss:$8 sm:$0xf]   ;;  %v481_v14 = vsel %vm4_vm0, %v5653_v9, %v5652_v7 }
  0x6e   :  { %v5850_v40 = vld [vmem:[%s13126_s0 + $0x7c7] ss:$8 sm:$0xf0]   ;;  %1152 = vrot.lane.b32.xlu0 %v1151_v39, %s7029_s14  ;;  %v5641_v15 = vld [vmem:[%s13126_s0 + $0xc40] ss:$8 sm:$0xf0]  }
  0x6f   :  { %v5846_v43 = vld [vmem:[%s13126_s0 + $0x6c7] ss:$8 sm:$0xf]   ;;  %v1184_v48 = vsel %vm4_vm0, %v5850_v40, %v5849_v34  ;;  %5654 = vst.msk [vmem:[%s13127_s1 + $0x1a8] sm:$0xff] %vm6_vm1, %v481_v14   ;;  %v445_v19 = vsel %vm4_vm0, %v5641_v15, %v5640_v10 }
  0x70   :  { %v5847_v44 = vld [vmem:[%s13126_s0 + $0x6c7] ss:$8 sm:$0xf0]   ;;  %1185 = vrot.lane.b32.xlu1 %v1184_v48, %s7029_s14  ;;  %5642 = vst.msk [vmem:[%s13127_s1 + $0x188] sm:$0xff] %vm6_vm1, %v445_v19  }
  0x71   :  { %v5855_v46 = vld [vmem:[%s13126_s0 + $0x9c7] ss:$8 sm:$0xf]   ;;  %v1173_v51 = vsel %vm4_vm0, %v5847_v44, %v5846_v43  ;;  %v5676_v22 = vld [vmem:[%s13126_s0 + $0xf40] ss:$8 sm:$0xf]  }
  0x72   :  { %v5856_v52 = vld [vmem:[%s13126_s0 + $0x9c7] ss:$8 sm:$0xf0]   ;;  %1174 = vrot.lane.b32.xlu0 %v1173_v51, %s7029_s14  ;;  %v5677_v24 = vld [vmem:[%s13126_s0 + $0xf40] ss:$8 sm:$0xf0]  }
  0x73   :  { %v5852_v55 = vld [vmem:[%s13126_s0 + $0x8c7] ss:$8 sm:$0xf]   ;;  %v1206_v60 = vsel %vm4_vm0, %v5856_v52, %v5855_v46  ;;  %v5664_v25 = vld [vmem:[%s13126_s0 + $0xe40] ss:$8 sm:$0xf]   ;;  %v553_v29 = vsel %vm4_vm0, %v5677_v24, %v5676_v22 }
  0x74   :  { %v5853_v56 = vld [vmem:[%s13126_s0 + $0x8c7] ss:$8 sm:$0xf0]   ;;  %1207 = vrot.lane.b32.xlu1 %v1206_v60, %s7029_s14  ;;  %v5665_v30 = vld [vmem:[%s13126_s0 + $0xe40] ss:$8 sm:$0xf0]  }
  0x75   :  { %v5861_v58 = vld [vmem:[%s13126_s0 + $0xbc7] ss:$8 sm:$0xf]   ;;  %v1195_v63 = vsel %vm4_vm0, %v5853_v56, %v5852_v55  ;;  %5678 = vst.msk [vmem:[%s13127_s1 + $0x1e8] sm:$0xff] %vm6_vm1, %v553_v29   ;;  %v517_v33 = vsel %vm4_vm0, %v5665_v30, %v5664_v25 }
  0x76   :  { %v5862_v0 = vld [vmem:[%s13126_s0 + $0xbc7] ss:$8 sm:$0xf0]   ;;  %1196 = vrot.lane.b32.xlu0 %v1195_v63, %s7029_s14  ;;  %v603_v11 = vpop.permute.xlu1 %602   ;;  %v5878_v34 = vld [vmem:[%s13126_s0 + $0x106] ss:$8 sm:$0xf]  }
  0x77   :  { %v5858_v3 = vld [vmem:[%s13126_s0 + $0xac7] ss:$8 sm:$0xf]   ;;  %v1228_v8 = vsel %vm4_vm0, %v5862_v0, %v5861_v58  ;;  %5692 = vst.msk [vmem:[%s13127_s1 + $0x40] sm:$0xff] %vm583_vm2, %v603_v11  }
  0x78   :  { %v5859_v4 = vld [vmem:[%s13126_s0 + $0xac7] ss:$8 sm:$0xf0]   ;;  %v582_v16 = vpop.permute.xlu0 %581   ;;  %1229 = vrot.lane.b32.xlu1 %v1228_v8, %s7029_s14  ;;  %5666 = vst.msk [vmem:[%s13127_s1 + $0x1c8] sm:$0xff] %vm6_vm1, %v517_v33  }
  0x79   :  { %v5867_v6 = vld [vmem:[%s13126_s0 + $0xdc7] ss:$8 sm:$0xf]   ;;  %v1217_v12 = vsel %vm4_vm0, %v5859_v4, %v5858_v3  ;;  %584 = vst.msk [vmem:[%s13127_s1] sm:$0xff] %vm583_vm2, %v582_v16  }
  0x7a   :  { %v5868_v13 = vld [vmem:[%s13126_s0 + $0xdc7] ss:$8 sm:$0xf0]   ;;  %1218 = vrot.lane.b32.xlu0 %v1217_v12, %s7029_s14  ;;  %v614_v26 = vpop.permute.xlu1 %613   ;;  %v5511_v35 = vld [vmem:[%s13126_s0 + $0x180] ss:$8 sm:$0xf]  }
  0x7b   :  { %v5864_v17 = vld [vmem:[%s13126_s0 + $0xcc7] ss:$8 sm:$0xf]   ;;  %v1250_v23 = vsel %vm4_vm0, %v5868_v13, %v5867_v6  ;;  %5695 = vst.msk [vmem:[%s13127_s1 + $0x60] sm:$0xff] %vm583_vm2, %v614_v26  }
  0x7c   :  { %v5865_v18 = vld [vmem:[%s13126_s0 + $0xcc7] ss:$8 sm:$0xf0]   ;;  %v592_v31 = vpop.permute.xlu0 %591   ;;  %1251 = vrot.lane.b32.xlu1 %v1250_v23, %s7029_s14  ;;  %v5512_v37 = vld [vmem:[%s13126_s0 + $0x180] ss:$8 sm:$0xf0]  }
  0x7d   :  { %v5873_v20 = vld [vmem:[%s13126_s0 + $0xfc7] ss:$8 sm:$0xf]   ;;  %v1239_v27 = vsel %vm4_vm0, %v5865_v18, %v5864_v17  ;;  %5689 = vst.msk [vmem:[%s13127_s1 + $0x20] sm:$0xff] %vm583_vm2, %v592_v31   ;;  %v58_v42 = vsel %vm4_vm0, %v5512_v37, %v5511_v35 }
  0x7e   :  { %v5874_v21 = vld [vmem:[%s13126_s0 + $0xfc7] ss:$8 sm:$0xf0]   ;;  %1240 = vrot.lane.b32.xlu0 %v1239_v27, %s7029_s14  ;;  %v5499_v38 = vld [vmem:[%s13126_s0 + $0x80] ss:$8 sm:$0xf]   ;;  %v636_v39 = vpop.permute.xlu1 %635  }
  0x7f   :  { %v5870_v28 = vld [vmem:[%s13126_s0 + $0xec7] ss:$8 sm:$0xf]   ;;  %v1272_v36 = vsel %vm4_vm0, %v5874_v21, %v5873_v20  ;;  %v5879_v41 = vld [vmem:[%s13126_s0 + $0x106] ss:$8 sm:$0xf0]  }
  0x80   :  { %v5871_v32 = vld [vmem:[%s13126_s0 + $0xec7] ss:$8 sm:$0xf0]   ;;  %v5500_v43 = vld [vmem:[%s13126_s0 + $0x80] ss:$8 sm:$0xf0]   ;;  %v625_v44 = vpop.permute.xlu0 %624   ;;  %1273 = vrot.lane.b32.xlu1 %v1272_v36, %s7029_s14  ;;  %v1293_v50 = vsel %vm4_vm0, %v5879_v41, %v5878_v34 }
  0x81   :  { %v1261_v40 = vsel %vm4_vm0, %v5871_v32, %v5870_v28  ;;  %5701 = vst.msk [vmem:[%s13127_s1 + $0xa0] sm:$0xff] %vm583_vm2, %v636_v39   ;;  %v5876_v45 = vld [vmem:[%s13126_s0 + $0x6] ss:$8 sm:$0xf]   ;;  %v22_v47 = vsel %vm4_vm0, %v5500_v43, %v5499_v38  ;;  %5698 = vst.msk [vmem:[%s13127_s1 + $0x80] sm:$0xff] %vm583_vm2, %v625_v44  }
  0x82   :  { %v5877_v46 = vld [vmem:[%s13126_s0 + $0x6] ss:$8 sm:$0xf0]   ;;  %5513 = vst.msk [vmem:[%s13127_s1 + $0x30] sm:$0xff] %vm6_vm1, %v58_v42   ;;  %5501 = vst.msk [vmem:[%s13127_s1 + $0x10] sm:$0xff] %vm6_vm1, %v22_v47   ;;  %1262 = vrot.lane.b32.xlu0 %v1261_v40, %s7029_s14  ;;  %v658_v53 = vpop.permute.xlu1 %657  }
  0x83   :  { %v5884_v48 = vld [vmem:[%s13126_s0 + $0x306] ss:$8 sm:$0xf]   ;;  %v5535_v49 = vld [vmem:[%s13126_s0 + $0x380] ss:$8 sm:$0xf]   ;;  %v1283_v54 = vsel %vm4_vm0, %v5877_v46, %v5876_v45 }
  0x84   :  { %v5536_v51 = vld [vmem:[%s13126_s0 + $0x380] ss:$8 sm:$0xf0]   ;;  %v5885_v55 = vld [vmem:[%s13126_s0 + $0x306] ss:$8 sm:$0xf0]   ;;  %v647_v58 = vpop.permute.xlu0 %646   ;;  %1294 = vrot.lane.b32.xlu1 %v1293_v50, %s7030_s3 }
  0x85   :  { %v5523_v52 = vld [vmem:[%s13126_s0 + $0x280] ss:$8 sm:$0xf]   ;;  %v130_v56 = vsel %vm4_vm0, %v5536_v51, %v5535_v49  ;;  %5707 = vst.msk [vmem:[%s13127_s1 + $0xe0] sm:$0xff] %vm583_vm2, %v658_v53   ;;  %5704 = vst.msk [vmem:[%s13127_s1 + $0xc0] sm:$0xff] %vm583_vm2, %v647_v58   ;;  %v1315_v0 = vsel %vm4_vm0, %v5885_v55, %v5884_v48 }
  0x86   :  { %v5524_v57 = vld [vmem:[%s13126_s0 + $0x280] ss:$8 sm:$0xf0]   ;;  %v5881_v59 = vld [vmem:[%s13126_s0 + $0x206] ss:$8 sm:$0xf]   ;;  %1284 = vrot.lane.b32.xlu0 %v1283_v54, %s7030_s3  ;;  %v680_v3 = vpop.permute.xlu1 %679  }
  0x87   :  { %v5882_v60 = vld [vmem:[%s13126_s0 + $0x206] ss:$8 sm:$0xf0]   ;;  %5537 = vst.msk [vmem:[%s13127_s1 + $0x70] sm:$0xff] %vm6_vm1, %v130_v56   ;;  %v94_v61 = vsel %vm4_vm0, %v5524_v57, %v5523_v52 }
  0x88   :  { %v5890_v62 = vld [vmem:[%s13126_s0 + $0x506] ss:$8 sm:$0xf]   ;;  %5525 = vst.msk [vmem:[%s13127_s1 + $0x50] sm:$0xff] %vm6_vm1, %v94_v61   ;;  %v1304_v4 = vsel %vm4_vm0, %v5882_v60, %v5881_v59  ;;  %v669_v8 = vpop.permute.xlu0 %668   ;;  %1316 = vrot.lane.b32.xlu1 %v1315_v0, %s7030_s3 }
  0x89   :  { %v5559_v63 = vld [vmem:[%s13126_s0 + $0x580] ss:$8 sm:$0xf]   ;;  %v5891_v5 = vld [vmem:[%s13126_s0 + $0x506] ss:$8 sm:$0xf0]  }
  0x8a   :  { %v5560_v1 = vld [vmem:[%s13126_s0 + $0x580] ss:$8 sm:$0xf0]   ;;  %5713 = vst.msk [vmem:[%s13127_s1 + $0x120] sm:$0xff] %vm583_vm2, %v680_v3   ;;  %5710 = vst.msk [vmem:[%s13127_s1 + $0x100] sm:$0xff] %vm583_vm2, %v669_v8   ;;  %1305 = vrot.lane.b32.xlu0 %v1304_v4, %s7030_s3  ;;  %v1337_v14 = vsel %vm4_vm0, %v5891_v5, %v5890_v62  ;;  %v702_v17 = vpop.permute.xlu1 %701  }
  0x8b   :  { %v5547_v2 = vld [vmem:[%s13126_s0 + $0x480] ss:$8 sm:$0xf]   ;;  %v202_v6 = vsel %vm4_vm0, %v5560_v1, %v5559_v63  ;;  %v5887_v9 = vld [vmem:[%s13126_s0 + $0x406] ss:$8 sm:$0xf]  }
  0x8c   :  { %v5548_v7 = vld [vmem:[%s13126_s0 + $0x480] ss:$8 sm:$0xf0]   ;;  %v5888_v10 = vld [vmem:[%s13126_s0 + $0x406] ss:$8 sm:$0xf0]   ;;  %v691_v22 = vpop.permute.xlu0 %690   ;;  %1338 = vrot.lane.b32.xlu1 %v1337_v14, %s7030_s3 }
  0x8d   :  { %5561 = vst.msk [vmem:[%s13127_s1 + $0xb0] sm:$0xff] %vm6_vm1, %v202_v6   ;;  %v166_v11 = vsel %vm4_vm0, %v5548_v7, %v5547_v2  ;;  %v5896_v12 = vld [vmem:[%s13126_s0 + $0x706] ss:$8 sm:$0xf]   ;;  %v1326_v18 = vsel %vm4_vm0, %v5888_v10, %v5887_v9 }
  0x8e   :  { %5549 = vst.msk [vmem:[%s13127_s1 + $0x90] sm:$0xff] %vm6_vm1, %v166_v11   ;;  %v5583_v13 = vld [vmem:[%s13126_s0 + $0x780] ss:$8 sm:$0xf]   ;;  %1327 = vrot.lane.b32.xlu0 %v1326_v18, %s7030_s3  ;;  %v724_v31 = vpop.permute.xlu1 %723  }
  0x8f   :  { %v5584_v15 = vld [vmem:[%s13126_s0 + $0x780] ss:$8 sm:$0xf0]   ;;  %v5897_v19 = vld [vmem:[%s13126_s0 + $0x706] ss:$8 sm:$0xf0]  }
  0x90   :  { %v5571_v16 = vld [vmem:[%s13126_s0 + $0x680] ss:$8 sm:$0xf]   ;;  %v274_v20 = vsel %vm4_vm0, %v5584_v15, %v5583_v13  ;;  %5719 = vst.msk [vmem:[%s13127_s1 + $0x160] sm:$0xff] %vm583_vm2, %v702_v17   ;;  %5716 = vst.msk [vmem:[%s13127_s1 + $0x140] sm:$0xff] %vm583_vm2, %v691_v22   ;;  %v1359_v28 = vsel %vm4_vm0, %v5897_v19, %v5896_v12  ;;  %v713_v36 = vpop.permute.xlu0 %712  }
  0x91   :  { %v5572_v21 = vld [vmem:[%s13126_s0 + $0x680] ss:$8 sm:$0xf0]   ;;  %v5893_v23 = vld [vmem:[%s13126_s0 + $0x606] ss:$8 sm:$0xf]   ;;  %1360 = vrot.lane.b32.xlu1 %v1359_v28, %s7030_s3 }
  0x92   :  { %v5894_v24 = vld [vmem:[%s13126_s0 + $0x606] ss:$8 sm:$0xf0]   ;;  %5585 = vst.msk [vmem:[%s13127_s1 + $0xf0] sm:$0xff] %vm6_vm1, %v274_v20   ;;  %v238_v25 = vsel %vm4_vm0, %v5572_v21, %v5571_v16  ;;  %v746_v45 = vpop.permute.xlu1 %745  }
  0x93   :  { %v5902_v26 = vld [vmem:[%s13126_s0 + $0x906] ss:$8 sm:$0xf]   ;;  %5573 = vst.msk [vmem:[%s13127_s1 + $0xd0] sm:$0xff] %vm6_vm1, %v238_v25   ;;  %v1348_v32 = vsel %vm4_vm0, %v5894_v24, %v5893_v23 }
  0x94   :  { %v5607_v27 = vld [vmem:[%s13126_s0 + $0x980] ss:$8 sm:$0xf]   ;;  %v5903_v33 = vld [vmem:[%s13126_s0 + $0x906] ss:$8 sm:$0xf0]   ;;  %1349 = vrot.lane.b32.xlu0 %v1348_v32, %s7030_s3  ;;  %v735_v50 = vpop.permute.xlu0 %734  }
  0x95   :  { %v5608_v29 = vld [vmem:[%s13126_s0 + $0x980] ss:$8 sm:$0xf0]   ;;  %5725 = vst.msk [vmem:[%s13127_s1 + $0x1a0] sm:$0xff] %vm583_vm2, %v724_v31   ;;  %5722 = vst.msk [vmem:[%s13127_s1 + $0x180] sm:$0xff] %vm583_vm2, %v713_v36   ;;  %v1381_v42 = vsel %vm4_vm0, %v5903_v33, %v5902_v26 }
  0x96   :  { %v5595_v30 = vld [vmem:[%s13126_s0 + $0x880] ss:$8 sm:$0xf]   ;;  %v346_v34 = vsel %vm4_vm0, %v5608_v29, %v5607_v27  ;;  %v5899_v37 = vld [vmem:[%s13126_s0 + $0x806] ss:$8 sm:$0xf]   ;;  %1382 = vrot.lane.b32.xlu1 %v1381_v42, %s7030_s3  ;;  %v768_v59 = vpop.permute.xlu1 %767  }
  0x97   :  { %v5596_v35 = vld [vmem:[%s13126_s0 + $0x880] ss:$8 sm:$0xf0]   ;;  %v5900_v38 = vld [vmem:[%s13126_s0 + $0x806] ss:$8 sm:$0xf0]  }
  0x98   :  { %5609 = vst.msk [vmem:[%s13127_s1 + $0x130] sm:$0xff] %vm6_vm1, %v346_v34   ;;  %v310_v39 = vsel %vm4_vm0, %v5596_v35, %v5595_v30  ;;  %v5908_v40 = vld [vmem:[%s13126_s0 + $0xb06] ss:$8 sm:$0xf]   ;;  %v1370_v46 = vsel %vm4_vm0, %v5900_v38, %v5899_v37  ;;  %v757_v0 = vpop.permute.xlu0 %756  }
  0x99   :  { %5597 = vst.msk [vmem:[%s13127_s1 + $0x110] sm:$0xff] %vm6_vm1, %v310_v39   ;;  %v5631_v41 = vld [vmem:[%s13126_s0 + $0xb80] ss:$8 sm:$0xf]   ;;  %1371 = vrot.lane.b32.xlu0 %v1370_v46, %s7030_s3 }
  0x9a   :  { %v5632_v43 = vld [vmem:[%s13126_s0 + $0xb80] ss:$8 sm:$0xf0]   ;;  %v5909_v47 = vld [vmem:[%s13126_s0 + $0xb06] ss:$8 sm:$0xf0]   ;;  %v790_v9 = vpop.permute.xlu1 %789  }
  0x9b   :  { %v5619_v44 = vld [vmem:[%s13126_s0 + $0xa80] ss:$8 sm:$0xf]   ;;  %v418_v48 = vsel %vm4_vm0, %v5632_v43, %v5631_v41  ;;  %5731 = vst.msk [vmem:[%s13127_s1 + $0x1e0] sm:$0xff] %vm583_vm2, %v746_v45   ;;  %5728 = vst.msk [vmem:[%s13127_s1 + $0x1c0] sm:$0xff] %vm583_vm2, %v735_v50   ;;  %v1403_v56 = vsel %vm4_vm0, %v5909_v47, %v5908_v40 }
  0x9c   :  { %v5620_v49 = vld [vmem:[%s13126_s0 + $0xa80] ss:$8 sm:$0xf0]   ;;  %v5905_v51 = vld [vmem:[%s13126_s0 + $0xa06] ss:$8 sm:$0xf]   ;;  %1404 = vrot.lane.b32.xlu1 %v1403_v56, %s7030_s3  ;;  %v779_v14 = vpop.permute.xlu0 %778  }
  0x9d   :  { %v5906_v52 = vld [vmem:[%s13126_s0 + $0xa06] ss:$8 sm:$0xf0]   ;;  %5633 = vst.msk [vmem:[%s13127_s1 + $0x170] sm:$0xff] %vm6_vm1, %v418_v48   ;;  %v382_v53 = vsel %vm4_vm0, %v5620_v49, %v5619_v44 }
  0x9e   :  { %v5914_v54 = vld [vmem:[%s13126_s0 + $0xd06] ss:$8 sm:$0xf]   ;;  %5621 = vst.msk [vmem:[%s13127_s1 + $0x150] sm:$0xff] %vm6_vm1, %v382_v53   ;;  %v1392_v60 = vsel %vm4_vm0, %v5906_v52, %v5905_v51  ;;  %v812_v23 = vpop.permute.xlu1 %811  }
  0x9f   :  { %v5655_v55 = vld [vmem:[%s13126_s0 + $0xd80] ss:$8 sm:$0xf]   ;;  %v5915_v61 = vld [vmem:[%s13126_s0 + $0xd06] ss:$8 sm:$0xf0]   ;;  %1393 = vrot.lane.b32.xlu0 %v1392_v60, %s7030_s3 }
  0xa0   :  { %v5656_v57 = vld [vmem:[%s13126_s0 + $0xd80] ss:$8 sm:$0xf0]   ;;  %5737 = vst.msk [vmem:[%s13127_s1 + $0x28] sm:$0xff] %vm583_vm2, %v768_v59   ;;  %5734 = vst.msk [vmem:[%s13127_s1 + $0x8] sm:$0xff] %vm583_vm2, %v757_v0   ;;  %v1425_v6 = vsel %vm4_vm0, %v5915_v61, %v5914_v54  ;;  %v801_v28 = vpop.permute.xlu0 %800  }
  0xa1   :  { %v5643_v58 = vld [vmem:[%s13126_s0 + $0xc80] ss:$8 sm:$0xf]   ;;  %v490_v62 = vsel %vm4_vm0, %v5656_v57, %v5655_v55  ;;  %v5911_v1 = vld [vmem:[%s13126_s0 + $0xc06] ss:$8 sm:$0xf]   ;;  %1426 = vrot.lane.b32.xlu1 %v1425_v6, %s7030_s3 }
  0xa2   :  { %v5644_v63 = vld [vmem:[%s13126_s0 + $0xc80] ss:$8 sm:$0xf0]   ;;  %v5912_v2 = vld [vmem:[%s13126_s0 + $0xc06] ss:$8 sm:$0xf0]   ;;  %v834_v37 = vpop.permute.xlu1 %833  }
  0xa3   :  { %5657 = vst.msk [vmem:[%s13127_s1 + $0x1b0] sm:$0xff] %vm6_vm1, %v490_v62   ;;  %v454_v3 = vsel %vm4_vm0, %v5644_v63, %v5643_v58  ;;  %v5920_v4 = vld [vmem:[%s13126_s0 + $0xf06] ss:$8 sm:$0xf]   ;;  %v1414_v10 = vsel %vm4_vm0, %v5912_v2, %v5911_v1 }
  0xa4   :  { %5645 = vst.msk [vmem:[%s13127_s1 + $0x190] sm:$0xff] %vm6_vm1, %v454_v3   ;;  %v5679_v5 = vld [vmem:[%s13126_s0 + $0xf80] ss:$8 sm:$0xf]   ;;  %1415 = vrot.lane.b32.xlu0 %v1414_v10, %s7030_s3  ;;  %v823_v42 = vpop.permute.xlu0 %822  }
  0xa5   :  { %v5680_v7 = vld [vmem:[%s13126_s0 + $0xf80] ss:$8 sm:$0xf0]   ;;  %v5921_v11 = vld [vmem:[%s13126_s0 + $0xf06] ss:$8 sm:$0xf0]  }
  0xa6   :  { %v5667_v8 = vld [vmem:[%s13126_s0 + $0xe80] ss:$8 sm:$0xf]   ;;  %v562_v12 = vsel %vm4_vm0, %v5680_v7, %v5679_v5  ;;  %5743 = vst.msk [vmem:[%s13127_s1 + $0x68] sm:$0xff] %vm583_vm2, %v790_v9   ;;  %5740 = vst.msk [vmem:[%s13127_s1 + $0x48] sm:$0xff] %vm583_vm2, %v779_v14   ;;  %v1447_v20 = vsel %vm4_vm0, %v5921_v11, %v5920_v4  ;;  %v856_v51 = vpop.permute.xlu1 %855  }
  0xa7   :  { %v5668_v13 = vld [vmem:[%s13126_s0 + $0xe80] ss:$8 sm:$0xf0]   ;;  %v5917_v15 = vld [vmem:[%s13126_s0 + $0xe06] ss:$8 sm:$0xf]   ;;  %1448 = vrot.lane.b32.xlu1 %v1447_v20, %s7030_s3 }
  0xa8   :  { %v5918_v16 = vld [vmem:[%s13126_s0 + $0xe06] ss:$8 sm:$0xf0]   ;;  %5681 = vst.msk [vmem:[%s13127_s1 + $0x1f0] sm:$0xff] %vm6_vm1, %v562_v12   ;;  %v526_v17 = vsel %vm4_vm0, %v5668_v13, %v5667_v8  ;;  %v845_v56 = vpop.permute.xlu0 %844  }
  0xa9   :  { %v5926_v18 = vld [vmem:[%s13126_s0 + $0x146] ss:$8 sm:$0xf]   ;;  %5669 = vst.msk [vmem:[%s13127_s1 + $0x1d0] sm:$0xff] %vm6_vm1, %v526_v17   ;;  %v1436_v24 = vsel %vm4_vm0, %v5918_v16, %v5917_v15 }
  0xaa   :  { %v5514_v19 = vld [vmem:[%s13126_s0 + $0x1c0] ss:$8 sm:$0xf]   ;;  %v5927_v25 = vld [vmem:[%s13126_s0 + $0x146] ss:$8 sm:$0xf0]   ;;  %1437 = vrot.lane.b32.xlu0 %v1436_v24, %s7030_s3  ;;  %v878_v1 = vpop.permute.xlu1 %877  }
  0xab   :  { %v5515_v21 = vld [vmem:[%s13126_s0 + $0x1c0] ss:$8 sm:$0xf0]   ;;  %5749 = vst.msk [vmem:[%s13127_s1 + $0xa8] sm:$0xff] %vm583_vm2, %v812_v23   ;;  %5746 = vst.msk [vmem:[%s13127_s1 + $0x88] sm:$0xff] %vm583_vm2, %v801_v28   ;;  %v1469_v34 = vsel %vm4_vm0, %v5927_v25, %v5926_v18 }
  0xac   :  { %v5502_v22 = vld [vmem:[%s13126_s0 + $0xc0] ss:$8 sm:$0xf]   ;;  %v67_v26 = vsel %vm4_vm0, %v5515_v21, %v5514_v19  ;;  %v5923_v29 = vld [vmem:[%s13126_s0 + $0x46] ss:$8 sm:$0xf]   ;;  %1470 = vrot.lane.b32.xlu1 %v1469_v34, %s7030_s3  ;;  %v867_v6 = vpop.permute.xlu0 %866  }
  0xad   :  { %v5503_v27 = vld [vmem:[%s13126_s0 + $0xc0] ss:$8 sm:$0xf0]   ;;  %v5924_v30 = vld [vmem:[%s13126_s0 + $0x46] ss:$8 sm:$0xf0]  }
  0xae   :  { %5516 = vst.msk [vmem:[%s13127_s1 + $0x38] sm:$0xff] %vm6_vm1, %v67_v26   ;;  %v31_v31 = vsel %vm4_vm0, %v5503_v27, %v5502_v22  ;;  %v5932_v32 = vld [vmem:[%s13126_s0 + $0x346] ss:$8 sm:$0xf]   ;;  %v1458_v38 = vsel %vm4_vm0, %v5924_v30, %v5923_v29  ;;  %v900_v15 = vpop.permute.xlu1 %899  }
  0xaf   :  { %5504 = vst.msk [vmem:[%s13127_s1 + $0x18] sm:$0xff] %vm6_vm1, %v31_v31   ;;  %v5538_v33 = vld [vmem:[%s13126_s0 + $0x3c0] ss:$8 sm:$0xf]   ;;  %1459 = vrot.lane.b32.xlu0 %v1458_v38, %s7030_s3 }
  0xb0   :  { %v5539_v35 = vld [vmem:[%s13126_s0 + $0x3c0] ss:$8 sm:$0xf0]   ;;  %v5933_v39 = vld [vmem:[%s13126_s0 + $0x346] ss:$8 sm:$0xf0]   ;;  %v889_v20 = vpop.permute.xlu0 %888  }
  0xb1   :  { %v5526_v36 = vld [vmem:[%s13126_s0 + $0x2c0] ss:$8 sm:$0xf]   ;;  %v139_v40 = vsel %vm4_vm0, %v5539_v35, %v5538_v33  ;;  %5755 = vst.msk [vmem:[%s13127_s1 + $0xe8] sm:$0xff] %vm583_vm2, %v834_v37   ;;  %5752 = vst.msk [vmem:[%s13127_s1 + $0xc8] sm:$0xff] %vm583_vm2, %v823_v42   ;;  %v1491_v48 = vsel %vm4_vm0, %v5933_v39, %v5932_v32 }
  0xb2   :  { %v5527_v41 = vld [vmem:[%s13126_s0 + $0x2c0] ss:$8 sm:$0xf0]   ;;  %v5929_v43 = vld [vmem:[%s13126_s0 + $0x246] ss:$8 sm:$0xf]   ;;  %1492 = vrot.lane.b32.xlu1 %v1491_v48, %s7030_s3  ;;  %v922_v29 = vpop.permute.xlu1 %921  }
  0xb3   :  { %v5930_v44 = vld [vmem:[%s13126_s0 + $0x246] ss:$8 sm:$0xf0]   ;;  %5540 = vst.msk [vmem:[%s13127_s1 + $0x78] sm:$0xff] %vm6_vm1, %v139_v40   ;;  %v103_v45 = vsel %vm4_vm0, %v5527_v41, %v5526_v36 }
  0xb4   :  { %v5938_v46 = vld [vmem:[%s13126_s0 + $0x546] ss:$8 sm:$0xf]   ;;  %5528 = vst.msk [vmem:[%s13127_s1 + $0x58] sm:$0xff] %vm6_vm1, %v103_v45   ;;  %v1480_v52 = vsel %vm4_vm0, %v5930_v44, %v5929_v43  ;;  %v911_v34 = vpop.permute.xlu0 %910  }
  0xb5   :  { %v5562_v47 = vld [vmem:[%s13126_s0 + $0x5c0] ss:$8 sm:$0xf]   ;;  %v5939_v53 = vld [vmem:[%s13126_s0 + $0x546] ss:$8 sm:$0xf0]   ;;  %1481 = vrot.lane.b32.xlu0 %v1480_v52, %s7030_s3 }
  0xb6   :  { %v5563_v49 = vld [vmem:[%s13126_s0 + $0x5c0] ss:$8 sm:$0xf0]   ;;  %5761 = vst.msk [vmem:[%s13127_s1 + $0x128] sm:$0xff] %vm583_vm2, %v856_v51   ;;  %5758 = vst.msk [vmem:[%s13127_s1 + $0x108] sm:$0xff] %vm583_vm2, %v845_v56   ;;  %v1513_v62 = vsel %vm4_vm0, %v5939_v53, %v5938_v46  ;;  %v944_v43 = vpop.permute.xlu1 %943  }
  0xb7   :  { %v5550_v50 = vld [vmem:[%s13126_s0 + $0x4c0] ss:$8 sm:$0xf]   ;;  %v211_v54 = vsel %vm4_vm0, %v5563_v49, %v5562_v47  ;;  %v5935_v57 = vld [vmem:[%s13126_s0 + $0x446] ss:$8 sm:$0xf]   ;;  %1514 = vrot.lane.b32.xlu1 %v1513_v62, %s7030_s3 }
  0xb8   :  { %v5551_v55 = vld [vmem:[%s13126_s0 + $0x4c0] ss:$8 sm:$0xf0]   ;;  %v5936_v58 = vld [vmem:[%s13126_s0 + $0x446] ss:$8 sm:$0xf0]   ;;  %v933_v48 = vpop.permute.xlu0 %932  }
  0xb9   :  { %5564 = vst.msk [vmem:[%s13127_s1 + $0xb8] sm:$0xff] %vm6_vm1, %v211_v54   ;;  %v175_v59 = vsel %vm4_vm0, %v5551_v55, %v5550_v50  ;;  %v5944_v60 = vld [vmem:[%s13126_s0 + $0x746] ss:$8 sm:$0xf]   ;;  %v1502_v2 = vsel %vm4_vm0, %v5936_v58, %v5935_v57 }
  0xba   :  { %5552 = vst.msk [vmem:[%s13127_s1 + $0x98] sm:$0xff] %vm6_vm1, %v175_v59   ;;  %v5586_v61 = vld [vmem:[%s13126_s0 + $0x7c0] ss:$8 sm:$0xf]   ;;  %1503 = vrot.lane.b32.xlu0 %v1502_v2, %s7030_s3  ;;  %v966_v57 = vpop.permute.xlu1 %965  }
  0xbb   :  { %v5587_v63 = vld [vmem:[%s13126_s0 + $0x7c0] ss:$8 sm:$0xf0]   ;;  %v5945_v3 = vld [vmem:[%s13126_s0 + $0x746] ss:$8 sm:$0xf0]  }
  0xbc   :  { %v5574_v0 = vld [vmem:[%s13126_s0 + $0x6c0] ss:$8 sm:$0xf]   ;;  %v283_v4 = vsel %vm4_vm0, %v5587_v63, %v5586_v61  ;;  %5767 = vst.msk [vmem:[%s13127_s1 + $0x168] sm:$0xff] %vm583_vm2, %v878_v1   ;;  %5764 = vst.msk [vmem:[%s13127_s1 + $0x148] sm:$0xff] %vm583_vm2, %v867_v6   ;;  %v1535_v12 = vsel %vm4_vm0, %v5945_v3, %v5944_v60  ;;  %v955_v62 = vpop.permute.xlu0 %954  }
  0xbd   :  { %v5575_v5 = vld [vmem:[%s13126_s0 + $0x6c0] ss:$8 sm:$0xf0]   ;;  %v5941_v7 = vld [vmem:[%s13126_s0 + $0x646] ss:$8 sm:$0xf]   ;;  %1536 = vrot.lane.b32.xlu1 %v1535_v12, %s7030_s3 }
  0xbe   :  { %v5942_v8 = vld [vmem:[%s13126_s0 + $0x646] ss:$8 sm:$0xf0]   ;;  %5588 = vst.msk [vmem:[%s13127_s1 + $0xf8] sm:$0xff] %vm6_vm1, %v283_v4   ;;  %v247_v9 = vsel %vm4_vm0, %v5575_v5, %v5574_v0  ;;  %v988_v3 = vpop.permute.xlu1 %987  }
  0xbf   :  { %v5950_v10 = vld [vmem:[%s13126_s0 + $0x946] ss:$8 sm:$0xf]   ;;  %5576 = vst.msk [vmem:[%s13127_s1 + $0xd8] sm:$0xff] %vm6_vm1, %v247_v9   ;;  %v1524_v16 = vsel %vm4_vm0, %v5942_v8, %v5941_v7 }
  0xc0   :  { %v5610_v11 = vld [vmem:[%s13126_s0 + $0x9c0] ss:$8 sm:$0xf]   ;;  %v5951_v17 = vld [vmem:[%s13126_s0 + $0x946] ss:$8 sm:$0xf0]   ;;  %1525 = vrot.lane.b32.xlu0 %v1524_v16, %s7030_s3  ;;  %v977_v7 = vpop.permute.xlu0 %976  }
  0xc1   :  { %v5611_v13 = vld [vmem:[%s13126_s0 + $0x9c0] ss:$8 sm:$0xf0]   ;;  %5773 = vst.msk [vmem:[%s13127_s1 + $0x1a8] sm:$0xff] %vm583_vm2, %v900_v15   ;;  %5770 = vst.msk [vmem:[%s13127_s1 + $0x188] sm:$0xff] %vm583_vm2, %v889_v20   ;;  %v1557_v26 = vsel %vm4_vm0, %v5951_v17, %v5950_v10 }
  0xc2   :  { %v5598_v14 = vld [vmem:[%s13126_s0 + $0x8c0] ss:$8 sm:$0xf]   ;;  %v355_v18 = vsel %vm4_vm0, %v5611_v13, %v5610_v11  ;;  %v5947_v21 = vld [vmem:[%s13126_s0 + $0x846] ss:$8 sm:$0xf]   ;;  %1558 = vrot.lane.b32.xlu1 %v1557_v26, %s7030_s3  ;;  %v1010_v11 = vpop.permute.xlu1 %1009  }
  0xc3   :  { %v5599_v19 = vld [vmem:[%s13126_s0 + $0x8c0] ss:$8 sm:$0xf0]   ;;  %v5948_v22 = vld [vmem:[%s13126_s0 + $0x846] ss:$8 sm:$0xf0]  }
  0xc4   :  { %5612 = vst.msk [vmem:[%s13127_s1 + $0x138] sm:$0xff] %vm6_vm1, %v355_v18   ;;  %v319_v23 = vsel %vm4_vm0, %v5599_v19, %v5598_v14  ;;  %v5956_v24 = vld [vmem:[%s13126_s0 + $0xb46] ss:$8 sm:$0xf]   ;;  %v1546_v30 = vsel %vm4_vm0, %v5948_v22, %v5947_v21  ;;  %v999_v15 = vpop.permute.xlu0 %998  }
  0xc5   :  { %5600 = vst.msk [vmem:[%s13127_s1 + $0x118] sm:$0xff] %vm6_vm1, %v319_v23   ;;  %v5634_v25 = vld [vmem:[%s13126_s0 + $0xbc0] ss:$8 sm:$0xf]   ;;  %1547 = vrot.lane.b32.xlu0 %v1546_v30, %s7030_s3 }
  0xc6   :  { %v5635_v27 = vld [vmem:[%s13126_s0 + $0xbc0] ss:$8 sm:$0xf0]   ;;  %v5957_v31 = vld [vmem:[%s13126_s0 + $0xb46] ss:$8 sm:$0xf0]   ;;  %v1032_v19 = vpop.permute.xlu1 %1031  }
  0xc7   :  { %v5622_v28 = vld [vmem:[%s13126_s0 + $0xac0] ss:$8 sm:$0xf]   ;;  %v427_v32 = vsel %vm4_vm0, %v5635_v27, %v5634_v25  ;;  %5779 = vst.msk [vmem:[%s13127_s1 + $0x1e8] sm:$0xff] %vm583_vm2, %v922_v29   ;;  %5776 = vst.msk [vmem:[%s13127_s1 + $0x1c8] sm:$0xff] %vm583_vm2, %v911_v34   ;;  %v1579_v40 = vsel %vm4_vm0, %v5957_v31, %v5956_v24 }
  0xc8   :  { %v5623_v33 = vld [vmem:[%s13126_s0 + $0xac0] ss:$8 sm:$0xf0]   ;;  %v5953_v35 = vld [vmem:[%s13126_s0 + $0xa46] ss:$8 sm:$0xf]   ;;  %1580 = vrot.lane.b32.xlu1 %v1579_v40, %s7030_s3  ;;  %v1021_v23 = vpop.permute.xlu0 %1020  }
  0xc9   :  { %v5954_v36 = vld [vmem:[%s13126_s0 + $0xa46] ss:$8 sm:$0xf0]   ;;  %5636 = vst.msk [vmem:[%s13127_s1 + $0x178] sm:$0xff] %vm6_vm1, %v427_v32   ;;  %v391_v37 = vsel %vm4_vm0, %v5623_v33, %v5622_v28 }
  0xca   :  { %v5962_v38 = vld [vmem:[%s13126_s0 + $0xd46] ss:$8 sm:$0xf]   ;;  %5624 = vst.msk [vmem:[%s13127_s1 + $0x158] sm:$0xff] %vm6_vm1, %v391_v37   ;;  %v1568_v44 = vsel %vm4_vm0, %v5954_v36, %v5953_v35  ;;  %v1054_v27 = vpop.permute.xlu1 %1053  }
  0xcb   :  { %v5658_v39 = vld [vmem:[%s13126_s0 + $0xdc0] ss:$8 sm:$0xf]   ;;  %v5963_v45 = vld [vmem:[%s13126_s0 + $0xd46] ss:$8 sm:$0xf0]   ;;  %1569 = vrot.lane.b32.xlu0 %v1568_v44, %s7030_s3 }
  0xcc   :  { %v5659_v41 = vld [vmem:[%s13126_s0 + $0xdc0] ss:$8 sm:$0xf0]   ;;  %5785 = vst.msk [vmem:[%s13127_s1 + $0x30] sm:$0xff] %vm583_vm2, %v944_v43   ;;  %5782 = vst.msk [vmem:[%s13127_s1 + $0x10] sm:$0xff] %vm583_vm2, %v933_v48   ;;  %v1601_v54 = vsel %vm4_vm0, %v5963_v45, %v5962_v38  ;;  %v1043_v31 = vpop.permute.xlu0 %1042  }
  0xcd   :  { %v5646_v42 = vld [vmem:[%s13126_s0 + $0xcc0] ss:$8 sm:$0xf]   ;;  %v499_v46 = vsel %vm4_vm0, %v5659_v41, %v5658_v39  ;;  %v5959_v49 = vld [vmem:[%s13126_s0 + $0xc46] ss:$8 sm:$0xf]   ;;  %1602 = vrot.lane.b32.xlu1 %v1601_v54, %s7030_s3 }
  0xce   :  { %v5647_v47 = vld [vmem:[%s13126_s0 + $0xcc0] ss:$8 sm:$0xf0]   ;;  %v5960_v50 = vld [vmem:[%s13126_s0 + $0xc46] ss:$8 sm:$0xf0]   ;;  %v1076_v35 = vpop.permute.xlu1 %1075  }
  0xcf   :  { %5660 = vst.msk [vmem:[%s13127_s1 + $0x1b8] sm:$0xff] %vm6_vm1, %v499_v46   ;;  %v463_v51 = vsel %vm4_vm0, %v5647_v47, %v5646_v42  ;;  %v5968_v52 = vld [vmem:[%s13126_s0 + $0xf46] ss:$8 sm:$0xf]   ;;  %v1590_v58 = vsel %vm4_vm0, %v5960_v50, %v5959_v49 }
  0xd0   :  { %5648 = vst.msk [vmem:[%s13127_s1 + $0x198] sm:$0xff] %vm6_vm1, %v463_v51   ;;  %v5682_v53 = vld [vmem:[%s13126_s0 + $0xfc0] ss:$8 sm:$0xf]   ;;  %1591 = vrot.lane.b32.xlu0 %v1590_v58, %s7030_s3  ;;  %v1065_v39 = vpop.permute.xlu0 %1064  }
  0xd1   :  { %v5683_v55 = vld [vmem:[%s13126_s0 + $0xfc0] ss:$8 sm:$0xf0]   ;;  %v5969_v59 = vld [vmem:[%s13126_s0 + $0xf46] ss:$8 sm:$0xf0]  }
  0xd2   :  { %v5670_v56 = vld [vmem:[%s13126_s0 + $0xec0] ss:$8 sm:$0xf]   ;;  %v571_v60 = vsel %vm4_vm0, %v5683_v55, %v5682_v53  ;;  %5791 = vst.msk [vmem:[%s13127_s1 + $0x70] sm:$0xff] %vm583_vm2, %v966_v57   ;;  %5788 = vst.msk [vmem:[%s13127_s1 + $0x50] sm:$0xff] %vm583_vm2, %v955_v62   ;;  %v1623_v2 = vsel %vm4_vm0, %v5969_v59, %v5968_v52  ;;  %v1098_v43 = vpop.permute.xlu1 %1097  }
  0xd3   :  { %v5671_v61 = vld [vmem:[%s13126_s0 + $0xec0] ss:$8 sm:$0xf0]   ;;  %v5965_v63 = vld [vmem:[%s13126_s0 + $0xe46] ss:$8 sm:$0xf]   ;;  %1624 = vrot.lane.b32.xlu1 %v1623_v2, %s7030_s3 }
  0xd4   :  { %v5966_v0 = vld [vmem:[%s13126_s0 + $0xe46] ss:$8 sm:$0xf0]   ;;  %5684 = vst.msk [vmem:[%s13127_s1 + $0x1f8] sm:$0xff] %vm6_vm1, %v571_v60   ;;  %v535_v1 = vsel %vm4_vm0, %v5671_v61, %v5670_v56  ;;  %v1087_v47 = vpop.permute.xlu0 %1086  }
  0xd5   :  { %5672 = vst.msk [vmem:[%s13127_s1 + $0x1d8] sm:$0xff] %vm6_vm1, %v535_v1   ;;  %v1612_v4 = vsel %vm4_vm0, %v5966_v0, %v5965_v63  ;;  %v5974_v5 = vld [vmem:[%s13126_s0 + $0x186] ss:$8 sm:$0xf]  }
  0xd6   :  { %v5975_v6 = vld [vmem:[%s13126_s0 + $0x186] ss:$8 sm:$0xf0]   ;;  %5797 = vst.msk [vmem:[%s13127_s1 + $0xb0] sm:$0xff] %vm583_vm2, %v988_v3   ;;  %5794 = vst.msk [vmem:[%s13127_s1 + $0x90] sm:$0xff] %vm583_vm2, %v977_v7   ;;  %1613 = vrot.lane.b32.xlu0 %v1612_v4, %s7030_s3  ;;  %v1120_v51 = vpop.permute.xlu1 %1119  }
  0xd7   :  { %v5971_v8 = vld [vmem:[%s13126_s0 + $0x86] ss:$8 sm:$0xf]   ;;  %v1645_v10 = vsel %vm4_vm0, %v5975_v6, %v5974_v5  ;;  %5803 = vst.msk [vmem:[%s13127_s1 + $0xf0] sm:$0xff] %vm583_vm2, %v1010_v11   ;;  %5800 = vst.msk [vmem:[%s13127_s1 + $0xd0] sm:$0xff] %vm583_vm2, %v999_v15  }
  0xd8   :  { %v5972_v9 = vld [vmem:[%s13126_s0 + $0x86] ss:$8 sm:$0xf0]   ;;  %1646 = vrot.lane.b32.xlu1 %v1645_v10, %s7030_s3  ;;  %5809 = vst.msk [vmem:[%s13127_s1 + $0x130] sm:$0xff] %vm583_vm2, %v1032_v19   ;;  %5806 = vst.msk [vmem:[%s13127_s1 + $0x110] sm:$0xff] %vm583_vm2, %v1021_v23   ;;  %v1109_v55 = vpop.permute.xlu0 %1108  }
  0xd9   :  { %v1634_v12 = vsel %vm4_vm0, %v5972_v9, %v5971_v8  ;;  %v5980_v13 = vld [vmem:[%s13126_s0 + $0x386] ss:$8 sm:$0xf]   ;;  %5815 = vst.msk [vmem:[%s13127_s1 + $0x170] sm:$0xff] %vm583_vm2, %v1054_v27   ;;  %5812 = vst.msk [vmem:[%s13127_s1 + $0x150] sm:$0xff] %vm583_vm2, %v1043_v31  }
  0xda   :  { %v5981_v14 = vld [vmem:[%s13126_s0 + $0x386] ss:$8 sm:$0xf0]   ;;  %1635 = vrot.lane.b32.xlu0 %v1634_v12, %s7030_s3  ;;  %5821 = vst.msk [vmem:[%s13127_s1 + $0x1b0] sm:$0xff] %vm583_vm2, %v1076_v35   ;;  %5818 = vst.msk [vmem:[%s13127_s1 + $0x190] sm:$0xff] %vm583_vm2, %v1065_v39   ;;  %v1142_v59 = vpop.permute.xlu1 %1141  }
  0xdb   :  { %v5977_v16 = vld [vmem:[%s13126_s0 + $0x286] ss:$8 sm:$0xf]   ;;  %v1667_v18 = vsel %vm4_vm0, %v5981_v14, %v5980_v13  ;;  %5827 = vst.msk [vmem:[%s13127_s1 + $0x1f0] sm:$0xff] %vm583_vm2, %v1098_v43   ;;  %5824 = vst.msk [vmem:[%s13127_s1 + $0x1d0] sm:$0xff] %vm583_vm2, %v1087_v47  }
  0xdc   :  { %v5978_v17 = vld [vmem:[%s13126_s0 + $0x286] ss:$8 sm:$0xf0]   ;;  %1668 = vrot.lane.b32.xlu1 %v1667_v18, %s7030_s3  ;;  %5833 = vst.msk [vmem:[%s13127_s1 + $0x38] sm:$0xff] %vm583_vm2, %v1120_v51   ;;  %5830 = vst.msk [vmem:[%s13127_s1 + $0x18] sm:$0xff] %vm583_vm2, %v1109_v55   ;;  %v1131_v63 = vpop.permute.xlu0 %1130  }
  0xdd   :  { %v1656_v20 = vsel %vm4_vm0, %v5978_v17, %v5977_v16  ;;  %v5986_v21 = vld [vmem:[%s13126_s0 + $0x586] ss:$8 sm:$0xf]   ;;  %5839 = vst.msk [vmem:[%s13127_s1 + $0x78] sm:$0xff] %vm583_vm2, %v1142_v59   ;;  %5836 = vst.msk [vmem:[%s13127_s1 + $0x58] sm:$0xff] %vm583_vm2, %v1131_v63  }
  0xde   :  { %v5987_v22 = vld [vmem:[%s13126_s0 + $0x586] ss:$8 sm:$0xf0]   ;;  %1657 = vrot.lane.b32.xlu0 %v1656_v20, %s7030_s3  ;;  %v1164_v3 = vpop.permute.xlu1 %1163  }
  0xdf   :  { %v5983_v24 = vld [vmem:[%s13126_s0 + $0x486] ss:$8 sm:$0xf]   ;;  %v1689_v26 = vsel %vm4_vm0, %v5987_v22, %v5986_v21  ;;  %5845 = vst.msk [vmem:[%s13127_s1 + $0xb8] sm:$0xff] %vm583_vm2, %v1164_v3  }
  0xe0   :  { %v5984_v25 = vld [vmem:[%s13126_s0 + $0x486] ss:$8 sm:$0xf0]   ;;  %1690 = vrot.lane.b32.xlu1 %v1689_v26, %s7030_s3  ;;  %v1153_v7 = vpop.permute.xlu0 %1152  }
  0xe1   :  { %v1678_v28 = vsel %vm4_vm0, %v5984_v25, %v5983_v24  ;;  %v5992_v29 = vld [vmem:[%s13126_s0 + $0x786] ss:$8 sm:$0xf]   ;;  %5842 = vst.msk [vmem:[%s13127_s1 + $0x98] sm:$0xff] %vm583_vm2, %v1153_v7  }
  0xe2   :  { %v5993_v30 = vld [vmem:[%s13126_s0 + $0x786] ss:$8 sm:$0xf0]   ;;  %1679 = vrot.lane.b32.xlu0 %v1678_v28, %s7030_s3  ;;  %v1186_v11 = vpop.permute.xlu1 %1185  }
  0xe3   :  { %v5989_v32 = vld [vmem:[%s13126_s0 + $0x686] ss:$8 sm:$0xf]   ;;  %v1711_v34 = vsel %vm4_vm0, %v5993_v30, %v5992_v29  ;;  %5851 = vst.msk [vmem:[%s13127_s1 + $0xf8] sm:$0xff] %vm583_vm2, %v1186_v11  }
  0xe4   :  { %v5990_v33 = vld [vmem:[%s13126_s0 + $0x686] ss:$8 sm:$0xf0]   ;;  %1712 = vrot.lane.b32.xlu1 %v1711_v34, %s7030_s3  ;;  %v1175_v15 = vpop.permute.xlu0 %1174  }
  0xe5   :  { %v1700_v36 = vsel %vm4_vm0, %v5990_v33, %v5989_v32  ;;  %v5998_v37 = vld [vmem:[%s13126_s0 + $0x986] ss:$8 sm:$0xf]   ;;  %5848 = vst.msk [vmem:[%s13127_s1 + $0xd8] sm:$0xff] %vm583_vm2, %v1175_v15  }
  0xe6   :  { %v5999_v38 = vld [vmem:[%s13126_s0 + $0x986] ss:$8 sm:$0xf0]   ;;  %1701 = vrot.lane.b32.xlu0 %v1700_v36, %s7030_s3  ;;  %v1208_v19 = vpop.permute.xlu1 %1207  }
  0xe7   :  { %v5995_v40 = vld [vmem:[%s13126_s0 + $0x886] ss:$8 sm:$0xf]   ;;  %v1733_v42 = vsel %vm4_vm0, %v5999_v38, %v5998_v37  ;;  %5857 = vst.msk [vmem:[%s13127_s1 + $0x138] sm:$0xff] %vm583_vm2, %v1208_v19  }
  0xe8   :  { %v5996_v41 = vld [vmem:[%s13126_s0 + $0x886] ss:$8 sm:$0xf0]   ;;  %1734 = vrot.lane.b32.xlu1 %v1733_v42, %s7030_s3  ;;  %v1197_v23 = vpop.permute.xlu0 %1196  }
  0xe9   :  { %v1722_v44 = vsel %vm4_vm0, %v5996_v41, %v5995_v40  ;;  %v6004_v45 = vld [vmem:[%s13126_s0 + $0xb86] ss:$8 sm:$0xf]   ;;  %5854 = vst.msk [vmem:[%s13127_s1 + $0x118] sm:$0xff] %vm583_vm2, %v1197_v23  }
  0xea   :  { %v6005_v46 = vld [vmem:[%s13126_s0 + $0xb86] ss:$8 sm:$0xf0]   ;;  %1723 = vrot.lane.b32.xlu0 %v1722_v44, %s7030_s3  ;;  %v1230_v27 = vpop.permute.xlu1 %1229  }
  0xeb   :  { %v6001_v48 = vld [vmem:[%s13126_s0 + $0xa86] ss:$8 sm:$0xf]   ;;  %v1755_v50 = vsel %vm4_vm0, %v6005_v46, %v6004_v45  ;;  %5863 = vst.msk [vmem:[%s13127_s1 + $0x178] sm:$0xff] %vm583_vm2, %v1230_v27  }
  0xec   :  { %v6002_v49 = vld [vmem:[%s13126_s0 + $0xa86] ss:$8 sm:$0xf0]   ;;  %1756 = vrot.lane.b32.xlu1 %v1755_v50, %s7030_s3  ;;  %v1219_v31 = vpop.permute.xlu0 %1218  }
  0xed   :  { %v1744_v52 = vsel %vm4_vm0, %v6002_v49, %v6001_v48  ;;  %v6010_v53 = vld [vmem:[%s13126_s0 + $0xd86] ss:$8 sm:$0xf]   ;;  %5860 = vst.msk [vmem:[%s13127_s1 + $0x158] sm:$0xff] %vm583_vm2, %v1219_v31  }
  0xee   :  { %v6011_v54 = vld [vmem:[%s13126_s0 + $0xd86] ss:$8 sm:$0xf0]   ;;  %1745 = vrot.lane.b32.xlu0 %v1744_v52, %s7030_s3  ;;  %v1252_v35 = vpop.permute.xlu1 %1251  }
  0xef   :  { %v6007_v56 = vld [vmem:[%s13126_s0 + $0xc86] ss:$8 sm:$0xf]   ;;  %v1777_v58 = vsel %vm4_vm0, %v6011_v54, %v6010_v53  ;;  %5869 = vst.msk [vmem:[%s13127_s1 + $0x1b8] sm:$0xff] %vm583_vm2, %v1252_v35  }
  0xf0   :  { %v6008_v57 = vld [vmem:[%s13126_s0 + $0xc86] ss:$8 sm:$0xf0]   ;;  %1778 = vrot.lane.b32.xlu1 %v1777_v58, %s7030_s3  ;;  %v1241_v39 = vpop.permute.xlu0 %1240  }
  0xf1   :  { %v1766_v60 = vsel %vm4_vm0, %v6008_v57, %v6007_v56  ;;  %v6016_v61 = vld [vmem:[%s13126_s0 + $0xf86] ss:$8 sm:$0xf]   ;;  %5866 = vst.msk [vmem:[%s13127_s1 + $0x198] sm:$0xff] %vm583_vm2, %v1241_v39  }
  0xf2   :  { %v6017_v62 = vld [vmem:[%s13126_s0 + $0xf86] ss:$8 sm:$0xf0]   ;;  %1767 = vrot.lane.b32.xlu0 %v1766_v60, %s7030_s3  ;;  %v1274_v43 = vpop.permute.xlu1 %1273  }
  0xf3   :  { %v6013_v0 = vld [vmem:[%s13126_s0 + $0xe86] ss:$8 sm:$0xf]   ;;  %v1799_v2 = vsel %vm4_vm0, %v6017_v62, %v6016_v61  ;;  %5875 = vst.msk [vmem:[%s13127_s1 + $0x1f8] sm:$0xff] %vm583_vm2, %v1274_v43  }
  0xf4   :  { %v6014_v1 = vld [vmem:[%s13126_s0 + $0xe86] ss:$8 sm:$0xf0]   ;;  %1800 = vrot.lane.b32.xlu1 %v1799_v2, %s7030_s3  ;;  %v1263_v47 = vpop.permute.xlu0 %1262  }
  0xf5   :  { %v1788_v4 = vsel %vm4_vm0, %v6014_v1, %v6013_v0  ;;  %v6022_v5 = vld [vmem:[%s13126_s0 + $0x1c6] ss:$8 sm:$0xf]   ;;  %5872 = vst.msk [vmem:[%s13127_s1 + $0x1d8] sm:$0xff] %vm583_vm2, %v1263_v47  }
  0xf6   :  { %v6023_v6 = vld [vmem:[%s13126_s0 + $0x1c6] ss:$8 sm:$0xf0]   ;;  %1789 = vrot.lane.b32.xlu0 %v1788_v4, %s7030_s3  ;;  %v1295_v51 = vpop.permute.xlu1 %1294  }
  0xf7   :  { %v6019_v8 = vld [vmem:[%s13126_s0 + $0xc6] ss:$8 sm:$0xf]   ;;  %v1821_v10 = vsel %vm4_vm0, %v6023_v6, %v6022_v5  ;;  %5880 = vst.msk [vmem:[%s13127_s1 + $0x20] sm:$0xff] %vm1286_vm3, %v1295_v51  }
  0xf8   :  { %v6020_v9 = vld [vmem:[%s13126_s0 + $0xc6] ss:$8 sm:$0xf0]   ;;  %1822 = vrot.lane.b32.xlu1 %v1821_v10, %s7030_s3  ;;  %v1285_v55 = vpop.permute.xlu0 %1284   ;;  %v6069_v5 = vld [vmem:[%s13126_s0 + $0x105] ss:$8 sm:$0xf]  }
  0xf9   :  { %v1810_v12 = vsel %vm4_vm0, %v6020_v9, %v6019_v8  ;;  %v6028_v13 = vld [vmem:[%s13126_s0 + $0x3c6] ss:$8 sm:$0xf]   ;;  %1287 = vst.msk [vmem:[%s13127_s1] sm:$0xff] %vm1286_vm3, %v1285_v55  }
  0xfa   :  { %v6029_v14 = vld [vmem:[%s13126_s0 + $0x3c6] ss:$8 sm:$0xf0]   ;;  %1811 = vrot.lane.b32.xlu0 %v1810_v12, %s7030_s3  ;;  %v1317_v59 = vpop.permute.xlu1 %1316   ;;  %v6070_v6 = vld [vmem:[%s13126_s0 + $0x105] ss:$8 sm:$0xf0]  }
  0xfb   :  { %v6025_v16 = vld [vmem:[%s13126_s0 + $0x2c6] ss:$8 sm:$0xf]   ;;  %v1843_v18 = vsel %vm4_vm0, %v6029_v14, %v6028_v13  ;;  %5886 = vst.msk [vmem:[%s13127_s1 + $0x60] sm:$0xff] %vm1286_vm3, %v1317_v59   ;;  %v1996_v10 = vsel %vm4_vm0, %v6070_v6, %v6069_v5 }
  0xfc   :  { %v6026_v17 = vld [vmem:[%s13126_s0 + $0x2c6] ss:$8 sm:$0xf0]   ;;  %1844 = vrot.lane.b32.xlu1 %v1843_v18, %s7030_s3  ;;  %v1306_v63 = vpop.permute.xlu0 %1305   ;;  %v6067_v8 = vld [vmem:[%s13126_s0 + $0x5] ss:$8 sm:$0xf]  }
  0xfd   :  { %v1832_v20 = vsel %vm4_vm0, %v6026_v17, %v6025_v16  ;;  %v6034_v21 = vld [vmem:[%s13126_s0 + $0x5c6] ss:$8 sm:$0xf]   ;;  %5883 = vst.msk [vmem:[%s13127_s1 + $0x40] sm:$0xff] %vm1286_vm3, %v1306_v63  }
  0xfe   :  { %v6035_v22 = vld [vmem:[%s13126_s0 + $0x5c6] ss:$8 sm:$0xf0]   ;;  %1833 = vrot.lane.b32.xlu0 %v1832_v20, %s7030_s3  ;;  %v1339_v3 = vpop.permute.xlu1 %1338   ;;  %v6068_v9 = vld [vmem:[%s13126_s0 + $0x5] ss:$8 sm:$0xf0]  }
  0xff   :  { %v6031_v24 = vld [vmem:[%s13126_s0 + $0x4c6] ss:$8 sm:$0xf]   ;;  %v1865_v26 = vsel %vm4_vm0, %v6035_v22, %v6034_v21  ;;  %5892 = vst.msk [vmem:[%s13127_s1 + $0xa0] sm:$0xff] %vm1286_vm3, %v1339_v3   ;;  %v1986_v12 = vsel %vm4_vm0, %v6068_v9, %v6067_v8 }
 0x100   :  { %v6032_v25 = vld [vmem:[%s13126_s0 + $0x4c6] ss:$8 sm:$0xf0]   ;;  %1866 = vrot.lane.b32.xlu1 %v1865_v26, %s7030_s3  ;;  %v1328_v7 = vpop.permute.xlu0 %1327   ;;  %v6075_v13 = vld [vmem:[%s13126_s0 + $0x305] ss:$8 sm:$0xf]  }
 0x101   :  { %v1854_v28 = vsel %vm4_vm0, %v6032_v25, %v6031_v24  ;;  %v6040_v29 = vld [vmem:[%s13126_s0 + $0x7c6] ss:$8 sm:$0xf]   ;;  %5889 = vst.msk [vmem:[%s13127_s1 + $0x80] sm:$0xff] %vm1286_vm3, %v1328_v7  }
 0x102   :  { %v6041_v30 = vld [vmem:[%s13126_s0 + $0x7c6] ss:$8 sm:$0xf0]   ;;  %1855 = vrot.lane.b32.xlu0 %v1854_v28, %s7030_s3  ;;  %v6076_v14 = vld [vmem:[%s13126_s0 + $0x305] ss:$8 sm:$0xf0]  }
 0x103   :  { %v6037_v32 = vld [vmem:[%s13126_s0 + $0x6c6] ss:$8 sm:$0xf]   ;;  %v1887_v34 = vsel %vm4_vm0, %v6041_v30, %v6040_v29  ;;  %v1361_v11 = vpop.permute.xlu1 %1360   ;;  %v6072_v16 = vld [vmem:[%s13126_s0 + $0x205] ss:$8 sm:$0xf]   ;;  %v2018_v18 = vsel %vm4_vm0, %v6076_v14, %v6075_v13 }
 0x104   :  { %v6038_v33 = vld [vmem:[%s13126_s0 + $0x6c6] ss:$8 sm:$0xf0]   ;;  %1888 = vrot.lane.b32.xlu1 %v1887_v34, %s7030_s3  ;;  %5898 = vst.msk [vmem:[%s13127_s1 + $0xe0] sm:$0xff] %vm1286_vm3, %v1361_v11  }
 0x105   :  { %v1876_v36 = vsel %vm4_vm0, %v6038_v33, %v6037_v32  ;;  %v6046_v37 = vld [vmem:[%s13126_s0 + $0x9c6] ss:$8 sm:$0xf]   ;;  %v6073_v17 = vld [vmem:[%s13126_s0 + $0x205] ss:$8 sm:$0xf0]  }
 0x106   :  { %v6047_v38 = vld [vmem:[%s13126_s0 + $0x9c6] ss:$8 sm:$0xf0]   ;;  %1877 = vrot.lane.b32.xlu0 %v1876_v36, %s7030_s3  ;;  %v1350_v15 = vpop.permute.xlu0 %1349   ;;  %v2007_v20 = vsel %vm4_vm0, %v6073_v17, %v6072_v16  ;;  %v6081_v21 = vld [vmem:[%s13126_s0 + $0x505] ss:$8 sm:$0xf]  }
 0x107   :  { %v6043_v40 = vld [vmem:[%s13126_s0 + $0x8c6] ss:$8 sm:$0xf]   ;;  %v1909_v42 = vsel %vm4_vm0, %v6047_v38, %v6046_v37  ;;  %5895 = vst.msk [vmem:[%s13127_s1 + $0xc0] sm:$0xff] %vm1286_vm3, %v1350_v15  }
 0x108   :  { %v6044_v41 = vld [vmem:[%s13126_s0 + $0x8c6] ss:$8 sm:$0xf0]   ;;  %1910 = vrot.lane.b32.xlu1 %v1909_v42, %s7030_s3  ;;  %v1383_v19 = vpop.permute.xlu1 %1382   ;;  %v6082_v22 = vld [vmem:[%s13126_s0 + $0x505] ss:$8 sm:$0xf0]  }
 0x109   :  { %v1898_v44 = vsel %vm4_vm0, %v6044_v41, %v6043_v40  ;;  %v6052_v45 = vld [vmem:[%s13126_s0 + $0xbc6] ss:$8 sm:$0xf]   ;;  %5904 = vst.msk [vmem:[%s13127_s1 + $0x120] sm:$0xff] %vm1286_vm3, %v1383_v19   ;;  %v2040_v26 = vsel %vm4_vm0, %v6082_v22, %v6081_v21 }
 0x10a   :  { %v6053_v46 = vld [vmem:[%s13126_s0 + $0xbc6] ss:$8 sm:$0xf0]   ;;  %1899 = vrot.lane.b32.xlu0 %v1898_v44, %s7030_s3  ;;  %v6078_v24 = vld [vmem:[%s13126_s0 + $0x405] ss:$8 sm:$0xf]  }
 0x10b   :  { %v6049_v48 = vld [vmem:[%s13126_s0 + $0xac6] ss:$8 sm:$0xf]   ;;  %v1931_v50 = vsel %vm4_vm0, %v6053_v46, %v6052_v45  ;;  %v1372_v23 = vpop.permute.xlu0 %1371   ;;  %v6079_v25 = vld [vmem:[%s13126_s0 + $0x405] ss:$8 sm:$0xf0]  }
 0x10c   :  { %v6050_v49 = vld [vmem:[%s13126_s0 + $0xac6] ss:$8 sm:$0xf0]   ;;  %1932 = vrot.lane.b32.xlu1 %v1931_v50, %s7030_s3  ;;  %5901 = vst.msk [vmem:[%s13127_s1 + $0x100] sm:$0xff] %vm1286_vm3, %v1372_v23   ;;  %v2029_v28 = vsel %vm4_vm0, %v6079_v25, %v6078_v24 }
 0x10d   :  { %v1920_v52 = vsel %vm4_vm0, %v6050_v49, %v6049_v48  ;;  %v6058_v53 = vld [vmem:[%s13126_s0 + $0xdc6] ss:$8 sm:$0xf]   ;;  %v6087_v29 = vld [vmem:[%s13126_s0 + $0x705] ss:$8 sm:$0xf]  }
 0x10e   :  { %v6059_v54 = vld [vmem:[%s13126_s0 + $0xdc6] ss:$8 sm:$0xf0]   ;;  %1921 = vrot.lane.b32.xlu0 %v1920_v52, %s7030_s3  ;;  %v1405_v27 = vpop.permute.xlu1 %1404   ;;  %v6088_v30 = vld [vmem:[%s13126_s0 + $0x705] ss:$8 sm:$0xf0]  }
 0x10f   :  { %v6055_v56 = vld [vmem:[%s13126_s0 + $0xcc6] ss:$8 sm:$0xf]   ;;  %v1953_v58 = vsel %vm4_vm0, %v6059_v54, %v6058_v53  ;;  %5910 = vst.msk [vmem:[%s13127_s1 + $0x160] sm:$0xff] %vm1286_vm3, %v1405_v27   ;;  %v2062_v34 = vsel %vm4_vm0, %v6088_v30, %v6087_v29 }
 0x110   :  { %v6056_v57 = vld [vmem:[%s13126_s0 + $0xcc6] ss:$8 sm:$0xf0]   ;;  %1954 = vrot.lane.b32.xlu1 %v1953_v58, %s7030_s3  ;;  %v6084_v32 = vld [vmem:[%s13126_s0 + $0x605] ss:$8 sm:$0xf]  }
 0x111   :  { %v1942_v60 = vsel %vm4_vm0, %v6056_v57, %v6055_v56  ;;  %v6064_v61 = vld [vmem:[%s13126_s0 + $0xfc6] ss:$8 sm:$0xf]   ;;  %v1394_v31 = vpop.permute.xlu0 %1393   ;;  %v6085_v33 = vld [vmem:[%s13126_s0 + $0x605] ss:$8 sm:$0xf0]  }
 0x112   :  { %v6065_v62 = vld [vmem:[%s13126_s0 + $0xfc6] ss:$8 sm:$0xf0]   ;;  %1943 = vrot.lane.b32.xlu0 %v1942_v60, %s7030_s3  ;;  %5907 = vst.msk [vmem:[%s13127_s1 + $0x140] sm:$0xff] %vm1286_vm3, %v1394_v31   ;;  %v2051_v36 = vsel %vm4_vm0, %v6085_v33, %v6084_v32 }
 0x113   :  { %v6061_v0 = vld [vmem:[%s13126_s0 + $0xec6] ss:$8 sm:$0xf]   ;;  %v1975_v2 = vsel %vm4_vm0, %v6065_v62, %v6064_v61  ;;  %v1427_v35 = vpop.permute.xlu1 %1426   ;;  %v6093_v37 = vld [vmem:[%s13126_s0 + $0x905] ss:$8 sm:$0xf]  }
 0x114   :  { %v6062_v1 = vld [vmem:[%s13126_s0 + $0xec6] ss:$8 sm:$0xf0]   ;;  %1976 = vrot.lane.b32.xlu1 %v1975_v2, %s7030_s3  ;;  %v6094_v38 = vld [vmem:[%s13126_s0 + $0x905] ss:$8 sm:$0xf0]  }
 0x115   :  { %v1964_v4 = vsel %vm4_vm0, %v6062_v1, %v6061_v0  ;;  %5916 = vst.msk [vmem:[%s13127_s1 + $0x1a0] sm:$0xff] %vm1286_vm3, %v1427_v35   ;;  %v6090_v40 = vld [vmem:[%s13126_s0 + $0x805] ss:$8 sm:$0xf]   ;;  %v2084_v42 = vsel %vm4_vm0, %v6094_v38, %v6093_v37 }
 0x116   :  { %1965 = vrot.lane.b32.xlu0 %v1964_v4, %s7030_s3  ;;  %v1416_v39 = vpop.permute.xlu0 %1415   ;;  %v6091_v41 = vld [vmem:[%s13126_s0 + $0x805] ss:$8 sm:$0xf0]  }
 0x117   :  { %5913 = vst.msk [vmem:[%s13127_s1 + $0x180] sm:$0xff] %vm1286_vm3, %v1416_v39   ;;  %v2073_v44 = vsel %vm4_vm0, %v6091_v41, %v6090_v40  ;;  %v6099_v45 = vld [vmem:[%s13126_s0 + $0xb05] ss:$8 sm:$0xf]  }
 0x118   :  { %1997 = vrot.lane.b32.xlu1 %v1996_v10, %s7031_s25  ;;  %v6100_v46 = vld [vmem:[%s13126_s0 + $0xb05] ss:$8 sm:$0xf0]  }
 0x119   :  { %v1449_v43 = vpop.permute.xlu1 %1448   ;;  %v6096_v48 = vld [vmem:[%s13126_s0 + $0xa05] ss:$8 sm:$0xf]   ;;  %v2106_v50 = vsel %vm4_vm0, %v6100_v46, %v6099_v45 }
 0x11a   :  { %1987 = vrot.lane.b32.xlu0 %v1986_v12, %s7031_s25  ;;  %5922 = vst.msk [vmem:[%s13127_s1 + $0x1e0] sm:$0xff] %vm1286_vm3, %v1449_v43   ;;  %v6097_v49 = vld [vmem:[%s13126_s0 + $0xa05] ss:$8 sm:$0xf0]  }
 0x11b   :  { %v2095_v52 = vsel %vm4_vm0, %v6097_v49, %v6096_v48  ;;  %v6105_v53 = vld [vmem:[%s13126_s0 + $0xd05] ss:$8 sm:$0xf]  }
 0x11c   :  { %2019 = vrot.lane.b32.xlu1 %v2018_v18, %s7031_s25  ;;  %v1438_v47 = vpop.permute.xlu0 %1437   ;;  %v6106_v54 = vld [vmem:[%s13126_s0 + $0xd05] ss:$8 sm:$0xf0]  }
 0x11d   :  { %5919 = vst.msk [vmem:[%s13127_s1 + $0x1c0] sm:$0xff] %vm1286_vm3, %v1438_v47   ;;  %v6102_v56 = vld [vmem:[%s13126_s0 + $0xc05] ss:$8 sm:$0xf]   ;;  %v2128_v58 = vsel %vm4_vm0, %v6106_v54, %v6105_v53 }
 0x11e   :  { %2008 = vrot.lane.b32.xlu0 %v2007_v20, %s7031_s25  ;;  %v1471_v51 = vpop.permute.xlu1 %1470   ;;  %v6103_v57 = vld [vmem:[%s13126_s0 + $0xc05] ss:$8 sm:$0xf0]  }
 0x11f   :  { %5928 = vst.msk [vmem:[%s13127_s1 + $0x28] sm:$0xff] %vm1286_vm3, %v1471_v51   ;;  %v2117_v60 = vsel %vm4_vm0, %v6103_v57, %v6102_v56  ;;  %v6111_v61 = vld [vmem:[%s13126_s0 + $0xf05] ss:$8 sm:$0xf]  }
 0x120   :  { %2041 = vrot.lane.b32.xlu1 %v2040_v26, %s7031_s25  ;;  %v6112_v62 = vld [vmem:[%s13126_s0 + $0xf05] ss:$8 sm:$0xf0]  }
 0x121   :  { %v1460_v55 = vpop.permute.xlu0 %1459   ;;  %v6108_v0 = vld [vmem:[%s13126_s0 + $0xe05] ss:$8 sm:$0xf]   ;;  %v2150_v2 = vsel %vm4_vm0, %v6112_v62, %v6111_v61 }
 0x122   :  { %2030 = vrot.lane.b32.xlu0 %v2029_v28, %s7031_s25  ;;  %5925 = vst.msk [vmem:[%s13127_s1 + $0x8] sm:$0xff] %vm1286_vm3, %v1460_v55   ;;  %v6109_v1 = vld [vmem:[%s13126_s0 + $0xe05] ss:$8 sm:$0xf0]  }
 0x123   :  { %v2139_v4 = vsel %vm4_vm0, %v6109_v1, %v6108_v0  ;;  %v6117_v5 = vld [vmem:[%s13126_s0 + $0x145] ss:$8 sm:$0xf]  }
 0x124   :  { %2063 = vrot.lane.b32.xlu1 %v2062_v34, %s7031_s25  ;;  %v1493_v59 = vpop.permute.xlu1 %1492   ;;  %v6118_v6 = vld [vmem:[%s13126_s0 + $0x145] ss:$8 sm:$0xf0]  }
 0x125   :  { %5934 = vst.msk [vmem:[%s13127_s1 + $0x68] sm:$0xff] %vm1286_vm3, %v1493_v59   ;;  %v6114_v8 = vld [vmem:[%s13126_s0 + $0x45] ss:$8 sm:$0xf]   ;;  %v2172_v10 = vsel %vm4_vm0, %v6118_v6, %v6117_v5 }
 0x126   :  { %2052 = vrot.lane.b32.xlu0 %v2051_v36, %s7031_s25  ;;  %v6115_v9 = vld [vmem:[%s13126_s0 + $0x45] ss:$8 sm:$0xf0]  }
 0x127   :  { %v1482_v63 = vpop.permute.xlu0 %1481   ;;  %v2161_v12 = vsel %vm4_vm0, %v6115_v9, %v6114_v8  ;;  %v6123_v13 = vld [vmem:[%s13126_s0 + $0x345] ss:$8 sm:$0xf]  }
 0x128   :  { %2085 = vrot.lane.b32.xlu1 %v2084_v42, %s7031_s25  ;;  %5931 = vst.msk [vmem:[%s13127_s1 + $0x48] sm:$0xff] %vm1286_vm3, %v1482_v63   ;;  %v6124_v14 = vld [vmem:[%s13126_s0 + $0x345] ss:$8 sm:$0xf0]  }
 0x129   :  { %v1515_v3 = vpop.permute.xlu1 %1514   ;;  %v6120_v16 = vld [vmem:[%s13126_s0 + $0x245] ss:$8 sm:$0xf]   ;;  %v2194_v18 = vsel %vm4_vm0, %v6124_v14, %v6123_v13 }
 0x12a   :  { %2074 = vrot.lane.b32.xlu0 %v2073_v44, %s7031_s25  ;;  %5940 = vst.msk [vmem:[%s13127_s1 + $0xa8] sm:$0xff] %vm1286_vm3, %v1515_v3   ;;  %v6121_v17 = vld [vmem:[%s13126_s0 + $0x245] ss:$8 sm:$0xf0]  }
 0x12b   :  { %v2183_v20 = vsel %vm4_vm0, %v6121_v17, %v6120_v16  ;;  %v6129_v21 = vld [vmem:[%s13126_s0 + $0x545] ss:$8 sm:$0xf]  }
 0x12c   :  { %2107 = vrot.lane.b32.xlu1 %v2106_v50, %s7031_s25  ;;  %v1504_v7 = vpop.permute.xlu0 %1503   ;;  %v6130_v22 = vld [vmem:[%s13126_s0 + $0x545] ss:$8 sm:$0xf0]  }
 0x12d   :  { %5937 = vst.msk [vmem:[%s13127_s1 + $0x88] sm:$0xff] %vm1286_vm3, %v1504_v7   ;;  %v6126_v24 = vld [vmem:[%s13126_s0 + $0x445] ss:$8 sm:$0xf]   ;;  %v2216_v26 = vsel %vm4_vm0, %v6130_v22, %v6129_v21 }
 0x12e   :  { %2096 = vrot.lane.b32.xlu0 %v2095_v52, %s7031_s25  ;;  %v6127_v25 = vld [vmem:[%s13126_s0 + $0x445] ss:$8 sm:$0xf0]  }
 0x12f   :  { %v1537_v11 = vpop.permute.xlu1 %1536   ;;  %v2205_v28 = vsel %vm4_vm0, %v6127_v25, %v6126_v24  ;;  %v6135_v29 = vld [vmem:[%s13126_s0 + $0x745] ss:$8 sm:$0xf]  }
 0x130   :  { %2129 = vrot.lane.b32.xlu1 %v2128_v58, %s7031_s25  ;;  %5946 = vst.msk [vmem:[%s13127_s1 + $0xe8] sm:$0xff] %vm1286_vm3, %v1537_v11   ;;  %v6136_v30 = vld [vmem:[%s13126_s0 + $0x745] ss:$8 sm:$0xf0]  }
 0x131   :  { %v6132_v32 = vld [vmem:[%s13126_s0 + $0x645] ss:$8 sm:$0xf]   ;;  %v2238_v34 = vsel %vm4_vm0, %v6136_v30, %v6135_v29 }
 0x132   :  { %2118 = vrot.lane.b32.xlu0 %v2117_v60, %s7031_s25  ;;  %v1526_v15 = vpop.permute.xlu0 %1525   ;;  %v6133_v33 = vld [vmem:[%s13126_s0 + $0x645] ss:$8 sm:$0xf0]  }
 0x133   :  { %5943 = vst.msk [vmem:[%s13127_s1 + $0xc8] sm:$0xff] %vm1286_vm3, %v1526_v15   ;;  %v2227_v36 = vsel %vm4_vm0, %v6133_v33, %v6132_v32  ;;  %v6141_v37 = vld [vmem:[%s13126_s0 + $0x945] ss:$8 sm:$0xf]  }
 0x134   :  { %2151 = vrot.lane.b32.xlu1 %v2150_v2, %s7031_s25  ;;  %v1559_v19 = vpop.permute.xlu1 %1558   ;;  %v6142_v38 = vld [vmem:[%s13126_s0 + $0x945] ss:$8 sm:$0xf0]  }
 0x135   :  { %5952 = vst.msk [vmem:[%s13127_s1 + $0x128] sm:$0xff] %vm1286_vm3, %v1559_v19   ;;  %v6138_v40 = vld [vmem:[%s13126_s0 + $0x845] ss:$8 sm:$0xf]   ;;  %v2260_v42 = vsel %vm4_vm0, %v6142_v38, %v6141_v37 }
 0x136   :  { %2140 = vrot.lane.b32.xlu0 %v2139_v4, %s7031_s25  ;;  %v6139_v41 = vld [vmem:[%s13126_s0 + $0x845] ss:$8 sm:$0xf0]  }
 0x137   :  { %v1548_v23 = vpop.permute.xlu0 %1547   ;;  %v2249_v44 = vsel %vm4_vm0, %v6139_v41, %v6138_v40  ;;  %v6147_v45 = vld [vmem:[%s13126_s0 + $0xb45] ss:$8 sm:$0xf]  }
 0x138   :  { %2173 = vrot.lane.b32.xlu1 %v2172_v10, %s7031_s25  ;;  %5949 = vst.msk [vmem:[%s13127_s1 + $0x108] sm:$0xff] %vm1286_vm3, %v1548_v23   ;;  %v6148_v46 = vld [vmem:[%s13126_s0 + $0xb45] ss:$8 sm:$0xf0]  }
 0x139   :  { %v6144_v48 = vld [vmem:[%s13126_s0 + $0xa45] ss:$8 sm:$0xf]   ;;  %v2282_v50 = vsel %vm4_vm0, %v6148_v46, %v6147_v45 }
 0x13a   :  { %2162 = vrot.lane.b32.xlu0 %v2161_v12, %s7031_s25  ;;  %v1581_v27 = vpop.permute.xlu1 %1580   ;;  %v6145_v49 = vld [vmem:[%s13126_s0 + $0xa45] ss:$8 sm:$0xf0]  }
 0x13b   :  { %5958 = vst.msk [vmem:[%s13127_s1 + $0x168] sm:$0xff] %vm1286_vm3, %v1581_v27   ;;  %v2271_v52 = vsel %vm4_vm0, %v6145_v49, %v6144_v48  ;;  %v6153_v53 = vld [vmem:[%s13126_s0 + $0xd45] ss:$8 sm:$0xf]  }
 0x13c   :  { %2195 = vrot.lane.b32.xlu1 %v2194_v18, %s7031_s25  ;;  %v6154_v54 = vld [vmem:[%s13126_s0 + $0xd45] ss:$8 sm:$0xf0]  }
 0x13d   :  { %v1570_v31 = vpop.permute.xlu0 %1569   ;;  %v6150_v56 = vld [vmem:[%s13126_s0 + $0xc45] ss:$8 sm:$0xf]   ;;  %v2304_v58 = vsel %vm4_vm0, %v6154_v54, %v6153_v53 }
 0x13e   :  { %2184 = vrot.lane.b32.xlu0 %v2183_v20, %s7031_s25  ;;  %5955 = vst.msk [vmem:[%s13127_s1 + $0x148] sm:$0xff] %vm1286_vm3, %v1570_v31   ;;  %v6151_v57 = vld [vmem:[%s13126_s0 + $0xc45] ss:$8 sm:$0xf0]  }
 0x13f   :  { %v1603_v35 = vpop.permute.xlu1 %1602   ;;  %v2293_v60 = vsel %vm4_vm0, %v6151_v57, %v6150_v56  ;;  %v6159_v61 = vld [vmem:[%s13126_s0 + $0xf45] ss:$8 sm:$0xf]  }
 0x140   :  { %2217 = vrot.lane.b32.xlu1 %v2216_v26, %s7031_s25  ;;  %5964 = vst.msk [vmem:[%s13127_s1 + $0x1a8] sm:$0xff] %vm1286_vm3, %v1603_v35   ;;  %v6160_v62 = vld [vmem:[%s13126_s0 + $0xf45] ss:$8 sm:$0xf0]  }
 0x141   :  { %v6156_v0 = vld [vmem:[%s13126_s0 + $0xe45] ss:$8 sm:$0xf]   ;;  %v2326_v2 = vsel %vm4_vm0, %v6160_v62, %v6159_v61 }
 0x142   :  { %2206 = vrot.lane.b32.xlu0 %v2205_v28, %s7031_s25  ;;  %v1592_v39 = vpop.permute.xlu0 %1591   ;;  %v6157_v1 = vld [vmem:[%s13126_s0 + $0xe45] ss:$8 sm:$0xf0]  }
 0x143   :  { %5961 = vst.msk [vmem:[%s13127_s1 + $0x188] sm:$0xff] %vm1286_vm3, %v1592_v39   ;;  %v2315_v4 = vsel %vm4_vm0, %v6157_v1, %v6156_v0  ;;  %v6165_v5 = vld [vmem:[%s13126_s0 + $0x185] ss:$8 sm:$0xf]  }
 0x144   :  { %2239 = vrot.lane.b32.xlu1 %v2238_v34, %s7031_s25  ;;  %v6166_v6 = vld [vmem:[%s13126_s0 + $0x185] ss:$8 sm:$0xf0]  }
 0x145   :  { %v1625_v43 = vpop.permute.xlu1 %1624   ;;  %v6162_v8 = vld [vmem:[%s13126_s0 + $0x85] ss:$8 sm:$0xf]   ;;  %v2348_v10 = vsel %vm4_vm0, %v6166_v6, %v6165_v5 }
 0x146   :  { %2228 = vrot.lane.b32.xlu0 %v2227_v36, %s7031_s25  ;;  %5970 = vst.msk [vmem:[%s13127_s1 + $0x1e8] sm:$0xff] %vm1286_vm3, %v1625_v43   ;;  %v6163_v9 = vld [vmem:[%s13126_s0 + $0x85] ss:$8 sm:$0xf0]  }
 0x147   :  { %v2337_v12 = vsel %vm4_vm0, %v6163_v9, %v6162_v8  ;;  %v6171_v13 = vld [vmem:[%s13126_s0 + $0x385] ss:$8 sm:$0xf]  }
 0x148   :  { %v1614_v47 = vpop.permute.xlu0 %1613   ;;  %2261 = vrot.lane.b32.xlu1 %v2260_v42, %s7031_s25  ;;  %v6172_v14 = vld [vmem:[%s13126_s0 + $0x385] ss:$8 sm:$0xf0]  }
 0x149   :  { %5967 = vst.msk [vmem:[%s13127_s1 + $0x1c8] sm:$0xff] %vm1286_vm3, %v1614_v47   ;;  %v6168_v16 = vld [vmem:[%s13126_s0 + $0x285] ss:$8 sm:$0xf]   ;;  %v2370_v18 = vsel %vm4_vm0, %v6172_v14, %v6171_v13 }
 0x14a   :  { %2250 = vrot.lane.b32.xlu0 %v2249_v44, %s7031_s25  ;;  %v1647_v51 = vpop.permute.xlu1 %1646   ;;  %v6169_v17 = vld [vmem:[%s13126_s0 + $0x285] ss:$8 sm:$0xf0]  }
 0x14b   :  { %5976 = vst.msk [vmem:[%s13127_s1 + $0x30] sm:$0xff] %vm1286_vm3, %v1647_v51   ;;  %v2359_v20 = vsel %vm4_vm0, %v6169_v17, %v6168_v16  ;;  %v6177_v21 = vld [vmem:[%s13126_s0 + $0x585] ss:$8 sm:$0xf]  }
 0x14c   :  { %v1636_v55 = vpop.permute.xlu0 %1635   ;;  %2283 = vrot.lane.b32.xlu1 %v2282_v50, %s7031_s25  ;;  %v6178_v22 = vld [vmem:[%s13126_s0 + $0x585] ss:$8 sm:$0xf0]  }
 0x14d   :  { %5973 = vst.msk [vmem:[%s13127_s1 + $0x10] sm:$0xff] %vm1286_vm3, %v1636_v55   ;;  %v6174_v24 = vld [vmem:[%s13126_s0 + $0x485] ss:$8 sm:$0xf]   ;;  %v2392_v26 = vsel %vm4_vm0, %v6178_v22, %v6177_v21 }
 0x14e   :  { %2272 = vrot.lane.b32.xlu0 %v2271_v52, %s7031_s25  ;;  %v1669_v59 = vpop.permute.xlu1 %1668   ;;  %v6175_v25 = vld [vmem:[%s13126_s0 + $0x485] ss:$8 sm:$0xf0]  }
 0x14f   :  { %5982 = vst.msk [vmem:[%s13127_s1 + $0x70] sm:$0xff] %vm1286_vm3, %v1669_v59   ;;  %v2381_v28 = vsel %vm4_vm0, %v6175_v25, %v6174_v24  ;;  %v6183_v29 = vld [vmem:[%s13126_s0 + $0x785] ss:$8 sm:$0xf]  }
 0x150   :  { %v1658_v63 = vpop.permute.xlu0 %1657   ;;  %2305 = vrot.lane.b32.xlu1 %v2304_v58, %s7031_s25  ;;  %v6184_v30 = vld [vmem:[%s13126_s0 + $0x785] ss:$8 sm:$0xf0]  }
 0x151   :  { %5979 = vst.msk [vmem:[%s13127_s1 + $0x50] sm:$0xff] %vm1286_vm3, %v1658_v63   ;;  %v6180_v32 = vld [vmem:[%s13126_s0 + $0x685] ss:$8 sm:$0xf]   ;;  %v2414_v34 = vsel %vm4_vm0, %v6184_v30, %v6183_v29 }
 0x152   :  { %2294 = vrot.lane.b32.xlu0 %v2293_v60, %s7031_s25  ;;  %v1691_v3 = vpop.permute.xlu1 %1690   ;;  %v6181_v33 = vld [vmem:[%s13126_s0 + $0x685] ss:$8 sm:$0xf0]  }
 0x153   :  { %5988 = vst.msk [vmem:[%s13127_s1 + $0xb0] sm:$0xff] %vm1286_vm3, %v1691_v3   ;;  %v2403_v36 = vsel %vm4_vm0, %v6181_v33, %v6180_v32  ;;  %v6189_v37 = vld [vmem:[%s13126_s0 + $0x985] ss:$8 sm:$0xf]  }
 0x154   :  { %v1680_v7 = vpop.permute.xlu0 %1679   ;;  %2327 = vrot.lane.b32.xlu1 %v2326_v2, %s7031_s25  ;;  %v6190_v38 = vld [vmem:[%s13126_s0 + $0x985] ss:$8 sm:$0xf0]  }
 0x155   :  { %5985 = vst.msk [vmem:[%s13127_s1 + $0x90] sm:$0xff] %vm1286_vm3, %v1680_v7   ;;  %v6186_v40 = vld [vmem:[%s13126_s0 + $0x885] ss:$8 sm:$0xf]   ;;  %v2436_v42 = vsel %vm4_vm0, %v6190_v38, %v6189_v37 }
 0x156   :  { %2316 = vrot.lane.b32.xlu0 %v2315_v4, %s7031_s25  ;;  %v1713_v11 = vpop.permute.xlu1 %1712   ;;  %v6187_v41 = vld [vmem:[%s13126_s0 + $0x885] ss:$8 sm:$0xf0]  }
 0x157   :  { %5994 = vst.msk [vmem:[%s13127_s1 + $0xf0] sm:$0xff] %vm1286_vm3, %v1713_v11   ;;  %v2425_v44 = vsel %vm4_vm0, %v6187_v41, %v6186_v40  ;;  %v6195_v45 = vld [vmem:[%s13126_s0 + $0xb85] ss:$8 sm:$0xf]  }
 0x158   :  { %v1702_v15 = vpop.permute.xlu0 %1701   ;;  %2349 = vrot.lane.b32.xlu1 %v2348_v10, %s7031_s25  ;;  %v6196_v46 = vld [vmem:[%s13126_s0 + $0xb85] ss:$8 sm:$0xf0]  }
 0x159   :  { %5991 = vst.msk [vmem:[%s13127_s1 + $0xd0] sm:$0xff] %vm1286_vm3, %v1702_v15   ;;  %v6192_v48 = vld [vmem:[%s13126_s0 + $0xa85] ss:$8 sm:$0xf]   ;;  %v2458_v50 = vsel %vm4_vm0, %v6196_v46, %v6195_v45 }
 0x15a   :  { %2338 = vrot.lane.b32.xlu0 %v2337_v12, %s7031_s25  ;;  %v1735_v19 = vpop.permute.xlu1 %1734   ;;  %v6193_v49 = vld [vmem:[%s13126_s0 + $0xa85] ss:$8 sm:$0xf0]  }
 0x15b   :  { %6000 = vst.msk [vmem:[%s13127_s1 + $0x130] sm:$0xff] %vm1286_vm3, %v1735_v19   ;;  %v2447_v52 = vsel %vm4_vm0, %v6193_v49, %v6192_v48  ;;  %v6201_v53 = vld [vmem:[%s13126_s0 + $0xd85] ss:$8 sm:$0xf]  }
 0x15c   :  { %v1724_v23 = vpop.permute.xlu0 %1723   ;;  %2371 = vrot.lane.b32.xlu1 %v2370_v18, %s7031_s25  ;;  %v6202_v54 = vld [vmem:[%s13126_s0 + $0xd85] ss:$8 sm:$0xf0]  }
 0x15d   :  { %5997 = vst.msk [vmem:[%s13127_s1 + $0x110] sm:$0xff] %vm1286_vm3, %v1724_v23   ;;  %v6198_v56 = vld [vmem:[%s13126_s0 + $0xc85] ss:$8 sm:$0xf]   ;;  %v2480_v58 = vsel %vm4_vm0, %v6202_v54, %v6201_v53 }
 0x15e   :  { %2360 = vrot.lane.b32.xlu0 %v2359_v20, %s7031_s25  ;;  %v1757_v27 = vpop.permute.xlu1 %1756   ;;  %v6199_v57 = vld [vmem:[%s13126_s0 + $0xc85] ss:$8 sm:$0xf0]  }
 0x15f   :  { %6006 = vst.msk [vmem:[%s13127_s1 + $0x170] sm:$0xff] %vm1286_vm3, %v1757_v27   ;;  %v2469_v60 = vsel %vm4_vm0, %v6199_v57, %v6198_v56  ;;  %v6207_v61 = vld [vmem:[%s13126_s0 + $0xf85] ss:$8 sm:$0xf]  }
 0x160   :  { %v1746_v31 = vpop.permute.xlu0 %1745   ;;  %2393 = vrot.lane.b32.xlu1 %v2392_v26, %s7031_s25  ;;  %v6208_v62 = vld [vmem:[%s13126_s0 + $0xf85] ss:$8 sm:$0xf0]  }
 0x161   :  { %6003 = vst.msk [vmem:[%s13127_s1 + $0x150] sm:$0xff] %vm1286_vm3, %v1746_v31   ;;  %v6204_v0 = vld [vmem:[%s13126_s0 + $0xe85] ss:$8 sm:$0xf]   ;;  %v2502_v2 = vsel %vm4_vm0, %v6208_v62, %v6207_v61 }
 0x162   :  { %2382 = vrot.lane.b32.xlu0 %v2381_v28, %s7031_s25  ;;  %v1779_v35 = vpop.permute.xlu1 %1778   ;;  %v6205_v1 = vld [vmem:[%s13126_s0 + $0xe85] ss:$8 sm:$0xf0]  }
 0x163   :  { %6012 = vst.msk [vmem:[%s13127_s1 + $0x1b0] sm:$0xff] %vm1286_vm3, %v1779_v35   ;;  %v2491_v4 = vsel %vm4_vm0, %v6205_v1, %v6204_v0  ;;  %v6213_v5 = vld [vmem:[%s13126_s0 + $0x1c5] ss:$8 sm:$0xf]  }
 0x164   :  { %v1768_v39 = vpop.permute.xlu0 %1767   ;;  %2415 = vrot.lane.b32.xlu1 %v2414_v34, %s7031_s25  ;;  %v6214_v6 = vld [vmem:[%s13126_s0 + $0x1c5] ss:$8 sm:$0xf0]  }
 0x165   :  { %6009 = vst.msk [vmem:[%s13127_s1 + $0x190] sm:$0xff] %vm1286_vm3, %v1768_v39   ;;  %v6210_v8 = vld [vmem:[%s13126_s0 + $0xc5] ss:$8 sm:$0xf]   ;;  %v2524_v10 = vsel %vm4_vm0, %v6214_v6, %v6213_v5 }
 0x166   :  { %2404 = vrot.lane.b32.xlu0 %v2403_v36, %s7031_s25  ;;  %v1801_v43 = vpop.permute.xlu1 %1800   ;;  %v6211_v9 = vld [vmem:[%s13126_s0 + $0xc5] ss:$8 sm:$0xf0]   ;;  %v6260_v5 = vld [vmem:[%s13126_s0 + $0x104] ss:$8 sm:$0xf]  }
 0x167   :  { %6018 = vst.msk [vmem:[%s13127_s1 + $0x1f0] sm:$0xff] %vm1286_vm3, %v1801_v43   ;;  %v2513_v12 = vsel %vm4_vm0, %v6211_v9, %v6210_v8  ;;  %v6219_v13 = vld [vmem:[%s13126_s0 + $0x3c5] ss:$8 sm:$0xf]  }
 0x168   :  { %v1790_v47 = vpop.permute.xlu0 %1789   ;;  %2437 = vrot.lane.b32.xlu1 %v2436_v42, %s7031_s25  ;;  %v6220_v14 = vld [vmem:[%s13126_s0 + $0x3c5] ss:$8 sm:$0xf0]   ;;  %v6261_v6 = vld [vmem:[%s13126_s0 + $0x104] ss:$8 sm:$0xf0]  }
 0x169   :  { %6015 = vst.msk [vmem:[%s13127_s1 + $0x1d0] sm:$0xff] %vm1286_vm3, %v1790_v47   ;;  %v6216_v16 = vld [vmem:[%s13126_s0 + $0x2c5] ss:$8 sm:$0xf]   ;;  %v2546_v18 = vsel %vm4_vm0, %v6220_v14, %v6219_v13 }
 0x16a   :  { %2426 = vrot.lane.b32.xlu0 %v2425_v44, %s7031_s25  ;;  %v1823_v51 = vpop.permute.xlu1 %1822   ;;  %v6217_v17 = vld [vmem:[%s13126_s0 + $0x2c5] ss:$8 sm:$0xf0]   ;;  %v6258_v8 = vld [vmem:[%s13126_s0 + $0x4] ss:$8 sm:$0xf]  }
 0x16b   :  { %6024 = vst.msk [vmem:[%s13127_s1 + $0x38] sm:$0xff] %vm1286_vm3, %v1823_v51   ;;  %v2535_v20 = vsel %vm4_vm0, %v6217_v17, %v6216_v16  ;;  %v6225_v21 = vld [vmem:[%s13126_s0 + $0x5c5] ss:$8 sm:$0xf]  }
 0x16c   :  { %v1812_v55 = vpop.permute.xlu0 %1811   ;;  %2459 = vrot.lane.b32.xlu1 %v2458_v50, %s7031_s25  ;;  %v6226_v22 = vld [vmem:[%s13126_s0 + $0x5c5] ss:$8 sm:$0xf0]   ;;  %v6259_v9 = vld [vmem:[%s13126_s0 + $0x4] ss:$8 sm:$0xf0]  }
 0x16d   :  { %6021 = vst.msk [vmem:[%s13127_s1 + $0x18] sm:$0xff] %vm1286_vm3, %v1812_v55   ;;  %v6222_v24 = vld [vmem:[%s13126_s0 + $0x4c5] ss:$8 sm:$0xf]   ;;  %v2568_v26 = vsel %vm4_vm0, %v6226_v22, %v6225_v21 }
 0x16e   :  { %2448 = vrot.lane.b32.xlu0 %v2447_v52, %s7031_s25  ;;  %v1845_v59 = vpop.permute.xlu1 %1844   ;;  %v6223_v25 = vld [vmem:[%s13126_s0 + $0x4c5] ss:$8 sm:$0xf0]   ;;  %v6266_v13 = vld [vmem:[%s13126_s0 + $0x304] ss:$8 sm:$0xf]  }
 0x16f   :  { %6030 = vst.msk [vmem:[%s13127_s1 + $0x78] sm:$0xff] %vm1286_vm3, %v1845_v59   ;;  %v2557_v28 = vsel %vm4_vm0, %v6223_v25, %v6222_v24  ;;  %v6231_v29 = vld [vmem:[%s13126_s0 + $0x7c5] ss:$8 sm:$0xf]  }
 0x170   :  { %v1834_v63 = vpop.permute.xlu0 %1833   ;;  %2481 = vrot.lane.b32.xlu1 %v2480_v58, %s7031_s25  ;;  %v6232_v30 = vld [vmem:[%s13126_s0 + $0x7c5] ss:$8 sm:$0xf0]   ;;  %v6267_v14 = vld [vmem:[%s13126_s0 + $0x304] ss:$8 sm:$0xf0]  }
 0x171   :  { %6027 = vst.msk [vmem:[%s13127_s1 + $0x58] sm:$0xff] %vm1286_vm3, %v1834_v63   ;;  %v6228_v32 = vld [vmem:[%s13126_s0 + $0x6c5] ss:$8 sm:$0xf]   ;;  %v2590_v34 = vsel %vm4_vm0, %v6232_v30, %v6231_v29 }
 0x172   :  { %2470 = vrot.lane.b32.xlu0 %v2469_v60, %s7031_s25  ;;  %v1867_v3 = vpop.permute.xlu1 %1866   ;;  %v6229_v33 = vld [vmem:[%s13126_s0 + $0x6c5] ss:$8 sm:$0xf0]   ;;  %v6263_v16 = vld [vmem:[%s13126_s0 + $0x204] ss:$8 sm:$0xf]  }
 0x173   :  { %6036 = vst.msk [vmem:[%s13127_s1 + $0xb8] sm:$0xff] %vm1286_vm3, %v1867_v3   ;;  %v2579_v36 = vsel %vm4_vm0, %v6229_v33, %v6228_v32  ;;  %v6237_v37 = vld [vmem:[%s13126_s0 + $0x9c5] ss:$8 sm:$0xf]  }
 0x174   :  { %v1856_v7 = vpop.permute.xlu0 %1855   ;;  %2503 = vrot.lane.b32.xlu1 %v2502_v2, %s7031_s25  ;;  %v6238_v38 = vld [vmem:[%s13126_s0 + $0x9c5] ss:$8 sm:$0xf0]   ;;  %v6264_v17 = vld [vmem:[%s13126_s0 + $0x204] ss:$8 sm:$0xf0]  }
 0x175   :  { %6033 = vst.msk [vmem:[%s13127_s1 + $0x98] sm:$0xff] %vm1286_vm3, %v1856_v7   ;;  %v6234_v40 = vld [vmem:[%s13126_s0 + $0x8c5] ss:$8 sm:$0xf]   ;;  %v2612_v42 = vsel %vm4_vm0, %v6238_v38, %v6237_v37 }
 0x176   :  { %2492 = vrot.lane.b32.xlu0 %v2491_v4, %s7031_s25  ;;  %v1889_v11 = vpop.permute.xlu1 %1888   ;;  %v6235_v41 = vld [vmem:[%s13126_s0 + $0x8c5] ss:$8 sm:$0xf0]   ;;  %v6272_v21 = vld [vmem:[%s13126_s0 + $0x504] ss:$8 sm:$0xf]  }
 0x177   :  { %6042 = vst.msk [vmem:[%s13127_s1 + $0xf8] sm:$0xff] %vm1286_vm3, %v1889_v11   ;;  %v2601_v44 = vsel %vm4_vm0, %v6235_v41, %v6234_v40  ;;  %v6243_v45 = vld [vmem:[%s13126_s0 + $0xbc5] ss:$8 sm:$0xf]  }
 0x178   :  { %v1878_v15 = vpop.permute.xlu0 %1877   ;;  %2525 = vrot.lane.b32.xlu1 %v2524_v10, %s7031_s25  ;;  %v6244_v46 = vld [vmem:[%s13126_s0 + $0xbc5] ss:$8 sm:$0xf0]   ;;  %v2699_v10 = vsel %vm4_vm0, %v6261_v6, %v6260_v5  ;;  %v6273_v22 = vld [vmem:[%s13126_s0 + $0x504] ss:$8 sm:$0xf0]  }
 0x179   :  { %6039 = vst.msk [vmem:[%s13127_s1 + $0xd8] sm:$0xff] %vm1286_vm3, %v1878_v15   ;;  %v6240_v48 = vld [vmem:[%s13126_s0 + $0xac5] ss:$8 sm:$0xf]   ;;  %v2634_v50 = vsel %vm4_vm0, %v6244_v46, %v6243_v45 }
 0x17a   :  { %2514 = vrot.lane.b32.xlu0 %v2513_v12, %s7031_s25  ;;  %v1911_v19 = vpop.permute.xlu1 %1910   ;;  %v6241_v49 = vld [vmem:[%s13126_s0 + $0xac5] ss:$8 sm:$0xf0]   ;;  %v2689_v12 = vsel %vm4_vm0, %v6259_v9, %v6258_v8  ;;  %v6269_v24 = vld [vmem:[%s13126_s0 + $0x404] ss:$8 sm:$0xf]  }
 0x17b   :  { %6048 = vst.msk [vmem:[%s13127_s1 + $0x138] sm:$0xff] %vm1286_vm3, %v1911_v19   ;;  %v2623_v52 = vsel %vm4_vm0, %v6241_v49, %v6240_v48  ;;  %v6249_v53 = vld [vmem:[%s13126_s0 + $0xdc5] ss:$8 sm:$0xf]  }
 0x17c   :  { %v1900_v23 = vpop.permute.xlu0 %1899   ;;  %2547 = vrot.lane.b32.xlu1 %v2546_v18, %s7031_s25  ;;  %v6250_v54 = vld [vmem:[%s13126_s0 + $0xdc5] ss:$8 sm:$0xf0]   ;;  %v2721_v18 = vsel %vm4_vm0, %v6267_v14, %v6266_v13  ;;  %v6270_v25 = vld [vmem:[%s13126_s0 + $0x404] ss:$8 sm:$0xf0]  }
 0x17d   :  { %6045 = vst.msk [vmem:[%s13127_s1 + $0x118] sm:$0xff] %vm1286_vm3, %v1900_v23   ;;  %v6246_v56 = vld [vmem:[%s13126_s0 + $0xcc5] ss:$8 sm:$0xf]   ;;  %v2656_v58 = vsel %vm4_vm0, %v6250_v54, %v6249_v53 }
 0x17e   :  { %2536 = vrot.lane.b32.xlu0 %v2535_v20, %s7031_s25  ;;  %v1933_v27 = vpop.permute.xlu1 %1932   ;;  %v6247_v57 = vld [vmem:[%s13126_s0 + $0xcc5] ss:$8 sm:$0xf0]   ;;  %v2710_v20 = vsel %vm4_vm0, %v6264_v17, %v6263_v16  ;;  %v6278_v29 = vld [vmem:[%s13126_s0 + $0x704] ss:$8 sm:$0xf]  }
 0x17f   :  { %6054 = vst.msk [vmem:[%s13127_s1 + $0x178] sm:$0xff] %vm1286_vm3, %v1933_v27   ;;  %v2645_v60 = vsel %vm4_vm0, %v6247_v57, %v6246_v56  ;;  %v6255_v61 = vld [vmem:[%s13126_s0 + $0xfc5] ss:$8 sm:$0xf]  }
 0x180   :  { %v1922_v31 = vpop.permute.xlu0 %1921   ;;  %2569 = vrot.lane.b32.xlu1 %v2568_v26, %s7031_s25  ;;  %v6256_v62 = vld [vmem:[%s13126_s0 + $0xfc5] ss:$8 sm:$0xf0]   ;;  %v2743_v26 = vsel %vm4_vm0, %v6273_v22, %v6272_v21  ;;  %v6279_v30 = vld [vmem:[%s13126_s0 + $0x704] ss:$8 sm:$0xf0]  }
 0x181   :  { %6051 = vst.msk [vmem:[%s13127_s1 + $0x158] sm:$0xff] %vm1286_vm3, %v1922_v31   ;;  %v6252_v0 = vld [vmem:[%s13126_s0 + $0xec5] ss:$8 sm:$0xf]   ;;  %v2678_v2 = vsel %vm4_vm0, %v6256_v62, %v6255_v61 }
 0x182   :  { %2558 = vrot.lane.b32.xlu0 %v2557_v28, %s7031_s25  ;;  %v1955_v35 = vpop.permute.xlu1 %1954   ;;  %v6253_v1 = vld [vmem:[%s13126_s0 + $0xec5] ss:$8 sm:$0xf0]   ;;  %v2732_v28 = vsel %vm4_vm0, %v6270_v25, %v6269_v24  ;;  %v6275_v32 = vld [vmem:[%s13126_s0 + $0x604] ss:$8 sm:$0xf]  }
 0x183   :  { %6060 = vst.msk [vmem:[%s13127_s1 + $0x1b8] sm:$0xff] %vm1286_vm3, %v1955_v35   ;;  %v2667_v4 = vsel %vm4_vm0, %v6253_v1, %v6252_v0  ;;  %v6276_v33 = vld [vmem:[%s13126_s0 + $0x604] ss:$8 sm:$0xf0]  }
 0x184   :  { %v1944_v39 = vpop.permute.xlu0 %1943   ;;  %2591 = vrot.lane.b32.xlu1 %v2590_v34, %s7031_s25  ;;  %v2765_v34 = vsel %vm4_vm0, %v6279_v30, %v6278_v29  ;;  %v6284_v37 = vld [vmem:[%s13126_s0 + $0x904] ss:$8 sm:$0xf]  }
 0x185   :  { %6057 = vst.msk [vmem:[%s13127_s1 + $0x198] sm:$0xff] %vm1286_vm3, %v1944_v39   ;;  %v6285_v38 = vld [vmem:[%s13126_s0 + $0x904] ss:$8 sm:$0xf0]  }
 0x186   :  { %2580 = vrot.lane.b32.xlu0 %v2579_v36, %s7031_s25  ;;  %v1977_v43 = vpop.permute.xlu1 %1976   ;;  %v2754_v36 = vsel %vm4_vm0, %v6276_v33, %v6275_v32  ;;  %v6281_v40 = vld [vmem:[%s13126_s0 + $0x804] ss:$8 sm:$0xf]  }
 0x187   :  { %6066 = vst.msk [vmem:[%s13127_s1 + $0x1f8] sm:$0xff] %vm1286_vm3, %v1977_v43   ;;  %v6282_v41 = vld [vmem:[%s13126_s0 + $0x804] ss:$8 sm:$0xf0]  }
 0x188   :  { %v1966_v47 = vpop.permute.xlu0 %1965   ;;  %2613 = vrot.lane.b32.xlu1 %v2612_v42, %s7031_s25  ;;  %v2787_v42 = vsel %vm4_vm0, %v6285_v38, %v6284_v37  ;;  %v6290_v45 = vld [vmem:[%s13126_s0 + $0xb04] ss:$8 sm:$0xf]  }
 0x189   :  { %6063 = vst.msk [vmem:[%s13127_s1 + $0x1d8] sm:$0xff] %vm1286_vm3, %v1966_v47   ;;  %v6291_v46 = vld [vmem:[%s13126_s0 + $0xb04] ss:$8 sm:$0xf0]  }
 0x18a   :  { %2602 = vrot.lane.b32.xlu0 %v2601_v44, %s7031_s25  ;;  %v1998_v51 = vpop.permute.xlu1 %1997   ;;  %v2776_v44 = vsel %vm4_vm0, %v6282_v41, %v6281_v40  ;;  %v6287_v48 = vld [vmem:[%s13126_s0 + $0xa04] ss:$8 sm:$0xf]  }
 0x18b   :  { %6071 = vst.msk [vmem:[%s13127_s1 + $0x20] sm:$0xff] %vm1989_vm4, %v1998_v51   ;;  %v6288_v49 = vld [vmem:[%s13126_s0 + $0xa04] ss:$8 sm:$0xf0]  }
 0x18c   :  { %v1988_v55 = vpop.permute.xlu0 %1987   ;;  %2635 = vrot.lane.b32.xlu1 %v2634_v50, %s7031_s25  ;;  %v2809_v50 = vsel %vm4_vm0, %v6291_v46, %v6290_v45  ;;  %v6296_v53 = vld [vmem:[%s13126_s0 + $0xd04] ss:$8 sm:$0xf]  }
 0x18d   :  { %1990 = vst.msk [vmem:[%s13127_s1] sm:$0xff] %vm1989_vm4, %v1988_v55   ;;  %v6297_v54 = vld [vmem:[%s13126_s0 + $0xd04] ss:$8 sm:$0xf0]  }
 0x18e   :  { %2624 = vrot.lane.b32.xlu0 %v2623_v52, %s7031_s25  ;;  %v2020_v59 = vpop.permute.xlu1 %2019   ;;  %v2798_v52 = vsel %vm4_vm0, %v6288_v49, %v6287_v48  ;;  %v6293_v56 = vld [vmem:[%s13126_s0 + $0xc04] ss:$8 sm:$0xf]  }
 0x18f   :  { %6077 = vst.msk [vmem:[%s13127_s1 + $0x60] sm:$0xff] %vm1989_vm4, %v2020_v59   ;;  %v6294_v57 = vld [vmem:[%s13126_s0 + $0xc04] ss:$8 sm:$0xf0]  }
 0x190   :  { %v2009_v63 = vpop.permute.xlu0 %2008   ;;  %2657 = vrot.lane.b32.xlu1 %v2656_v58, %s7031_s25  ;;  %v2831_v58 = vsel %vm4_vm0, %v6297_v54, %v6296_v53  ;;  %v6302_v61 = vld [vmem:[%s13126_s0 + $0xf04] ss:$8 sm:$0xf]  }
 0x191   :  { %6074 = vst.msk [vmem:[%s13127_s1 + $0x40] sm:$0xff] %vm1989_vm4, %v2009_v63   ;;  %v6303_v62 = vld [vmem:[%s13126_s0 + $0xf04] ss:$8 sm:$0xf0]  }
 0x192   :  { %2646 = vrot.lane.b32.xlu0 %v2645_v60, %s7031_s25  ;;  %v2042_v3 = vpop.permute.xlu1 %2041   ;;  %v2820_v60 = vsel %vm4_vm0, %v6294_v57, %v6293_v56  ;;  %v6299_v0 = vld [vmem:[%s13126_s0 + $0xe04] ss:$8 sm:$0xf]  }
 0x193   :  { %6083 = vst.msk [vmem:[%s13127_s1 + $0xa0] sm:$0xff] %vm1989_vm4, %v2042_v3   ;;  %v6300_v1 = vld [vmem:[%s13126_s0 + $0xe04] ss:$8 sm:$0xf0]  }
 0x194   :  { %v2031_v7 = vpop.permute.xlu0 %2030   ;;  %2679 = vrot.lane.b32.xlu1 %v2678_v2, %s7031_s25  ;;  %v2853_v2 = vsel %vm4_vm0, %v6303_v62, %v6302_v61  ;;  %v6308_v5 = vld [vmem:[%s13126_s0 + $0x144] ss:$8 sm:$0xf]  }
 0x195   :  { %6080 = vst.msk [vmem:[%s13127_s1 + $0x80] sm:$0xff] %vm1989_vm4, %v2031_v7   ;;  %v6309_v6 = vld [vmem:[%s13126_s0 + $0x144] ss:$8 sm:$0xf0]  }
 0x196   :  { %2668 = vrot.lane.b32.xlu0 %v2667_v4, %s7031_s25  ;;  %v2064_v11 = vpop.permute.xlu1 %2063   ;;  %v2842_v4 = vsel %vm4_vm0, %v6300_v1, %v6299_v0  ;;  %v6305_v8 = vld [vmem:[%s13126_s0 + $0x44] ss:$8 sm:$0xf]  }
 0x197   :  { %6089 = vst.msk [vmem:[%s13127_s1 + $0xe0] sm:$0xff] %vm1989_vm4, %v2064_v11   ;;  %v6306_v9 = vld [vmem:[%s13126_s0 + $0x44] ss:$8 sm:$0xf0]  }
 0x198   :  { %v2053_v15 = vpop.permute.xlu0 %2052   ;;  %2700 = vrot.lane.b32.xlu1 %v2699_v10, %s7032_s16  ;;  %v2875_v10 = vsel %vm4_vm0, %v6309_v6, %v6308_v5  ;;  %v6314_v13 = vld [vmem:[%s13126_s0 + $0x344] ss:$8 sm:$0xf]  }
 0x199   :  { %6086 = vst.msk [vmem:[%s13127_s1 + $0xc0] sm:$0xff] %vm1989_vm4, %v2053_v15   ;;  %v6315_v14 = vld [vmem:[%s13126_s0 + $0x344] ss:$8 sm:$0xf0]  }
 0x19a   :  { %2690 = vrot.lane.b32.xlu0 %v2689_v12, %s7032_s16  ;;  %v2086_v19 = vpop.permute.xlu1 %2085   ;;  %v2864_v12 = vsel %vm4_vm0, %v6306_v9, %v6305_v8  ;;  %v6311_v16 = vld [vmem:[%s13126_s0 + $0x244] ss:$8 sm:$0xf]  }
 0x19b   :  { %6095 = vst.msk [vmem:[%s13127_s1 + $0x120] sm:$0xff] %vm1989_vm4, %v2086_v19   ;;  %v6312_v17 = vld [vmem:[%s13126_s0 + $0x244] ss:$8 sm:$0xf0]  }
 0x19c   :  { %v2075_v23 = vpop.permute.xlu0 %2074   ;;  %2722 = vrot.lane.b32.xlu1 %v2721_v18, %s7032_s16  ;;  %v2897_v18 = vsel %vm4_vm0, %v6315_v14, %v6314_v13  ;;  %v6320_v21 = vld [vmem:[%s13126_s0 + $0x544] ss:$8 sm:$0xf]  }
 0x19d   :  { %6092 = vst.msk [vmem:[%s13127_s1 + $0x100] sm:$0xff] %vm1989_vm4, %v2075_v23   ;;  %v6321_v22 = vld [vmem:[%s13126_s0 + $0x544] ss:$8 sm:$0xf0]  }
 0x19e   :  { %2711 = vrot.lane.b32.xlu0 %v2710_v20, %s7032_s16  ;;  %v2108_v27 = vpop.permute.xlu1 %2107   ;;  %v2886_v20 = vsel %vm4_vm0, %v6312_v17, %v6311_v16  ;;  %v6317_v24 = vld [vmem:[%s13126_s0 + $0x444] ss:$8 sm:$0xf]  }
 0x19f   :  { %6101 = vst.msk [vmem:[%s13127_s1 + $0x160] sm:$0xff] %vm1989_vm4, %v2108_v27   ;;  %v6318_v25 = vld [vmem:[%s13126_s0 + $0x444] ss:$8 sm:$0xf0]  }
 0x1a0   :  { %v2097_v31 = vpop.permute.xlu0 %2096   ;;  %2744 = vrot.lane.b32.xlu1 %v2743_v26, %s7032_s16  ;;  %v2919_v26 = vsel %vm4_vm0, %v6321_v22, %v6320_v21  ;;  %v6326_v29 = vld [vmem:[%s13126_s0 + $0x744] ss:$8 sm:$0xf]  }
 0x1a1   :  { %6098 = vst.msk [vmem:[%s13127_s1 + $0x140] sm:$0xff] %vm1989_vm4, %v2097_v31   ;;  %v6327_v30 = vld [vmem:[%s13126_s0 + $0x744] ss:$8 sm:$0xf0]  }
 0x1a2   :  { %2733 = vrot.lane.b32.xlu0 %v2732_v28, %s7032_s16  ;;  %v2130_v35 = vpop.permute.xlu1 %2129   ;;  %v2908_v28 = vsel %vm4_vm0, %v6318_v25, %v6317_v24  ;;  %v6323_v32 = vld [vmem:[%s13126_s0 + $0x644] ss:$8 sm:$0xf]  }
 0x1a3   :  { %6107 = vst.msk [vmem:[%s13127_s1 + $0x1a0] sm:$0xff] %vm1989_vm4, %v2130_v35   ;;  %v6324_v33 = vld [vmem:[%s13126_s0 + $0x644] ss:$8 sm:$0xf0]  }
 0x1a4   :  { %v2119_v39 = vpop.permute.xlu0 %2118   ;;  %2766 = vrot.lane.b32.xlu1 %v2765_v34, %s7032_s16  ;;  %v2941_v34 = vsel %vm4_vm0, %v6327_v30, %v6326_v29  ;;  %v6332_v37 = vld [vmem:[%s13126_s0 + $0x944] ss:$8 sm:$0xf]  }
 0x1a5   :  { %6104 = vst.msk [vmem:[%s13127_s1 + $0x180] sm:$0xff] %vm1989_vm4, %v2119_v39   ;;  %v6333_v38 = vld [vmem:[%s13126_s0 + $0x944] ss:$8 sm:$0xf0]  }
 0x1a6   :  { %2755 = vrot.lane.b32.xlu0 %v2754_v36, %s7032_s16  ;;  %v2152_v43 = vpop.permute.xlu1 %2151   ;;  %v2930_v36 = vsel %vm4_vm0, %v6324_v33, %v6323_v32  ;;  %v6329_v40 = vld [vmem:[%s13126_s0 + $0x844] ss:$8 sm:$0xf]  }
 0x1a7   :  { %6113 = vst.msk [vmem:[%s13127_s1 + $0x1e0] sm:$0xff] %vm1989_vm4, %v2152_v43   ;;  %v6330_v41 = vld [vmem:[%s13126_s0 + $0x844] ss:$8 sm:$0xf0]  }
 0x1a8   :  { %v2141_v47 = vpop.permute.xlu0 %2140   ;;  %2788 = vrot.lane.b32.xlu1 %v2787_v42, %s7032_s16  ;;  %v2963_v42 = vsel %vm4_vm0, %v6333_v38, %v6332_v37  ;;  %v6338_v45 = vld [vmem:[%s13126_s0 + $0xb44] ss:$8 sm:$0xf]  }
 0x1a9   :  { %6110 = vst.msk [vmem:[%s13127_s1 + $0x1c0] sm:$0xff] %vm1989_vm4, %v2141_v47   ;;  %v6339_v46 = vld [vmem:[%s13126_s0 + $0xb44] ss:$8 sm:$0xf0]  }
 0x1aa   :  { %2777 = vrot.lane.b32.xlu0 %v2776_v44, %s7032_s16  ;;  %v2174_v51 = vpop.permute.xlu1 %2173   ;;  %v2952_v44 = vsel %vm4_vm0, %v6330_v41, %v6329_v40  ;;  %v6335_v48 = vld [vmem:[%s13126_s0 + $0xa44] ss:$8 sm:$0xf]  }
 0x1ab   :  { %6119 = vst.msk [vmem:[%s13127_s1 + $0x28] sm:$0xff] %vm1989_vm4, %v2174_v51   ;;  %v6336_v49 = vld [vmem:[%s13126_s0 + $0xa44] ss:$8 sm:$0xf0]  }
 0x1ac   :  { %v2163_v55 = vpop.permute.xlu0 %2162   ;;  %2810 = vrot.lane.b32.xlu1 %v2809_v50, %s7032_s16  ;;  %v2985_v50 = vsel %vm4_vm0, %v6339_v46, %v6338_v45  ;;  %v6344_v53 = vld [vmem:[%s13126_s0 + $0xd44] ss:$8 sm:$0xf]  }
 0x1ad   :  { %6116 = vst.msk [vmem:[%s13127_s1 + $0x8] sm:$0xff] %vm1989_vm4, %v2163_v55   ;;  %v6345_v54 = vld [vmem:[%s13126_s0 + $0xd44] ss:$8 sm:$0xf0]  }
 0x1ae   :  { %2799 = vrot.lane.b32.xlu0 %v2798_v52, %s7032_s16  ;;  %v2196_v59 = vpop.permute.xlu1 %2195   ;;  %v2974_v52 = vsel %vm4_vm0, %v6336_v49, %v6335_v48  ;;  %v6341_v56 = vld [vmem:[%s13126_s0 + $0xc44] ss:$8 sm:$0xf]  }
 0x1af   :  { %6125 = vst.msk [vmem:[%s13127_s1 + $0x68] sm:$0xff] %vm1989_vm4, %v2196_v59   ;;  %v6342_v57 = vld [vmem:[%s13126_s0 + $0xc44] ss:$8 sm:$0xf0]  }
 0x1b0   :  { %v2185_v63 = vpop.permute.xlu0 %2184   ;;  %2832 = vrot.lane.b32.xlu1 %v2831_v58, %s7032_s16  ;;  %v3007_v58 = vsel %vm4_vm0, %v6345_v54, %v6344_v53  ;;  %v6350_v61 = vld [vmem:[%s13126_s0 + $0xf44] ss:$8 sm:$0xf]  }
 0x1b1   :  { %6122 = vst.msk [vmem:[%s13127_s1 + $0x48] sm:$0xff] %vm1989_vm4, %v2185_v63   ;;  %v6351_v62 = vld [vmem:[%s13126_s0 + $0xf44] ss:$8 sm:$0xf0]  }
 0x1b2   :  { %2821 = vrot.lane.b32.xlu0 %v2820_v60, %s7032_s16  ;;  %v2218_v3 = vpop.permute.xlu1 %2217   ;;  %v2996_v60 = vsel %vm4_vm0, %v6342_v57, %v6341_v56  ;;  %v6347_v0 = vld [vmem:[%s13126_s0 + $0xe44] ss:$8 sm:$0xf]  }
 0x1b3   :  { %6131 = vst.msk [vmem:[%s13127_s1 + $0xa8] sm:$0xff] %vm1989_vm4, %v2218_v3   ;;  %v6348_v1 = vld [vmem:[%s13126_s0 + $0xe44] ss:$8 sm:$0xf0]  }
 0x1b4   :  { %v2207_v7 = vpop.permute.xlu0 %2206   ;;  %2854 = vrot.lane.b32.xlu1 %v2853_v2, %s7032_s16  ;;  %v3029_v2 = vsel %vm4_vm0, %v6351_v62, %v6350_v61  ;;  %v6356_v5 = vld [vmem:[%s13126_s0 + $0x184] ss:$8 sm:$0xf]  }
 0x1b5   :  { %6128 = vst.msk [vmem:[%s13127_s1 + $0x88] sm:$0xff] %vm1989_vm4, %v2207_v7   ;;  %v6357_v6 = vld [vmem:[%s13126_s0 + $0x184] ss:$8 sm:$0xf0]  }
 0x1b6   :  { %2843 = vrot.lane.b32.xlu0 %v2842_v4, %s7032_s16  ;;  %v2240_v11 = vpop.permute.xlu1 %2239   ;;  %v3018_v4 = vsel %vm4_vm0, %v6348_v1, %v6347_v0  ;;  %v6353_v8 = vld [vmem:[%s13126_s0 + $0x84] ss:$8 sm:$0xf]  }
 0x1b7   :  { %6137 = vst.msk [vmem:[%s13127_s1 + $0xe8] sm:$0xff] %vm1989_vm4, %v2240_v11   ;;  %v6354_v9 = vld [vmem:[%s13126_s0 + $0x84] ss:$8 sm:$0xf0]  }
 0x1b8   :  { %v2229_v15 = vpop.permute.xlu0 %2228   ;;  %2876 = vrot.lane.b32.xlu1 %v2875_v10, %s7032_s16  ;;  %v3051_v10 = vsel %vm4_vm0, %v6357_v6, %v6356_v5  ;;  %v6362_v13 = vld [vmem:[%s13126_s0 + $0x384] ss:$8 sm:$0xf]  }
 0x1b9   :  { %6134 = vst.msk [vmem:[%s13127_s1 + $0xc8] sm:$0xff] %vm1989_vm4, %v2229_v15   ;;  %v6363_v14 = vld [vmem:[%s13126_s0 + $0x384] ss:$8 sm:$0xf0]  }
 0x1ba   :  { %2865 = vrot.lane.b32.xlu0 %v2864_v12, %s7032_s16  ;;  %v2262_v19 = vpop.permute.xlu1 %2261   ;;  %v3040_v12 = vsel %vm4_vm0, %v6354_v9, %v6353_v8  ;;  %v6359_v16 = vld [vmem:[%s13126_s0 + $0x284] ss:$8 sm:$0xf]  }
 0x1bb   :  { %6143 = vst.msk [vmem:[%s13127_s1 + $0x128] sm:$0xff] %vm1989_vm4, %v2262_v19   ;;  %v6360_v17 = vld [vmem:[%s13126_s0 + $0x284] ss:$8 sm:$0xf0]  }
 0x1bc   :  { %v2251_v23 = vpop.permute.xlu0 %2250   ;;  %2898 = vrot.lane.b32.xlu1 %v2897_v18, %s7032_s16  ;;  %v3073_v18 = vsel %vm4_vm0, %v6363_v14, %v6362_v13  ;;  %v6368_v21 = vld [vmem:[%s13126_s0 + $0x584] ss:$8 sm:$0xf]  }
 0x1bd   :  { %6140 = vst.msk [vmem:[%s13127_s1 + $0x108] sm:$0xff] %vm1989_vm4, %v2251_v23   ;;  %v6369_v22 = vld [vmem:[%s13126_s0 + $0x584] ss:$8 sm:$0xf0]  }
 0x1be   :  { %2887 = vrot.lane.b32.xlu0 %v2886_v20, %s7032_s16  ;;  %v2284_v27 = vpop.permute.xlu1 %2283   ;;  %v3062_v20 = vsel %vm4_vm0, %v6360_v17, %v6359_v16  ;;  %v6365_v24 = vld [vmem:[%s13126_s0 + $0x484] ss:$8 sm:$0xf]  }
 0x1bf   :  { %6149 = vst.msk [vmem:[%s13127_s1 + $0x168] sm:$0xff] %vm1989_vm4, %v2284_v27   ;;  %v6366_v25 = vld [vmem:[%s13126_s0 + $0x484] ss:$8 sm:$0xf0]  }
 0x1c0   :  { %v2273_v31 = vpop.permute.xlu0 %2272   ;;  %2920 = vrot.lane.b32.xlu1 %v2919_v26, %s7032_s16  ;;  %v3095_v26 = vsel %vm4_vm0, %v6369_v22, %v6368_v21  ;;  %v6374_v29 = vld [vmem:[%s13126_s0 + $0x784] ss:$8 sm:$0xf]  }
 0x1c1   :  { %6146 = vst.msk [vmem:[%s13127_s1 + $0x148] sm:$0xff] %vm1989_vm4, %v2273_v31   ;;  %v6375_v30 = vld [vmem:[%s13126_s0 + $0x784] ss:$8 sm:$0xf0]  }
 0x1c2   :  { %2909 = vrot.lane.b32.xlu0 %v2908_v28, %s7032_s16  ;;  %v2306_v35 = vpop.permute.xlu1 %2305   ;;  %v3084_v28 = vsel %vm4_vm0, %v6366_v25, %v6365_v24  ;;  %v6371_v32 = vld [vmem:[%s13126_s0 + $0x684] ss:$8 sm:$0xf]  }
 0x1c3   :  { %6155 = vst.msk [vmem:[%s13127_s1 + $0x1a8] sm:$0xff] %vm1989_vm4, %v2306_v35   ;;  %v6372_v33 = vld [vmem:[%s13126_s0 + $0x684] ss:$8 sm:$0xf0]  }
 0x1c4   :  { %v2295_v39 = vpop.permute.xlu0 %2294   ;;  %2942 = vrot.lane.b32.xlu1 %v2941_v34, %s7032_s16  ;;  %v3117_v34 = vsel %vm4_vm0, %v6375_v30, %v6374_v29  ;;  %v6380_v37 = vld [vmem:[%s13126_s0 + $0x984] ss:$8 sm:$0xf]  }
 0x1c5   :  { %6152 = vst.msk [vmem:[%s13127_s1 + $0x188] sm:$0xff] %vm1989_vm4, %v2295_v39   ;;  %v6381_v38 = vld [vmem:[%s13126_s0 + $0x984] ss:$8 sm:$0xf0]  }
 0x1c6   :  { %2931 = vrot.lane.b32.xlu0 %v2930_v36, %s7032_s16  ;;  %v2328_v43 = vpop.permute.xlu1 %2327   ;;  %v3106_v36 = vsel %vm4_vm0, %v6372_v33, %v6371_v32  ;;  %v6377_v40 = vld [vmem:[%s13126_s0 + $0x884] ss:$8 sm:$0xf]  }
 0x1c7   :  { %6161 = vst.msk [vmem:[%s13127_s1 + $0x1e8] sm:$0xff] %vm1989_vm4, %v2328_v43   ;;  %v6378_v41 = vld [vmem:[%s13126_s0 + $0x884] ss:$8 sm:$0xf0]  }
 0x1c8   :  { %v2317_v47 = vpop.permute.xlu0 %2316   ;;  %2964 = vrot.lane.b32.xlu1 %v2963_v42, %s7032_s16  ;;  %v3139_v42 = vsel %vm4_vm0, %v6381_v38, %v6380_v37  ;;  %v6386_v45 = vld [vmem:[%s13126_s0 + $0xb84] ss:$8 sm:$0xf]  }
 0x1c9   :  { %6158 = vst.msk [vmem:[%s13127_s1 + $0x1c8] sm:$0xff] %vm1989_vm4, %v2317_v47   ;;  %v6387_v46 = vld [vmem:[%s13126_s0 + $0xb84] ss:$8 sm:$0xf0]  }
 0x1ca   :  { %2953 = vrot.lane.b32.xlu0 %v2952_v44, %s7032_s16  ;;  %v2350_v51 = vpop.permute.xlu1 %2349   ;;  %v3128_v44 = vsel %vm4_vm0, %v6378_v41, %v6377_v40  ;;  %v6383_v48 = vld [vmem:[%s13126_s0 + $0xa84] ss:$8 sm:$0xf]  }
 0x1cb   :  { %6167 = vst.msk [vmem:[%s13127_s1 + $0x30] sm:$0xff] %vm1989_vm4, %v2350_v51   ;;  %v6384_v49 = vld [vmem:[%s13126_s0 + $0xa84] ss:$8 sm:$0xf0]  }
 0x1cc   :  { %v2339_v55 = vpop.permute.xlu0 %2338   ;;  %2986 = vrot.lane.b32.xlu1 %v2985_v50, %s7032_s16  ;;  %v3161_v50 = vsel %vm4_vm0, %v6387_v46, %v6386_v45  ;;  %v6392_v53 = vld [vmem:[%s13126_s0 + $0xd84] ss:$8 sm:$0xf]  }
 0x1cd   :  { %6164 = vst.msk [vmem:[%s13127_s1 + $0x10] sm:$0xff] %vm1989_vm4, %v2339_v55   ;;  %v6393_v54 = vld [vmem:[%s13126_s0 + $0xd84] ss:$8 sm:$0xf0]  }
 0x1ce   :  { %2975 = vrot.lane.b32.xlu0 %v2974_v52, %s7032_s16  ;;  %v2372_v59 = vpop.permute.xlu1 %2371   ;;  %v3150_v52 = vsel %vm4_vm0, %v6384_v49, %v6383_v48  ;;  %v6389_v56 = vld [vmem:[%s13126_s0 + $0xc84] ss:$8 sm:$0xf]  }
 0x1cf   :  { %6173 = vst.msk [vmem:[%s13127_s1 + $0x70] sm:$0xff] %vm1989_vm4, %v2372_v59   ;;  %v6390_v57 = vld [vmem:[%s13126_s0 + $0xc84] ss:$8 sm:$0xf0]  }
 0x1d0   :  { %v2361_v63 = vpop.permute.xlu0 %2360   ;;  %3008 = vrot.lane.b32.xlu1 %v3007_v58, %s7032_s16  ;;  %v3183_v58 = vsel %vm4_vm0, %v6393_v54, %v6392_v53  ;;  %v6398_v61 = vld [vmem:[%s13126_s0 + $0xf84] ss:$8 sm:$0xf]  }
 0x1d1   :  { %6170 = vst.msk [vmem:[%s13127_s1 + $0x50] sm:$0xff] %vm1989_vm4, %v2361_v63   ;;  %v6399_v62 = vld [vmem:[%s13126_s0 + $0xf84] ss:$8 sm:$0xf0]  }
 0x1d2   :  { %2997 = vrot.lane.b32.xlu0 %v2996_v60, %s7032_s16  ;;  %v2394_v3 = vpop.permute.xlu1 %2393   ;;  %v3172_v60 = vsel %vm4_vm0, %v6390_v57, %v6389_v56  ;;  %v6395_v0 = vld [vmem:[%s13126_s0 + $0xe84] ss:$8 sm:$0xf]  }
 0x1d3   :  { %6179 = vst.msk [vmem:[%s13127_s1 + $0xb0] sm:$0xff] %vm1989_vm4, %v2394_v3   ;;  %v6396_v1 = vld [vmem:[%s13126_s0 + $0xe84] ss:$8 sm:$0xf0]  }
 0x1d4   :  { %v2383_v7 = vpop.permute.xlu0 %2382   ;;  %3030 = vrot.lane.b32.xlu1 %v3029_v2, %s7032_s16  ;;  %v3205_v2 = vsel %vm4_vm0, %v6399_v62, %v6398_v61  ;;  %v6404_v5 = vld [vmem:[%s13126_s0 + $0x1c4] ss:$8 sm:$0xf]  }
 0x1d5   :  { %6176 = vst.msk [vmem:[%s13127_s1 + $0x90] sm:$0xff] %vm1989_vm4, %v2383_v7   ;;  %v6405_v6 = vld [vmem:[%s13126_s0 + $0x1c4] ss:$8 sm:$0xf0]  }
 0x1d6   :  { %3019 = vrot.lane.b32.xlu0 %v3018_v4, %s7032_s16  ;;  %v2416_v11 = vpop.permute.xlu1 %2415   ;;  %v3194_v4 = vsel %vm4_vm0, %v6396_v1, %v6395_v0  ;;  %v6401_v8 = vld [vmem:[%s13126_s0 + $0xc4] ss:$8 sm:$0xf]  }
 0x1d7   :  { %6185 = vst.msk [vmem:[%s13127_s1 + $0xf0] sm:$0xff] %vm1989_vm4, %v2416_v11   ;;  %v6402_v9 = vld [vmem:[%s13126_s0 + $0xc4] ss:$8 sm:$0xf0]  }
 0x1d8   :  { %v2405_v15 = vpop.permute.xlu0 %2404   ;;  %3052 = vrot.lane.b32.xlu1 %v3051_v10, %s7032_s16  ;;  %v3227_v10 = vsel %vm4_vm0, %v6405_v6, %v6404_v5  ;;  %v6410_v13 = vld [vmem:[%s13126_s0 + $0x3c4] ss:$8 sm:$0xf]   ;;  %v6451_v5 = vld [vmem:[%s13126_s0 + $0x103] ss:$8 sm:$0xf]  }
 0x1d9   :  { %6182 = vst.msk [vmem:[%s13127_s1 + $0xd0] sm:$0xff] %vm1989_vm4, %v2405_v15   ;;  %v6411_v14 = vld [vmem:[%s13126_s0 + $0x3c4] ss:$8 sm:$0xf0]  }
 0x1da   :  { %3041 = vrot.lane.b32.xlu0 %v3040_v12, %s7032_s16  ;;  %v2438_v19 = vpop.permute.xlu1 %2437   ;;  %v3216_v12 = vsel %vm4_vm0, %v6402_v9, %v6401_v8  ;;  %v6407_v16 = vld [vmem:[%s13126_s0 + $0x2c4] ss:$8 sm:$0xf]   ;;  %v6452_v6 = vld [vmem:[%s13126_s0 + $0x103] ss:$8 sm:$0xf0]  }
 0x1db   :  { %6191 = vst.msk [vmem:[%s13127_s1 + $0x130] sm:$0xff] %vm1989_vm4, %v2438_v19   ;;  %v6408_v17 = vld [vmem:[%s13126_s0 + $0x2c4] ss:$8 sm:$0xf0]  }
 0x1dc   :  { %v2427_v23 = vpop.permute.xlu0 %2426   ;;  %3074 = vrot.lane.b32.xlu1 %v3073_v18, %s7032_s16  ;;  %v3249_v18 = vsel %vm4_vm0, %v6411_v14, %v6410_v13  ;;  %v6416_v21 = vld [vmem:[%s13126_s0 + $0x5c4] ss:$8 sm:$0xf]   ;;  %v6449_v8 = vld [vmem:[%s13126_s0 + $0x3] ss:$8 sm:$0xf]  }
 0x1dd   :  { %6188 = vst.msk [vmem:[%s13127_s1 + $0x110] sm:$0xff] %vm1989_vm4, %v2427_v23   ;;  %v6417_v22 = vld [vmem:[%s13126_s0 + $0x5c4] ss:$8 sm:$0xf0]  }
 0x1de   :  { %3063 = vrot.lane.b32.xlu0 %v3062_v20, %s7032_s16  ;;  %v2460_v27 = vpop.permute.xlu1 %2459   ;;  %v3238_v20 = vsel %vm4_vm0, %v6408_v17, %v6407_v16  ;;  %v6413_v24 = vld [vmem:[%s13126_s0 + $0x4c4] ss:$8 sm:$0xf]   ;;  %v6450_v9 = vld [vmem:[%s13126_s0 + $0x3] ss:$8 sm:$0xf0]  }
 0x1df   :  { %6197 = vst.msk [vmem:[%s13127_s1 + $0x170] sm:$0xff] %vm1989_vm4, %v2460_v27   ;;  %v6414_v25 = vld [vmem:[%s13126_s0 + $0x4c4] ss:$8 sm:$0xf0]  }
 0x1e0   :  { %v2449_v31 = vpop.permute.xlu0 %2448   ;;  %3096 = vrot.lane.b32.xlu1 %v3095_v26, %s7032_s16  ;;  %v3271_v26 = vsel %vm4_vm0, %v6417_v22, %v6416_v21  ;;  %v6422_v29 = vld [vmem:[%s13126_s0 + $0x7c4] ss:$8 sm:$0xf]   ;;  %v6457_v13 = vld [vmem:[%s13126_s0 + $0x303] ss:$8 sm:$0xf]  }
 0x1e1   :  { %6194 = vst.msk [vmem:[%s13127_s1 + $0x150] sm:$0xff] %vm1989_vm4, %v2449_v31   ;;  %v6423_v30 = vld [vmem:[%s13126_s0 + $0x7c4] ss:$8 sm:$0xf0]  }
 0x1e2   :  { %3085 = vrot.lane.b32.xlu0 %v3084_v28, %s7032_s16  ;;  %v2482_v35 = vpop.permute.xlu1 %2481   ;;  %v3260_v28 = vsel %vm4_vm0, %v6414_v25, %v6413_v24  ;;  %v6419_v32 = vld [vmem:[%s13126_s0 + $0x6c4] ss:$8 sm:$0xf]   ;;  %v6458_v14 = vld [vmem:[%s13126_s0 + $0x303] ss:$8 sm:$0xf0]  }
 0x1e3   :  { %6203 = vst.msk [vmem:[%s13127_s1 + $0x1b0] sm:$0xff] %vm1989_vm4, %v2482_v35   ;;  %v6420_v33 = vld [vmem:[%s13126_s0 + $0x6c4] ss:$8 sm:$0xf0]  }
 0x1e4   :  { %v2471_v39 = vpop.permute.xlu0 %2470   ;;  %3118 = vrot.lane.b32.xlu1 %v3117_v34, %s7032_s16  ;;  %v3293_v34 = vsel %vm4_vm0, %v6423_v30, %v6422_v29  ;;  %v6428_v37 = vld [vmem:[%s13126_s0 + $0x9c4] ss:$8 sm:$0xf]   ;;  %v6454_v16 = vld [vmem:[%s13126_s0 + $0x203] ss:$8 sm:$0xf]  }
 0x1e5   :  { %6200 = vst.msk [vmem:[%s13127_s1 + $0x190] sm:$0xff] %vm1989_vm4, %v2471_v39   ;;  %v6429_v38 = vld [vmem:[%s13126_s0 + $0x9c4] ss:$8 sm:$0xf0]  }
 0x1e6   :  { %3107 = vrot.lane.b32.xlu0 %v3106_v36, %s7032_s16  ;;  %v2504_v43 = vpop.permute.xlu1 %2503   ;;  %v3282_v36 = vsel %vm4_vm0, %v6420_v33, %v6419_v32  ;;  %v6425_v40 = vld [vmem:[%s13126_s0 + $0x8c4] ss:$8 sm:$0xf]   ;;  %v6455_v17 = vld [vmem:[%s13126_s0 + $0x203] ss:$8 sm:$0xf0]  }
 0x1e7   :  { %6209 = vst.msk [vmem:[%s13127_s1 + $0x1f0] sm:$0xff] %vm1989_vm4, %v2504_v43   ;;  %v6426_v41 = vld [vmem:[%s13126_s0 + $0x8c4] ss:$8 sm:$0xf0]  }
 0x1e8   :  { %v2493_v47 = vpop.permute.xlu0 %2492   ;;  %3140 = vrot.lane.b32.xlu1 %v3139_v42, %s7032_s16  ;;  %v3315_v42 = vsel %vm4_vm0, %v6429_v38, %v6428_v37  ;;  %v6434_v45 = vld [vmem:[%s13126_s0 + $0xbc4] ss:$8 sm:$0xf]   ;;  %v6463_v21 = vld [vmem:[%s13126_s0 + $0x503] ss:$8 sm:$0xf]  }
 0x1e9   :  { %6206 = vst.msk [vmem:[%s13127_s1 + $0x1d0] sm:$0xff] %vm1989_vm4, %v2493_v47   ;;  %v6435_v46 = vld [vmem:[%s13126_s0 + $0xbc4] ss:$8 sm:$0xf0]  }
 0x1ea   :  { %3129 = vrot.lane.b32.xlu0 %v3128_v44, %s7032_s16  ;;  %v2526_v51 = vpop.permute.xlu1 %2525   ;;  %v3304_v44 = vsel %vm4_vm0, %v6426_v41, %v6425_v40  ;;  %v6431_v48 = vld [vmem:[%s13126_s0 + $0xac4] ss:$8 sm:$0xf]   ;;  %v6464_v22 = vld [vmem:[%s13126_s0 + $0x503] ss:$8 sm:$0xf0]  }
 0x1eb   :  { %6215 = vst.msk [vmem:[%s13127_s1 + $0x38] sm:$0xff] %vm1989_vm4, %v2526_v51   ;;  %v6432_v49 = vld [vmem:[%s13126_s0 + $0xac4] ss:$8 sm:$0xf0]  }
 0x1ec   :  { %v2515_v55 = vpop.permute.xlu0 %2514   ;;  %3162 = vrot.lane.b32.xlu1 %v3161_v50, %s7032_s16  ;;  %v3337_v50 = vsel %vm4_vm0, %v6435_v46, %v6434_v45  ;;  %v6440_v53 = vld [vmem:[%s13126_s0 + $0xdc4] ss:$8 sm:$0xf]   ;;  %v6460_v24 = vld [vmem:[%s13126_s0 + $0x403] ss:$8 sm:$0xf]  }
 0x1ed   :  { %6212 = vst.msk [vmem:[%s13127_s1 + $0x18] sm:$0xff] %vm1989_vm4, %v2515_v55   ;;  %v6441_v54 = vld [vmem:[%s13126_s0 + $0xdc4] ss:$8 sm:$0xf0]  }
 0x1ee   :  { %3151 = vrot.lane.b32.xlu0 %v3150_v52, %s7032_s16  ;;  %v2548_v59 = vpop.permute.xlu1 %2547   ;;  %v3326_v52 = vsel %vm4_vm0, %v6432_v49, %v6431_v48  ;;  %v6437_v56 = vld [vmem:[%s13126_s0 + $0xcc4] ss:$8 sm:$0xf]   ;;  %v6461_v25 = vld [vmem:[%s13126_s0 + $0x403] ss:$8 sm:$0xf0]  }
 0x1ef   :  { %6221 = vst.msk [vmem:[%s13127_s1 + $0x78] sm:$0xff] %vm1989_vm4, %v2548_v59   ;;  %v6438_v57 = vld [vmem:[%s13126_s0 + $0xcc4] ss:$8 sm:$0xf0]  }
 0x1f0   :  { %v2537_v63 = vpop.permute.xlu0 %2536   ;;  %3184 = vrot.lane.b32.xlu1 %v3183_v58, %s7032_s16  ;;  %v3359_v58 = vsel %vm4_vm0, %v6441_v54, %v6440_v53  ;;  %v6446_v61 = vld [vmem:[%s13126_s0 + $0xfc4] ss:$8 sm:$0xf]   ;;  %v6469_v29 = vld [vmem:[%s13126_s0 + $0x703] ss:$8 sm:$0xf]  }
 0x1f1   :  { %6218 = vst.msk [vmem:[%s13127_s1 + $0x58] sm:$0xff] %vm1989_vm4, %v2537_v63   ;;  %v6447_v62 = vld [vmem:[%s13126_s0 + $0xfc4] ss:$8 sm:$0xf0]  }
 0x1f2   :  { %3173 = vrot.lane.b32.xlu0 %v3172_v60, %s7032_s16  ;;  %v2570_v3 = vpop.permute.xlu1 %2569   ;;  %v3348_v60 = vsel %vm4_vm0, %v6438_v57, %v6437_v56  ;;  %v6443_v0 = vld [vmem:[%s13126_s0 + $0xec4] ss:$8 sm:$0xf]   ;;  %v6470_v30 = vld [vmem:[%s13126_s0 + $0x703] ss:$8 sm:$0xf0]  }
 0x1f3   :  { %6227 = vst.msk [vmem:[%s13127_s1 + $0xb8] sm:$0xff] %vm1989_vm4, %v2570_v3   ;;  %v6444_v1 = vld [vmem:[%s13126_s0 + $0xec4] ss:$8 sm:$0xf0]  }
 0x1f4   :  { %v2559_v7 = vpop.permute.xlu0 %2558   ;;  %3206 = vrot.lane.b32.xlu1 %v3205_v2, %s7032_s16  ;;  %v3381_v2 = vsel %vm4_vm0, %v6447_v62, %v6446_v61  ;;  %v6466_v32 = vld [vmem:[%s13126_s0 + $0x603] ss:$8 sm:$0xf]  }
 0x1f5   :  { %6224 = vst.msk [vmem:[%s13127_s1 + $0x98] sm:$0xff] %vm1989_vm4, %v2559_v7   ;;  %v6467_v33 = vld [vmem:[%s13126_s0 + $0x603] ss:$8 sm:$0xf0]  }
 0x1f6   :  { %3195 = vrot.lane.b32.xlu0 %v3194_v4, %s7032_s16  ;;  %v2592_v11 = vpop.permute.xlu1 %2591   ;;  %v3370_v4 = vsel %vm4_vm0, %v6444_v1, %v6443_v0  ;;  %v6475_v37 = vld [vmem:[%s13126_s0 + $0x903] ss:$8 sm:$0xf]  }
 0x1f7   :  { %6233 = vst.msk [vmem:[%s13127_s1 + $0xf8] sm:$0xff] %vm1989_vm4, %v2592_v11   ;;  %v6476_v38 = vld [vmem:[%s13126_s0 + $0x903] ss:$8 sm:$0xf0]  }
 0x1f8   :  { %v2581_v15 = vpop.permute.xlu0 %2580   ;;  %3228 = vrot.lane.b32.xlu1 %v3227_v10, %s7032_s16  ;;  %v3402_v10 = vsel %vm4_vm0, %v6452_v6, %v6451_v5  ;;  %v6472_v40 = vld [vmem:[%s13126_s0 + $0x803] ss:$8 sm:$0xf]  }
 0x1f9   :  { %6230 = vst.msk [vmem:[%s13127_s1 + $0xd8] sm:$0xff] %vm1989_vm4, %v2581_v15   ;;  %v6473_v41 = vld [vmem:[%s13126_s0 + $0x803] ss:$8 sm:$0xf0]  }
 0x1fa   :  { %3217 = vrot.lane.b32.xlu0 %v3216_v12, %s7032_s16  ;;  %v2614_v19 = vpop.permute.xlu1 %2613   ;;  %v3392_v12 = vsel %vm4_vm0, %v6450_v9, %v6449_v8  ;;  %v6481_v45 = vld [vmem:[%s13126_s0 + $0xb03] ss:$8 sm:$0xf]  }
 0x1fb   :  { %6239 = vst.msk [vmem:[%s13127_s1 + $0x138] sm:$0xff] %vm1989_vm4, %v2614_v19   ;;  %v6482_v46 = vld [vmem:[%s13126_s0 + $0xb03] ss:$8 sm:$0xf0]  }
 0x1fc   :  { %v2603_v23 = vpop.permute.xlu0 %2602   ;;  %3250 = vrot.lane.b32.xlu1 %v3249_v18, %s7032_s16  ;;  %v3424_v18 = vsel %vm4_vm0, %v6458_v14, %v6457_v13  ;;  %v6478_v48 = vld [vmem:[%s13126_s0 + $0xa03] ss:$8 sm:$0xf]  }
 0x1fd   :  { %6236 = vst.msk [vmem:[%s13127_s1 + $0x118] sm:$0xff] %vm1989_vm4, %v2603_v23   ;;  %v6479_v49 = vld [vmem:[%s13126_s0 + $0xa03] ss:$8 sm:$0xf0]  }
 0x1fe   :  { %3239 = vrot.lane.b32.xlu0 %v3238_v20, %s7032_s16  ;;  %v2636_v27 = vpop.permute.xlu1 %2635   ;;  %v3413_v20 = vsel %vm4_vm0, %v6455_v17, %v6454_v16  ;;  %v6487_v53 = vld [vmem:[%s13126_s0 + $0xd03] ss:$8 sm:$0xf]  }
 0x1ff   :  { %6245 = vst.msk [vmem:[%s13127_s1 + $0x178] sm:$0xff] %vm1989_vm4, %v2636_v27   ;;  %v6488_v54 = vld [vmem:[%s13126_s0 + $0xd03] ss:$8 sm:$0xf0]  }
 0x200   :  { %v2625_v31 = vpop.permute.xlu0 %2624   ;;  %3272 = vrot.lane.b32.xlu1 %v3271_v26, %s7032_s16  ;;  %v3446_v26 = vsel %vm4_vm0, %v6464_v22, %v6463_v21  ;;  %v6484_v56 = vld [vmem:[%s13126_s0 + $0xc03] ss:$8 sm:$0xf]  }
 0x201   :  { %6242 = vst.msk [vmem:[%s13127_s1 + $0x158] sm:$0xff] %vm1989_vm4, %v2625_v31   ;;  %v6485_v57 = vld [vmem:[%s13126_s0 + $0xc03] ss:$8 sm:$0xf0]  }
 0x202   :  { %3261 = vrot.lane.b32.xlu0 %v3260_v28, %s7032_s16  ;;  %v2658_v35 = vpop.permute.xlu1 %2657   ;;  %v3435_v28 = vsel %vm4_vm0, %v6461_v25, %v6460_v24  ;;  %v6493_v61 = vld [vmem:[%s13126_s0 + $0xf03] ss:$8 sm:$0xf]  }
 0x203   :  { %6251 = vst.msk [vmem:[%s13127_s1 + $0x1b8] sm:$0xff] %vm1989_vm4, %v2658_v35   ;;  %v6494_v62 = vld [vmem:[%s13126_s0 + $0xf03] ss:$8 sm:$0xf0]  }
 0x204   :  { %v2647_v39 = vpop.permute.xlu0 %2646   ;;  %3294 = vrot.lane.b32.xlu1 %v3293_v34, %s7032_s16  ;;  %v3468_v34 = vsel %vm4_vm0, %v6470_v30, %v6469_v29  ;;  %v6490_v0 = vld [vmem:[%s13126_s0 + $0xe03] ss:$8 sm:$0xf]  }
 0x205   :  { %6248 = vst.msk [vmem:[%s13127_s1 + $0x198] sm:$0xff] %vm1989_vm4, %v2647_v39   ;;  %v6491_v1 = vld [vmem:[%s13126_s0 + $0xe03] ss:$8 sm:$0xf0]  }
 0x206   :  { %3283 = vrot.lane.b32.xlu0 %v3282_v36, %s7032_s16  ;;  %v2680_v43 = vpop.permute.xlu1 %2679   ;;  %v3457_v36 = vsel %vm4_vm0, %v6467_v33, %v6466_v32  ;;  %v6499_v5 = vld [vmem:[%s13126_s0 + $0x143] ss:$8 sm:$0xf]  }
 0x207   :  { %6257 = vst.msk [vmem:[%s13127_s1 + $0x1f8] sm:$0xff] %vm1989_vm4, %v2680_v43   ;;  %v6500_v6 = vld [vmem:[%s13126_s0 + $0x143] ss:$8 sm:$0xf0]  }
 0x208   :  { %v2669_v47 = vpop.permute.xlu0 %2668   ;;  %3316 = vrot.lane.b32.xlu1 %v3315_v42, %s7032_s16  ;;  %v3490_v42 = vsel %vm4_vm0, %v6476_v38, %v6475_v37  ;;  %v6496_v8 = vld [vmem:[%s13126_s0 + $0x43] ss:$8 sm:$0xf]  }
 0x209   :  { %6254 = vst.msk [vmem:[%s13127_s1 + $0x1d8] sm:$0xff] %vm1989_vm4, %v2669_v47   ;;  %v6497_v9 = vld [vmem:[%s13126_s0 + $0x43] ss:$8 sm:$0xf0]  }
 0x20a   :  { %3305 = vrot.lane.b32.xlu0 %v3304_v44, %s7032_s16  ;;  %v2701_v51 = vpop.permute.xlu1 %2700   ;;  %v3479_v44 = vsel %vm4_vm0, %v6473_v41, %v6472_v40  ;;  %v6505_v13 = vld [vmem:[%s13126_s0 + $0x343] ss:$8 sm:$0xf]  }
 0x20b   :  { %6262 = vst.msk [vmem:[%s13127_s1 + $0x20] sm:$0xff] %vm2692_vm5, %v2701_v51   ;;  %v6506_v14 = vld [vmem:[%s13126_s0 + $0x343] ss:$8 sm:$0xf0]  }
 0x20c   :  { %v2691_v55 = vpop.permute.xlu0 %2690   ;;  %3338 = vrot.lane.b32.xlu1 %v3337_v50, %s7032_s16  ;;  %v3512_v50 = vsel %vm4_vm0, %v6482_v46, %v6481_v45  ;;  %v6502_v16 = vld [vmem:[%s13126_s0 + $0x243] ss:$8 sm:$0xf]  }
 0x20d   :  { %2693 = vst.msk [vmem:[%s13127_s1] sm:$0xff] %vm2692_vm5, %v2691_v55   ;;  %v6503_v17 = vld [vmem:[%s13126_s0 + $0x243] ss:$8 sm:$0xf0]  }
 0x20e   :  { %3327 = vrot.lane.b32.xlu0 %v3326_v52, %s7032_s16  ;;  %v2723_v59 = vpop.permute.xlu1 %2722   ;;  %v3501_v52 = vsel %vm4_vm0, %v6479_v49, %v6478_v48  ;;  %v6511_v21 = vld [vmem:[%s13126_s0 + $0x543] ss:$8 sm:$0xf]  }
 0x20f   :  { %6268 = vst.msk [vmem:[%s13127_s1 + $0x60] sm:$0xff] %vm2692_vm5, %v2723_v59   ;;  %v6512_v22 = vld [vmem:[%s13126_s0 + $0x543] ss:$8 sm:$0xf0]  }
 0x210   :  { %v2712_v63 = vpop.permute.xlu0 %2711   ;;  %3360 = vrot.lane.b32.xlu1 %v3359_v58, %s7032_s16  ;;  %v3534_v58 = vsel %vm4_vm0, %v6488_v54, %v6487_v53  ;;  %v6508_v24 = vld [vmem:[%s13126_s0 + $0x443] ss:$8 sm:$0xf]  }
 0x211   :  { %6265 = vst.msk [vmem:[%s13127_s1 + $0x40] sm:$0xff] %vm2692_vm5, %v2712_v63   ;;  %v6509_v25 = vld [vmem:[%s13126_s0 + $0x443] ss:$8 sm:$0xf0]  }
 0x212   :  { %3349 = vrot.lane.b32.xlu0 %v3348_v60, %s7032_s16  ;;  %v2745_v3 = vpop.permute.xlu1 %2744   ;;  %v3523_v60 = vsel %vm4_vm0, %v6485_v57, %v6484_v56  ;;  %v6517_v29 = vld [vmem:[%s13126_s0 + $0x743] ss:$8 sm:$0xf]  }
 0x213   :  { %6274 = vst.msk [vmem:[%s13127_s1 + $0xa0] sm:$0xff] %vm2692_vm5, %v2745_v3   ;;  %v6518_v30 = vld [vmem:[%s13126_s0 + $0x743] ss:$8 sm:$0xf0]  }
 0x214   :  { %v2734_v7 = vpop.permute.xlu0 %2733   ;;  %3382 = vrot.lane.b32.xlu1 %v3381_v2, %s7032_s16  ;;  %v3556_v2 = vsel %vm4_vm0, %v6494_v62, %v6493_v61  ;;  %v6514_v32 = vld [vmem:[%s13126_s0 + $0x643] ss:$8 sm:$0xf]  }
 0x215   :  { %6271 = vst.msk [vmem:[%s13127_s1 + $0x80] sm:$0xff] %vm2692_vm5, %v2734_v7   ;;  %v6515_v33 = vld [vmem:[%s13126_s0 + $0x643] ss:$8 sm:$0xf0]  }
 0x216   :  { %3371 = vrot.lane.b32.xlu0 %v3370_v4, %s7032_s16  ;;  %v2767_v11 = vpop.permute.xlu1 %2766   ;;  %v3545_v4 = vsel %vm4_vm0, %v6491_v1, %v6490_v0  ;;  %v6523_v37 = vld [vmem:[%s13126_s0 + $0x943] ss:$8 sm:$0xf]  }
 0x217   :  { %6280 = vst.msk [vmem:[%s13127_s1 + $0xe0] sm:$0xff] %vm2692_vm5, %v2767_v11   ;;  %v6524_v38 = vld [vmem:[%s13126_s0 + $0x943] ss:$8 sm:$0xf0]  }
 0x218   :  { %v2756_v15 = vpop.permute.xlu0 %2755   ;;  %3403 = vrot.lane.b32.xlu1 %v3402_v10, %s7033_s8  ;;  %v3578_v10 = vsel %vm4_vm0, %v6500_v6, %v6499_v5  ;;  %v6520_v40 = vld [vmem:[%s13126_s0 + $0x843] ss:$8 sm:$0xf]  }
 0x219   :  { %6277 = vst.msk [vmem:[%s13127_s1 + $0xc0] sm:$0xff] %vm2692_vm5, %v2756_v15   ;;  %v6521_v41 = vld [vmem:[%s13126_s0 + $0x843] ss:$8 sm:$0xf0]  }
 0x21a   :  { %3393 = vrot.lane.b32.xlu0 %v3392_v12, %s7033_s8  ;;  %v2789_v19 = vpop.permute.xlu1 %2788   ;;  %v3567_v12 = vsel %vm4_vm0, %v6497_v9, %v6496_v8  ;;  %v6529_v45 = vld [vmem:[%s13126_s0 + $0xb43] ss:$8 sm:$0xf]  }
 0x21b   :  { %6286 = vst.msk [vmem:[%s13127_s1 + $0x120] sm:$0xff] %vm2692_vm5, %v2789_v19   ;;  %v6530_v46 = vld [vmem:[%s13126_s0 + $0xb43] ss:$8 sm:$0xf0]  }
 0x21c   :  { %v2778_v23 = vpop.permute.xlu0 %2777   ;;  %3425 = vrot.lane.b32.xlu1 %v3424_v18, %s7033_s8  ;;  %v3600_v18 = vsel %vm4_vm0, %v6506_v14, %v6505_v13  ;;  %v6526_v48 = vld [vmem:[%s13126_s0 + $0xa43] ss:$8 sm:$0xf]  }
 0x21d   :  { %6283 = vst.msk [vmem:[%s13127_s1 + $0x100] sm:$0xff] %vm2692_vm5, %v2778_v23   ;;  %v6527_v49 = vld [vmem:[%s13126_s0 + $0xa43] ss:$8 sm:$0xf0]  }
 0x21e   :  { %3414 = vrot.lane.b32.xlu0 %v3413_v20, %s7033_s8  ;;  %v2811_v27 = vpop.permute.xlu1 %2810   ;;  %v3589_v20 = vsel %vm4_vm0, %v6503_v17, %v6502_v16  ;;  %v6535_v53 = vld [vmem:[%s13126_s0 + $0xd43] ss:$8 sm:$0xf]  }
 0x21f   :  { %6292 = vst.msk [vmem:[%s13127_s1 + $0x160] sm:$0xff] %vm2692_vm5, %v2811_v27   ;;  %v6536_v54 = vld [vmem:[%s13126_s0 + $0xd43] ss:$8 sm:$0xf0]  }
 0x220   :  { %v2800_v31 = vpop.permute.xlu0 %2799   ;;  %3447 = vrot.lane.b32.xlu1 %v3446_v26, %s7033_s8  ;;  %v3622_v26 = vsel %vm4_vm0, %v6512_v22, %v6511_v21  ;;  %v6532_v56 = vld [vmem:[%s13126_s0 + $0xc43] ss:$8 sm:$0xf]  }
 0x221   :  { %6289 = vst.msk [vmem:[%s13127_s1 + $0x140] sm:$0xff] %vm2692_vm5, %v2800_v31   ;;  %v6533_v57 = vld [vmem:[%s13126_s0 + $0xc43] ss:$8 sm:$0xf0]  }
 0x222   :  { %3436 = vrot.lane.b32.xlu0 %v3435_v28, %s7033_s8  ;;  %v2833_v35 = vpop.permute.xlu1 %2832   ;;  %v3611_v28 = vsel %vm4_vm0, %v6509_v25, %v6508_v24  ;;  %v6541_v61 = vld [vmem:[%s13126_s0 + $0xf43] ss:$8 sm:$0xf]  }
 0x223   :  { %6298 = vst.msk [vmem:[%s13127_s1 + $0x1a0] sm:$0xff] %vm2692_vm5, %v2833_v35   ;;  %v6542_v62 = vld [vmem:[%s13126_s0 + $0xf43] ss:$8 sm:$0xf0]  }
 0x224   :  { %v2822_v39 = vpop.permute.xlu0 %2821   ;;  %3469 = vrot.lane.b32.xlu1 %v3468_v34, %s7033_s8  ;;  %v3644_v34 = vsel %vm4_vm0, %v6518_v30, %v6517_v29  ;;  %v6538_v0 = vld [vmem:[%s13126_s0 + $0xe43] ss:$8 sm:$0xf]  }
 0x225   :  { %6295 = vst.msk [vmem:[%s13127_s1 + $0x180] sm:$0xff] %vm2692_vm5, %v2822_v39   ;;  %v6539_v1 = vld [vmem:[%s13126_s0 + $0xe43] ss:$8 sm:$0xf0]  }
 0x226   :  { %3458 = vrot.lane.b32.xlu0 %v3457_v36, %s7033_s8  ;;  %v2855_v43 = vpop.permute.xlu1 %2854   ;;  %v3633_v36 = vsel %vm4_vm0, %v6515_v33, %v6514_v32  ;;  %v6547_v5 = vld [vmem:[%s13126_s0 + $0x183] ss:$8 sm:$0xf]  }
 0x227   :  { %6304 = vst.msk [vmem:[%s13127_s1 + $0x1e0] sm:$0xff] %vm2692_vm5, %v2855_v43   ;;  %v6548_v6 = vld [vmem:[%s13126_s0 + $0x183] ss:$8 sm:$0xf0]  }
 0x228   :  { %v2844_v47 = vpop.permute.xlu0 %2843   ;;  %3491 = vrot.lane.b32.xlu1 %v3490_v42, %s7033_s8  ;;  %v3666_v42 = vsel %vm4_vm0, %v6524_v38, %v6523_v37  ;;  %v6544_v8 = vld [vmem:[%s13126_s0 + $0x83] ss:$8 sm:$0xf]  }
 0x229   :  { %6301 = vst.msk [vmem:[%s13127_s1 + $0x1c0] sm:$0xff] %vm2692_vm5, %v2844_v47   ;;  %v6545_v9 = vld [vmem:[%s13126_s0 + $0x83] ss:$8 sm:$0xf0]  }
 0x22a   :  { %3480 = vrot.lane.b32.xlu0 %v3479_v44, %s7033_s8  ;;  %v2877_v51 = vpop.permute.xlu1 %2876   ;;  %v3655_v44 = vsel %vm4_vm0, %v6521_v41, %v6520_v40  ;;  %v6553_v13 = vld [vmem:[%s13126_s0 + $0x383] ss:$8 sm:$0xf]  }
 0x22b   :  { %6310 = vst.msk [vmem:[%s13127_s1 + $0x28] sm:$0xff] %vm2692_vm5, %v2877_v51   ;;  %v6554_v14 = vld [vmem:[%s13126_s0 + $0x383] ss:$8 sm:$0xf0]  }
 0x22c   :  { %v2866_v55 = vpop.permute.xlu0 %2865   ;;  %3513 = vrot.lane.b32.xlu1 %v3512_v50, %s7033_s8  ;;  %v3688_v50 = vsel %vm4_vm0, %v6530_v46, %v6529_v45  ;;  %v6550_v16 = vld [vmem:[%s13126_s0 + $0x283] ss:$8 sm:$0xf]  }
 0x22d   :  { %6307 = vst.msk [vmem:[%s13127_s1 + $0x8] sm:$0xff] %vm2692_vm5, %v2866_v55   ;;  %v6551_v17 = vld [vmem:[%s13126_s0 + $0x283] ss:$8 sm:$0xf0]  }
 0x22e   :  { %3502 = vrot.lane.b32.xlu0 %v3501_v52, %s7033_s8  ;;  %v2899_v59 = vpop.permute.xlu1 %2898   ;;  %v3677_v52 = vsel %vm4_vm0, %v6527_v49, %v6526_v48  ;;  %v6559_v21 = vld [vmem:[%s13126_s0 + $0x583] ss:$8 sm:$0xf]  }
 0x22f   :  { %6316 = vst.msk [vmem:[%s13127_s1 + $0x68] sm:$0xff] %vm2692_vm5, %v2899_v59   ;;  %v6560_v22 = vld [vmem:[%s13126_s0 + $0x583] ss:$8 sm:$0xf0]  }
 0x230   :  { %v2888_v63 = vpop.permute.xlu0 %2887   ;;  %3535 = vrot.lane.b32.xlu1 %v3534_v58, %s7033_s8  ;;  %v3710_v58 = vsel %vm4_vm0, %v6536_v54, %v6535_v53  ;;  %v6556_v24 = vld [vmem:[%s13126_s0 + $0x483] ss:$8 sm:$0xf]  }
 0x231   :  { %6313 = vst.msk [vmem:[%s13127_s1 + $0x48] sm:$0xff] %vm2692_vm5, %v2888_v63   ;;  %v6557_v25 = vld [vmem:[%s13126_s0 + $0x483] ss:$8 sm:$0xf0]  }
 0x232   :  { %3524 = vrot.lane.b32.xlu0 %v3523_v60, %s7033_s8  ;;  %v2921_v3 = vpop.permute.xlu1 %2920   ;;  %v3699_v60 = vsel %vm4_vm0, %v6533_v57, %v6532_v56  ;;  %v6565_v29 = vld [vmem:[%s13126_s0 + $0x783] ss:$8 sm:$0xf]  }
 0x233   :  { %6322 = vst.msk [vmem:[%s13127_s1 + $0xa8] sm:$0xff] %vm2692_vm5, %v2921_v3   ;;  %v6566_v30 = vld [vmem:[%s13126_s0 + $0x783] ss:$8 sm:$0xf0]  }
 0x234   :  { %v2910_v7 = vpop.permute.xlu0 %2909   ;;  %3557 = vrot.lane.b32.xlu1 %v3556_v2, %s7033_s8  ;;  %v3732_v2 = vsel %vm4_vm0, %v6542_v62, %v6541_v61  ;;  %v6562_v32 = vld [vmem:[%s13126_s0 + $0x683] ss:$8 sm:$0xf]  }
 0x235   :  { %6319 = vst.msk [vmem:[%s13127_s1 + $0x88] sm:$0xff] %vm2692_vm5, %v2910_v7   ;;  %v6563_v33 = vld [vmem:[%s13126_s0 + $0x683] ss:$8 sm:$0xf0]  }
 0x236   :  { %3546 = vrot.lane.b32.xlu0 %v3545_v4, %s7033_s8  ;;  %v2943_v11 = vpop.permute.xlu1 %2942   ;;  %v3721_v4 = vsel %vm4_vm0, %v6539_v1, %v6538_v0  ;;  %v6571_v37 = vld [vmem:[%s13126_s0 + $0x983] ss:$8 sm:$0xf]  }
 0x237   :  { %6328 = vst.msk [vmem:[%s13127_s1 + $0xe8] sm:$0xff] %vm2692_vm5, %v2943_v11   ;;  %v6572_v38 = vld [vmem:[%s13126_s0 + $0x983] ss:$8 sm:$0xf0]  }
 0x238   :  { %v2932_v15 = vpop.permute.xlu0 %2931   ;;  %3579 = vrot.lane.b32.xlu1 %v3578_v10, %s7033_s8  ;;  %v3754_v10 = vsel %vm4_vm0, %v6548_v6, %v6547_v5  ;;  %v6568_v40 = vld [vmem:[%s13126_s0 + $0x883] ss:$8 sm:$0xf]  }
 0x239   :  { %6325 = vst.msk [vmem:[%s13127_s1 + $0xc8] sm:$0xff] %vm2692_vm5, %v2932_v15   ;;  %v6569_v41 = vld [vmem:[%s13126_s0 + $0x883] ss:$8 sm:$0xf0]  }
 0x23a   :  { %3568 = vrot.lane.b32.xlu0 %v3567_v12, %s7033_s8  ;;  %v2965_v19 = vpop.permute.xlu1 %2964   ;;  %v3743_v12 = vsel %vm4_vm0, %v6545_v9, %v6544_v8  ;;  %v6577_v45 = vld [vmem:[%s13126_s0 + $0xb83] ss:$8 sm:$0xf]  }
 0x23b   :  { %6334 = vst.msk [vmem:[%s13127_s1 + $0x128] sm:$0xff] %vm2692_vm5, %v2965_v19   ;;  %v6578_v46 = vld [vmem:[%s13126_s0 + $0xb83] ss:$8 sm:$0xf0]  }
 0x23c   :  { %v2954_v23 = vpop.permute.xlu0 %2953   ;;  %3601 = vrot.lane.b32.xlu1 %v3600_v18, %s7033_s8  ;;  %v3776_v18 = vsel %vm4_vm0, %v6554_v14, %v6553_v13  ;;  %v6574_v48 = vld [vmem:[%s13126_s0 + $0xa83] ss:$8 sm:$0xf]  }
 0x23d   :  { %6331 = vst.msk [vmem:[%s13127_s1 + $0x108] sm:$0xff] %vm2692_vm5, %v2954_v23   ;;  %v6575_v49 = vld [vmem:[%s13126_s0 + $0xa83] ss:$8 sm:$0xf0]  }
 0x23e   :  { %3590 = vrot.lane.b32.xlu0 %v3589_v20, %s7033_s8  ;;  %v2987_v27 = vpop.permute.xlu1 %2986   ;;  %v3765_v20 = vsel %vm4_vm0, %v6551_v17, %v6550_v16  ;;  %v6583_v53 = vld [vmem:[%s13126_s0 + $0xd83] ss:$8 sm:$0xf]  }
 0x23f   :  { %6340 = vst.msk [vmem:[%s13127_s1 + $0x168] sm:$0xff] %vm2692_vm5, %v2987_v27   ;;  %v6584_v54 = vld [vmem:[%s13126_s0 + $0xd83] ss:$8 sm:$0xf0]  }
 0x240   :  { %v2976_v31 = vpop.permute.xlu0 %2975   ;;  %3623 = vrot.lane.b32.xlu1 %v3622_v26, %s7033_s8  ;;  %v3798_v26 = vsel %vm4_vm0, %v6560_v22, %v6559_v21  ;;  %v6580_v56 = vld [vmem:[%s13126_s0 + $0xc83] ss:$8 sm:$0xf]  }
 0x241   :  { %6337 = vst.msk [vmem:[%s13127_s1 + $0x148] sm:$0xff] %vm2692_vm5, %v2976_v31   ;;  %v6581_v57 = vld [vmem:[%s13126_s0 + $0xc83] ss:$8 sm:$0xf0]  }
 0x242   :  { %3612 = vrot.lane.b32.xlu0 %v3611_v28, %s7033_s8  ;;  %v3009_v35 = vpop.permute.xlu1 %3008   ;;  %v3787_v28 = vsel %vm4_vm0, %v6557_v25, %v6556_v24  ;;  %v6589_v61 = vld [vmem:[%s13126_s0 + $0xf83] ss:$8 sm:$0xf]  }
 0x243   :  { %6346 = vst.msk [vmem:[%s13127_s1 + $0x1a8] sm:$0xff] %vm2692_vm5, %v3009_v35   ;;  %v6590_v62 = vld [vmem:[%s13126_s0 + $0xf83] ss:$8 sm:$0xf0]  }
 0x244   :  { %v2998_v39 = vpop.permute.xlu0 %2997   ;;  %3645 = vrot.lane.b32.xlu1 %v3644_v34, %s7033_s8  ;;  %v3820_v34 = vsel %vm4_vm0, %v6566_v30, %v6565_v29  ;;  %v6586_v0 = vld [vmem:[%s13126_s0 + $0xe83] ss:$8 sm:$0xf]  }
 0x245   :  { %6343 = vst.msk [vmem:[%s13127_s1 + $0x188] sm:$0xff] %vm2692_vm5, %v2998_v39   ;;  %v6587_v1 = vld [vmem:[%s13126_s0 + $0xe83] ss:$8 sm:$0xf0]  }
 0x246   :  { %3634 = vrot.lane.b32.xlu0 %v3633_v36, %s7033_s8  ;;  %v3031_v43 = vpop.permute.xlu1 %3030   ;;  %v3809_v36 = vsel %vm4_vm0, %v6563_v33, %v6562_v32  ;;  %v6595_v5 = vld [vmem:[%s13126_s0 + $0x1c3] ss:$8 sm:$0xf]  }
 0x247   :  { %6352 = vst.msk [vmem:[%s13127_s1 + $0x1e8] sm:$0xff] %vm2692_vm5, %v3031_v43   ;;  %v6596_v6 = vld [vmem:[%s13126_s0 + $0x1c3] ss:$8 sm:$0xf0]  }
 0x248   :  { %v3020_v47 = vpop.permute.xlu0 %3019   ;;  %3667 = vrot.lane.b32.xlu1 %v3666_v42, %s7033_s8  ;;  %v3842_v42 = vsel %vm4_vm0, %v6572_v38, %v6571_v37  ;;  %v6592_v8 = vld [vmem:[%s13126_s0 + $0xc3] ss:$8 sm:$0xf]  }
 0x249   :  { %6349 = vst.msk [vmem:[%s13127_s1 + $0x1c8] sm:$0xff] %vm2692_vm5, %v3020_v47   ;;  %v6593_v9 = vld [vmem:[%s13126_s0 + $0xc3] ss:$8 sm:$0xf0]  }
 0x24a   :  { %3656 = vrot.lane.b32.xlu0 %v3655_v44, %s7033_s8  ;;  %v3053_v51 = vpop.permute.xlu1 %3052   ;;  %v3831_v44 = vsel %vm4_vm0, %v6569_v41, %v6568_v40  ;;  %v6601_v13 = vld [vmem:[%s13126_s0 + $0x3c3] ss:$8 sm:$0xf]  }
 0x24b   :  { %6358 = vst.msk [vmem:[%s13127_s1 + $0x30] sm:$0xff] %vm2692_vm5, %v3053_v51   ;;  %v6602_v14 = vld [vmem:[%s13126_s0 + $0x3c3] ss:$8 sm:$0xf0]  }
 0x24c   :  { %v3042_v55 = vpop.permute.xlu0 %3041   ;;  %3689 = vrot.lane.b32.xlu1 %v3688_v50, %s7033_s8  ;;  %v3864_v50 = vsel %vm4_vm0, %v6578_v46, %v6577_v45  ;;  %v6598_v16 = vld [vmem:[%s13126_s0 + $0x2c3] ss:$8 sm:$0xf]  }
 0x24d   :  { %6355 = vst.msk [vmem:[%s13127_s1 + $0x10] sm:$0xff] %vm2692_vm5, %v3042_v55   ;;  %v6599_v17 = vld [vmem:[%s13126_s0 + $0x2c3] ss:$8 sm:$0xf0]  }
 0x24e   :  { %3678 = vrot.lane.b32.xlu0 %v3677_v52, %s7033_s8  ;;  %v3075_v59 = vpop.permute.xlu1 %3074   ;;  %v3853_v52 = vsel %vm4_vm0, %v6575_v49, %v6574_v48  ;;  %v6607_v21 = vld [vmem:[%s13126_s0 + $0x5c3] ss:$8 sm:$0xf]  }
 0x24f   :  { %6364 = vst.msk [vmem:[%s13127_s1 + $0x70] sm:$0xff] %vm2692_vm5, %v3075_v59   ;;  %v6608_v22 = vld [vmem:[%s13126_s0 + $0x5c3] ss:$8 sm:$0xf0]  }
 0x250   :  { %v3064_v63 = vpop.permute.xlu0 %3063   ;;  %3711 = vrot.lane.b32.xlu1 %v3710_v58, %s7033_s8  ;;  %v3886_v58 = vsel %vm4_vm0, %v6584_v54, %v6583_v53  ;;  %v6604_v24 = vld [vmem:[%s13126_s0 + $0x4c3] ss:$8 sm:$0xf]  }
 0x251   :  { %6361 = vst.msk [vmem:[%s13127_s1 + $0x50] sm:$0xff] %vm2692_vm5, %v3064_v63   ;;  %v6605_v25 = vld [vmem:[%s13126_s0 + $0x4c3] ss:$8 sm:$0xf0]  }
 0x252   :  { %3700 = vrot.lane.b32.xlu0 %v3699_v60, %s7033_s8  ;;  %v3097_v3 = vpop.permute.xlu1 %3096   ;;  %v3875_v60 = vsel %vm4_vm0, %v6581_v57, %v6580_v56  ;;  %v6613_v29 = vld [vmem:[%s13126_s0 + $0x7c3] ss:$8 sm:$0xf]  }
 0x253   :  { %6370 = vst.msk [vmem:[%s13127_s1 + $0xb0] sm:$0xff] %vm2692_vm5, %v3097_v3   ;;  %v6614_v30 = vld [vmem:[%s13126_s0 + $0x7c3] ss:$8 sm:$0xf0]  }
 0x254   :  { %v3086_v7 = vpop.permute.xlu0 %3085   ;;  %3733 = vrot.lane.b32.xlu1 %v3732_v2, %s7033_s8  ;;  %v3908_v2 = vsel %vm4_vm0, %v6590_v62, %v6589_v61  ;;  %v6610_v32 = vld [vmem:[%s13126_s0 + $0x6c3] ss:$8 sm:$0xf]  }
 0x255   :  { %6367 = vst.msk [vmem:[%s13127_s1 + $0x90] sm:$0xff] %vm2692_vm5, %v3086_v7   ;;  %v6611_v33 = vld [vmem:[%s13126_s0 + $0x6c3] ss:$8 sm:$0xf0]  }
 0x256   :  { %3722 = vrot.lane.b32.xlu0 %v3721_v4, %s7033_s8  ;;  %v3119_v11 = vpop.permute.xlu1 %3118   ;;  %v3897_v4 = vsel %vm4_vm0, %v6587_v1, %v6586_v0  ;;  %v6619_v37 = vld [vmem:[%s13126_s0 + $0x9c3] ss:$8 sm:$0xf]  }
 0x257   :  { %6376 = vst.msk [vmem:[%s13127_s1 + $0xf0] sm:$0xff] %vm2692_vm5, %v3119_v11   ;;  %v6620_v38 = vld [vmem:[%s13126_s0 + $0x9c3] ss:$8 sm:$0xf0]  }
 0x258   :  { %v3108_v15 = vpop.permute.xlu0 %3107   ;;  %3755 = vrot.lane.b32.xlu1 %v3754_v10, %s7033_s8  ;;  %v3930_v10 = vsel %vm4_vm0, %v6596_v6, %v6595_v5  ;;  %v6616_v40 = vld [vmem:[%s13126_s0 + $0x8c3] ss:$8 sm:$0xf]   ;;  %v6642_v5 = vld [vmem:[%s13126_s0 + $0x102] ss:$8 sm:$0xf]  }
 0x259   :  { %6373 = vst.msk [vmem:[%s13127_s1 + $0xd0] sm:$0xff] %vm2692_vm5, %v3108_v15   ;;  %v6617_v41 = vld [vmem:[%s13126_s0 + $0x8c3] ss:$8 sm:$0xf0]  }
 0x25a   :  { %3744 = vrot.lane.b32.xlu0 %v3743_v12, %s7033_s8  ;;  %v3141_v19 = vpop.permute.xlu1 %3140   ;;  %v3919_v12 = vsel %vm4_vm0, %v6593_v9, %v6592_v8  ;;  %v6625_v45 = vld [vmem:[%s13126_s0 + $0xbc3] ss:$8 sm:$0xf]   ;;  %v6643_v6 = vld [vmem:[%s13126_s0 + $0x102] ss:$8 sm:$0xf0]  }
 0x25b   :  { %6382 = vst.msk [vmem:[%s13127_s1 + $0x130] sm:$0xff] %vm2692_vm5, %v3141_v19   ;;  %v6626_v46 = vld [vmem:[%s13126_s0 + $0xbc3] ss:$8 sm:$0xf0]  }
 0x25c   :  { %v3130_v23 = vpop.permute.xlu0 %3129   ;;  %3777 = vrot.lane.b32.xlu1 %v3776_v18, %s7033_s8  ;;  %v3952_v18 = vsel %vm4_vm0, %v6602_v14, %v6601_v13  ;;  %v6622_v48 = vld [vmem:[%s13126_s0 + $0xac3] ss:$8 sm:$0xf]   ;;  %v6640_v8 = vld [vmem:[%s13126_s0 + $0x2] ss:$8 sm:$0xf]  }
 0x25d   :  { %6379 = vst.msk [vmem:[%s13127_s1 + $0x110] sm:$0xff] %vm2692_vm5, %v3130_v23   ;;  %v6623_v49 = vld [vmem:[%s13126_s0 + $0xac3] ss:$8 sm:$0xf0]  }
 0x25e   :  { %3766 = vrot.lane.b32.xlu0 %v3765_v20, %s7033_s8  ;;  %v3163_v27 = vpop.permute.xlu1 %3162   ;;  %v3941_v20 = vsel %vm4_vm0, %v6599_v17, %v6598_v16  ;;  %v6631_v53 = vld [vmem:[%s13126_s0 + $0xdc3] ss:$8 sm:$0xf]   ;;  %v6641_v9 = vld [vmem:[%s13126_s0 + $0x2] ss:$8 sm:$0xf0]  }
 0x25f   :  { %6388 = vst.msk [vmem:[%s13127_s1 + $0x170] sm:$0xff] %vm2692_vm5, %v3163_v27   ;;  %v6632_v54 = vld [vmem:[%s13126_s0 + $0xdc3] ss:$8 sm:$0xf0]  }
 0x260   :  { %v3152_v31 = vpop.permute.xlu0 %3151   ;;  %3799 = vrot.lane.b32.xlu1 %v3798_v26, %s7033_s8  ;;  %v3974_v26 = vsel %vm4_vm0, %v6608_v22, %v6607_v21  ;;  %v6628_v56 = vld [vmem:[%s13126_s0 + $0xcc3] ss:$8 sm:$0xf]   ;;  %v6648_v13 = vld [vmem:[%s13126_s0 + $0x302] ss:$8 sm:$0xf]  }
 0x261   :  { %6385 = vst.msk [vmem:[%s13127_s1 + $0x150] sm:$0xff] %vm2692_vm5, %v3152_v31   ;;  %v6629_v57 = vld [vmem:[%s13126_s0 + $0xcc3] ss:$8 sm:$0xf0]  }
 0x262   :  { %3788 = vrot.lane.b32.xlu0 %v3787_v28, %s7033_s8  ;;  %v3185_v35 = vpop.permute.xlu1 %3184   ;;  %v3963_v28 = vsel %vm4_vm0, %v6605_v25, %v6604_v24  ;;  %v6637_v61 = vld [vmem:[%s13126_s0 + $0xfc3] ss:$8 sm:$0xf]   ;;  %v6649_v14 = vld [vmem:[%s13126_s0 + $0x302] ss:$8 sm:$0xf0]  }
 0x263   :  { %6394 = vst.msk [vmem:[%s13127_s1 + $0x1b0] sm:$0xff] %vm2692_vm5, %v3185_v35   ;;  %v6638_v62 = vld [vmem:[%s13126_s0 + $0xfc3] ss:$8 sm:$0xf0]  }
 0x264   :  { %v3174_v39 = vpop.permute.xlu0 %3173   ;;  %3821 = vrot.lane.b32.xlu1 %v3820_v34, %s7033_s8  ;;  %v3996_v34 = vsel %vm4_vm0, %v6614_v30, %v6613_v29  ;;  %v6634_v0 = vld [vmem:[%s13126_s0 + $0xec3] ss:$8 sm:$0xf]   ;;  %v6645_v16 = vld [vmem:[%s13126_s0 + $0x202] ss:$8 sm:$0xf]  }
 0x265   :  { %6391 = vst.msk [vmem:[%s13127_s1 + $0x190] sm:$0xff] %vm2692_vm5, %v3174_v39   ;;  %v6635_v1 = vld [vmem:[%s13126_s0 + $0xec3] ss:$8 sm:$0xf0]  }
 0x266   :  { %3810 = vrot.lane.b32.xlu0 %v3809_v36, %s7033_s8  ;;  %v3207_v43 = vpop.permute.xlu1 %3206   ;;  %v3985_v36 = vsel %vm4_vm0, %v6611_v33, %v6610_v32  ;;  %v6646_v17 = vld [vmem:[%s13126_s0 + $0x202] ss:$8 sm:$0xf0]  }
 0x267   :  { %6400 = vst.msk [vmem:[%s13127_s1 + $0x1f0] sm:$0xff] %vm2692_vm5, %v3207_v43   ;;  %v6654_v21 = vld [vmem:[%s13126_s0 + $0x502] ss:$8 sm:$0xf]  }
 0x268   :  { %v3196_v47 = vpop.permute.xlu0 %3195   ;;  %3843 = vrot.lane.b32.xlu1 %v3842_v42, %s7033_s8  ;;  %v4018_v42 = vsel %vm4_vm0, %v6620_v38, %v6619_v37  ;;  %v6655_v22 = vld [vmem:[%s13126_s0 + $0x502] ss:$8 sm:$0xf0]  }
 0x269   :  { %6397 = vst.msk [vmem:[%s13127_s1 + $0x1d0] sm:$0xff] %vm2692_vm5, %v3196_v47   ;;  %v6651_v24 = vld [vmem:[%s13126_s0 + $0x402] ss:$8 sm:$0xf]  }
 0x26a   :  { %3832 = vrot.lane.b32.xlu0 %v3831_v44, %s7033_s8  ;;  %v3229_v51 = vpop.permute.xlu1 %3228   ;;  %v4007_v44 = vsel %vm4_vm0, %v6617_v41, %v6616_v40  ;;  %v6652_v25 = vld [vmem:[%s13126_s0 + $0x402] ss:$8 sm:$0xf0]  }
 0x26b   :  { %6406 = vst.msk [vmem:[%s13127_s1 + $0x38] sm:$0xff] %vm2692_vm5, %v3229_v51   ;;  %v6660_v29 = vld [vmem:[%s13126_s0 + $0x702] ss:$8 sm:$0xf]  }
 0x26c   :  { %v3218_v55 = vpop.permute.xlu0 %3217   ;;  %3865 = vrot.lane.b32.xlu1 %v3864_v50, %s7033_s8  ;;  %v4040_v50 = vsel %vm4_vm0, %v6626_v46, %v6625_v45  ;;  %v6661_v30 = vld [vmem:[%s13126_s0 + $0x702] ss:$8 sm:$0xf0]  }
 0x26d   :  { %6403 = vst.msk [vmem:[%s13127_s1 + $0x18] sm:$0xff] %vm2692_vm5, %v3218_v55   ;;  %v6657_v32 = vld [vmem:[%s13126_s0 + $0x602] ss:$8 sm:$0xf]  }
 0x26e   :  { %3854 = vrot.lane.b32.xlu0 %v3853_v52, %s7033_s8  ;;  %v3251_v59 = vpop.permute.xlu1 %3250   ;;  %v4029_v52 = vsel %vm4_vm0, %v6623_v49, %v6622_v48  ;;  %v6658_v33 = vld [vmem:[%s13126_s0 + $0x602] ss:$8 sm:$0xf0]  }
 0x26f   :  { %6412 = vst.msk [vmem:[%s13127_s1 + $0x78] sm:$0xff] %vm2692_vm5, %v3251_v59   ;;  %v6666_v37 = vld [vmem:[%s13126_s0 + $0x902] ss:$8 sm:$0xf]  }
 0x270   :  { %v3240_v63 = vpop.permute.xlu0 %3239   ;;  %3887 = vrot.lane.b32.xlu1 %v3886_v58, %s7033_s8  ;;  %v4062_v58 = vsel %vm4_vm0, %v6632_v54, %v6631_v53  ;;  %v6667_v38 = vld [vmem:[%s13126_s0 + $0x902] ss:$8 sm:$0xf0]  }
 0x271   :  { %6409 = vst.msk [vmem:[%s13127_s1 + $0x58] sm:$0xff] %vm2692_vm5, %v3240_v63   ;;  %v6663_v40 = vld [vmem:[%s13126_s0 + $0x802] ss:$8 sm:$0xf]  }
 0x272   :  { %3876 = vrot.lane.b32.xlu0 %v3875_v60, %s7033_s8  ;;  %v3273_v3 = vpop.permute.xlu1 %3272   ;;  %v4051_v60 = vsel %vm4_vm0, %v6629_v57, %v6628_v56  ;;  %v6664_v41 = vld [vmem:[%s13126_s0 + $0x802] ss:$8 sm:$0xf0]  }
 0x273   :  { %6418 = vst.msk [vmem:[%s13127_s1 + $0xb8] sm:$0xff] %vm2692_vm5, %v3273_v3   ;;  %v6672_v45 = vld [vmem:[%s13126_s0 + $0xb02] ss:$8 sm:$0xf]  }
 0x274   :  { %v3262_v7 = vpop.permute.xlu0 %3261   ;;  %3909 = vrot.lane.b32.xlu1 %v3908_v2, %s7033_s8  ;;  %v4084_v2 = vsel %vm4_vm0, %v6638_v62, %v6637_v61  ;;  %v6673_v46 = vld [vmem:[%s13126_s0 + $0xb02] ss:$8 sm:$0xf0]  }
 0x275   :  { %6415 = vst.msk [vmem:[%s13127_s1 + $0x98] sm:$0xff] %vm2692_vm5, %v3262_v7   ;;  %v6669_v48 = vld [vmem:[%s13126_s0 + $0xa02] ss:$8 sm:$0xf]  }
 0x276   :  { %3898 = vrot.lane.b32.xlu0 %v3897_v4, %s7033_s8  ;;  %v3295_v11 = vpop.permute.xlu1 %3294   ;;  %v4073_v4 = vsel %vm4_vm0, %v6635_v1, %v6634_v0  ;;  %v6670_v49 = vld [vmem:[%s13126_s0 + $0xa02] ss:$8 sm:$0xf0]  }
 0x277   :  { %6424 = vst.msk [vmem:[%s13127_s1 + $0xf8] sm:$0xff] %vm2692_vm5, %v3295_v11   ;;  %v6678_v53 = vld [vmem:[%s13126_s0 + $0xd02] ss:$8 sm:$0xf]  }
 0x278   :  { %v3284_v15 = vpop.permute.xlu0 %3283   ;;  %3931 = vrot.lane.b32.xlu1 %v3930_v10, %s7033_s8  ;;  %v4105_v10 = vsel %vm4_vm0, %v6643_v6, %v6642_v5  ;;  %v6679_v54 = vld [vmem:[%s13126_s0 + $0xd02] ss:$8 sm:$0xf0]  }
 0x279   :  { %6421 = vst.msk [vmem:[%s13127_s1 + $0xd8] sm:$0xff] %vm2692_vm5, %v3284_v15   ;;  %v6675_v56 = vld [vmem:[%s13126_s0 + $0xc02] ss:$8 sm:$0xf]  }
 0x27a   :  { %3920 = vrot.lane.b32.xlu0 %v3919_v12, %s7033_s8  ;;  %v3317_v19 = vpop.permute.xlu1 %3316   ;;  %v4095_v12 = vsel %vm4_vm0, %v6641_v9, %v6640_v8  ;;  %v6676_v57 = vld [vmem:[%s13126_s0 + $0xc02] ss:$8 sm:$0xf0]  }
 0x27b   :  { %6430 = vst.msk [vmem:[%s13127_s1 + $0x138] sm:$0xff] %vm2692_vm5, %v3317_v19   ;;  %v6684_v61 = vld [vmem:[%s13126_s0 + $0xf02] ss:$8 sm:$0xf]  }
 0x27c   :  { %v3306_v23 = vpop.permute.xlu0 %3305   ;;  %3953 = vrot.lane.b32.xlu1 %v3952_v18, %s7033_s8  ;;  %v4127_v18 = vsel %vm4_vm0, %v6649_v14, %v6648_v13  ;;  %v6685_v62 = vld [vmem:[%s13126_s0 + $0xf02] ss:$8 sm:$0xf0]  }
 0x27d   :  { %6427 = vst.msk [vmem:[%s13127_s1 + $0x118] sm:$0xff] %vm2692_vm5, %v3306_v23   ;;  %v6681_v0 = vld [vmem:[%s13126_s0 + $0xe02] ss:$8 sm:$0xf]  }
 0x27e   :  { %3942 = vrot.lane.b32.xlu0 %v3941_v20, %s7033_s8  ;;  %v3339_v27 = vpop.permute.xlu1 %3338   ;;  %v4116_v20 = vsel %vm4_vm0, %v6646_v17, %v6645_v16  ;;  %v6682_v1 = vld [vmem:[%s13126_s0 + $0xe02] ss:$8 sm:$0xf0]  }
 0x27f   :  { %6436 = vst.msk [vmem:[%s13127_s1 + $0x178] sm:$0xff] %vm2692_vm5, %v3339_v27   ;;  %v6690_v5 = vld [vmem:[%s13126_s0 + $0x142] ss:$8 sm:$0xf]  }
 0x280   :  { %v3328_v31 = vpop.permute.xlu0 %3327   ;;  %3975 = vrot.lane.b32.xlu1 %v3974_v26, %s7033_s8  ;;  %v4149_v26 = vsel %vm4_vm0, %v6655_v22, %v6654_v21  ;;  %v6691_v6 = vld [vmem:[%s13126_s0 + $0x142] ss:$8 sm:$0xf0]  }
 0x281   :  { %6433 = vst.msk [vmem:[%s13127_s1 + $0x158] sm:$0xff] %vm2692_vm5, %v3328_v31   ;;  %v6687_v8 = vld [vmem:[%s13126_s0 + $0x42] ss:$8 sm:$0xf]  }
 0x282   :  { %3964 = vrot.lane.b32.xlu0 %v3963_v28, %s7033_s8  ;;  %v3361_v35 = vpop.permute.xlu1 %3360   ;;  %v4138_v28 = vsel %vm4_vm0, %v6652_v25, %v6651_v24  ;;  %v6688_v9 = vld [vmem:[%s13126_s0 + $0x42] ss:$8 sm:$0xf0]  }
 0x283   :  { %6442 = vst.msk [vmem:[%s13127_s1 + $0x1b8] sm:$0xff] %vm2692_vm5, %v3361_v35   ;;  %v6696_v13 = vld [vmem:[%s13126_s0 + $0x342] ss:$8 sm:$0xf]  }
 0x284   :  { %v3350_v39 = vpop.permute.xlu0 %3349   ;;  %3997 = vrot.lane.b32.xlu1 %v3996_v34, %s7033_s8  ;;  %v4171_v34 = vsel %vm4_vm0, %v6661_v30, %v6660_v29  ;;  %v6697_v14 = vld [vmem:[%s13126_s0 + $0x342] ss:$8 sm:$0xf0]  }
 0x285   :  { %6439 = vst.msk [vmem:[%s13127_s1 + $0x198] sm:$0xff] %vm2692_vm5, %v3350_v39   ;;  %v6693_v16 = vld [vmem:[%s13126_s0 + $0x242] ss:$8 sm:$0xf]  }
 0x286   :  { %3986 = vrot.lane.b32.xlu0 %v3985_v36, %s7033_s8  ;;  %v3383_v43 = vpop.permute.xlu1 %3382   ;;  %v4160_v36 = vsel %vm4_vm0, %v6658_v33, %v6657_v32  ;;  %v6694_v17 = vld [vmem:[%s13126_s0 + $0x242] ss:$8 sm:$0xf0]  }
 0x287   :  { %6448 = vst.msk [vmem:[%s13127_s1 + $0x1f8] sm:$0xff] %vm2692_vm5, %v3383_v43   ;;  %v6702_v21 = vld [vmem:[%s13126_s0 + $0x542] ss:$8 sm:$0xf]  }
 0x288   :  { %v3372_v47 = vpop.permute.xlu0 %3371   ;;  %4019 = vrot.lane.b32.xlu1 %v4018_v42, %s7033_s8  ;;  %v4193_v42 = vsel %vm4_vm0, %v6667_v38, %v6666_v37  ;;  %v6703_v22 = vld [vmem:[%s13126_s0 + $0x542] ss:$8 sm:$0xf0]  }
 0x289   :  { %6445 = vst.msk [vmem:[%s13127_s1 + $0x1d8] sm:$0xff] %vm2692_vm5, %v3372_v47   ;;  %v6699_v24 = vld [vmem:[%s13126_s0 + $0x442] ss:$8 sm:$0xf]  }
 0x28a   :  { %4008 = vrot.lane.b32.xlu0 %v4007_v44, %s7033_s8  ;;  %v3404_v51 = vpop.permute.xlu1 %3403   ;;  %v4182_v44 = vsel %vm4_vm0, %v6664_v41, %v6663_v40  ;;  %v6700_v25 = vld [vmem:[%s13126_s0 + $0x442] ss:$8 sm:$0xf0]  }
 0x28b   :  { %6453 = vst.msk [vmem:[%s13127_s1 + $0x20] sm:$0xff] %vm3395_vm6, %v3404_v51   ;;  %v6708_v29 = vld [vmem:[%s13126_s0 + $0x742] ss:$8 sm:$0xf]  }
 0x28c   :  { %v3394_v55 = vpop.permute.xlu0 %3393   ;;  %4041 = vrot.lane.b32.xlu1 %v4040_v50, %s7033_s8  ;;  %v4215_v50 = vsel %vm4_vm0, %v6673_v46, %v6672_v45  ;;  %v6709_v30 = vld [vmem:[%s13126_s0 + $0x742] ss:$8 sm:$0xf0]  }
 0x28d   :  { %3396 = vst.msk [vmem:[%s13127_s1] sm:$0xff] %vm3395_vm6, %v3394_v55   ;;  %v6705_v32 = vld [vmem:[%s13126_s0 + $0x642] ss:$8 sm:$0xf]  }
 0x28e   :  { %4030 = vrot.lane.b32.xlu0 %v4029_v52, %s7033_s8  ;;  %v3426_v59 = vpop.permute.xlu1 %3425   ;;  %v4204_v52 = vsel %vm4_vm0, %v6670_v49, %v6669_v48  ;;  %v6706_v33 = vld [vmem:[%s13126_s0 + $0x642] ss:$8 sm:$0xf0]  }
 0x28f   :  { %6459 = vst.msk [vmem:[%s13127_s1 + $0x60] sm:$0xff] %vm3395_vm6, %v3426_v59   ;;  %v6714_v37 = vld [vmem:[%s13126_s0 + $0x942] ss:$8 sm:$0xf]  }
 0x290   :  { %v3415_v63 = vpop.permute.xlu0 %3414   ;;  %4063 = vrot.lane.b32.xlu1 %v4062_v58, %s7033_s8  ;;  %v4237_v58 = vsel %vm4_vm0, %v6679_v54, %v6678_v53  ;;  %v6715_v38 = vld [vmem:[%s13126_s0 + $0x942] ss:$8 sm:$0xf0]  }
 0x291   :  { %6456 = vst.msk [vmem:[%s13127_s1 + $0x40] sm:$0xff] %vm3395_vm6, %v3415_v63   ;;  %v6711_v40 = vld [vmem:[%s13126_s0 + $0x842] ss:$8 sm:$0xf]  }
 0x292   :  { %4052 = vrot.lane.b32.xlu0 %v4051_v60, %s7033_s8  ;;  %v3448_v3 = vpop.permute.xlu1 %3447   ;;  %v4226_v60 = vsel %vm4_vm0, %v6676_v57, %v6675_v56  ;;  %v6712_v41 = vld [vmem:[%s13126_s0 + $0x842] ss:$8 sm:$0xf0]  }
 0x293   :  { %6465 = vst.msk [vmem:[%s13127_s1 + $0xa0] sm:$0xff] %vm3395_vm6, %v3448_v3   ;;  %v6720_v45 = vld [vmem:[%s13126_s0 + $0xb42] ss:$8 sm:$0xf]  }
 0x294   :  { %v3437_v7 = vpop.permute.xlu0 %3436   ;;  %4085 = vrot.lane.b32.xlu1 %v4084_v2, %s7033_s8  ;;  %v4259_v2 = vsel %vm4_vm0, %v6685_v62, %v6684_v61  ;;  %v6721_v46 = vld [vmem:[%s13126_s0 + $0xb42] ss:$8 sm:$0xf0]  }
 0x295   :  { %6462 = vst.msk [vmem:[%s13127_s1 + $0x80] sm:$0xff] %vm3395_vm6, %v3437_v7   ;;  %v6717_v48 = vld [vmem:[%s13126_s0 + $0xa42] ss:$8 sm:$0xf]  }
 0x296   :  { %4074 = vrot.lane.b32.xlu0 %v4073_v4, %s7033_s8  ;;  %v3470_v11 = vpop.permute.xlu1 %3469   ;;  %v4248_v4 = vsel %vm4_vm0, %v6682_v1, %v6681_v0  ;;  %v6718_v49 = vld [vmem:[%s13126_s0 + $0xa42] ss:$8 sm:$0xf0]  }
 0x297   :  { %6471 = vst.msk [vmem:[%s13127_s1 + $0xe0] sm:$0xff] %vm3395_vm6, %v3470_v11   ;;  %v6726_v53 = vld [vmem:[%s13126_s0 + $0xd42] ss:$8 sm:$0xf]  }
 0x298   :  { %v3459_v15 = vpop.permute.xlu0 %3458   ;;  %4106 = vrot.lane.b32.xlu1 %v4105_v10, %s7034_s28  ;;  %v4281_v10 = vsel %vm4_vm0, %v6691_v6, %v6690_v5  ;;  %v6727_v54 = vld [vmem:[%s13126_s0 + $0xd42] ss:$8 sm:$0xf0]  }
 0x299   :  { %6468 = vst.msk [vmem:[%s13127_s1 + $0xc0] sm:$0xff] %vm3395_vm6, %v3459_v15   ;;  %v6723_v56 = vld [vmem:[%s13126_s0 + $0xc42] ss:$8 sm:$0xf]  }
 0x29a   :  { %4096 = vrot.lane.b32.xlu0 %v4095_v12, %s7034_s28  ;;  %v3492_v19 = vpop.permute.xlu1 %3491   ;;  %v4270_v12 = vsel %vm4_vm0, %v6688_v9, %v6687_v8  ;;  %v6724_v57 = vld [vmem:[%s13126_s0 + $0xc42] ss:$8 sm:$0xf0]  }
 0x29b   :  { %6477 = vst.msk [vmem:[%s13127_s1 + $0x120] sm:$0xff] %vm3395_vm6, %v3492_v19   ;;  %v6732_v61 = vld [vmem:[%s13126_s0 + $0xf42] ss:$8 sm:$0xf]  }
 0x29c   :  { %v3481_v23 = vpop.permute.xlu0 %3480   ;;  %4128 = vrot.lane.b32.xlu1 %v4127_v18, %s7034_s28  ;;  %v4303_v18 = vsel %vm4_vm0, %v6697_v14, %v6696_v13  ;;  %v6733_v62 = vld [vmem:[%s13126_s0 + $0xf42] ss:$8 sm:$0xf0]  }
 0x29d   :  { %6474 = vst.msk [vmem:[%s13127_s1 + $0x100] sm:$0xff] %vm3395_vm6, %v3481_v23   ;;  %v6729_v0 = vld [vmem:[%s13126_s0 + $0xe42] ss:$8 sm:$0xf]  }
 0x29e   :  { %4117 = vrot.lane.b32.xlu0 %v4116_v20, %s7034_s28  ;;  %v3514_v27 = vpop.permute.xlu1 %3513   ;;  %v4292_v20 = vsel %vm4_vm0, %v6694_v17, %v6693_v16  ;;  %v6730_v1 = vld [vmem:[%s13126_s0 + $0xe42] ss:$8 sm:$0xf0]  }
 0x29f   :  { %6483 = vst.msk [vmem:[%s13127_s1 + $0x160] sm:$0xff] %vm3395_vm6, %v3514_v27   ;;  %v6738_v5 = vld [vmem:[%s13126_s0 + $0x182] ss:$8 sm:$0xf]  }
 0x2a0   :  { %v3503_v31 = vpop.permute.xlu0 %3502   ;;  %4150 = vrot.lane.b32.xlu1 %v4149_v26, %s7034_s28  ;;  %v4325_v26 = vsel %vm4_vm0, %v6703_v22, %v6702_v21  ;;  %v6739_v6 = vld [vmem:[%s13126_s0 + $0x182] ss:$8 sm:$0xf0]  }
 0x2a1   :  { %6480 = vst.msk [vmem:[%s13127_s1 + $0x140] sm:$0xff] %vm3395_vm6, %v3503_v31   ;;  %v6735_v8 = vld [vmem:[%s13126_s0 + $0x82] ss:$8 sm:$0xf]  }
 0x2a2   :  { %4139 = vrot.lane.b32.xlu0 %v4138_v28, %s7034_s28  ;;  %v3536_v35 = vpop.permute.xlu1 %3535   ;;  %v4314_v28 = vsel %vm4_vm0, %v6700_v25, %v6699_v24  ;;  %v6736_v9 = vld [vmem:[%s13126_s0 + $0x82] ss:$8 sm:$0xf0]  }
 0x2a3   :  { %6489 = vst.msk [vmem:[%s13127_s1 + $0x1a0] sm:$0xff] %vm3395_vm6, %v3536_v35   ;;  %v6744_v13 = vld [vmem:[%s13126_s0 + $0x382] ss:$8 sm:$0xf]  }
 0x2a4   :  { %v3525_v39 = vpop.permute.xlu0 %3524   ;;  %4172 = vrot.lane.b32.xlu1 %v4171_v34, %s7034_s28  ;;  %v4347_v34 = vsel %vm4_vm0, %v6709_v30, %v6708_v29  ;;  %v6745_v14 = vld [vmem:[%s13126_s0 + $0x382] ss:$8 sm:$0xf0]  }
 0x2a5   :  { %6486 = vst.msk [vmem:[%s13127_s1 + $0x180] sm:$0xff] %vm3395_vm6, %v3525_v39   ;;  %v6741_v16 = vld [vmem:[%s13126_s0 + $0x282] ss:$8 sm:$0xf]  }
 0x2a6   :  { %4161 = vrot.lane.b32.xlu0 %v4160_v36, %s7034_s28  ;;  %v3558_v43 = vpop.permute.xlu1 %3557   ;;  %v4336_v36 = vsel %vm4_vm0, %v6706_v33, %v6705_v32  ;;  %v6742_v17 = vld [vmem:[%s13126_s0 + $0x282] ss:$8 sm:$0xf0]  }
 0x2a7   :  { %6495 = vst.msk [vmem:[%s13127_s1 + $0x1e0] sm:$0xff] %vm3395_vm6, %v3558_v43   ;;  %v6750_v21 = vld [vmem:[%s13126_s0 + $0x582] ss:$8 sm:$0xf]  }
 0x2a8   :  { %v3547_v47 = vpop.permute.xlu0 %3546   ;;  %4194 = vrot.lane.b32.xlu1 %v4193_v42, %s7034_s28  ;;  %v4369_v42 = vsel %vm4_vm0, %v6715_v38, %v6714_v37  ;;  %v6751_v22 = vld [vmem:[%s13126_s0 + $0x582] ss:$8 sm:$0xf0]  }
 0x2a9   :  { %6492 = vst.msk [vmem:[%s13127_s1 + $0x1c0] sm:$0xff] %vm3395_vm6, %v3547_v47   ;;  %v6747_v24 = vld [vmem:[%s13126_s0 + $0x482] ss:$8 sm:$0xf]  }
 0x2aa   :  { %4183 = vrot.lane.b32.xlu0 %v4182_v44, %s7034_s28  ;;  %v3580_v51 = vpop.permute.xlu1 %3579   ;;  %v4358_v44 = vsel %vm4_vm0, %v6712_v41, %v6711_v40  ;;  %v6748_v25 = vld [vmem:[%s13126_s0 + $0x482] ss:$8 sm:$0xf0]  }
 0x2ab   :  { %6501 = vst.msk [vmem:[%s13127_s1 + $0x28] sm:$0xff] %vm3395_vm6, %v3580_v51   ;;  %v6756_v29 = vld [vmem:[%s13126_s0 + $0x782] ss:$8 sm:$0xf]  }
 0x2ac   :  { %v3569_v55 = vpop.permute.xlu0 %3568   ;;  %4216 = vrot.lane.b32.xlu1 %v4215_v50, %s7034_s28  ;;  %v4391_v50 = vsel %vm4_vm0, %v6721_v46, %v6720_v45  ;;  %v6757_v30 = vld [vmem:[%s13126_s0 + $0x782] ss:$8 sm:$0xf0]  }
 0x2ad   :  { %6498 = vst.msk [vmem:[%s13127_s1 + $0x8] sm:$0xff] %vm3395_vm6, %v3569_v55   ;;  %v6753_v32 = vld [vmem:[%s13126_s0 + $0x682] ss:$8 sm:$0xf]  }
 0x2ae   :  { %4205 = vrot.lane.b32.xlu0 %v4204_v52, %s7034_s28  ;;  %v3602_v59 = vpop.permute.xlu1 %3601   ;;  %v4380_v52 = vsel %vm4_vm0, %v6718_v49, %v6717_v48  ;;  %v6754_v33 = vld [vmem:[%s13126_s0 + $0x682] ss:$8 sm:$0xf0]  }
 0x2af   :  { %6507 = vst.msk [vmem:[%s13127_s1 + $0x68] sm:$0xff] %vm3395_vm6, %v3602_v59   ;;  %v6762_v37 = vld [vmem:[%s13126_s0 + $0x982] ss:$8 sm:$0xf]  }
 0x2b0   :  { %v3591_v63 = vpop.permute.xlu0 %3590   ;;  %4238 = vrot.lane.b32.xlu1 %v4237_v58, %s7034_s28  ;;  %v4413_v58 = vsel %vm4_vm0, %v6727_v54, %v6726_v53  ;;  %v6763_v38 = vld [vmem:[%s13126_s0 + $0x982] ss:$8 sm:$0xf0]  }
 0x2b1   :  { %6504 = vst.msk [vmem:[%s13127_s1 + $0x48] sm:$0xff] %vm3395_vm6, %v3591_v63   ;;  %v6759_v40 = vld [vmem:[%s13126_s0 + $0x882] ss:$8 sm:$0xf]  }
 0x2b2   :  { %4227 = vrot.lane.b32.xlu0 %v4226_v60, %s7034_s28  ;;  %v3624_v3 = vpop.permute.xlu1 %3623   ;;  %v4402_v60 = vsel %vm4_vm0, %v6724_v57, %v6723_v56  ;;  %v6760_v41 = vld [vmem:[%s13126_s0 + $0x882] ss:$8 sm:$0xf0]  }
 0x2b3   :  { %6513 = vst.msk [vmem:[%s13127_s1 + $0xa8] sm:$0xff] %vm3395_vm6, %v3624_v3   ;;  %v6768_v45 = vld [vmem:[%s13126_s0 + $0xb82] ss:$8 sm:$0xf]  }
 0x2b4   :  { %v3613_v7 = vpop.permute.xlu0 %3612   ;;  %4260 = vrot.lane.b32.xlu1 %v4259_v2, %s7034_s28  ;;  %v4435_v2 = vsel %vm4_vm0, %v6733_v62, %v6732_v61  ;;  %v6769_v46 = vld [vmem:[%s13126_s0 + $0xb82] ss:$8 sm:$0xf0]  }
 0x2b5   :  { %6510 = vst.msk [vmem:[%s13127_s1 + $0x88] sm:$0xff] %vm3395_vm6, %v3613_v7   ;;  %v6765_v48 = vld [vmem:[%s13126_s0 + $0xa82] ss:$8 sm:$0xf]  }
 0x2b6   :  { %4249 = vrot.lane.b32.xlu0 %v4248_v4, %s7034_s28  ;;  %v3646_v11 = vpop.permute.xlu1 %3645   ;;  %v4424_v4 = vsel %vm4_vm0, %v6730_v1, %v6729_v0  ;;  %v6766_v49 = vld [vmem:[%s13126_s0 + $0xa82] ss:$8 sm:$0xf0]  }
 0x2b7   :  { %6519 = vst.msk [vmem:[%s13127_s1 + $0xe8] sm:$0xff] %vm3395_vm6, %v3646_v11   ;;  %v6774_v53 = vld [vmem:[%s13126_s0 + $0xd82] ss:$8 sm:$0xf]  }
 0x2b8   :  { %v3635_v15 = vpop.permute.xlu0 %3634   ;;  %4282 = vrot.lane.b32.xlu1 %v4281_v10, %s7034_s28  ;;  %v4457_v10 = vsel %vm4_vm0, %v6739_v6, %v6738_v5  ;;  %v6775_v54 = vld [vmem:[%s13126_s0 + $0xd82] ss:$8 sm:$0xf0]  }
 0x2b9   :  { %6516 = vst.msk [vmem:[%s13127_s1 + $0xc8] sm:$0xff] %vm3395_vm6, %v3635_v15   ;;  %v6771_v56 = vld [vmem:[%s13126_s0 + $0xc82] ss:$8 sm:$0xf]  }
 0x2ba   :  { %4271 = vrot.lane.b32.xlu0 %v4270_v12, %s7034_s28  ;;  %v3668_v19 = vpop.permute.xlu1 %3667   ;;  %v4446_v12 = vsel %vm4_vm0, %v6736_v9, %v6735_v8  ;;  %v6772_v57 = vld [vmem:[%s13126_s0 + $0xc82] ss:$8 sm:$0xf0]  }
 0x2bb   :  { %6525 = vst.msk [vmem:[%s13127_s1 + $0x128] sm:$0xff] %vm3395_vm6, %v3668_v19   ;;  %v6780_v61 = vld [vmem:[%s13126_s0 + $0xf82] ss:$8 sm:$0xf]  }
 0x2bc   :  { %v3657_v23 = vpop.permute.xlu0 %3656   ;;  %4304 = vrot.lane.b32.xlu1 %v4303_v18, %s7034_s28  ;;  %v4479_v18 = vsel %vm4_vm0, %v6745_v14, %v6744_v13  ;;  %v6781_v62 = vld [vmem:[%s13126_s0 + $0xf82] ss:$8 sm:$0xf0]  }
 0x2bd   :  { %6522 = vst.msk [vmem:[%s13127_s1 + $0x108] sm:$0xff] %vm3395_vm6, %v3657_v23   ;;  %v6777_v0 = vld [vmem:[%s13126_s0 + $0xe82] ss:$8 sm:$0xf]  }
 0x2be   :  { %4293 = vrot.lane.b32.xlu0 %v4292_v20, %s7034_s28  ;;  %v3690_v27 = vpop.permute.xlu1 %3689   ;;  %v4468_v20 = vsel %vm4_vm0, %v6742_v17, %v6741_v16  ;;  %v6778_v1 = vld [vmem:[%s13126_s0 + $0xe82] ss:$8 sm:$0xf0]  }
 0x2bf   :  { %6531 = vst.msk [vmem:[%s13127_s1 + $0x168] sm:$0xff] %vm3395_vm6, %v3690_v27   ;;  %v6786_v5 = vld [vmem:[%s13126_s0 + $0x1c2] ss:$8 sm:$0xf]  }
 0x2c0   :  { %v3679_v31 = vpop.permute.xlu0 %3678   ;;  %4326 = vrot.lane.b32.xlu1 %v4325_v26, %s7034_s28  ;;  %v4501_v26 = vsel %vm4_vm0, %v6751_v22, %v6750_v21  ;;  %v6787_v6 = vld [vmem:[%s13126_s0 + $0x1c2] ss:$8 sm:$0xf0]  }
 0x2c1   :  { %6528 = vst.msk [vmem:[%s13127_s1 + $0x148] sm:$0xff] %vm3395_vm6, %v3679_v31   ;;  %v6783_v8 = vld [vmem:[%s13126_s0 + $0xc2] ss:$8 sm:$0xf]  }
 0x2c2   :  { %4315 = vrot.lane.b32.xlu0 %v4314_v28, %s7034_s28  ;;  %v3712_v35 = vpop.permute.xlu1 %3711   ;;  %v4490_v28 = vsel %vm4_vm0, %v6748_v25, %v6747_v24  ;;  %v6784_v9 = vld [vmem:[%s13126_s0 + $0xc2] ss:$8 sm:$0xf0]  }
 0x2c3   :  { %6537 = vst.msk [vmem:[%s13127_s1 + $0x1a8] sm:$0xff] %vm3395_vm6, %v3712_v35   ;;  %v6792_v13 = vld [vmem:[%s13126_s0 + $0x3c2] ss:$8 sm:$0xf]  }
 0x2c4   :  { %v3701_v39 = vpop.permute.xlu0 %3700   ;;  %4348 = vrot.lane.b32.xlu1 %v4347_v34, %s7034_s28  ;;  %v4523_v34 = vsel %vm4_vm0, %v6757_v30, %v6756_v29  ;;  %v6793_v14 = vld [vmem:[%s13126_s0 + $0x3c2] ss:$8 sm:$0xf0]  }
 0x2c5   :  { %6534 = vst.msk [vmem:[%s13127_s1 + $0x188] sm:$0xff] %vm3395_vm6, %v3701_v39   ;;  %v6789_v16 = vld [vmem:[%s13126_s0 + $0x2c2] ss:$8 sm:$0xf]  }
 0x2c6   :  { %4337 = vrot.lane.b32.xlu0 %v4336_v36, %s7034_s28  ;;  %v3734_v43 = vpop.permute.xlu1 %3733   ;;  %v4512_v36 = vsel %vm4_vm0, %v6754_v33, %v6753_v32  ;;  %v6790_v17 = vld [vmem:[%s13126_s0 + $0x2c2] ss:$8 sm:$0xf0]  }
 0x2c7   :  { %6543 = vst.msk [vmem:[%s13127_s1 + $0x1e8] sm:$0xff] %vm3395_vm6, %v3734_v43   ;;  %v6798_v21 = vld [vmem:[%s13126_s0 + $0x5c2] ss:$8 sm:$0xf]  }
 0x2c8   :  { %v3723_v47 = vpop.permute.xlu0 %3722   ;;  %4370 = vrot.lane.b32.xlu1 %v4369_v42, %s7034_s28  ;;  %v4545_v42 = vsel %vm4_vm0, %v6763_v38, %v6762_v37  ;;  %v6799_v22 = vld [vmem:[%s13126_s0 + $0x5c2] ss:$8 sm:$0xf0]  }
 0x2c9   :  { %6540 = vst.msk [vmem:[%s13127_s1 + $0x1c8] sm:$0xff] %vm3395_vm6, %v3723_v47   ;;  %v6795_v24 = vld [vmem:[%s13126_s0 + $0x4c2] ss:$8 sm:$0xf]  }
 0x2ca   :  { %4359 = vrot.lane.b32.xlu0 %v4358_v44, %s7034_s28  ;;  %v3756_v51 = vpop.permute.xlu1 %3755   ;;  %v4534_v44 = vsel %vm4_vm0, %v6760_v41, %v6759_v40  ;;  %v6796_v25 = vld [vmem:[%s13126_s0 + $0x4c2] ss:$8 sm:$0xf0]  }
 0x2cb   :  { %6549 = vst.msk [vmem:[%s13127_s1 + $0x30] sm:$0xff] %vm3395_vm6, %v3756_v51   ;;  %v6804_v29 = vld [vmem:[%s13126_s0 + $0x7c2] ss:$8 sm:$0xf]  }
 0x2cc   :  { %v3745_v55 = vpop.permute.xlu0 %3744   ;;  %4392 = vrot.lane.b32.xlu1 %v4391_v50, %s7034_s28  ;;  %v4567_v50 = vsel %vm4_vm0, %v6769_v46, %v6768_v45  ;;  %v6805_v30 = vld [vmem:[%s13126_s0 + $0x7c2] ss:$8 sm:$0xf0]  }
 0x2cd   :  { %6546 = vst.msk [vmem:[%s13127_s1 + $0x10] sm:$0xff] %vm3395_vm6, %v3745_v55   ;;  %v6801_v32 = vld [vmem:[%s13126_s0 + $0x6c2] ss:$8 sm:$0xf]  }
 0x2ce   :  { %4381 = vrot.lane.b32.xlu0 %v4380_v52, %s7034_s28  ;;  %v3778_v59 = vpop.permute.xlu1 %3777   ;;  %v4556_v52 = vsel %vm4_vm0, %v6766_v49, %v6765_v48  ;;  %v6802_v33 = vld [vmem:[%s13126_s0 + $0x6c2] ss:$8 sm:$0xf0]  }
 0x2cf   :  { %6555 = vst.msk [vmem:[%s13127_s1 + $0x70] sm:$0xff] %vm3395_vm6, %v3778_v59   ;;  %v6810_v37 = vld [vmem:[%s13126_s0 + $0x9c2] ss:$8 sm:$0xf]  }
 0x2d0   :  { %v3767_v63 = vpop.permute.xlu0 %3766   ;;  %4414 = vrot.lane.b32.xlu1 %v4413_v58, %s7034_s28  ;;  %v4589_v58 = vsel %vm4_vm0, %v6775_v54, %v6774_v53  ;;  %v6811_v38 = vld [vmem:[%s13126_s0 + $0x9c2] ss:$8 sm:$0xf0]  }
 0x2d1   :  { %6552 = vst.msk [vmem:[%s13127_s1 + $0x50] sm:$0xff] %vm3395_vm6, %v3767_v63   ;;  %v6807_v40 = vld [vmem:[%s13126_s0 + $0x8c2] ss:$8 sm:$0xf]  }
 0x2d2   :  { %4403 = vrot.lane.b32.xlu0 %v4402_v60, %s7034_s28  ;;  %v3800_v3 = vpop.permute.xlu1 %3799   ;;  %v4578_v60 = vsel %vm4_vm0, %v6772_v57, %v6771_v56  ;;  %v6808_v41 = vld [vmem:[%s13126_s0 + $0x8c2] ss:$8 sm:$0xf0]  }
 0x2d3   :  { %6561 = vst.msk [vmem:[%s13127_s1 + $0xb0] sm:$0xff] %vm3395_vm6, %v3800_v3   ;;  %v6816_v45 = vld [vmem:[%s13126_s0 + $0xbc2] ss:$8 sm:$0xf]  }
 0x2d4   :  { %v3789_v7 = vpop.permute.xlu0 %3788   ;;  %4436 = vrot.lane.b32.xlu1 %v4435_v2, %s7034_s28  ;;  %v4611_v2 = vsel %vm4_vm0, %v6781_v62, %v6780_v61  ;;  %v6817_v46 = vld [vmem:[%s13126_s0 + $0xbc2] ss:$8 sm:$0xf0]  }
 0x2d5   :  { %6558 = vst.msk [vmem:[%s13127_s1 + $0x90] sm:$0xff] %vm3395_vm6, %v3789_v7   ;;  %v6813_v48 = vld [vmem:[%s13126_s0 + $0xac2] ss:$8 sm:$0xf]  }
 0x2d6   :  { %4425 = vrot.lane.b32.xlu0 %v4424_v4, %s7034_s28  ;;  %v3822_v11 = vpop.permute.xlu1 %3821   ;;  %v4600_v4 = vsel %vm4_vm0, %v6778_v1, %v6777_v0  ;;  %v6814_v49 = vld [vmem:[%s13126_s0 + $0xac2] ss:$8 sm:$0xf0]  }
 0x2d7   :  { %6567 = vst.msk [vmem:[%s13127_s1 + $0xf0] sm:$0xff] %vm3395_vm6, %v3822_v11   ;;  %v6822_v53 = vld [vmem:[%s13126_s0 + $0xdc2] ss:$8 sm:$0xf]  }
 0x2d8   :  { %v3811_v15 = vpop.permute.xlu0 %3810   ;;  %4458 = vrot.lane.b32.xlu1 %v4457_v10, %s7034_s28  ;;  %v4633_v10 = vsel %vm4_vm0, %v6787_v6, %v6786_v5  ;;  %v6823_v54 = vld [vmem:[%s13126_s0 + $0xdc2] ss:$8 sm:$0xf0]   ;;  %v6833_v5 = vld [vmem:[%s13126_s0 + $0x101] ss:$8 sm:$0xf]  }
 0x2d9   :  { %6564 = vst.msk [vmem:[%s13127_s1 + $0xd0] sm:$0xff] %vm3395_vm6, %v3811_v15   ;;  %v6819_v56 = vld [vmem:[%s13126_s0 + $0xcc2] ss:$8 sm:$0xf]  }
 0x2da   :  { %4447 = vrot.lane.b32.xlu0 %v4446_v12, %s7034_s28  ;;  %v3844_v19 = vpop.permute.xlu1 %3843   ;;  %v4622_v12 = vsel %vm4_vm0, %v6784_v9, %v6783_v8  ;;  %v6820_v57 = vld [vmem:[%s13126_s0 + $0xcc2] ss:$8 sm:$0xf0]   ;;  %v6834_v6 = vld [vmem:[%s13126_s0 + $0x101] ss:$8 sm:$0xf0]  }
 0x2db   :  { %6573 = vst.msk [vmem:[%s13127_s1 + $0x130] sm:$0xff] %vm3395_vm6, %v3844_v19   ;;  %v6828_v61 = vld [vmem:[%s13126_s0 + $0xfc2] ss:$8 sm:$0xf]  }
 0x2dc   :  { %v3833_v23 = vpop.permute.xlu0 %3832   ;;  %4480 = vrot.lane.b32.xlu1 %v4479_v18, %s7034_s28  ;;  %v4655_v18 = vsel %vm4_vm0, %v6793_v14, %v6792_v13  ;;  %v6829_v62 = vld [vmem:[%s13126_s0 + $0xfc2] ss:$8 sm:$0xf0]   ;;  %v6831_v8 = vld [vmem:[%s13126_s0 + $0x1] ss:$8 sm:$0xf]  }
 0x2dd   :  { %6570 = vst.msk [vmem:[%s13127_s1 + $0x110] sm:$0xff] %vm3395_vm6, %v3833_v23   ;;  %v6825_v0 = vld [vmem:[%s13126_s0 + $0xec2] ss:$8 sm:$0xf]  }
 0x2de   :  { %4469 = vrot.lane.b32.xlu0 %v4468_v20, %s7034_s28  ;;  %v3866_v27 = vpop.permute.xlu1 %3865   ;;  %v4644_v20 = vsel %vm4_vm0, %v6790_v17, %v6789_v16  ;;  %v6826_v1 = vld [vmem:[%s13126_s0 + $0xec2] ss:$8 sm:$0xf0]   ;;  %v6832_v9 = vld [vmem:[%s13126_s0 + $0x1] ss:$8 sm:$0xf0]  }
 0x2df   :  { %6579 = vst.msk [vmem:[%s13127_s1 + $0x170] sm:$0xff] %vm3395_vm6, %v3866_v27   ;;  %v6839_v13 = vld [vmem:[%s13126_s0 + $0x301] ss:$8 sm:$0xf]  }
 0x2e0   :  { %v3855_v31 = vpop.permute.xlu0 %3854   ;;  %4502 = vrot.lane.b32.xlu1 %v4501_v26, %s7034_s28  ;;  %v4677_v26 = vsel %vm4_vm0, %v6799_v22, %v6798_v21  ;;  %v6840_v14 = vld [vmem:[%s13126_s0 + $0x301] ss:$8 sm:$0xf0]  }
 0x2e1   :  { %6576 = vst.msk [vmem:[%s13127_s1 + $0x150] sm:$0xff] %vm3395_vm6, %v3855_v31   ;;  %v6836_v16 = vld [vmem:[%s13126_s0 + $0x201] ss:$8 sm:$0xf]  }
 0x2e2   :  { %4491 = vrot.lane.b32.xlu0 %v4490_v28, %s7034_s28  ;;  %v3888_v35 = vpop.permute.xlu1 %3887   ;;  %v4666_v28 = vsel %vm4_vm0, %v6796_v25, %v6795_v24  ;;  %v6837_v17 = vld [vmem:[%s13126_s0 + $0x201] ss:$8 sm:$0xf0]  }
 0x2e3   :  { %6585 = vst.msk [vmem:[%s13127_s1 + $0x1b0] sm:$0xff] %vm3395_vm6, %v3888_v35   ;;  %v6845_v21 = vld [vmem:[%s13126_s0 + $0x501] ss:$8 sm:$0xf]  }
 0x2e4   :  { %v3877_v39 = vpop.permute.xlu0 %3876   ;;  %4524 = vrot.lane.b32.xlu1 %v4523_v34, %s7034_s28  ;;  %v4699_v34 = vsel %vm4_vm0, %v6805_v30, %v6804_v29  ;;  %v6846_v22 = vld [vmem:[%s13126_s0 + $0x501] ss:$8 sm:$0xf0]  }
 0x2e5   :  { %6582 = vst.msk [vmem:[%s13127_s1 + $0x190] sm:$0xff] %vm3395_vm6, %v3877_v39   ;;  %v6842_v24 = vld [vmem:[%s13126_s0 + $0x401] ss:$8 sm:$0xf]  }
 0x2e6   :  { %4513 = vrot.lane.b32.xlu0 %v4512_v36, %s7034_s28  ;;  %v3910_v43 = vpop.permute.xlu1 %3909   ;;  %v4688_v36 = vsel %vm4_vm0, %v6802_v33, %v6801_v32  ;;  %v6843_v25 = vld [vmem:[%s13126_s0 + $0x401] ss:$8 sm:$0xf0]  }
 0x2e7   :  { %6591 = vst.msk [vmem:[%s13127_s1 + $0x1f0] sm:$0xff] %vm3395_vm6, %v3910_v43   ;;  %v6851_v29 = vld [vmem:[%s13126_s0 + $0x701] ss:$8 sm:$0xf]  }
 0x2e8   :  { %v3899_v47 = vpop.permute.xlu0 %3898   ;;  %4546 = vrot.lane.b32.xlu1 %v4545_v42, %s7034_s28  ;;  %v4721_v42 = vsel %vm4_vm0, %v6811_v38, %v6810_v37  ;;  %v6852_v30 = vld [vmem:[%s13126_s0 + $0x701] ss:$8 sm:$0xf0]  }
 0x2e9   :  { %6588 = vst.msk [vmem:[%s13127_s1 + $0x1d0] sm:$0xff] %vm3395_vm6, %v3899_v47   ;;  %v6848_v32 = vld [vmem:[%s13126_s0 + $0x601] ss:$8 sm:$0xf]  }
 0x2ea   :  { %4535 = vrot.lane.b32.xlu0 %v4534_v44, %s7034_s28  ;;  %v3932_v51 = vpop.permute.xlu1 %3931   ;;  %v4710_v44 = vsel %vm4_vm0, %v6808_v41, %v6807_v40  ;;  %v6849_v33 = vld [vmem:[%s13126_s0 + $0x601] ss:$8 sm:$0xf0]  }
 0x2eb   :  { %6597 = vst.msk [vmem:[%s13127_s1 + $0x38] sm:$0xff] %vm3395_vm6, %v3932_v51   ;;  %v6857_v37 = vld [vmem:[%s13126_s0 + $0x901] ss:$8 sm:$0xf]  }
 0x2ec   :  { %v3921_v55 = vpop.permute.xlu0 %3920   ;;  %4568 = vrot.lane.b32.xlu1 %v4567_v50, %s7034_s28  ;;  %v4743_v50 = vsel %vm4_vm0, %v6817_v46, %v6816_v45  ;;  %v6858_v38 = vld [vmem:[%s13126_s0 + $0x901] ss:$8 sm:$0xf0]  }
 0x2ed   :  { %6594 = vst.msk [vmem:[%s13127_s1 + $0x18] sm:$0xff] %vm3395_vm6, %v3921_v55   ;;  %v6854_v40 = vld [vmem:[%s13126_s0 + $0x801] ss:$8 sm:$0xf]  }
 0x2ee   :  { %4557 = vrot.lane.b32.xlu0 %v4556_v52, %s7034_s28  ;;  %v3954_v59 = vpop.permute.xlu1 %3953   ;;  %v4732_v52 = vsel %vm4_vm0, %v6814_v49, %v6813_v48  ;;  %v6855_v41 = vld [vmem:[%s13126_s0 + $0x801] ss:$8 sm:$0xf0]  }
 0x2ef   :  { %6603 = vst.msk [vmem:[%s13127_s1 + $0x78] sm:$0xff] %vm3395_vm6, %v3954_v59   ;;  %v6863_v45 = vld [vmem:[%s13126_s0 + $0xb01] ss:$8 sm:$0xf]  }
 0x2f0   :  { %v3943_v63 = vpop.permute.xlu0 %3942   ;;  %4590 = vrot.lane.b32.xlu1 %v4589_v58, %s7034_s28  ;;  %v4765_v58 = vsel %vm4_vm0, %v6823_v54, %v6822_v53  ;;  %v6864_v46 = vld [vmem:[%s13126_s0 + $0xb01] ss:$8 sm:$0xf0]  }
 0x2f1   :  { %6600 = vst.msk [vmem:[%s13127_s1 + $0x58] sm:$0xff] %vm3395_vm6, %v3943_v63   ;;  %v6860_v48 = vld [vmem:[%s13126_s0 + $0xa01] ss:$8 sm:$0xf]  }
 0x2f2   :  { %4579 = vrot.lane.b32.xlu0 %v4578_v60, %s7034_s28  ;;  %v3976_v3 = vpop.permute.xlu1 %3975   ;;  %v4754_v60 = vsel %vm4_vm0, %v6820_v57, %v6819_v56  ;;  %v6861_v49 = vld [vmem:[%s13126_s0 + $0xa01] ss:$8 sm:$0xf0]  }
 0x2f3   :  { %6609 = vst.msk [vmem:[%s13127_s1 + $0xb8] sm:$0xff] %vm3395_vm6, %v3976_v3   ;;  %v6869_v53 = vld [vmem:[%s13126_s0 + $0xd01] ss:$8 sm:$0xf]  }
 0x2f4   :  { %v3965_v7 = vpop.permute.xlu0 %3964   ;;  %4612 = vrot.lane.b32.xlu1 %v4611_v2, %s7034_s28  ;;  %v4787_v2 = vsel %vm4_vm0, %v6829_v62, %v6828_v61  ;;  %v6870_v54 = vld [vmem:[%s13126_s0 + $0xd01] ss:$8 sm:$0xf0]  }
 0x2f5   :  { %6606 = vst.msk [vmem:[%s13127_s1 + $0x98] sm:$0xff] %vm3395_vm6, %v3965_v7   ;;  %v6866_v56 = vld [vmem:[%s13126_s0 + $0xc01] ss:$8 sm:$0xf]  }
 0x2f6   :  { %4601 = vrot.lane.b32.xlu0 %v4600_v4, %s7034_s28  ;;  %v3998_v11 = vpop.permute.xlu1 %3997   ;;  %v4776_v4 = vsel %vm4_vm0, %v6826_v1, %v6825_v0  ;;  %v6867_v57 = vld [vmem:[%s13126_s0 + $0xc01] ss:$8 sm:$0xf0]  }
 0x2f7   :  { %6615 = vst.msk [vmem:[%s13127_s1 + $0xf8] sm:$0xff] %vm3395_vm6, %v3998_v11   ;;  %v6875_v61 = vld [vmem:[%s13126_s0 + $0xf01] ss:$8 sm:$0xf]  }
 0x2f8   :  { %v3987_v15 = vpop.permute.xlu0 %3986   ;;  %4634 = vrot.lane.b32.xlu1 %v4633_v10, %s7034_s28  ;;  %v4808_v10 = vsel %vm4_vm0, %v6834_v6, %v6833_v5  ;;  %v6876_v62 = vld [vmem:[%s13126_s0 + $0xf01] ss:$8 sm:$0xf0]  }
 0x2f9   :  { %6612 = vst.msk [vmem:[%s13127_s1 + $0xd8] sm:$0xff] %vm3395_vm6, %v3987_v15   ;;  %v6872_v0 = vld [vmem:[%s13126_s0 + $0xe01] ss:$8 sm:$0xf]  }
 0x2fa   :  { %4623 = vrot.lane.b32.xlu0 %v4622_v12, %s7034_s28  ;;  %v4020_v19 = vpop.permute.xlu1 %4019   ;;  %v4798_v12 = vsel %vm4_vm0, %v6832_v9, %v6831_v8  ;;  %v6873_v1 = vld [vmem:[%s13126_s0 + $0xe01] ss:$8 sm:$0xf0]  }
 0x2fb   :  { %6621 = vst.msk [vmem:[%s13127_s1 + $0x138] sm:$0xff] %vm3395_vm6, %v4020_v19   ;;  %v6881_v5 = vld [vmem:[%s13126_s0 + $0x141] ss:$8 sm:$0xf]  }
 0x2fc   :  { %v4009_v23 = vpop.permute.xlu0 %4008   ;;  %4656 = vrot.lane.b32.xlu1 %v4655_v18, %s7034_s28  ;;  %v4830_v18 = vsel %vm4_vm0, %v6840_v14, %v6839_v13  ;;  %v6882_v6 = vld [vmem:[%s13126_s0 + $0x141] ss:$8 sm:$0xf0]  }
 0x2fd   :  { %6618 = vst.msk [vmem:[%s13127_s1 + $0x118] sm:$0xff] %vm3395_vm6, %v4009_v23   ;;  %v6878_v8 = vld [vmem:[%s13126_s0 + $0x41] ss:$8 sm:$0xf]  }
 0x2fe   :  { %4645 = vrot.lane.b32.xlu0 %v4644_v20, %s7034_s28  ;;  %v4042_v27 = vpop.permute.xlu1 %4041   ;;  %v4819_v20 = vsel %vm4_vm0, %v6837_v17, %v6836_v16  ;;  %v6879_v9 = vld [vmem:[%s13126_s0 + $0x41] ss:$8 sm:$0xf0]  }
 0x2ff   :  { %6627 = vst.msk [vmem:[%s13127_s1 + $0x178] sm:$0xff] %vm3395_vm6, %v4042_v27   ;;  %v6887_v13 = vld [vmem:[%s13126_s0 + $0x341] ss:$8 sm:$0xf]  }
 0x300   :  { %v4031_v31 = vpop.permute.xlu0 %4030   ;;  %4678 = vrot.lane.b32.xlu1 %v4677_v26, %s7034_s28  ;;  %v4852_v26 = vsel %vm4_vm0, %v6846_v22, %v6845_v21  ;;  %v6888_v14 = vld [vmem:[%s13126_s0 + $0x341] ss:$8 sm:$0xf0]  }
 0x301   :  { %6624 = vst.msk [vmem:[%s13127_s1 + $0x158] sm:$0xff] %vm3395_vm6, %v4031_v31   ;;  %v6884_v16 = vld [vmem:[%s13126_s0 + $0x241] ss:$8 sm:$0xf]  }
 0x302   :  { %4667 = vrot.lane.b32.xlu0 %v4666_v28, %s7034_s28  ;;  %v4064_v35 = vpop.permute.xlu1 %4063   ;;  %v4841_v28 = vsel %vm4_vm0, %v6843_v25, %v6842_v24  ;;  %v6885_v17 = vld [vmem:[%s13126_s0 + $0x241] ss:$8 sm:$0xf0]  }
 0x303   :  { %6633 = vst.msk [vmem:[%s13127_s1 + $0x1b8] sm:$0xff] %vm3395_vm6, %v4064_v35   ;;  %v6893_v21 = vld [vmem:[%s13126_s0 + $0x541] ss:$8 sm:$0xf]  }
 0x304   :  { %v4053_v39 = vpop.permute.xlu0 %4052   ;;  %4700 = vrot.lane.b32.xlu1 %v4699_v34, %s7034_s28  ;;  %v4874_v34 = vsel %vm4_vm0, %v6852_v30, %v6851_v29  ;;  %v6894_v22 = vld [vmem:[%s13126_s0 + $0x541] ss:$8 sm:$0xf0]  }
 0x305   :  { %6630 = vst.msk [vmem:[%s13127_s1 + $0x198] sm:$0xff] %vm3395_vm6, %v4053_v39   ;;  %v6890_v24 = vld [vmem:[%s13126_s0 + $0x441] ss:$8 sm:$0xf]  }
 0x306   :  { %4689 = vrot.lane.b32.xlu0 %v4688_v36, %s7034_s28  ;;  %v4086_v43 = vpop.permute.xlu1 %4085   ;;  %v4863_v36 = vsel %vm4_vm0, %v6849_v33, %v6848_v32  ;;  %v6891_v25 = vld [vmem:[%s13126_s0 + $0x441] ss:$8 sm:$0xf0]  }
 0x307   :  { %6639 = vst.msk [vmem:[%s13127_s1 + $0x1f8] sm:$0xff] %vm3395_vm6, %v4086_v43   ;;  %v6899_v29 = vld [vmem:[%s13126_s0 + $0x741] ss:$8 sm:$0xf]  }
 0x308   :  { %v4075_v47 = vpop.permute.xlu0 %4074   ;;  %4722 = vrot.lane.b32.xlu1 %v4721_v42, %s7034_s28  ;;  %v4896_v42 = vsel %vm4_vm0, %v6858_v38, %v6857_v37  ;;  %v6900_v30 = vld [vmem:[%s13126_s0 + $0x741] ss:$8 sm:$0xf0]  }
 0x309   :  { %6636 = vst.msk [vmem:[%s13127_s1 + $0x1d8] sm:$0xff] %vm3395_vm6, %v4075_v47   ;;  %v6896_v32 = vld [vmem:[%s13126_s0 + $0x641] ss:$8 sm:$0xf]  }
 0x30a   :  { %4711 = vrot.lane.b32.xlu0 %v4710_v44, %s7034_s28  ;;  %v4107_v51 = vpop.permute.xlu1 %4106   ;;  %v4885_v44 = vsel %vm4_vm0, %v6855_v41, %v6854_v40  ;;  %v6897_v33 = vld [vmem:[%s13126_s0 + $0x641] ss:$8 sm:$0xf0]  }
 0x30b   :  { %6644 = vst.msk [vmem:[%s13127_s1 + $0x20] sm:$0xff] %vm4098_vm7, %v4107_v51   ;;  %v6905_v37 = vld [vmem:[%s13126_s0 + $0x941] ss:$8 sm:$0xf]  }
 0x30c   :  { %v4097_v55 = vpop.permute.xlu0 %4096   ;;  %4744 = vrot.lane.b32.xlu1 %v4743_v50, %s7034_s28  ;;  %v4918_v50 = vsel %vm4_vm0, %v6864_v46, %v6863_v45  ;;  %v6906_v38 = vld [vmem:[%s13126_s0 + $0x941] ss:$8 sm:$0xf0]  }
 0x30d   :  { %4099 = vst.msk [vmem:[%s13127_s1] sm:$0xff] %vm4098_vm7, %v4097_v55   ;;  %v6902_v40 = vld [vmem:[%s13126_s0 + $0x841] ss:$8 sm:$0xf]  }
 0x30e   :  { %4733 = vrot.lane.b32.xlu0 %v4732_v52, %s7034_s28  ;;  %v4129_v59 = vpop.permute.xlu1 %4128   ;;  %v4907_v52 = vsel %vm4_vm0, %v6861_v49, %v6860_v48  ;;  %v6903_v41 = vld [vmem:[%s13126_s0 + $0x841] ss:$8 sm:$0xf0]  }
 0x30f   :  { %6650 = vst.msk [vmem:[%s13127_s1 + $0x60] sm:$0xff] %vm4098_vm7, %v4129_v59   ;;  %v6911_v45 = vld [vmem:[%s13126_s0 + $0xb41] ss:$8 sm:$0xf]  }
 0x310   :  { %v4118_v63 = vpop.permute.xlu0 %4117   ;;  %4766 = vrot.lane.b32.xlu1 %v4765_v58, %s7034_s28  ;;  %v4940_v58 = vsel %vm4_vm0, %v6870_v54, %v6869_v53  ;;  %v6912_v46 = vld [vmem:[%s13126_s0 + $0xb41] ss:$8 sm:$0xf0]  }
 0x311   :  { %6647 = vst.msk [vmem:[%s13127_s1 + $0x40] sm:$0xff] %vm4098_vm7, %v4118_v63   ;;  %v6908_v48 = vld [vmem:[%s13126_s0 + $0xa41] ss:$8 sm:$0xf]  }
 0x312   :  { %4755 = vrot.lane.b32.xlu0 %v4754_v60, %s7034_s28  ;;  %v4151_v3 = vpop.permute.xlu1 %4150   ;;  %v4929_v60 = vsel %vm4_vm0, %v6867_v57, %v6866_v56  ;;  %v6909_v49 = vld [vmem:[%s13126_s0 + $0xa41] ss:$8 sm:$0xf0]  }
 0x313   :  { %6656 = vst.msk [vmem:[%s13127_s1 + $0xa0] sm:$0xff] %vm4098_vm7, %v4151_v3   ;;  %v6917_v53 = vld [vmem:[%s13126_s0 + $0xd41] ss:$8 sm:$0xf]  }
 0x314   :  { %v4140_v7 = vpop.permute.xlu0 %4139   ;;  %4788 = vrot.lane.b32.xlu1 %v4787_v2, %s7034_s28  ;;  %v4962_v2 = vsel %vm4_vm0, %v6876_v62, %v6875_v61  ;;  %v6918_v54 = vld [vmem:[%s13126_s0 + $0xd41] ss:$8 sm:$0xf0]  }
 0x315   :  { %6653 = vst.msk [vmem:[%s13127_s1 + $0x80] sm:$0xff] %vm4098_vm7, %v4140_v7   ;;  %v6914_v56 = vld [vmem:[%s13126_s0 + $0xc41] ss:$8 sm:$0xf]  }
 0x316   :  { %4777 = vrot.lane.b32.xlu0 %v4776_v4, %s7034_s28  ;;  %v4173_v11 = vpop.permute.xlu1 %4172   ;;  %v4951_v4 = vsel %vm4_vm0, %v6873_v1, %v6872_v0  ;;  %v6915_v57 = vld [vmem:[%s13126_s0 + $0xc41] ss:$8 sm:$0xf0]  }
 0x317   :  { %6662 = vst.msk [vmem:[%s13127_s1 + $0xe0] sm:$0xff] %vm4098_vm7, %v4173_v11   ;;  %v6923_v61 = vld [vmem:[%s13126_s0 + $0xf41] ss:$8 sm:$0xf]  }
 0x318   :  { %v4162_v15 = vpop.permute.xlu0 %4161   ;;  %4809 = vrot.lane.b32.xlu1 %v4808_v10, %s7035_s19  ;;  %v4984_v10 = vsel %vm4_vm0, %v6882_v6, %v6881_v5  ;;  %v6924_v62 = vld [vmem:[%s13126_s0 + $0xf41] ss:$8 sm:$0xf0]  }
 0x319   :  { %6659 = vst.msk [vmem:[%s13127_s1 + $0xc0] sm:$0xff] %vm4098_vm7, %v4162_v15   ;;  %v6920_v0 = vld [vmem:[%s13126_s0 + $0xe41] ss:$8 sm:$0xf]  }
 0x31a   :  { %4799 = vrot.lane.b32.xlu0 %v4798_v12, %s7035_s19  ;;  %v4195_v19 = vpop.permute.xlu1 %4194   ;;  %v4973_v12 = vsel %vm4_vm0, %v6879_v9, %v6878_v8  ;;  %v6921_v1 = vld [vmem:[%s13126_s0 + $0xe41] ss:$8 sm:$0xf0]  }
 0x31b   :  { %6668 = vst.msk [vmem:[%s13127_s1 + $0x120] sm:$0xff] %vm4098_vm7, %v4195_v19   ;;  %v6929_v5 = vld [vmem:[%s13126_s0 + $0x181] ss:$8 sm:$0xf]  }
 0x31c   :  { %v4184_v23 = vpop.permute.xlu0 %4183   ;;  %4831 = vrot.lane.b32.xlu1 %v4830_v18, %s7035_s19  ;;  %v5006_v18 = vsel %vm4_vm0, %v6888_v14, %v6887_v13  ;;  %v6930_v6 = vld [vmem:[%s13126_s0 + $0x181] ss:$8 sm:$0xf0]  }
 0x31d   :  { %6665 = vst.msk [vmem:[%s13127_s1 + $0x100] sm:$0xff] %vm4098_vm7, %v4184_v23   ;;  %v6926_v8 = vld [vmem:[%s13126_s0 + $0x81] ss:$8 sm:$0xf]  }
 0x31e   :  { %4820 = vrot.lane.b32.xlu0 %v4819_v20, %s7035_s19  ;;  %v4217_v27 = vpop.permute.xlu1 %4216   ;;  %v4995_v20 = vsel %vm4_vm0, %v6885_v17, %v6884_v16  ;;  %v6927_v9 = vld [vmem:[%s13126_s0 + $0x81] ss:$8 sm:$0xf0]  }
 0x31f   :  { %6674 = vst.msk [vmem:[%s13127_s1 + $0x160] sm:$0xff] %vm4098_vm7, %v4217_v27   ;;  %v6935_v13 = vld [vmem:[%s13126_s0 + $0x381] ss:$8 sm:$0xf]  }
 0x320   :  { %v4206_v31 = vpop.permute.xlu0 %4205   ;;  %4853 = vrot.lane.b32.xlu1 %v4852_v26, %s7035_s19  ;;  %v5028_v26 = vsel %vm4_vm0, %v6894_v22, %v6893_v21  ;;  %v6936_v14 = vld [vmem:[%s13126_s0 + $0x381] ss:$8 sm:$0xf0]  }
 0x321   :  { %6671 = vst.msk [vmem:[%s13127_s1 + $0x140] sm:$0xff] %vm4098_vm7, %v4206_v31   ;;  %v6932_v16 = vld [vmem:[%s13126_s0 + $0x281] ss:$8 sm:$0xf]  }
 0x322   :  { %4842 = vrot.lane.b32.xlu0 %v4841_v28, %s7035_s19  ;;  %v4239_v35 = vpop.permute.xlu1 %4238   ;;  %v5017_v28 = vsel %vm4_vm0, %v6891_v25, %v6890_v24  ;;  %v6933_v17 = vld [vmem:[%s13126_s0 + $0x281] ss:$8 sm:$0xf0]  }
 0x323   :  { %6680 = vst.msk [vmem:[%s13127_s1 + $0x1a0] sm:$0xff] %vm4098_vm7, %v4239_v35   ;;  %v6941_v21 = vld [vmem:[%s13126_s0 + $0x581] ss:$8 sm:$0xf]  }
 0x324   :  { %v4228_v39 = vpop.permute.xlu0 %4227   ;;  %4875 = vrot.lane.b32.xlu1 %v4874_v34, %s7035_s19  ;;  %v5050_v34 = vsel %vm4_vm0, %v6900_v30, %v6899_v29  ;;  %v6942_v22 = vld [vmem:[%s13126_s0 + $0x581] ss:$8 sm:$0xf0]  }
 0x325   :  { %6677 = vst.msk [vmem:[%s13127_s1 + $0x180] sm:$0xff] %vm4098_vm7, %v4228_v39   ;;  %v6938_v24 = vld [vmem:[%s13126_s0 + $0x481] ss:$8 sm:$0xf]  }
 0x326   :  { %4864 = vrot.lane.b32.xlu0 %v4863_v36, %s7035_s19  ;;  %v4261_v43 = vpop.permute.xlu1 %4260   ;;  %v5039_v36 = vsel %vm4_vm0, %v6897_v33, %v6896_v32  ;;  %v6939_v25 = vld [vmem:[%s13126_s0 + $0x481] ss:$8 sm:$0xf0]  }
 0x327   :  { %6686 = vst.msk [vmem:[%s13127_s1 + $0x1e0] sm:$0xff] %vm4098_vm7, %v4261_v43   ;;  %v6947_v29 = vld [vmem:[%s13126_s0 + $0x781] ss:$8 sm:$0xf]  }
 0x328   :  { %v4250_v47 = vpop.permute.xlu0 %4249   ;;  %4897 = vrot.lane.b32.xlu1 %v4896_v42, %s7035_s19  ;;  %v5072_v42 = vsel %vm4_vm0, %v6906_v38, %v6905_v37  ;;  %v6948_v30 = vld [vmem:[%s13126_s0 + $0x781] ss:$8 sm:$0xf0]  }
 0x329   :  { %6683 = vst.msk [vmem:[%s13127_s1 + $0x1c0] sm:$0xff] %vm4098_vm7, %v4250_v47   ;;  %v6944_v32 = vld [vmem:[%s13126_s0 + $0x681] ss:$8 sm:$0xf]  }
 0x32a   :  { %4886 = vrot.lane.b32.xlu0 %v4885_v44, %s7035_s19  ;;  %v4283_v51 = vpop.permute.xlu1 %4282   ;;  %v5061_v44 = vsel %vm4_vm0, %v6903_v41, %v6902_v40  ;;  %v6945_v33 = vld [vmem:[%s13126_s0 + $0x681] ss:$8 sm:$0xf0]  }
 0x32b   :  { %6692 = vst.msk [vmem:[%s13127_s1 + $0x28] sm:$0xff] %vm4098_vm7, %v4283_v51   ;;  %v6953_v37 = vld [vmem:[%s13126_s0 + $0x981] ss:$8 sm:$0xf]  }
 0x32c   :  { %v4272_v55 = vpop.permute.xlu0 %4271   ;;  %4919 = vrot.lane.b32.xlu1 %v4918_v50, %s7035_s19  ;;  %v5094_v50 = vsel %vm4_vm0, %v6912_v46, %v6911_v45  ;;  %v6954_v38 = vld [vmem:[%s13126_s0 + $0x981] ss:$8 sm:$0xf0]  }
 0x32d   :  { %6689 = vst.msk [vmem:[%s13127_s1 + $0x8] sm:$0xff] %vm4098_vm7, %v4272_v55   ;;  %v6950_v40 = vld [vmem:[%s13126_s0 + $0x881] ss:$8 sm:$0xf]  }
 0x32e   :  { %4908 = vrot.lane.b32.xlu0 %v4907_v52, %s7035_s19  ;;  %v4305_v59 = vpop.permute.xlu1 %4304   ;;  %v5083_v52 = vsel %vm4_vm0, %v6909_v49, %v6908_v48  ;;  %v6951_v41 = vld [vmem:[%s13126_s0 + $0x881] ss:$8 sm:$0xf0]  }
 0x32f   :  { %6698 = vst.msk [vmem:[%s13127_s1 + $0x68] sm:$0xff] %vm4098_vm7, %v4305_v59   ;;  %v6959_v45 = vld [vmem:[%s13126_s0 + $0xb81] ss:$8 sm:$0xf]  }
 0x330   :  { %v4294_v63 = vpop.permute.xlu0 %4293   ;;  %4941 = vrot.lane.b32.xlu1 %v4940_v58, %s7035_s19  ;;  %v5116_v58 = vsel %vm4_vm0, %v6918_v54, %v6917_v53  ;;  %v6960_v46 = vld [vmem:[%s13126_s0 + $0xb81] ss:$8 sm:$0xf0]  }
 0x331   :  { %6695 = vst.msk [vmem:[%s13127_s1 + $0x48] sm:$0xff] %vm4098_vm7, %v4294_v63   ;;  %v6956_v48 = vld [vmem:[%s13126_s0 + $0xa81] ss:$8 sm:$0xf]  }
 0x332   :  { %4930 = vrot.lane.b32.xlu0 %v4929_v60, %s7035_s19  ;;  %v4327_v3 = vpop.permute.xlu1 %4326   ;;  %v5105_v60 = vsel %vm4_vm0, %v6915_v57, %v6914_v56  ;;  %v6957_v49 = vld [vmem:[%s13126_s0 + $0xa81] ss:$8 sm:$0xf0]  }
 0x333   :  { %6704 = vst.msk [vmem:[%s13127_s1 + $0xa8] sm:$0xff] %vm4098_vm7, %v4327_v3   ;;  %v6965_v53 = vld [vmem:[%s13126_s0 + $0xd81] ss:$8 sm:$0xf]  }
 0x334   :  { %v4316_v7 = vpop.permute.xlu0 %4315   ;;  %4963 = vrot.lane.b32.xlu1 %v4962_v2, %s7035_s19  ;;  %v5138_v2 = vsel %vm4_vm0, %v6924_v62, %v6923_v61  ;;  %v6966_v54 = vld [vmem:[%s13126_s0 + $0xd81] ss:$8 sm:$0xf0]  }
 0x335   :  { %6701 = vst.msk [vmem:[%s13127_s1 + $0x88] sm:$0xff] %vm4098_vm7, %v4316_v7   ;;  %v6962_v56 = vld [vmem:[%s13126_s0 + $0xc81] ss:$8 sm:$0xf]  }
 0x336   :  { %4952 = vrot.lane.b32.xlu0 %v4951_v4, %s7035_s19  ;;  %v4349_v11 = vpop.permute.xlu1 %4348   ;;  %v5127_v4 = vsel %vm4_vm0, %v6921_v1, %v6920_v0  ;;  %v6963_v57 = vld [vmem:[%s13126_s0 + $0xc81] ss:$8 sm:$0xf0]  }
 0x337   :  { %6710 = vst.msk [vmem:[%s13127_s1 + $0xe8] sm:$0xff] %vm4098_vm7, %v4349_v11   ;;  %v6971_v61 = vld [vmem:[%s13126_s0 + $0xf81] ss:$8 sm:$0xf]  }
 0x338   :  { %v4338_v15 = vpop.permute.xlu0 %4337   ;;  %4985 = vrot.lane.b32.xlu1 %v4984_v10, %s7035_s19  ;;  %v5160_v10 = vsel %vm4_vm0, %v6930_v6, %v6929_v5  ;;  %v6972_v62 = vld [vmem:[%s13126_s0 + $0xf81] ss:$8 sm:$0xf0]  }
 0x339   :  { %6707 = vst.msk [vmem:[%s13127_s1 + $0xc8] sm:$0xff] %vm4098_vm7, %v4338_v15   ;;  %v6968_v0 = vld [vmem:[%s13126_s0 + $0xe81] ss:$8 sm:$0xf]  }
 0x33a   :  { %4974 = vrot.lane.b32.xlu0 %v4973_v12, %s7035_s19  ;;  %v4371_v19 = vpop.permute.xlu1 %4370   ;;  %v5149_v12 = vsel %vm4_vm0, %v6927_v9, %v6926_v8  ;;  %v6969_v1 = vld [vmem:[%s13126_s0 + $0xe81] ss:$8 sm:$0xf0]  }
 0x33b   :  { %6716 = vst.msk [vmem:[%s13127_s1 + $0x128] sm:$0xff] %vm4098_vm7, %v4371_v19   ;;  %v6977_v5 = vld [vmem:[%s13126_s0 + $0x1c1] ss:$8 sm:$0xf]  }
 0x33c   :  { %v4360_v23 = vpop.permute.xlu0 %4359   ;;  %5007 = vrot.lane.b32.xlu1 %v5006_v18, %s7035_s19  ;;  %v5182_v18 = vsel %vm4_vm0, %v6936_v14, %v6935_v13  ;;  %v6978_v6 = vld [vmem:[%s13126_s0 + $0x1c1] ss:$8 sm:$0xf0]  }
 0x33d   :  { %6713 = vst.msk [vmem:[%s13127_s1 + $0x108] sm:$0xff] %vm4098_vm7, %v4360_v23   ;;  %v6974_v8 = vld [vmem:[%s13126_s0 + $0xc1] ss:$8 sm:$0xf]  }
 0x33e   :  { %4996 = vrot.lane.b32.xlu0 %v4995_v20, %s7035_s19  ;;  %v4393_v27 = vpop.permute.xlu1 %4392   ;;  %v5171_v20 = vsel %vm4_vm0, %v6933_v17, %v6932_v16  ;;  %v6975_v9 = vld [vmem:[%s13126_s0 + $0xc1] ss:$8 sm:$0xf0]  }
 0x33f   :  { %6722 = vst.msk [vmem:[%s13127_s1 + $0x168] sm:$0xff] %vm4098_vm7, %v4393_v27   ;;  %v6983_v13 = vld [vmem:[%s13126_s0 + $0x3c1] ss:$8 sm:$0xf]  }
 0x340   :  { %v4382_v31 = vpop.permute.xlu0 %4381   ;;  %5029 = vrot.lane.b32.xlu1 %v5028_v26, %s7035_s19  ;;  %v5204_v26 = vsel %vm4_vm0, %v6942_v22, %v6941_v21  ;;  %v6984_v14 = vld [vmem:[%s13126_s0 + $0x3c1] ss:$8 sm:$0xf0]  }
 0x341   :  { %6719 = vst.msk [vmem:[%s13127_s1 + $0x148] sm:$0xff] %vm4098_vm7, %v4382_v31   ;;  %v6980_v16 = vld [vmem:[%s13126_s0 + $0x2c1] ss:$8 sm:$0xf]  }
 0x342   :  { %5018 = vrot.lane.b32.xlu0 %v5017_v28, %s7035_s19  ;;  %v4415_v35 = vpop.permute.xlu1 %4414   ;;  %v5193_v28 = vsel %vm4_vm0, %v6939_v25, %v6938_v24  ;;  %v6981_v17 = vld [vmem:[%s13126_s0 + $0x2c1] ss:$8 sm:$0xf0]  }
 0x343   :  { %6728 = vst.msk [vmem:[%s13127_s1 + $0x1a8] sm:$0xff] %vm4098_vm7, %v4415_v35   ;;  %v6989_v21 = vld [vmem:[%s13126_s0 + $0x5c1] ss:$8 sm:$0xf]  }
 0x344   :  { %v4404_v39 = vpop.permute.xlu0 %4403   ;;  %5051 = vrot.lane.b32.xlu1 %v5050_v34, %s7035_s19  ;;  %v5226_v34 = vsel %vm4_vm0, %v6948_v30, %v6947_v29  ;;  %v6990_v22 = vld [vmem:[%s13126_s0 + $0x5c1] ss:$8 sm:$0xf0]  }
 0x345   :  { %6725 = vst.msk [vmem:[%s13127_s1 + $0x188] sm:$0xff] %vm4098_vm7, %v4404_v39   ;;  %v6986_v24 = vld [vmem:[%s13126_s0 + $0x4c1] ss:$8 sm:$0xf]  }
 0x346   :  { %5040 = vrot.lane.b32.xlu0 %v5039_v36, %s7035_s19  ;;  %v4437_v43 = vpop.permute.xlu1 %4436   ;;  %v5215_v36 = vsel %vm4_vm0, %v6945_v33, %v6944_v32  ;;  %v6987_v25 = vld [vmem:[%s13126_s0 + $0x4c1] ss:$8 sm:$0xf0]  }
 0x347   :  { %6734 = vst.msk [vmem:[%s13127_s1 + $0x1e8] sm:$0xff] %vm4098_vm7, %v4437_v43   ;;  %v6995_v29 = vld [vmem:[%s13126_s0 + $0x7c1] ss:$8 sm:$0xf]  }
 0x348   :  { %v4426_v47 = vpop.permute.xlu0 %4425   ;;  %5073 = vrot.lane.b32.xlu1 %v5072_v42, %s7035_s19  ;;  %v5248_v42 = vsel %vm4_vm0, %v6954_v38, %v6953_v37  ;;  %v6996_v30 = vld [vmem:[%s13126_s0 + $0x7c1] ss:$8 sm:$0xf0]  }
 0x349   :  { %6731 = vst.msk [vmem:[%s13127_s1 + $0x1c8] sm:$0xff] %vm4098_vm7, %v4426_v47   ;;  %v6992_v32 = vld [vmem:[%s13126_s0 + $0x6c1] ss:$8 sm:$0xf]  }
 0x34a   :  { %5062 = vrot.lane.b32.xlu0 %v5061_v44, %s7035_s19  ;;  %v4459_v51 = vpop.permute.xlu1 %4458   ;;  %v5237_v44 = vsel %vm4_vm0, %v6951_v41, %v6950_v40  ;;  %v6993_v33 = vld [vmem:[%s13126_s0 + $0x6c1] ss:$8 sm:$0xf0]  }
 0x34b   :  { %6740 = vst.msk [vmem:[%s13127_s1 + $0x30] sm:$0xff] %vm4098_vm7, %v4459_v51   ;;  %v7001_v37 = vld [vmem:[%s13126_s0 + $0x9c1] ss:$8 sm:$0xf]  }
 0x34c   :  { %v4448_v55 = vpop.permute.xlu0 %4447   ;;  %5095 = vrot.lane.b32.xlu1 %v5094_v50, %s7035_s19  ;;  %v5270_v50 = vsel %vm4_vm0, %v6960_v46, %v6959_v45  ;;  %v7002_v38 = vld [vmem:[%s13126_s0 + $0x9c1] ss:$8 sm:$0xf0]  }
 0x34d   :  { %6737 = vst.msk [vmem:[%s13127_s1 + $0x10] sm:$0xff] %vm4098_vm7, %v4448_v55   ;;  %v6998_v40 = vld [vmem:[%s13126_s0 + $0x8c1] ss:$8 sm:$0xf]  }
 0x34e   :  { %5084 = vrot.lane.b32.xlu0 %v5083_v52, %s7035_s19  ;;  %v4481_v59 = vpop.permute.xlu1 %4480   ;;  %v5259_v52 = vsel %vm4_vm0, %v6957_v49, %v6956_v48  ;;  %v6999_v41 = vld [vmem:[%s13126_s0 + $0x8c1] ss:$8 sm:$0xf0]  }
 0x34f   :  { %6746 = vst.msk [vmem:[%s13127_s1 + $0x70] sm:$0xff] %vm4098_vm7, %v4481_v59   ;;  %v7007_v45 = vld [vmem:[%s13126_s0 + $0xbc1] ss:$8 sm:$0xf]  }
 0x350   :  { %v4470_v63 = vpop.permute.xlu0 %4469   ;;  %5117 = vrot.lane.b32.xlu1 %v5116_v58, %s7035_s19  ;;  %v5292_v58 = vsel %vm4_vm0, %v6966_v54, %v6965_v53  ;;  %v7008_v46 = vld [vmem:[%s13126_s0 + $0xbc1] ss:$8 sm:$0xf0]  }
 0x351   :  { %6743 = vst.msk [vmem:[%s13127_s1 + $0x50] sm:$0xff] %vm4098_vm7, %v4470_v63   ;;  %v7004_v48 = vld [vmem:[%s13126_s0 + $0xac1] ss:$8 sm:$0xf]  }
 0x352   :  { %5106 = vrot.lane.b32.xlu0 %v5105_v60, %s7035_s19  ;;  %v4503_v3 = vpop.permute.xlu1 %4502   ;;  %v5281_v60 = vsel %vm4_vm0, %v6963_v57, %v6962_v56  ;;  %v7005_v49 = vld [vmem:[%s13126_s0 + $0xac1] ss:$8 sm:$0xf0]  }
 0x353   :  { %6752 = vst.msk [vmem:[%s13127_s1 + $0xb0] sm:$0xff] %vm4098_vm7, %v4503_v3   ;;  %v7013_v53 = vld [vmem:[%s13126_s0 + $0xdc1] ss:$8 sm:$0xf]  }
 0x354   :  { %v4492_v7 = vpop.permute.xlu0 %4491   ;;  %5139 = vrot.lane.b32.xlu1 %v5138_v2, %s7035_s19  ;;  %v5314_v2 = vsel %vm4_vm0, %v6972_v62, %v6971_v61  ;;  %v7014_v54 = vld [vmem:[%s13126_s0 + $0xdc1] ss:$8 sm:$0xf0]  }
 0x355   :  { %6749 = vst.msk [vmem:[%s13127_s1 + $0x90] sm:$0xff] %vm4098_vm7, %v4492_v7   ;;  %v7010_v56 = vld [vmem:[%s13126_s0 + $0xcc1] ss:$8 sm:$0xf]  }
 0x356   :  { %5128 = vrot.lane.b32.xlu0 %v5127_v4, %s7035_s19  ;;  %v4525_v11 = vpop.permute.xlu1 %4524   ;;  %v5303_v4 = vsel %vm4_vm0, %v6969_v1, %v6968_v0  ;;  %v7011_v57 = vld [vmem:[%s13126_s0 + $0xcc1] ss:$8 sm:$0xf0]  }
 0x357   :  { %6758 = vst.msk [vmem:[%s13127_s1 + $0xf0] sm:$0xff] %vm4098_vm7, %v4525_v11   ;;  %v7019_v61 = vld [vmem:[%s13126_s0 + $0xfc1] ss:$8 sm:$0xf]  }
 0x358   :  { %v4514_v15 = vpop.permute.xlu0 %4513   ;;  %5161 = vrot.lane.b32.xlu1 %v5160_v10, %s7035_s19  ;;  %v5336_v10 = vsel %vm4_vm0, %v6978_v6, %v6977_v5  ;;  %v7020_v62 = vld [vmem:[%s13126_s0 + $0xfc1] ss:$8 sm:$0xf0]  }
 0x359   :  { %6755 = vst.msk [vmem:[%s13127_s1 + $0xd0] sm:$0xff] %vm4098_vm7, %v4514_v15   ;;  %v7016_v0 = vld [vmem:[%s13126_s0 + $0xec1] ss:$8 sm:$0xf]  }
 0x35a   :  { %5150 = vrot.lane.b32.xlu0 %v5149_v12, %s7035_s19  ;;  %v4547_v19 = vpop.permute.xlu1 %4546   ;;  %v5325_v12 = vsel %vm4_vm0, %v6975_v9, %v6974_v8  ;;  %v7017_v1 = vld [vmem:[%s13126_s0 + $0xec1] ss:$8 sm:$0xf0]  }
 0x35b   :  { %6764 = vst.msk [vmem:[%s13127_s1 + $0x130] sm:$0xff] %vm4098_vm7, %v4547_v19  }
 0x35c   :  { %v4536_v23 = vpop.permute.xlu0 %4535   ;;  %5183 = vrot.lane.b32.xlu1 %v5182_v18, %s7035_s19  ;;  %v5358_v18 = vsel %vm4_vm0, %v6984_v14, %v6983_v13 }
 0x35d   :  { %6761 = vst.msk [vmem:[%s13127_s1 + $0x110] sm:$0xff] %vm4098_vm7, %v4536_v23  }
 0x35e   :  { %5172 = vrot.lane.b32.xlu0 %v5171_v20, %s7035_s19  ;;  %v4569_v27 = vpop.permute.xlu1 %4568   ;;  %v5347_v20 = vsel %vm4_vm0, %v6981_v17, %v6980_v16 }
 0x35f   :  { %6770 = vst.msk [vmem:[%s13127_s1 + $0x170] sm:$0xff] %vm4098_vm7, %v4569_v27  }
 0x360   :  { %v4558_v31 = vpop.permute.xlu0 %4557   ;;  %5205 = vrot.lane.b32.xlu1 %v5204_v26, %s7035_s19  ;;  %v5380_v26 = vsel %vm4_vm0, %v6990_v22, %v6989_v21 }
 0x361   :  { %6767 = vst.msk [vmem:[%s13127_s1 + $0x150] sm:$0xff] %vm4098_vm7, %v4558_v31  }
 0x362   :  { %5194 = vrot.lane.b32.xlu0 %v5193_v28, %s7035_s19  ;;  %v4591_v35 = vpop.permute.xlu1 %4590   ;;  %v5369_v28 = vsel %vm4_vm0, %v6987_v25, %v6986_v24 }
 0x363   :  { %6776 = vst.msk [vmem:[%s13127_s1 + $0x1b0] sm:$0xff] %vm4098_vm7, %v4591_v35  }
 0x364   :  { %v4580_v39 = vpop.permute.xlu0 %4579   ;;  %5227 = vrot.lane.b32.xlu1 %v5226_v34, %s7035_s19  ;;  %v5402_v34 = vsel %vm4_vm0, %v6996_v30, %v6995_v29 }
 0x365   :  { %6773 = vst.msk [vmem:[%s13127_s1 + $0x190] sm:$0xff] %vm4098_vm7, %v4580_v39  }
 0x366   :  { %5216 = vrot.lane.b32.xlu0 %v5215_v36, %s7035_s19  ;;  %v4613_v43 = vpop.permute.xlu1 %4612   ;;  %v5391_v36 = vsel %vm4_vm0, %v6993_v33, %v6992_v32 }
 0x367   :  { %6782 = vst.msk [vmem:[%s13127_s1 + $0x1f0] sm:$0xff] %vm4098_vm7, %v4613_v43  }
 0x368   :  { %v4602_v47 = vpop.permute.xlu0 %4601   ;;  %5249 = vrot.lane.b32.xlu1 %v5248_v42, %s7035_s19  ;;  %v5424_v42 = vsel %vm4_vm0, %v7002_v38, %v7001_v37 }
 0x369   :  { %6779 = vst.msk [vmem:[%s13127_s1 + $0x1d0] sm:$0xff] %vm4098_vm7, %v4602_v47  }
 0x36a   :  { %5238 = vrot.lane.b32.xlu0 %v5237_v44, %s7035_s19  ;;  %v4635_v51 = vpop.permute.xlu1 %4634   ;;  %v5413_v44 = vsel %vm4_vm0, %v6999_v41, %v6998_v40 }
 0x36b   :  { %6788 = vst.msk [vmem:[%s13127_s1 + $0x38] sm:$0xff] %vm4098_vm7, %v4635_v51  }
 0x36c   :  { %v4624_v55 = vpop.permute.xlu0 %4623   ;;  %5271 = vrot.lane.b32.xlu1 %v5270_v50, %s7035_s19  ;;  %v5446_v50 = vsel %vm4_vm0, %v7008_v46, %v7007_v45 }
 0x36d   :  { %6785 = vst.msk [vmem:[%s13127_s1 + $0x18] sm:$0xff] %vm4098_vm7, %v4624_v55  }
 0x36e   :  { %5260 = vrot.lane.b32.xlu0 %v5259_v52, %s7035_s19  ;;  %v4657_v59 = vpop.permute.xlu1 %4656   ;;  %v5435_v52 = vsel %vm4_vm0, %v7005_v49, %v7004_v48 }
 0x36f   :  { %6794 = vst.msk [vmem:[%s13127_s1 + $0x78] sm:$0xff] %vm4098_vm7, %v4657_v59  }
 0x370   :  { %v4646_v63 = vpop.permute.xlu0 %4645   ;;  %5293 = vrot.lane.b32.xlu1 %v5292_v58, %s7035_s19  ;;  %v5468_v58 = vsel %vm4_vm0, %v7014_v54, %v7013_v53 }
 0x371   :  { %6791 = vst.msk [vmem:[%s13127_s1 + $0x58] sm:$0xff] %vm4098_vm7, %v4646_v63  }
 0x372   :  { %5282 = vrot.lane.b32.xlu0 %v5281_v60, %s7035_s19  ;;  %v4679_v3 = vpop.permute.xlu1 %4678   ;;  %v5457_v60 = vsel %vm4_vm0, %v7011_v57, %v7010_v56 }
 0x373   :  { %6800 = vst.msk [vmem:[%s13127_s1 + $0xb8] sm:$0xff] %vm4098_vm7, %v4679_v3  }
 0x374   :  { %v4668_v7 = vpop.permute.xlu0 %4667   ;;  %5315 = vrot.lane.b32.xlu1 %v5314_v2, %s7035_s19  ;;  %v5490_v2 = vsel %vm4_vm0, %v7020_v62, %v7019_v61 }
 0x375   :  { %6797 = vst.msk [vmem:[%s13127_s1 + $0x98] sm:$0xff] %vm4098_vm7, %v4668_v7  }
 0x376   :  { %5304 = vrot.lane.b32.xlu0 %v5303_v4, %s7035_s19  ;;  %v4701_v11 = vpop.permute.xlu1 %4700   ;;  %v5479_v4 = vsel %vm4_vm0, %v7017_v1, %v7016_v0 }
 0x377   :  { %6806 = vst.msk [vmem:[%s13127_s1 + $0xf8] sm:$0xff] %vm4098_vm7, %v4701_v11  }
 0x378   :  { %v4690_v15 = vpop.permute.xlu0 %4689   ;;  %5337 = vrot.lane.b32.xlu1 %v5336_v10, %s7035_s19 }
 0x379   :  { %6803 = vst.msk [vmem:[%s13127_s1 + $0xd8] sm:$0xff] %vm4098_vm7, %v4690_v15  }
 0x37a   :  { %5326 = vrot.lane.b32.xlu0 %v5325_v12, %s7035_s19  ;;  %v4723_v19 = vpop.permute.xlu1 %4722  }
 0x37b   :  { %6812 = vst.msk [vmem:[%s13127_s1 + $0x138] sm:$0xff] %vm4098_vm7, %v4723_v19  }
 0x37c   :  { %v4712_v23 = vpop.permute.xlu0 %4711   ;;  %5359 = vrot.lane.b32.xlu1 %v5358_v18, %s7035_s19 }
 0x37d   :  { %6809 = vst.msk [vmem:[%s13127_s1 + $0x118] sm:$0xff] %vm4098_vm7, %v4712_v23  }
 0x37e   :  { %5348 = vrot.lane.b32.xlu0 %v5347_v20, %s7035_s19  ;;  %v4745_v27 = vpop.permute.xlu1 %4744  }
 0x37f   :  { %6818 = vst.msk [vmem:[%s13127_s1 + $0x178] sm:$0xff] %vm4098_vm7, %v4745_v27  }
 0x380   :  { %v4734_v31 = vpop.permute.xlu0 %4733   ;;  %5381 = vrot.lane.b32.xlu1 %v5380_v26, %s7035_s19 }
 0x381   :  { %6815 = vst.msk [vmem:[%s13127_s1 + $0x158] sm:$0xff] %vm4098_vm7, %v4734_v31  }
 0x382   :  { %5370 = vrot.lane.b32.xlu0 %v5369_v28, %s7035_s19  ;;  %v4767_v35 = vpop.permute.xlu1 %4766  }
 0x383   :  { %6824 = vst.msk [vmem:[%s13127_s1 + $0x1b8] sm:$0xff] %vm4098_vm7, %v4767_v35  }
 0x384   :  { %v4756_v39 = vpop.permute.xlu0 %4755   ;;  %5403 = vrot.lane.b32.xlu1 %v5402_v34, %s7035_s19 }
 0x385   :  { %6821 = vst.msk [vmem:[%s13127_s1 + $0x198] sm:$0xff] %vm4098_vm7, %v4756_v39  }
 0x386   :  { %5392 = vrot.lane.b32.xlu0 %v5391_v36, %s7035_s19  ;;  %v4789_v43 = vpop.permute.xlu1 %4788  }
 0x387   :  { %6830 = vst.msk [vmem:[%s13127_s1 + $0x1f8] sm:$0xff] %vm4098_vm7, %v4789_v43  }
 0x388   :  { %v4778_v47 = vpop.permute.xlu0 %4777   ;;  %5425 = vrot.lane.b32.xlu1 %v5424_v42, %s7035_s19 }
 0x389   :  { %6827 = vst.msk [vmem:[%s13127_s1 + $0x1d8] sm:$0xff] %vm4098_vm7, %v4778_v47  }
 0x38a   :  { %5414 = vrot.lane.b32.xlu0 %v5413_v44, %s7035_s19  ;;  %v4810_v51 = vpop.permute.xlu1 %4809  }
 0x38b   :  { %6835 = vst.msk [vmem:[%s13127_s1 + $0x20] sm:$0xff] %vm4801_vm8, %v4810_v51  }
 0x38c   :  { %v4800_v55 = vpop.permute.xlu0 %4799   ;;  %5447 = vrot.lane.b32.xlu1 %v5446_v50, %s7035_s19 }
 0x38d   :  { %4802 = vst.msk [vmem:[%s13127_s1] sm:$0xff] %vm4801_vm8, %v4800_v55  }
 0x38e   :  { %5436 = vrot.lane.b32.xlu0 %v5435_v52, %s7035_s19  ;;  %v4832_v59 = vpop.permute.xlu1 %4831  }
 0x38f   :  { %6841 = vst.msk [vmem:[%s13127_s1 + $0x60] sm:$0xff] %vm4801_vm8, %v4832_v59  }
 0x390   :  { %v4821_v63 = vpop.permute.xlu0 %4820   ;;  %5469 = vrot.lane.b32.xlu1 %v5468_v58, %s7035_s19 }
 0x391   :  { %6838 = vst.msk [vmem:[%s13127_s1 + $0x40] sm:$0xff] %vm4801_vm8, %v4821_v63  }
 0x392   :  { %5458 = vrot.lane.b32.xlu0 %v5457_v60, %s7035_s19  ;;  %v4854_v3 = vpop.permute.xlu1 %4853  }
 0x393   :  { %6847 = vst.msk [vmem:[%s13127_s1 + $0xa0] sm:$0xff] %vm4801_vm8, %v4854_v3  }
 0x394   :  { %v4843_v5 = vpop.permute.xlu0 %4842   ;;  %5491 = vrot.lane.b32.xlu1 %v5490_v2, %s7035_s19 }
 0x395   :  { %6844 = vst.msk [vmem:[%s13127_s1 + $0x80] sm:$0xff] %vm4801_vm8, %v4843_v5  }
 0x396   :  { %5480 = vrot.lane.b32.xlu0 %v5479_v4, %s7035_s19  ;;  %v4876_v6 = vpop.permute.xlu1 %4875  }
 0x397   :  { %6853 = vst.msk [vmem:[%s13127_s1 + $0xe0] sm:$0xff] %vm4801_vm8, %v4876_v6  }
 0x398   :  { %v4865_v7 = vpop.permute.xlu0 %4864  }
 0x399   :  { %6850 = vst.msk [vmem:[%s13127_s1 + $0xc0] sm:$0xff] %vm4801_vm8, %v4865_v7  }
 0x39a   :  { %v4898_v8 = vpop.permute.xlu1 %4897  }
 0x39b   :  { %6859 = vst.msk [vmem:[%s13127_s1 + $0x120] sm:$0xff] %vm4801_vm8, %v4898_v8  }
 0x39c   :  { %v4887_v9 = vpop.permute.xlu0 %4886  }
 0x39d   :  { %6856 = vst.msk [vmem:[%s13127_s1 + $0x100] sm:$0xff] %vm4801_vm8, %v4887_v9  }
 0x39e   :  { %v4920_v10 = vpop.permute.xlu1 %4919  }
 0x39f   :  { %6865 = vst.msk [vmem:[%s13127_s1 + $0x160] sm:$0xff] %vm4801_vm8, %v4920_v10  }
 0x3a0   :  { %v4909_v11 = vpop.permute.xlu0 %4908  }
 0x3a1   :  { %6862 = vst.msk [vmem:[%s13127_s1 + $0x140] sm:$0xff] %vm4801_vm8, %v4909_v11  }
 0x3a2   :  { %v4942_v12 = vpop.permute.xlu1 %4941  }
 0x3a3   :  { %6871 = vst.msk [vmem:[%s13127_s1 + $0x1a0] sm:$0xff] %vm4801_vm8, %v4942_v12  }
 0x3a4   :  { %v4931_v13 = vpop.permute.xlu0 %4930  }
 0x3a5   :  { %6868 = vst.msk [vmem:[%s13127_s1 + $0x180] sm:$0xff] %vm4801_vm8, %v4931_v13  }
 0x3a6   :  { %v4964_v14 = vpop.permute.xlu1 %4963  }
 0x3a7   :  { %6877 = vst.msk [vmem:[%s13127_s1 + $0x1e0] sm:$0xff] %vm4801_vm8, %v4964_v14  }
 0x3a8   :  { %v4953_v15 = vpop.permute.xlu0 %4952  }
 0x3a9   :  { %6874 = vst.msk [vmem:[%s13127_s1 + $0x1c0] sm:$0xff] %vm4801_vm8, %v4953_v15  }
 0x3aa   :  { %v4986_v16 = vpop.permute.xlu1 %4985  }
 0x3ab   :  { %6883 = vst.msk [vmem:[%s13127_s1 + $0x28] sm:$0xff] %vm4801_vm8, %v4986_v16  }
 0x3ac   :  { %v4975_v17 = vpop.permute.xlu0 %4974  }
 0x3ad   :  { %6880 = vst.msk [vmem:[%s13127_s1 + $0x8] sm:$0xff] %vm4801_vm8, %v4975_v17  }
 0x3ae   :  { %v5008_v18 = vpop.permute.xlu1 %5007  }
 0x3af   :  { %6889 = vst.msk [vmem:[%s13127_s1 + $0x68] sm:$0xff] %vm4801_vm8, %v5008_v18  }
 0x3b0   :  { %v4997_v19 = vpop.permute.xlu0 %4996  }
 0x3b1   :  { %6886 = vst.msk [vmem:[%s13127_s1 + $0x48] sm:$0xff] %vm4801_vm8, %v4997_v19  }
 0x3b2   :  { %v5030_v20 = vpop.permute.xlu1 %5029  }
 0x3b3   :  { %6895 = vst.msk [vmem:[%s13127_s1 + $0xa8] sm:$0xff] %vm4801_vm8, %v5030_v20  }
 0x3b4   :  { %v5019_v21 = vpop.permute.xlu0 %5018  }
 0x3b5   :  { %6892 = vst.msk [vmem:[%s13127_s1 + $0x88] sm:$0xff] %vm4801_vm8, %v5019_v21  }
 0x3b6   :  { %v5052_v22 = vpop.permute.xlu1 %5051  }
 0x3b7   :  { %6901 = vst.msk [vmem:[%s13127_s1 + $0xe8] sm:$0xff] %vm4801_vm8, %v5052_v22  }
 0x3b8   :  { %v5041_v23 = vpop.permute.xlu0 %5040  }
 0x3b9   :  { %6898 = vst.msk [vmem:[%s13127_s1 + $0xc8] sm:$0xff] %vm4801_vm8, %v5041_v23  }
 0x3ba   :  { %v5074_v24 = vpop.permute.xlu1 %5073  }
 0x3bb   :  { %6907 = vst.msk [vmem:[%s13127_s1 + $0x128] sm:$0xff] %vm4801_vm8, %v5074_v24  }
 0x3bc   :  { %v5063_v25 = vpop.permute.xlu0 %5062  }
 0x3bd   :  { %6904 = vst.msk [vmem:[%s13127_s1 + $0x108] sm:$0xff] %vm4801_vm8, %v5063_v25  }
 0x3be   :  { %v5096_v26 = vpop.permute.xlu1 %5095  }
 0x3bf   :  { %6913 = vst.msk [vmem:[%s13127_s1 + $0x168] sm:$0xff] %vm4801_vm8, %v5096_v26  }
 0x3c0   :  { %v5085_v27 = vpop.permute.xlu0 %5084  }
 0x3c1   :  { %6910 = vst.msk [vmem:[%s13127_s1 + $0x148] sm:$0xff] %vm4801_vm8, %v5085_v27  }
 0x3c2   :  { %v5118_v28 = vpop.permute.xlu1 %5117  }
 0x3c3   :  { %6919 = vst.msk [vmem:[%s13127_s1 + $0x1a8] sm:$0xff] %vm4801_vm8, %v5118_v28  }
 0x3c4   :  { %v5107_v29 = vpop.permute.xlu0 %5106  }
 0x3c5   :  { %6916 = vst.msk [vmem:[%s13127_s1 + $0x188] sm:$0xff] %vm4801_vm8, %v5107_v29  }
 0x3c6   :  { %v5140_v30 = vpop.permute.xlu1 %5139  }
 0x3c7   :  { %6925 = vst.msk [vmem:[%s13127_s1 + $0x1e8] sm:$0xff] %vm4801_vm8, %v5140_v30  }
 0x3c8   :  { %v5129_v31 = vpop.permute.xlu0 %5128  }
 0x3c9   :  { %6922 = vst.msk [vmem:[%s13127_s1 + $0x1c8] sm:$0xff] %vm4801_vm8, %v5129_v31  }
 0x3ca   :  { %v5162_v32 = vpop.permute.xlu1 %5161  }
 0x3cb   :  { %6931 = vst.msk [vmem:[%s13127_s1 + $0x30] sm:$0xff] %vm4801_vm8, %v5162_v32  }
 0x3cc   :  { %v5151_v33 = vpop.permute.xlu0 %5150  }
 0x3cd   :  { %6928 = vst.msk [vmem:[%s13127_s1 + $0x10] sm:$0xff] %vm4801_vm8, %v5151_v33  }
 0x3ce   :  { %v5184_v34 = vpop.permute.xlu1 %5183  }
 0x3cf   :  { %6937 = vst.msk [vmem:[%s13127_s1 + $0x70] sm:$0xff] %vm4801_vm8, %v5184_v34  }
 0x3d0   :  { %v5173_v35 = vpop.permute.xlu0 %5172  }
 0x3d1   :  { %6934 = vst.msk [vmem:[%s13127_s1 + $0x50] sm:$0xff] %vm4801_vm8, %v5173_v35  }
 0x3d2   :  { %v5206_v36 = vpop.permute.xlu1 %5205  }
 0x3d3   :  { %6943 = vst.msk [vmem:[%s13127_s1 + $0xb0] sm:$0xff] %vm4801_vm8, %v5206_v36  }
 0x3d4   :  { %v5195_v37 = vpop.permute.xlu0 %5194  }
 0x3d5   :  { %6940 = vst.msk [vmem:[%s13127_s1 + $0x90] sm:$0xff] %vm4801_vm8, %v5195_v37  }
 0x3d6   :  { %v5228_v38 = vpop.permute.xlu1 %5227  }
 0x3d7   :  { %6949 = vst.msk [vmem:[%s13127_s1 + $0xf0] sm:$0xff] %vm4801_vm8, %v5228_v38  }
 0x3d8   :  { %v5217_v39 = vpop.permute.xlu0 %5216  }
 0x3d9   :  { %6946 = vst.msk [vmem:[%s13127_s1 + $0xd0] sm:$0xff] %vm4801_vm8, %v5217_v39  }
 0x3da   :  { %v5250_v40 = vpop.permute.xlu1 %5249  }
 0x3db   :  { %6955 = vst.msk [vmem:[%s13127_s1 + $0x130] sm:$0xff] %vm4801_vm8, %v5250_v40  }
 0x3dc   :  { %v5239_v41 = vpop.permute.xlu0 %5238  }
 0x3dd   :  { %6952 = vst.msk [vmem:[%s13127_s1 + $0x110] sm:$0xff] %vm4801_vm8, %v5239_v41  }
 0x3de   :  { %v5272_v42 = vpop.permute.xlu1 %5271  }
 0x3df   :  { %6961 = vst.msk [vmem:[%s13127_s1 + $0x170] sm:$0xff] %vm4801_vm8, %v5272_v42  }
 0x3e0   :  { %v5261_v43 = vpop.permute.xlu0 %5260  }
 0x3e1   :  { %6958 = vst.msk [vmem:[%s13127_s1 + $0x150] sm:$0xff] %vm4801_vm8, %v5261_v43  }
 0x3e2   :  { %v5294_v44 = vpop.permute.xlu1 %5293  }
 0x3e3   :  { %6967 = vst.msk [vmem:[%s13127_s1 + $0x1b0] sm:$0xff] %vm4801_vm8, %v5294_v44  }
 0x3e4   :  { %v5283_v45 = vpop.permute.xlu0 %5282  }
 0x3e5   :  { %6964 = vst.msk [vmem:[%s13127_s1 + $0x190] sm:$0xff] %vm4801_vm8, %v5283_v45  }
 0x3e6   :  { %v5316_v46 = vpop.permute.xlu1 %5315  }
 0x3e7   :  { %6973 = vst.msk [vmem:[%s13127_s1 + $0x1f0] sm:$0xff] %vm4801_vm8, %v5316_v46  }
 0x3e8   :  { %v5305_v47 = vpop.permute.xlu0 %5304  }
 0x3e9   :  { %6970 = vst.msk [vmem:[%s13127_s1 + $0x1d0] sm:$0xff] %vm4801_vm8, %v5305_v47  }
 0x3ea   :  { %v5338_v48 = vpop.permute.xlu1 %5337  }
 0x3eb   :  { %6979 = vst.msk [vmem:[%s13127_s1 + $0x38] sm:$0xff] %vm4801_vm8, %v5338_v48  }
 0x3ec   :  { %v5327_v49 = vpop.permute.xlu0 %5326  }
 0x3ed   :  { %6976 = vst.msk [vmem:[%s13127_s1 + $0x18] sm:$0xff] %vm4801_vm8, %v5327_v49  }
 0x3ee   :  { %v5360_v50 = vpop.permute.xlu1 %5359  }
 0x3ef   :  { %6985 = vst.msk [vmem:[%s13127_s1 + $0x78] sm:$0xff] %vm4801_vm8, %v5360_v50  }
 0x3f0   :  { %v5349_v51 = vpop.permute.xlu0 %5348  }
 0x3f1   :  { %6982 = vst.msk [vmem:[%s13127_s1 + $0x58] sm:$0xff] %vm4801_vm8, %v5349_v51  }
 0x3f2   :  { %v5382_v52 = vpop.permute.xlu1 %5381  }
 0x3f3   :  { %6991 = vst.msk [vmem:[%s13127_s1 + $0xb8] sm:$0xff] %vm4801_vm8, %v5382_v52  }
 0x3f4   :  { %v5371_v53 = vpop.permute.xlu0 %5370  }
 0x3f5   :  { %6988 = vst.msk [vmem:[%s13127_s1 + $0x98] sm:$0xff] %vm4801_vm8, %v5371_v53  }
 0x3f6   :  { %v5404_v54 = vpop.permute.xlu1 %5403  }
 0x3f7   :  { %6997 = vst.msk [vmem:[%s13127_s1 + $0xf8] sm:$0xff] %vm4801_vm8, %v5404_v54  }
 0x3f8   :  { %v5393_v55 = vpop.permute.xlu0 %5392  }
 0x3f9   :  { %6994 = vst.msk [vmem:[%s13127_s1 + $0xd8] sm:$0xff] %vm4801_vm8, %v5393_v55  }
 0x3fa   :  { %v5426_v56 = vpop.permute.xlu1 %5425  }
 0x3fb   :  { %7003 = vst.msk [vmem:[%s13127_s1 + $0x138] sm:$0xff] %vm4801_vm8, %v5426_v56  }
 0x3fc   :  { %v5415_v57 = vpop.permute.xlu0 %5414  }
 0x3fd   :  { %7000 = vst.msk [vmem:[%s13127_s1 + $0x118] sm:$0xff] %vm4801_vm8, %v5415_v57  }
 0x3fe   :  { %v5448_v58 = vpop.permute.xlu1 %5447  }
 0x3ff   :  { %7009 = vst.msk [vmem:[%s13127_s1 + $0x178] sm:$0xff] %vm4801_vm8, %v5448_v58  }
 0x400   :  { %v5437_v59 = vpop.permute.xlu0 %5436  }
 0x401   :  { %7006 = vst.msk [vmem:[%s13127_s1 + $0x158] sm:$0xff] %vm4801_vm8, %v5437_v59  }
 0x402   :  { %v5470_v60 = vpop.permute.xlu1 %5469  }
 0x403   :  { %7015 = vst.msk [vmem:[%s13127_s1 + $0x1b8] sm:$0xff] %vm4801_vm8, %v5470_v60  }
 0x404   :  { %v5459_v61 = vpop.permute.xlu0 %5458  }
 0x405   :  { %7012 = vst.msk [vmem:[%s13127_s1 + $0x198] sm:$0xff] %vm4801_vm8, %v5459_v61  }
 0x406   :  { %v5492_v62 = vpop.permute.xlu1 %5491  }
 0x407   :  { %7021 = vst.msk [vmem:[%s13127_s1 + $0x1f8] sm:$0xff] %vm4801_vm8, %v5492_v62  }
 0x408   :  { %v5481_v63 = vpop.permute.xlu0 %5480  }
 0x409   :  { %7018 = vst.msk [vmem:[%s13127_s1 + $0x1d8] sm:$0xff] %vm4801_vm8, %v5481_v63  }

// kernel: window_attention_forward.1
= control target key start
LH: loop header
LB: loop body
LE: loop exit
PB: predicated region body
PF: predicated region fallthrough
CT: control target
= control target key end

     0   :  { %9 = vsyncpa [#allocation3], 0  ;;  %s7085_s0 = inlined_call_operand.vmem [shape: f32[512,32], index: 0, kind: input, shape index: {}]   ;;  %s7086_s1 = inlined_call_operand.vmem [shape: f32[512,32], index: 1, kind: input, shape index: {}]   ;;  %s7087_s2 = inlined_call_operand.vmem [shape: f32[512,32], index: 2, kind: input, shape index: {}]   ;;  %s7088_s3 = inlined_call_operand.vmem [shape: f32[4,128,128], index: 3, kind: input, shape index: {}]   ;;  %s7089_s4 = inlined_call_operand.hbm [shape: f32[512,32], index: 4, kind: output, shape index: {}]  }
   0x1   :  { %11 = vsyncpa [#allocation3 + $0x1], 0  ;;  %s5126_s15 = smov 0   ;;  %s5128_s16 = smov 0  }
   0x2   :  { %s5130_s17 = smov 0   ;;  %s5132_s18 = smov 0  }
   0x3 LB: > { %s5147_s19 = sadd.s32 4294967295, %s5091_s18   ;;  %s3222_s20 = sadd.s32 4294967294, %s5091_s18   ;;  %s5091_s18 = sphi %s5132_s18, %s7242_s18   ;;  %s5087_s17 = sphi %s5130_s17, %s7241_s17   ;;  %s5083_s16 = sphi %s5128_s16, %s7240_s16   ;;  %s5079_s15 = sphi %s5126_s15, %s7239_s15  }
   0x4   : > { %s5151_s21 = sadd.s32 1, %s5091_s18   ;;  %s123_s22 = sadd.s32 1, %s5087_s17 }
   0x5   : > { %s120_s23 = ssub.s32 %s5091_s18, %s5151_s21  ;;  %p133_p0 = scmp.ne.s32.totalorder %s5087_s17, %s5083_s16 }
   0x6   : > { %p121_p1 = scmp.eq.s32.totalorder %s120_s23, 0  ;;  %p134_p2 = scmp.eq.s32.totalorder %s5147_s19, 3 }
   0x7   : > { %p139_p3 = scmp.ne.s32.totalorder %s5083_s16, %s5079_s15  ;;  %p140_p4 = scmp.eq.s32.totalorder %s3222_s20, 3 }
   0x8   : > { %s5162_s24 = scalar_select %p121_p1, %s5087_s17, %s123_s22  }
   0x9   : > { %p5164_p5 = por %p134_p2, %p133_p0  ;;  %p5168_p6 = por %p140_p4, %p139_p3 }
   0xa   : > { %p3225_p7 = scmp.ge.s32.totalorder %s5091_s18, 1  ;;  %p188_p8 = scmp.lt.s32.totalorder %s5091_s18, 5 }
   0xc   : > { %p189_p9 = pnand %p3225_p7, %p188_p8 }
   0xe   : > { %192 = sbr.rel (%p189_p9) target bundleno = 2353 (0x931), region = 36 }
  0x15   : > { %s3227_s27 = sshll.u32 %s5147_s19, 4  ;;  %vm291_vm0 = vcmask 64512   ;;  %s5093_s9 = smov 120   ;;  %vm3071_vm2 = vcmask 130048   ;;  %vm3088_vm3 = vcmask 195584   ;;  %vm3105_vm4 = vcmask 261120  }
  0x16   : > { %p225_p10 = scmp.lt.s32.totalorder %s3227_s27, 63  ;;  %vm5185_vm1 = vmpackc.low %vm291_vm0, %vm291_vm0  ;;  %s5096_s10 = smov 8  }
  0x17   : > { %s3414_s14 = sshll.u32 %s5147_s19, 11  ;;  %s5099_s29 = smov [#allocation2]  }
  0x18   : > { %s7244_s27 = smov (!%p225_p10, %s3227_s27), 63 }
  0x19   : > { %s5175_s28 = sshll.u32 %s7244_s27, 3  ;;  %s7032_s27 = scalar_lea.hbm %s7089_s4, %s3414_s14 }
  0x1a   : > { %s5181_s5 = scalar_lea.vmem %s7086_s1, %s5175_s28  ;;  %s5201_s8 = scalar_lea.vmem %s7085_s0, %s5175_s28 }
  0x1b   : > { %v259_v1 = vld [vmem:[%s5181_s5] sm:$0xff]  ;;  %v260_v2 = vld [vmem:[%s5181_s5 + $0x8] sm:$0xff]  ;;  %v261_v3 = vld [vmem:[%s5181_s5 + $0x10] sm:$0xff]  ;;  %s5367_s12 = scalar_lea.vmem %s7087_s2, %s5175_s28  ;;  %s5094_s28 = smov 112  }
  0x1c   : > { %v4119_v4 = vpack.c.bf16 %v260_v2, %v259_v1  ;;  %v262_v5 = vld [vmem:[%s5181_s5 + $0x18] sm:$0xff]  ;;  %v5193_v6 = vpack.i.bf16 %v260_v2, %v259_v1  ;;  %v263_v8 = vld [vmem:[%s5181_s5 + $0x20] sm:$0xff]  ;;  %v264_v9 = vld [vmem:[%s5181_s5 + $0x28] sm:$0xff] }
  0x1d   : > { %v4125_v7 = vpack.c.bf16 %v262_v5, %v261_v3  ;;  %v5203_v10 = vpack.i.bf16 %v262_v5, %v261_v3  ;;  %v5209_v11 = vpack.i.bf16 %v264_v9, %v263_v8  ;;  %v5218_v12 = vld [vmem:[%s5201_s8] sm:$0xff]  ;;  %v268_v14 = vld [vmem:[%s5181_s5 + $0x48] sm:$0xff]  ;;  %v4131_v16 = vpack.c.bf16 %v264_v9, %v263_v8  ;;  %v5235_v17 = vld [vmem:[%s5181_s5 + $0x30] sm:$0xff] }
  0x1e   : > { %4121 = vmatprep.subr.msk.bf16.mxu0 %vm5185_vm1, %v4119_v4  ;;  %4486 = vrot.lane.b32.xlu1 %v5193_v6, %s5093_s9  ;;  %v267_v13 = vld [vmem:[%s5181_s5 + $0x40] sm:$0xff]  ;;  %v5238_v18 = vld [vmem:[%s5181_s5 + $0x38] sm:$0xff]  ;;  %v5251_v21 = vld [vmem:[%s5181_s5 + $0x50] sm:$0xff] }
  0x1f   : > { %7119 = vst [vmem:[#allocation5_spill] sm:$0xff] %v5209_v11  ;;  %4124 = vmatpush3.bf16.xpose.msk.msra.mxu0 %vm5185_vm1, %v4119_v4  ;;  %4491 = vrot.lane.b32.xlu0 %v5203_v10, %s5093_s9  ;;  %v5226_v15 = vpack.i.bf16 %v268_v14, %v267_v13  ;;  %v4137_v19 = vpack.c.bf16 %v5238_v18, %v5235_v17  ;;  %v5254_v22 = vld [vmem:[%s5181_s5 + $0x58] sm:$0xff]  ;;  %v5263_v24 = vld [vmem:[%s5181_s5 + $0x60] sm:$0xff]  ;;  %v5266_v25 = vld [vmem:[%s5181_s5 + $0x68] sm:$0xff] }
  0x20   : > { %4127 = vmatprep.subr.msk.bf16.mxu0 %vm5185_vm1, %v4125_v7  ;;  %3703 = vmatprep.mubr.msk.f32.mxu0 %vm291_vm0, %v5218_v12  ;;  %v4143_v20 = vpack.c.bf16 %v268_v14, %v267_v13  ;;  %v4149_v23 = vpack.c.bf16 %v5254_v22, %v5251_v21  ;;  %v4155_v26 = vpack.c.bf16 %v5266_v25, %v5263_v24  ;;  %v5275_v27 = vld [vmem:[%s5181_s5 + $0x70] sm:$0xff]  ;;  %v5278_v28 = vld [vmem:[%s5181_s5 + $0x78] sm:$0xff]  ;;  %v5289_v30 = vld [vmem:[%s5201_s8 + $0x8] sm:$0xff] }
  0x21   : > { %7120 = vst [vmem:[#allocation6_spill] sm:$0xff] %v5226_v15  ;;  %v4161_v29 = vpack.c.bf16 %v5278_v28, %v5275_v27  ;;  %v5292_v31 = vld [vmem:[%s5201_s8 + $0x10] sm:$0xff]  ;;  %v5299_v32 = vld [vmem:[%s5201_s8 + $0x18] sm:$0xff]  ;;  %v5302_v33 = vld [vmem:[%s5201_s8 + $0x20] sm:$0xff] }
  0x22   : > { %4496 = vrot.lane.b32.xlu1 %v5209_v11, %s5093_s9  ;;  %v5309_v34 = vld [vmem:[%s5201_s8 + $0x28] sm:$0xff]  ;;  %v5312_v35 = vld [vmem:[%s5201_s8 + $0x30] sm:$0xff]  ;;  %v5319_v36 = vld [vmem:[%s5201_s8 + $0x38] sm:$0xff] }
  0x23   : > { %v5322_v37 = vld [vmem:[%s5201_s8 + $0x40] sm:$0xff]  ;;  %v5329_v38 = vld [vmem:[%s5201_s8 + $0x48] sm:$0xff]  ;;  %v5332_v39 = vld [vmem:[%s5201_s8 + $0x50] sm:$0xff] }
  0x24   : > { %v5339_v40 = vld [vmem:[%s5201_s8 + $0x58] sm:$0xff]  ;;  %v5342_v41 = vld [vmem:[%s5201_s8 + $0x60] sm:$0xff]  ;;  %v5349_v42 = vld [vmem:[%s5201_s8 + $0x68] sm:$0xff] }
  0x25   : > { %v5352_v43 = vld [vmem:[%s5201_s8 + $0x70] sm:$0xff]  ;;  %v5359_v44 = vld [vmem:[%s5201_s8 + $0x78] sm:$0xff]  ;;  %v5370_v45 = vld [vmem:[%s5367_s12] sm:$0xff] }
  0x26   : > { %4506 = vrot.lane.b32.xlu1 %v5226_v15, %s5093_s9  ;;  %v5373_v46 = vld [vmem:[%s5367_s12 + $0x8] sm:$0xff]  ;;  %v5378_v48 = vld [vmem:[%s5367_s12 + $0x10] sm:$0xff]  ;;  %v5381_v49 = vld [vmem:[%s5367_s12 + $0x18] sm:$0xff] }
  0x27   : > { %4130 = vmatpush3.bf16.xpose.msk.msra.mxu0 %vm5185_vm1, %v4125_v7  ;;  %v4167_v47 = vpack.c.bf16 %v5373_v46, %v5370_v45  ;;  %v4171_v50 = vpack.c.bf16 %v5381_v49, %v5378_v48  ;;  %v5386_v51 = vld [vmem:[%s5367_s12 + $0x20] sm:$0xff]  ;;  %v5389_v52 = vld [vmem:[%s5367_s12 + $0x28] sm:$0xff]  ;;  %v5394_v54 = vld [vmem:[%s5367_s12 + $0x30] sm:$0xff] }
  0x28   : > { %4133 = vmatprep.subr.msk.bf16.mxu0 %vm5185_vm1, %v4131_v16  ;;  %v4175_v53 = vpack.c.bf16 %v5389_v52, %v5386_v51  ;;  %v5397_v55 = vld [vmem:[%s5367_s12 + $0x38] sm:$0xff]  ;;  %v5402_v57 = vld [vmem:[%s5367_s12 + $0x40] sm:$0xff]  ;;  %v5405_v58 = vld [vmem:[%s5367_s12 + $0x48] sm:$0xff] }
  0x29   : > { %4168 = vmatprep.subr.bf16.mxu1 %v4167_v47  ;;  %v4179_v56 = vpack.c.bf16 %v5397_v55, %v5394_v54  ;;  %v4183_v59 = vpack.c.bf16 %v5405_v58, %v5402_v57  ;;  %v5410_v60 = vld [vmem:[%s5367_s12 + $0x50] sm:$0xff]  ;;  %v5413_v61 = vld [vmem:[%s5367_s12 + $0x58] sm:$0xff]  ;;  %v5418_v63 = vld [vmem:[%s5367_s12 + $0x60] sm:$0xff] }
  0x2a   : > { %4170 = vmatpush3.bf16.msra.mxu1 %v4167_v47  ;;  %v4187_v62 = vpack.c.bf16 %v5413_v61, %v5410_v60  ;;  %v5421_v1 = vld [vmem:[%s5367_s12 + $0x68] sm:$0xff]  ;;  %v5426_v7 = vld [vmem:[%s5367_s12 + $0x70] sm:$0xff]  ;;  %v5429_v8 = vld [vmem:[%s5367_s12 + $0x78] sm:$0xff] }
  0x2b   : > { %4172 = vmatprep.subr.bf16.mxu1 %v4171_v50  ;;  %v4191_v2 = vpack.c.bf16 %v5421_v1, %v5418_v63  ;;  %7121 = vst [vmem:[#allocation7_spill] sm:$0xff] %v5426_v7  ;;  %7122 = vst [vmem:[#allocation8_spill] sm:$0xff] %v5429_v8  ;;  %v4195_v13 = vpack.c.bf16 %v5429_v8, %v5426_v7  ;;  %v549_v47 = vld [vmem:[%s7088_s3] sm:$0xff] }
  0x2e   : > { %4174 = vmatpush3.bf16.msra.mxu1 %v4171_v50 }
  0x2f   : > { %4136 = vmatpush3.bf16.xpose.msk.msra.mxu0 %vm5185_vm1, %v4131_v16  ;;  %4176 = vmatprep.subr.bf16.mxu1 %v4175_v53  ;;  %v550_v16 = vld [vmem:[%s7088_s3 + $0x8] sm:$0xff] }
  0x30   : > { %4139 = vmatprep.subr.msk.bf16.mxu0 %vm5185_vm1, %v4137_v19 }
  0x32   : > { %4178 = vmatpush3.bf16.msra.mxu1 %v4175_v53  ;;  %v551_v53 = vld [vmem:[%s7088_s3 + $0x10] sm:$0xff] }
  0x33   : > { %4180 = vmatprep.subr.bf16.mxu1 %v4179_v56 }
  0x36   : > { %4182 = vmatpush3.bf16.msra.mxu1 %v4179_v56 }
  0x37   : > { %4142 = vmatpush3.bf16.xpose.msk.msra.mxu0 %vm5185_vm1, %v4137_v19  ;;  %4184 = vmatprep.subr.bf16.mxu1 %v4183_v59 }
  0x38   : > { %4145 = vmatprep.subr.msk.bf16.mxu0 %vm5185_vm1, %v4143_v20 }
  0x3a   : > { %4186 = vmatpush3.bf16.msra.mxu1 %v4183_v59 }
  0x3b   : > { %4188 = vmatprep.subr.bf16.mxu1 %v4187_v62 }
  0x3e   : > { %4190 = vmatpush3.bf16.msra.mxu1 %v4187_v62 }
  0x3f   : > { %4148 = vmatpush3.bf16.xpose.msk.msra.mxu0 %vm5185_vm1, %v4143_v20  ;;  %4192 = vmatprep.subr.bf16.mxu1 %v4191_v2 }
  0x40   : > { %4151 = vmatprep.subr.msk.bf16.mxu0 %vm5185_vm1, %v4149_v23 }
  0x42   : > { %4194 = vmatpush3.bf16.msra.mxu1 %v4191_v2 }
  0x43   : > { %4196 = vmatprep.subr.bf16.mxu1 %v4195_v13 }
  0x46   : > { %4198 = vmatpush3.bf16.msra.mxu1 %v4195_v13 }
  0x47   : > { %4154 = vmatpush3.bf16.xpose.msk.msra.mxu0 %vm5185_vm1, %v4149_v23 }
  0x48   : > { %4157 = vmatprep.subr.msk.bf16.mxu0 %vm5185_vm1, %v4155_v26 }
  0x4f   : > { %4160 = vmatpush3.bf16.xpose.msk.msra.mxu0 %vm5185_vm1, %v4155_v26 }
  0x50   : > { %4163 = vmatprep.subr.msk.bf16.mxu0 %vm5185_vm1, %v4161_v29 }
  0x57   : > { %4166 = vmatpush3.bf16.xpose.msk.msra.mxu0 %vm5185_vm1, %v4161_v29 }
  0x5e   : > { %3704 = vmatmul.mubr.msk.f32.vlgmr.msra.gmra.mrb[0].mxu0 %vm291_vm0, %v5289_v30 }
  0x5f   : > { %3706 = vmatprep.mubr.msk.f32.mxu0 %vm291_vm0, %v5292_v31 }
  0x62   : > { %3707 = vmatmul.mubr.msk.f32.gmra.mrb[2].mxu0 %vm291_vm0, %v5299_v32 }
  0x63   : > { %3709 = vmatprep.mubr.msk.f32.mxu0 %vm291_vm0, %v5302_v33 }
  0x66   : > { %3710 = vmatmul.mubr.msk.f32.gmra.mrb[4].mxu0 %vm291_vm0, %v5309_v34 }
  0x67   : > { %3712 = vmatprep.mubr.msk.f32.mxu0 %vm291_vm0, %v5312_v35 }
  0x6a   : > { %3713 = vmatmul.mubr.msk.f32.gmra.mrb[6].mxu0 %vm291_vm0, %v5319_v36 }
  0x6b   : > { %3715 = vmatprep.mubr.msk.f32.mxu0 %vm291_vm0, %v5322_v37 }
  0x6e   : > { %3716 = vmatmul.mubr.msk.f32.gmra.mrb[8].mxu0 %vm291_vm0, %v5329_v38 }
  0x6f   : > { %3718 = vmatprep.mubr.msk.f32.mxu0 %vm291_vm0, %v5332_v39 }
  0x72   : > { %3719 = vmatmul.mubr.msk.f32.gmra.mrb[10].mxu0 %vm291_vm0, %v5339_v40 }
  0x73   : > { %3721 = vmatprep.mubr.msk.f32.mxu0 %vm291_vm0, %v5342_v41 }
  0x76   : > { %3722 = vmatmul.mubr.msk.f32.gmra.mrb[12].mxu0 %vm291_vm0, %v5349_v42 }
  0x77   : > { %3724 = vmatprep.mubr.msk.f32.mxu0 %vm291_vm0, %v5352_v43 }
  0x7a   : > { %3725 = vmatmul.mubr.msk.f32.gmra.mrb[14].mxu0 %vm291_vm0, %v5359_v44 }
  0x90   : > { %v4487_v3 = vpop.permute.xlu1 %4486 }
  0x91   : > { %v4489_v4 = vunpack.i.h.bf16 %v4487_v3  ;;  %v4488_v5 = vunpack.i.l.bf16 %v4487_v3  ;;  %v554_v3 = vld [vmem:[%s7088_s3 + $0x28] sm:$0xff] }
  0x93   : > { %v5431_v9 = vpack.c.bf16 %v4489_v4, %v4488_v5 }
  0x95   : > { %4201 = vmatprep.subr.msk.bf16.mxu1 %vm5185_vm1, %v5431_v9 }
 0x131   : > { %v3705_v14 = vpop.f32.mrb[0].mxu0 }
 0x132   : > { %v534_v19 = vmul.f32 0.35355338, %v3705_v14  ;;  %v454_v20 = vpop.f32.mrb[1].mxu0 }
 0x133   : > { %v533_v23 = vmul.f32 0.35355338, %v454_v20  ;;  %v553_v20 = vld [vmem:[%s7088_s3 + $0x20] sm:$0xff] }
 0x134   : > { %v5441_v26 = vadd.f32 %v550_v16, %v534_v19 }
 0x135   : > { %v3708_v29 = vpop.f32.mrb[2].mxu0  ;;  %v5450_v59 = vadd.f32 %v549_v47, %v533_v23 }
 0x136   : > { %583 = vmax.xlane.f32.xlu0 %v5441_v26  ;;  %v464_v50 = vpop.f32.mrb[3].mxu0 }
 0x137   : > { %v535_v56 = vmul.f32 0.35355338, %v464_v50 }
 0x139   : > { %v3711_v62 = vpop.f32.mrb[4].mxu0  ;;  %v5452_v2 = vadd.f32 %v551_v53, %v535_v56  ;;  %v555_v56 = vld [vmem:[%s7088_s3 + $0x30] sm:$0xff] }
 0x13a   : > { %v538_v4 = vmul.f32 0.35355338, %v3711_v62  ;;  %581 = vmax.xlane.f32.xlu0 %v5450_v59  ;;  %v474_v5 = vpop.f32.mrb[5].mxu0 }
 0x13b   : > { %585 = vmax.xlane.f32.xlu1 %v5452_v2  ;;  %v537_v14 = vmul.f32 0.35355338, %v474_v5  ;;  %v559_v5 = vld [vmem:[%s7088_s3 + $0x50] sm:$0xff] }
 0x13c   : > { %v5459_v13 = vadd.f32 %v554_v3, %v538_v4 }
 0x13d   : > { %v3714_v16 = vpop.f32.mrb[6].mxu0  ;;  %v5465_v50 = vadd.f32 %v553_v20, %v537_v14  ;;  %v562_v20 = vld [vmem:[%s7088_s3 + $0x68] sm:$0xff] }
 0x13e   : > { %v484_v19 = vpop.f32.mrb[7].mxu0 }
 0x13f   : > { %591 = vmax.xlane.f32.xlu1 %v5459_v13  ;;  %v539_v23 = vmul.f32 0.35355338, %v484_v19 }
 0x141   : > { %v3717_v47 = vpop.f32.mrb[8].mxu0  ;;  %v5471_v3 = vadd.f32 %v555_v56, %v539_v23  ;;  %v5487_v56 = vpack.i.bf16 %v5238_v18, %v5235_v17  ;;  %v4515_v17 = vpack.i.bf16 %v5266_v25, %v5263_v24  ;;  %v4520_v18 = vpack.i.bf16 %v5278_v28, %v5275_v27  ;;  %v556_v24 = vld [vmem:[%s7088_s3 + $0x38] sm:$0xff]  ;;  %v558_v28 = vld [vmem:[%s7088_s3 + $0x48] sm:$0xff] }
 0x142   : > { %v494_v53 = vpop.f32.mrb[9].mxu0  ;;  %v542_v25 = vmul.f32 0.35355338, %v3717_v47  ;;  %v560_v47 = vld [vmem:[%s7088_s3 + $0x58] sm:$0xff] }
 0x143   : > { %589 = vmax.xlane.f32.xlu1 %v5465_v50 }
 0x145   : > { %v3720_v62 = vpop.f32.mrb[10].mxu0 }
 0x146   : > { %v504_v4 = vpop.f32.mrb[11].mxu0 }
 0x147   : > { %v543_v15 = vmul.f32 0.35355338, %v504_v4  ;;  %593 = vmax.xlane.f32.xlu1 %v5471_v3 }
 0x149   : > { %v3723_v14 = vpop.f32.mrb[12].mxu0  ;;  %v5477_v19 = vadd.f32 %v559_v5, %v543_v15  ;;  %v561_v15 = vld [vmem:[%s7088_s3 + $0x60] sm:$0xff] }
 0x14a   : > { %v546_v8 = vmul.f32 0.35355338, %v3723_v14  ;;  %v514_v7 = vpop.f32.mrb[13].mxu0 }
 0x14b   : > { %601 = vmax.xlane.f32.xlu1 %v5477_v19  ;;  %v545_v4 = vmul.f32 0.35355338, %v514_v7  ;;  %v536_v7 = vmul.f32 0.35355338, %v3708_v29  ;;  %v541_v29 = vmul.f32 0.35355338, %v494_v53 }
 0x14c   : > { %v5483_v23 = vadd.f32 %v562_v20, %v546_v8  ;;  %v552_v8 = vld [vmem:[%s7088_s3 + $0x18] sm:$0xff]  ;;  %v540_v20 = vmul.f32 0.35355338, %v3714_v16  ;;  %v557_v16 = vld [vmem:[%s7088_s3 + $0x40] sm:$0xff] }
 0x14d   : > { %v3726_v11 = vpop.f32.mrb[14].mxu0  ;;  %v5495_v14 = vadd.f32 %v561_v15, %v545_v4  ;;  %v5509_v4 = vadd.f32 %v552_v8, %v536_v7  ;;  %v544_v15 = vmul.f32 0.35355338, %v3720_v62  ;;  %v564_v53 = vld [vmem:[%s7088_s3 + $0x78] sm:$0xff] }
 0x14e   : > { %v524_v5 = vpop.f32.mrb[15].mxu0  ;;  %v5515_v27 = vadd.f32 %v556_v24, %v540_v20  ;;  %v563_v20 = vld [vmem:[%s7088_s3 + $0x70] sm:$0xff] }
 0x14f   : > { %607 = vmax.xlane.f32.xlu1 %v5483_v23  ;;  %v5536_v7 = vadd.f32 %v560_v47, %v544_v15  ;;  %v547_v62 = vmul.f32 0.35355338, %v524_v5 }
 0x150   : > { %4501 = vrot.lane.b32.xlu0 %v5487_v56, %s5093_s9 }
 0x151   : > { %v5545_v24 = vadd.f32 %v563_v20, %v547_v62 }
 0x153   : > { %605 = vmax.xlane.f32.xlu1 %v5495_v14 }
 0x164   : > { %4516 = vrot.lane.b32.xlu1 %v4515_v17, %s5093_s9  ;;  %v5527_v17 = vadd.f32 %v557_v16, %v541_v29 }
 0x168   : > { %4521 = vrot.lane.b32.xlu1 %v4520_v18, %s5093_s9  ;;  %v548_v18 = vmul.f32 0.35355338, %v3726_v11  ;;  %v4510_v11 = vpack.i.bf16 %v5254_v22, %v5251_v21  ;;  %v4497_v21 = vpop.permute.xlu1 %4496  ;;  %v4492_v22 = vpop.permute.xlu0 %4491 }
 0x16a   : > { %v5539_v8 = vadd.f32 %v564_v53, %v548_v18 }
 0x16c   : > { %870 = vrot.lane.b32.xlu1 %v5218_v12, %s5093_s9  ;;  %v5521_v12 = vadd.f32 %v558_v28, %v542_v25 }
 0x16f   : > { %587 = vmax.xlane.f32.xlu0 %v5509_v4 }
 0x173   : > { %595 = vmax.xlane.f32.xlu0 %v5515_v27 }
 0x177   : > { %599 = vmax.xlane.f32.xlu0 %v5521_v12 }
 0x17b   : > { %597 = vmax.xlane.f32.xlu0 %v5527_v17 }
 0x17f   : > { %603 = vmax.xlane.f32.xlu0 %v5536_v7 }
 0x183   : > { %611 = vmax.xlane.f32.xlu0 %v5539_v8 }
 0x190   : > { %609 = vmax.xlane.f32.xlu1 %v5545_v24 }
 0x199   : > { %4511 = vrot.lane.b32.xlu0 %v4510_v11, %s5093_s9 }
 0x19d   : > { %876 = vrot.lane.b32.xlu0 %v5299_v32, %s5093_s9 }
 0x1a1   : > { %872 = vrot.lane.b32.xlu1 %v5289_v30, %s5093_s9  ;;  %880 = vrot.lane.b32.xlu0 %v5309_v34, %s5093_s9 }
 0x1a5   : > { %874 = vrot.lane.b32.xlu1 %v5292_v31, %s5093_s9  ;;  %884 = vrot.lane.b32.xlu0 %v5319_v36, %s5093_s9  ;;  %v4507_v31 = vpop.permute.xlu1 %4506 }
 0x1a6   : > { %v4508_v47 = vunpack.i.l.bf16 %v4507_v31 }
 0x1a9   : > { %878 = vrot.lane.b32.xlu1 %v5302_v33, %s5093_s9  ;;  %888 = vrot.lane.b32.xlu0 %v5329_v38, %s5093_s9 }
 0x1ad   : > { %882 = vrot.lane.b32.xlu1 %v5312_v35, %s5093_s9  ;;  %892 = vrot.lane.b32.xlu0 %v5339_v40, %s5093_s9  ;;  %v4494_v40 = vunpack.i.h.bf16 %v4492_v22 }
 0x1b1   : > { %886 = vrot.lane.b32.xlu1 %v5322_v37, %s5093_s9  ;;  %896 = vrot.lane.b32.xlu0 %v5349_v42, %s5093_s9 }
 0x1b5   : > { %890 = vrot.lane.b32.xlu1 %v5332_v39, %s5093_s9  ;;  %900 = vrot.lane.b32.xlu0 %v5359_v44, %s5093_s9 }
 0x1b9   : > { %894 = vrot.lane.b32.xlu1 %v5342_v41, %s5093_s9  ;;  %v4493_v41 = vunpack.i.l.bf16 %v4492_v22 }
 0x1bd   : > { %898 = vrot.lane.b32.xlu1 %v5352_v43, %s5093_s9 }
 0x1c3   : > { %v584_v30 = vpop.xlane.xlu0 %583 }
 0x1c4   : > { %v614_v32 = vsub.f32 %v5441_v26, %v584_v30  ;;  %v4205_v26 = vpack.c.bf16 %v4494_v40, %v4493_v41 }
 0x1c6   : > { %v631_v33 = vmul.f32 1.442695, %v614_v32 }
 0x1c7   : > { %v582_v34 = vpop.xlane.xlu0 %581 }
 0x1c8   : > { %v613_v35 = vsub.f32 %v5450_v59, %v582_v34  ;;  %v586_v36 = vpop.xlane.xlu1 %585  ;;  %4725 = vpow2.f32 %v631_v33  ;;  %v4499_v59 = vunpack.i.h.bf16 %v4497_v21 }
 0x1c9   : > { %v615_v37 = vsub.f32 %v5452_v2, %v586_v36  ;;  %v4498_v2 = vunpack.i.l.bf16 %v4497_v21 }
 0x1ca   : > { %v629_v38 = vmul.f32 1.442695, %v613_v35 }
 0x1cb   : > { %v633_v39 = vmul.f32 1.442695, %v615_v37  ;;  %v4211_v5 = vpack.c.bf16 %v4499_v59, %v4498_v2  ;;  %v4502_v25 = vpop.permute.xlu0 %4501 }
 0x1cc   : > { %4727 = vpow2.f32 %v629_v38  ;;  %v4504_v28 = vunpack.i.h.bf16 %v4502_v25  ;;  %v4503_v29 = vunpack.i.l.bf16 %v4502_v25  ;;  %v592_v15 = vpop.xlane.xlu1 %591 }
 0x1cd   : > { %4729 = vpow2.f32 %v633_v39  ;;  %v618_v22 = vsub.f32 %v5459_v13, %v592_v15 }
 0x1ce   : > { %v4217_v16 = vpack.c.bf16 %v4504_v28, %v4503_v29 }
 0x1cf   : > { %v639_v35 = vmul.f32 1.442695, %v618_v22 }
 0x1d0   : > { %v590_v18 = vpop.xlane.xlu1 %589 }
 0x1d1   : > { %v617_v20 = vsub.f32 %v5465_v50, %v590_v18 }
 0x1d2   : > { %v5584_v42 = vpop.eup %4725 }
 0x1d3   : > { %7123 = vst [vmem:[#allocation9_spill] sm:$0xff] %v5584_v42 }
 0x1d4   : > { %v594_v62 = vpop.xlane.xlu1 %593 }
 0x1d5   : > { %v619_v32 = vsub.f32 %v5471_v3, %v594_v62 }
 0x1d6   : > { %v5586_v43 = vpop.eup %4727 }
 0x1d7   : > { %7124 = vst [vmem:[#allocation10_spill] sm:$0xff] %v5586_v43  ;;  %v5588_v44 = vpop.eup %4729  ;;  %3759 = vmatprep.mubr.f32.mxu1 %v5586_v43  ;;  %v641_v38 = vmul.f32 1.442695, %v619_v32 }
 0x1d8   : > { %7125 = vst [vmem:[#allocation11_spill] sm:$0xff] %v5588_v44  ;;  %3760 = vmatmul.mubr.f32.vlgmr.msra.gmra.mrb[0].mxu1 %v5584_v42  ;;  %v602_v11 = vpop.xlane.xlu1 %601 }
 0x1d9   : > { %4204 = vmatpush3.bf16.xpose.msk.msra.mxu1 %vm5185_vm1, %v5431_v9  ;;  %3762 = vmatprep.mubr.f32.mxu1 %v5588_v44  ;;  %v4509_v9 = vunpack.i.h.bf16 %v4507_v31  ;;  %v637_v31 = vmul.f32 1.442695, %v617_v20  ;;  %v3356_v44 = vld [vmem:[%s7088_s3 + $0x158] sm:$0xff] }
 0x1da   : > { %4207 = vmatprep.subr.msk.bf16.mxu1 %vm5185_vm1, %v4205_v26 }
 0x1db   : > { %v4223_v53 = vpack.c.bf16 %v4509_v9, %v4508_v47 }
 0x1dc   : > { %v608_v36 = vpop.xlane.xlu1 %607 }
 0x1e0   : > { %v606_v40 = vpop.xlane.xlu1 %605 }
 0x1e1   : > { %4210 = vmatpush3.bf16.xpose.msk.msra.mxu1 %vm5185_vm1, %v4205_v26 }
 0x1e2   : > { %4213 = vmatprep.subr.msk.bf16.mxu1 %vm5185_vm1, %v4211_v5 }
 0x1e9   : > { %4216 = vmatpush3.bf16.xpose.msk.msra.mxu1 %vm5185_vm1, %v4211_v5 }
 0x1ea   : > { %4219 = vmatprep.subr.msk.bf16.mxu1 %vm5185_vm1, %v4217_v16 }
 0x1f1   : > { %4222 = vmatpush3.bf16.xpose.msk.msra.mxu1 %vm5185_vm1, %v4217_v16 }
 0x1f2   : > { %4225 = vmatprep.subr.msk.bf16.mxu1 %vm5185_vm1, %v4223_v53 }
 0x1f9   : > { %4228 = vmatpush3.bf16.xpose.msk.msra.mxu1 %vm5185_vm1, %v4223_v53 }
 0x1fc   : > { %v588_v21 = vpop.xlane.xlu0 %587 }
 0x1fd   : > { %v616_v30 = vsub.f32 %v5509_v4, %v588_v21  ;;  %v623_v4 = vsub.f32 %v5477_v19, %v602_v11 }
 0x1ff   : > { %v635_v33 = vmul.f32 1.442695, %v616_v30  ;;  %v649_v2 = vmul.f32 1.442695, %v623_v4 }
 0x200   : > { %v596_v34 = vpop.xlane.xlu0 %595 }
 0x201   : > { %4731 = vpow2.f32 %v635_v33  ;;  %v620_v37 = vsub.f32 %v5515_v27, %v596_v34  ;;  %v625_v27 = vsub.f32 %v5495_v14, %v606_v40 }
 0x202   : > { %4733 = vpow2.f32 %v637_v31 }
 0x203   : > { %4735 = vpow2.f32 %v639_v35  ;;  %v643_v50 = vmul.f32 1.442695, %v620_v37  ;;  %v653_v16 = vmul.f32 1.442695, %v625_v27  ;;  %v4525_v27 = vpack.i.bf16 %v5373_v46, %v5370_v45 }
 0x204   : > { %v600_v39 = vpop.xlane.xlu0 %599  ;;  %4737 = vpow2.f32 %v641_v38  ;;  %v4540_v45 = vpack.i.bf16 %v5397_v55, %v5394_v54 }
 0x205   : > { %v622_v13 = vsub.f32 %v5521_v12, %v600_v39  ;;  %4739 = vpow2.f32 %v643_v50  ;;  %v4517_v12 = vpop.permute.xlu1 %4516  ;;  %4526 = vrot.lane.b32.xlu1 %v4525_v27, %s5093_s9 }
 0x206   : > { %v4519_v53 = vunpack.i.h.bf16 %v4517_v12  ;;  %v4518_v62 = vunpack.i.l.bf16 %v4517_v12  ;;  %v4535_v12 = vpack.i.bf16 %v5389_v52, %v5386_v51  ;;  %v4555_v52 = vpack.i.bf16 %v5421_v1, %v5418_v63  ;;  %v7139_v1 = vld [vmem:[#allocation5_spill] sm:$0xff] }
 0x207   : > { %v647_v26 = vmul.f32 1.442695, %v622_v13 }
 0x208   : > { %v598_v41 = vpop.xlane.xlu0 %597  ;;  %v4235_v32 = vpack.c.bf16 %v4519_v53, %v4518_v62 }
 0x209   : > { %v621_v3 = vsub.f32 %v5527_v17, %v598_v41  ;;  %v626_v17 = vsub.f32 %v5483_v23, %v608_v36  ;;  %v4522_v18 = vpop.permute.xlu1 %4521  ;;  %4536 = vrot.lane.b32.xlu1 %v4535_v12, %s5093_s9 }
 0x20a   : > { %v4524_v37 = vunpack.i.h.bf16 %v4522_v18  ;;  %v4523_v38 = vunpack.i.l.bf16 %v4522_v18 }
 0x20b   : > { %v5620_v59 = vpop.eup %4731  ;;  %v645_v5 = vmul.f32 1.442695, %v621_v3  ;;  %v655_v47 = vmul.f32 1.442695, %v626_v17  ;;  %v7141_v17 = vld [vmem:[#allocation8_spill] sm:$0xff] }
 0x20c   : > { %7126 = vst [vmem:[#allocation12_spill] sm:$0xff] %v5620_v59  ;;  %v5623_v25 = vpop.eup %4733  ;;  %3763 = vmatmul.mubr.f32.gmra.mrb[2].mxu1 %v5620_v59  ;;  %v604_v28 = vpop.xlane.xlu0 %603  ;;  %v4241_v41 = vpack.c.bf16 %v4524_v37, %v4523_v38 }
 0x20d   : > { %7127 = vst [vmem:[#allocation13_spill] sm:$0xff] %v5623_v25  ;;  %4741 = vpow2.f32 %v645_v5  ;;  %v624_v19 = vsub.f32 %v5536_v7, %v604_v28  ;;  %3765 = vmatprep.mubr.f32.mxu1 %v5623_v25  ;;  %v5629_v29 = vpop.eup %4735  ;;  %v871_v33 = vpop.permute.xlu1 %870  ;;  %v4530_v5 = vpack.i.bf16 %v5381_v49, %v5378_v48  ;;  %v4545_v48 = vpack.i.bf16 %v5405_v58, %v5402_v57 }
 0x20e   : > { %4743 = vpow2.f32 %v647_v26  ;;  %7128 = vst [vmem:[#allocation14_spill] sm:$0xff] %v5629_v29  ;;  %v5631_v15 = vpop.eup %4737  ;;  %v4550_v49 = vpack.i.bf16 %v5413_v61, %v5410_v60 }
 0x20f   : > { %4745 = vpow2.f32 %v649_v2  ;;  %v651_v14 = vmul.f32 1.442695, %v624_v19  ;;  %7129 = vst [vmem:[#allocation15_spill] sm:$0xff] %v5631_v15  ;;  %v5635_v7 = vpop.eup %4739  ;;  %4531 = vrot.lane.b32.xlu0 %v4530_v5, %s5093_s9  ;;  %4546 = vrot.lane.b32.xlu1 %v4545_v48, %s5093_s9 }
 0x210   : > { %3766 = vmatmul.mubr.f32.gmra.mrb[4].mxu1 %v5629_v29  ;;  %v612_v9 = vpop.xlane.xlu0 %611  ;;  %7130 = vst [vmem:[#allocation16_spill] sm:$0xff] %v5635_v7 }
 0x211   : > { %4747 = vpow2.f32 %v651_v14  ;;  %3768 = vmatprep.mubr.f32.mxu1 %v5631_v15  ;;  %v628_v35 = vsub.f32 %v5539_v8, %v612_v9  ;;  %v7142_v14 = vld [vmem:[#allocation6_spill] sm:$0xff] }
 0x212   : > { %4749 = vpow2.f32 %v653_v16 }
 0x213   : > { %4751 = vpow2.f32 %v655_v47  ;;  %v659_v13 = vmul.f32 1.442695, %v628_v35  ;;  %4541 = vrot.lane.b32.xlu0 %v4540_v45, %s5093_s9  ;;  %4556 = vrot.lane.b32.xlu1 %v4555_v52, %s5093_s9 }
 0x214   : > { %3769 = vmatmul.mubr.f32.gmra.mrb[6].mxu1 %v5635_v7  ;;  %v4512_v23 = vpop.permute.xlu0 %4511 }
 0x215   : > { %v4514_v20 = vunpack.i.h.bf16 %v4512_v23  ;;  %v4513_v11 = vunpack.i.l.bf16 %v4512_v23 }
 0x217   : > { %v5638_v21 = vpop.eup %4741  ;;  %v4229_v22 = vpack.c.bf16 %v4514_v20, %v4513_v11  ;;  %4551 = vrot.lane.b32.xlu0 %v4550_v49, %s5093_s9  ;;  %4566 = vrot.lane.b32.xlu1 %v5193_v6, %s5094_s28 }
 0x218   : > { %7131 = vst [vmem:[#allocation17_spill] sm:$0xff] %v5638_v21  ;;  %v5640_v30 = vpop.eup %4743  ;;  %3771 = vmatprep.mubr.f32.mxu1 %v5638_v21 }
 0x219   : > { %7132 = vst [vmem:[#allocation18_spill] sm:$0xff] %v5640_v30  ;;  %v5643_v31 = vpop.eup %4745  ;;  %3772 = vmatmul.mubr.f32.gmra.mrb[8].mxu1 %v5640_v30  ;;  %4231 = vmatprep.subr.msk.bf16.mxu1 %vm5185_vm1, %v4229_v22 }
 0x21a   : > { %7133 = vst [vmem:[#allocation19_spill] sm:$0xff] %v5643_v31  ;;  %3774 = vmatprep.mubr.f32.mxu1 %v5643_v31  ;;  %4234 = vmatpush3.bf16.xpose.msk.msra.mxu1 %vm5185_vm1, %v4229_v22 }
 0x21b   : > { %v5651_v34 = vpop.eup %4747  ;;  %4237 = vmatprep.subr.msk.bf16.mxu1 %vm5185_vm1, %v4235_v32  ;;  %4571 = vrot.lane.b32.xlu1 %v5203_v10, %s5094_s28  ;;  %v7140_v10 = vld [vmem:[#allocation7_spill] sm:$0xff] }
 0x21c   : > { %7134 = vst [vmem:[#allocation20_spill] sm:$0xff] %v5651_v34  ;;  %v5656_v36 = vpop.eup %4749  ;;  %v4560_v16 = vpack.i.bf16 %v7141_v17, %v7140_v10 }
 0x21d   : > { %7135 = vst [vmem:[#allocation21_spill] sm:$0xff] %v5656_v36  ;;  %3775 = vmatmul.mubr.f32.gmra.mrb[10].mxu1 %v5651_v34  ;;  %v610_v39 = vpop.xlane.xlu1 %609  ;;  %v5661_v4 = vpop.eup %4751 }
 0x21e   : > { %v627_v50 = vsub.f32 %v5545_v24, %v610_v39  ;;  %3777 = vmatprep.mubr.f32.mxu1 %v5656_v36  ;;  %7136 = vst [vmem:[#allocation22_spill] sm:$0xff] %v5661_v4  ;;  %v877_v24 = vpop.permute.xlu0 %876  ;;  %4561 = vrot.lane.b32.xlu0 %v4560_v16, %s5093_s9 }
 0x21f   : > { %4576 = vrot.lane.b32.xlu1 %v7139_v1, %s5094_s28 }
 0x220   : > { %v657_v40 = vmul.f32 1.442695, %v627_v50 }
 0x221   : > { %3778 = vmatmul.mubr.f32.gmra.mrb[12].mxu1 %v5661_v4  ;;  %v873_v8 = vpop.permute.xlu1 %872 }
 0x222   : > { %4753 = vpow2.f32 %v657_v40  ;;  %4240 = vmatpush3.bf16.xpose.msk.msra.mxu1 %vm5185_vm1, %v4235_v32  ;;  %v881_v19 = vpop.permute.xlu0 %880  ;;  %4581 = vrot.lane.b32.xlu0 %v5487_v56, %s5094_s28 }
 0x223   : > { %4755 = vpow2.f32 %v659_v13  ;;  %4243 = vmatprep.subr.msk.bf16.mxu1 %vm5185_vm1, %v4241_v41  ;;  %4586 = vrot.lane.b32.xlu1 %v7142_v14, %s5094_s28 }
 0x225   : > { %v875_v3 = vpop.permute.xlu1 %874 }
 0x226   : > { %v885_v51 = vpop.permute.xlu0 %884 }
 0x229   : > { %v879_v2 = vpop.permute.xlu1 %878 }
 0x22a   : > { %4246 = vmatpush3.bf16.xpose.msk.msra.mxu1 %vm5185_vm1, %v4241_v41  ;;  %v889_v55 = vpop.permute.xlu0 %888 }
 0x22c   : > { %v5670_v26 = vpop.eup %4753 }
 0x22d   : > { %7137 = vst [vmem:[#allocation23_spill] sm:$0xff] %v5670_v26  ;;  %v5676_v28 = vpop.eup %4755  ;;  %3780 = vmatprep.mubr.f32.mxu1 %v5670_v26  ;;  %v883_v46 = vpop.permute.xlu1 %882 }
 0x22e   : > { %7138 = vst [vmem:[#allocation24_spill] sm:$0xff] %v5676_v28  ;;  %3781 = vmatmul.mubr.f32.gmra.mrb[14].mxu1 %v5676_v28  ;;  %v893_v58 = vpop.permute.xlu0 %892 }
 0x22f   : > { %3815 = vmatprep.mubr.msk.f32.mxu1 %vm291_vm0, %v871_v33 }
 0x231   : > { %v887_v54 = vpop.permute.xlu1 %886 }
 0x232   : > { %3816 = vmatmul.mubr.msk.f32.vlgmr.msra.gmra.mrb[16].mxu1 %vm291_vm0, %v873_v8  ;;  %v897_v61 = vpop.permute.xlu0 %896 }
 0x233   : > { %3818 = vmatprep.mubr.msk.f32.mxu1 %vm291_vm0, %v875_v3 }
 0x235   : > { %v891_v57 = vpop.permute.xlu1 %890 }
 0x236   : > { %3819 = vmatmul.mubr.msk.f32.gmra.mrb[18].mxu1 %vm291_vm0, %v877_v24  ;;  %v901_v6 = vpop.permute.xlu0 %900 }
 0x237   : > { %3821 = vmatprep.mubr.msk.f32.mxu1 %vm291_vm0, %v879_v2 }
 0x239   : > { %v895_v60 = vpop.permute.xlu1 %894 }
 0x23a   : > { %3822 = vmatmul.mubr.msk.f32.gmra.mrb[20].mxu1 %vm291_vm0, %v881_v19 }
 0x23b   : > { %3824 = vmatprep.mubr.msk.f32.mxu1 %vm291_vm0, %v883_v46 }
 0x23d   : > { %v899_v63 = vpop.permute.xlu1 %898 }
 0x23e   : > { %3825 = vmatmul.mubr.msk.f32.gmra.mrb[22].mxu1 %vm291_vm0, %v885_v51 }
 0x23f   : > { %3827 = vmatprep.mubr.msk.f32.mxu1 %vm291_vm0, %v887_v54 }
 0x242   : > { %3828 = vmatmul.mubr.msk.f32.gmra.mrb[24].mxu1 %vm291_vm0, %v889_v55 }
 0x243   : > { %3830 = vmatprep.mubr.msk.f32.mxu1 %vm291_vm0, %v891_v57 }
 0x246   : > { %3831 = vmatmul.mubr.msk.f32.gmra.mrb[26].mxu1 %vm291_vm0, %v893_v58 }
 0x247   : > { %3833 = vmatprep.mubr.msk.f32.mxu1 %vm291_vm0, %v895_v60 }
 0x24a   : > { %3834 = vmatmul.mubr.msk.f32.gmra.mrb[28].mxu1 %vm291_vm0, %v897_v61 }
 0x24b   : > { %3836 = vmatprep.mubr.msk.f32.mxu1 %vm291_vm0, %v899_v63 }
 0x24e   : > { %3837 = vmatmul.mubr.msk.f32.gmra.mrb[30].mxu1 %vm291_vm0, %v901_v6 }
 0x277   : > { %v4527_v18 = vpop.permute.xlu1 %4526 }
 0x278   : > { %v4529_v23 = vunpack.i.h.bf16 %v4527_v18  ;;  %v4528_v53 = vunpack.i.l.bf16 %v4527_v18 }
 0x27a   : > { %v4247_v20 = vpack.c.bf16 %v4529_v23, %v4528_v53 }
 0x27b   : > { %v4537_v11 = vpop.permute.xlu1 %4536 }
 0x27c   : > { %v4539_v33 = vunpack.i.h.bf16 %v4537_v11  ;;  %v4538_v35 = vunpack.i.l.bf16 %v4537_v11  ;;  %4248 = vmatprep.subr.bf16.mxu0 %v4247_v20 }
 0x27d   : > { %4250 = vmatpush3.bf16.msra.mxu0 %v4247_v20 }
 0x27e   : > { %v4255_v39 = vpack.c.bf16 %v4539_v33, %v4538_v35  ;;  %v3297_v35 = vld [vmem:[%s7088_s3 + $0x80] sm:$0xff] }
 0x281   : > { %v4532_v62 = vpop.permute.xlu0 %4531  ;;  %v4547_v13 = vpop.permute.xlu1 %4546 }
 0x282   : > { %v4534_v22 = vunpack.i.h.bf16 %v4532_v62  ;;  %v4533_v32 = vunpack.i.l.bf16 %v4532_v62  ;;  %v4549_v40 = vunpack.i.h.bf16 %v4547_v13  ;;  %v4548_v41 = vunpack.i.l.bf16 %v4547_v13 }
 0x284   : > { %v4251_v37 = vpack.c.bf16 %v4534_v22, %v4533_v32  ;;  %v4263_v27 = vpack.c.bf16 %v4549_v40, %v4548_v41  ;;  %v3298_v22 = vld [vmem:[%s7088_s3 + $0x88] sm:$0xff]  ;;  %v3299_v41 = vld [vmem:[%s7088_s3 + $0x90] sm:$0xff] }
 0x285   : > { %v4542_v38 = vpop.permute.xlu0 %4541  ;;  %v4557_v5 = vpop.permute.xlu1 %4556 }
 0x286   : > { %4252 = vmatprep.subr.bf16.mxu0 %v4251_v37  ;;  %v4544_v56 = vunpack.i.h.bf16 %v4542_v38  ;;  %v4543_v50 = vunpack.i.l.bf16 %v4542_v38  ;;  %v4559_v12 = vunpack.i.h.bf16 %v4557_v5  ;;  %v4558_v19 = vunpack.i.l.bf16 %v4557_v5 }
 0x287   : > { %4254 = vmatpush3.bf16.msra.mxu0 %v4251_v37 }
 0x288   : > { %4256 = vmatprep.subr.bf16.mxu0 %v4255_v39  ;;  %v4259_v8 = vpack.c.bf16 %v4544_v56, %v4543_v50  ;;  %v4271_v46 = vpack.c.bf16 %v4559_v12, %v4558_v19  ;;  %v3300_v50 = vld [vmem:[%s7088_s3 + $0x98] sm:$0xff] }
 0x289   : > { %v4552_v3 = vpop.permute.xlu0 %4551  ;;  %v4567_v48 = vpop.permute.xlu1 %4566 }
 0x28a   : > { %v4554_v24 = vunpack.i.h.bf16 %v4552_v3  ;;  %v4553_v2 = vunpack.i.l.bf16 %v4552_v3  ;;  %v4569_v49 = vunpack.i.h.bf16 %v4567_v48  ;;  %v4568_v51 = vunpack.i.l.bf16 %v4567_v48 }
 0x28b   : > { %4258 = vmatpush3.bf16.msra.mxu0 %v4255_v39 }
 0x28c   : > { %4260 = vmatprep.subr.bf16.mxu0 %v4259_v8  ;;  %v4267_v45 = vpack.c.bf16 %v4554_v24, %v4553_v2  ;;  %v5730_v57 = vpack.c.bf16 %v4569_v49, %v4568_v51  ;;  %v3301_v49 = vld [vmem:[%s7088_s3 + $0xa0] sm:$0xff] }
 0x28f   : > { %4262 = vmatpush3.bf16.msra.mxu0 %v4259_v8 }
 0x290   : > { %4264 = vmatprep.subr.bf16.mxu0 %v4263_v27  ;;  %v4562_v52 = vpop.permute.xlu0 %4561 }
 0x291   : > { %v4564_v54 = vunpack.i.h.bf16 %v4562_v52  ;;  %v4563_v55 = vunpack.i.l.bf16 %v4562_v52 }
 0x293   : > { %4266 = vmatpush3.bf16.msra.mxu0 %v4263_v27  ;;  %v4275_v58 = vpack.c.bf16 %v4564_v54, %v4563_v55  ;;  %v3302_v27 = vld [vmem:[%s7088_s3 + $0xa8] sm:$0xff] }
 0x294   : > { %4268 = vmatprep.subr.bf16.mxu0 %v4267_v45 }
 0x297   : > { %4270 = vmatpush3.bf16.msra.mxu0 %v4267_v45 }
 0x298   : > { %4272 = vmatprep.subr.bf16.mxu0 %v4271_v46 }
 0x29b   : > { %4274 = vmatpush3.bf16.msra.mxu0 %v4271_v46 }
 0x29c   : > { %4276 = vmatprep.subr.bf16.mxu0 %v4275_v58 }
 0x29f   : > { %4278 = vmatpush3.bf16.msra.mxu0 %v4275_v58  ;;  %v3304_v58 = vld [vmem:[%s7088_s3 + $0xb8] sm:$0xff] }
 0x2a0   : > { %4281 = vmatprep.subr.msk.bf16.mxu0 %vm5185_vm1, %v5730_v57 }
 0x2ab   : > { %v5726_v9 = vpop.f32.mrb[0].mxu1 }
 0x2ac   : > { %7143 = vst [vmem:[#allocation5_spill] sm:$0xff] %v5726_v9  ;;  %v5728_v47 = vpop.f32.mrb[1].mxu1 }
 0x2ad   : > { %7144 = vst [vmem:[#allocation7_spill] sm:$0xff] %v5728_v47 }
 0x2df   : > { %v5735_v60 = vpop.f32.mrb[2].mxu1 }
 0x2e0   : > { %7145 = vst [vmem:[#allocation8_spill] sm:$0xff] %v5735_v60  ;;  %v5737_v61 = vpop.f32.mrb[3].mxu1 }
 0x2e1   : > { %7146 = vst [vmem:[#allocation6_spill] sm:$0xff] %v5737_v61 }
 0x2e3   : > { %v5739_v63 = vpop.f32.mrb[4].mxu1 }
 0x2e4   : > { %7147 = vst [vmem:[#allocation25_spill] sm:$0xff] %v5739_v63  ;;  %v5741_v6 = vpop.f32.mrb[5].mxu1  ;;  %v5959_v63 = vpop.permute.xlu0 %4581 }
 0x2e5   : > { %7148 = vst [vmem:[#allocation26_spill] sm:$0xff] %v5741_v6 }
 0x2e7   : > { %v5743_v1 = vpop.f32.mrb[6].mxu1 }
 0x2e8   : > { %7149 = vst [vmem:[#allocation27_spill] sm:$0xff] %v5743_v1  ;;  %v5745_v10 = vpop.f32.mrb[7].mxu1 }
 0x2e9   : > { %7150 = vst [vmem:[#allocation28_spill] sm:$0xff] %v5745_v10 }
 0x2ec   : > { %v5747_v17 = vpop.f32.mrb[8].mxu1 }
 0x2ed   : > { %7151 = vst [vmem:[#allocation29_spill] sm:$0xff] %v5747_v17  ;;  %v5749_v16 = vpop.f32.mrb[9].mxu1  ;;  %v5948_v17 = vld [vmem:[%s5201_s8 + $0x60] sm:$0xff] }
 0x2ee   : > { %7152 = vst [vmem:[#allocation30_spill] sm:$0xff] %v5749_v16 }
 0x2f0   : > { %v5751_v14 = vpop.f32.mrb[10].mxu1 }
 0x2f1   : > { %7153 = vst [vmem:[#allocation31_spill] sm:$0xff] %v5751_v14  ;;  %v5753_v18 = vpop.f32.mrb[11].mxu1  ;;  %v5943_v14 = vld [vmem:[%s5201_s8 + $0x50] sm:$0xff] }
 0x2f2   : > { %7154 = vst [vmem:[#allocation32_spill] sm:$0xff] %v5753_v18 }
 0x2f4   : > { %v5755_v23 = vpop.f32.mrb[12].mxu1 }
 0x2f5   : > { %7155 = vst [vmem:[#allocation33_spill] sm:$0xff] %v5755_v23  ;;  %v5757_v53 = vpop.f32.mrb[13].mxu1  ;;  %v5938_v23 = vld [vmem:[%s5201_s8 + $0x40] sm:$0xff] }
 0x2f6   : > { %7156 = vst [vmem:[#allocation34_spill] sm:$0xff] %v5757_v53  ;;  %v5953_v53 = vld [vmem:[%s5201_s8 + $0x70] sm:$0xff] }
 0x301   : > { %v5759_v62 = vpop.f32.mrb[14].mxu1 }
 0x302   : > { %7157 = vst [vmem:[#allocation35_spill] sm:$0xff] %v5759_v62  ;;  %v5761_v20 = vpop.f32.mrb[15].mxu1  ;;  %v5933_v62 = vld [vmem:[%s5201_s8 + $0x30] sm:$0xff] }
 0x303   : > { %7158 = vst [vmem:[#allocation36_spill] sm:$0xff] %v5761_v20  ;;  %v4572_v20 = vpop.permute.xlu1 %4571 }
 0x304   : > { %v4574_v7 = vunpack.i.h.bf16 %v4572_v20 }
 0x305   : > { %v3817_v11 = vpop.f32.mrb[16].mxu1 }
 0x306   : > { %v1144_v32 = vmul.f32 0.35355338, %v3817_v11  ;;  %v1064_v33 = vpop.f32.mrb[17].mxu1 }
 0x307   : > { %v1143_v37 = vmul.f32 0.35355338, %v1064_v33  ;;  %v3308_v33 = vld [vmem:[%s7088_s3 + $0xd8] sm:$0xff]  ;;  %v4577_v1 = vpop.permute.xlu1 %4576 }
 0x308   : > { %v5769_v38 = vadd.f32 %v3298_v22, %v1144_v32 }
 0x309   : > { %v3820_v39 = vpop.f32.mrb[18].mxu1  ;;  %v5771_v56 = vadd.f32 %v3297_v35, %v1143_v37 }
 0x30a   : > { %v1146_v13 = vmul.f32 0.35355338, %v3820_v39  ;;  %1194 = vmax.xlane.f32.xlu1 %v5769_v38  ;;  %v1074_v40 = vpop.f32.mrb[19].mxu1  ;;  %v3303_v39 = vld [vmem:[%s7088_s3 + $0xb0] sm:$0xff] }
 0x30b   : > { %v1145_v8 = vmul.f32 0.35355338, %v1074_v40  ;;  %1192 = vmax.xlane.f32.xlu0 %v5771_v56  ;;  %v5957_v18 = vpop.permute.xlu1 %4586 }
 0x30c   : > { %v5781_v3 = vadd.f32 %v3300_v50, %v1146_v13 }
 0x30d   : > { %v3823_v24 = vpop.f32.mrb[20].mxu1  ;;  %v5783_v2 = vadd.f32 %v3299_v41, %v1145_v8  ;;  %v3310_v8 = vld [vmem:[%s7088_s3 + $0xe8] sm:$0xff] }
 0x30e   : > { %v1148_v5 = vmul.f32 0.35355338, %v3823_v24  ;;  %1198 = vmax.xlane.f32.xlu1 %v5781_v3  ;;  %v1084_v12 = vpop.f32.mrb[21].mxu1 }
 0x30f   : > { %1196 = vmax.xlane.f32.xlu0 %v5783_v2  ;;  %v1147_v45 = vmul.f32 0.35355338, %v1084_v12 }
 0x310   : > { %v5790_v19 = vadd.f32 %v3302_v27, %v1148_v5  ;;  %v3306_v5 = vld [vmem:[%s7088_s3 + $0xc8] sm:$0xff] }
 0x311   : > { %v3826_v46 = vpop.f32.mrb[22].mxu1  ;;  %v5796_v54 = vadd.f32 %v3301_v49, %v1147_v45  ;;  %v3305_v49 = vld [vmem:[%s7088_s3 + $0xc0] sm:$0xff] }
 0x312   : > { %v1094_v48 = vpop.f32.mrb[23].mxu1  ;;  %v1150_v51 = vmul.f32 0.35355338, %v3826_v46 }
 0x313   : > { %1202 = vmax.xlane.f32.xlu0 %v5790_v19  ;;  %v1149_v11 = vmul.f32 0.35355338, %v1094_v48 }
 0x314   : > { %v5802_v32 = vadd.f32 %v3304_v58, %v1150_v51 }
 0x315   : > { %v3829_v52 = vpop.f32.mrb[24].mxu1  ;;  %v5813_v41 = vadd.f32 %v3303_v39, %v1149_v11 }
 0x316   : > { %v1104_v55 = vpop.f32.mrb[25].mxu1  ;;  %v1152_v13 = vmul.f32 0.35355338, %v3829_v52 }
 0x317   : > { %1200 = vmax.xlane.f32.xlu0 %v5796_v54  ;;  %v1151_v45 = vmul.f32 0.35355338, %v1104_v55  ;;  %v3307_v55 = vld [vmem:[%s7088_s3 + $0xd0] sm:$0xff] }
 0x318   : > { %v5825_v46 = vadd.f32 %v3306_v5, %v1152_v13  ;;  %v4981_v13 = vld [vmem:[%s5181_s5 + $0x60] sm:$0xff]  ;;  %v4984_v5 = vld [vmem:[%s5181_s5 + $0x78] sm:$0xff] }
 0x319   : > { %v3832_v22 = vpop.f32.mrb[26].mxu1  ;;  %v5832_v58 = vadd.f32 %v3305_v49, %v1151_v45  ;;  %v4986_v49 = vld [vmem:[%s5181_s5 + $0x50] sm:$0xff] }
 0x31a   : > { %v1154_v35 = vmul.f32 0.35355338, %v3832_v22  ;;  %v1114_v37 = vpop.f32.mrb[27].mxu1 }
 0x31b   : > { %1206 = vmax.xlane.f32.xlu0 %v5802_v32  ;;  %v1153_v52 = vmul.f32 0.35355338, %v1114_v37  ;;  %v3312_v37 = vld [vmem:[%s7088_s3 + $0xf8] sm:$0xff] }
 0x31c   : > { %v5811_v50 = vadd.f32 %v3308_v33, %v1154_v35  ;;  %v3309_v33 = vld [vmem:[%s7088_s3 + $0xe0] sm:$0xff] }
 0x31d   : > { %v3835_v40 = vpop.f32.mrb[28].mxu1  ;;  %v5838_v22 = vadd.f32 %v3307_v55, %v1153_v52  ;;  %v4987_v52 = vld [vmem:[%s5181_s5 + $0x58] sm:$0xff] }
 0x31e   : > { %v1156_v24 = vmul.f32 0.35355338, %v3835_v40  ;;  %1214 = vmax.xlane.f32.xlu1 %v5811_v50  ;;  %v1124_v27 = vpop.f32.mrb[29].mxu1  ;;  %v4982_v40 = vld [vmem:[%s5181_s5 + $0x68] sm:$0xff]  ;;  %v5872_v55 = vpack.i.bf16 %v4987_v52, %v4986_v49  ;;  %v5913_v49 = vld [vmem:[%s5201_s8 + $0x78] sm:$0xff] }
 0x31f   : > { %1204 = vmax.xlane.f32.xlu0 %v5813_v41  ;;  %v1155_v11 = vmul.f32 0.35355338, %v1124_v27  ;;  %v4983_v27 = vld [vmem:[%s5181_s5 + $0x70] sm:$0xff]  ;;  %v5918_v52 = vld [vmem:[%s5201_s8 + $0x8] sm:$0xff] }
 0x320   : > { %v5823_v12 = vadd.f32 %v3310_v8, %v1156_v24  ;;  %v5852_v8 = vpack.i.bf16 %v4982_v40, %v4981_v13  ;;  %v5861_v45 = vpack.i.bf16 %v4984_v5, %v4983_v27  ;;  %v5892_v13 = vld [vmem:[%s5201_s8 + $0x48] sm:$0xff]  ;;  %v3311_v40 = vld [vmem:[%s7088_s3 + $0xf0] sm:$0xff]  ;;  %v5902_v5 = vld [vmem:[%s5201_s8 + $0x58] sm:$0xff] }
 0x321   : > { %v3838_v48 = vpop.f32.mrb[30].mxu1  ;;  %v5847_v39 = vadd.f32 %v3309_v33, %v1155_v11  ;;  %v5877_v11 = vld [vmem:[%s5201_s8 + $0x18] sm:$0xff]  ;;  %v5882_v33 = vld [vmem:[%s5201_s8 + $0x28] sm:$0xff] }
 0x322   : > { %1218 = vmax.xlane.f32.xlu1 %v5823_v12  ;;  %v1134_v51 = vpop.f32.mrb[31].mxu1  ;;  %v1158_v35 = vmul.f32 0.35355338, %v3838_v48  ;;  %v5866_v48 = vld [vmem:[%s5201_s8] sm:$0xff] }
 0x323   : > { %1210 = vmax.xlane.f32.xlu0 %v5825_v46 }
 0x324   : > { %v5854_v24 = vadd.f32 %v3312_v37, %v1158_v35  ;;  %v5887_v35 = vld [vmem:[%s5201_s8 + $0x38] sm:$0xff]  ;;  %v1157_v37 = vmul.f32 0.35355338, %v1134_v51  ;;  %v5908_v51 = vld [vmem:[%s5201_s8 + $0x68] sm:$0xff] }
 0x326   : > { %v5899_v27 = vadd.f32 %v3311_v40, %v1157_v37  ;;  %v5923_v37 = vld [vmem:[%s5201_s8 + $0x10] sm:$0xff]  ;;  %v5928_v40 = vld [vmem:[%s5201_s8 + $0x20] sm:$0xff]  ;;  %s5095_s8 = smov 104  }
 0x327   : > { %1208 = vmax.xlane.f32.xlu0 %v5832_v58 }
 0x32b   : > { %1212 = vmax.xlane.f32.xlu0 %v5838_v22 }
 0x32f   : > { %1216 = vmax.xlane.f32.xlu0 %v5847_v39 }
 0x333   : > { %4596 = vrot.lane.b32.xlu1 %v5852_v8, %s5094_s28  ;;  %1222 = vmax.xlane.f32.xlu0 %v5854_v24 }
 0x337   : > { %4601 = vrot.lane.b32.xlu1 %v5861_v45, %s5094_s28 }
 0x33b   : > { %1545 = vrot.lane.b32.xlu1 %v5866_v48, %s5094_s28 }
 0x349   : > { %4591 = vrot.lane.b32.xlu0 %v5872_v55, %s5094_s28 }
 0x34d   : > { %1551 = vrot.lane.b32.xlu0 %v5877_v11, %s5094_s28 }
 0x351   : > { %1555 = vrot.lane.b32.xlu0 %v5882_v33, %s5094_s28 }
 0x355   : > { %1559 = vrot.lane.b32.xlu0 %v5887_v35, %s5094_s28 }
 0x359   : > { %1563 = vrot.lane.b32.xlu0 %v5892_v13, %s5094_s28 }
 0x35d   : > { %1567 = vrot.lane.b32.xlu0 %v5902_v5, %s5094_s28 }
 0x35f   : > { %1220 = vmax.xlane.f32.xlu1 %v5899_v27 }
 0x361   : > { %1571 = vrot.lane.b32.xlu0 %v5908_v51, %s5094_s28 }
 0x365   : > { %1575 = vrot.lane.b32.xlu0 %v5913_v49, %s5094_s28 }
 0x370   : > { %1547 = vrot.lane.b32.xlu1 %v5918_v52, %s5094_s28 }
 0x374   : > { %1549 = vrot.lane.b32.xlu1 %v5923_v37, %s5094_s28 }
 0x378   : > { %1553 = vrot.lane.b32.xlu1 %v5928_v40, %s5094_s28 }
 0x37c   : > { %1557 = vrot.lane.b32.xlu1 %v5933_v62, %s5094_s28 }
 0x380   : > { %1561 = vrot.lane.b32.xlu1 %v5938_v23, %s5094_s28 }
 0x384   : > { %1565 = vrot.lane.b32.xlu1 %v5943_v14, %s5094_s28 }
 0x388   : > { %1569 = vrot.lane.b32.xlu1 %v5948_v17, %s5094_s28 }
 0x38c   : > { %1573 = vrot.lane.b32.xlu1 %v5953_v53, %s5094_s28 }
 0x397   : > { %v1195_v16 = vpop.xlane.xlu1 %1194 }
 0x398   : > { %v1225_v60 = vsub.f32 %v5769_v38, %v1195_v16  ;;  %v1193_v10 = vpop.xlane.xlu0 %1192 }
 0x399   : > { %v1224_v9 = vsub.f32 %v5771_v56, %v1193_v10  ;;  %v4573_v10 = vunpack.i.l.bf16 %v4572_v20 }
 0x39a   : > { %v1242_v6 = vmul.f32 1.442695, %v1225_v60 }
 0x39b   : > { %v1240_v61 = vmul.f32 1.442695, %v1224_v9  ;;  %v1199_v47 = vpop.xlane.xlu1 %1198 }
 0x39c   : > { %v1227_v28 = vsub.f32 %v5781_v3, %v1199_v47  ;;  %v1197_v4 = vpop.xlane.xlu0 %1196 }
 0x39d   : > { %4757 = vpow2.f32 %v1240_v61  ;;  %v1226_v34 = vsub.f32 %v5783_v2, %v1197_v4 }
 0x39e   : > { %4759 = vpow2.f32 %v1242_v6  ;;  %v1246_v26 = vmul.f32 1.442695, %v1227_v28  ;;  %v4578_v6 = vunpack.i.l.bf16 %v4577_v1 }
 0x39f   : > { %v1244_v30 = vmul.f32 1.442695, %v1226_v34  ;;  %v4285_v34 = vpack.c.bf16 %v4574_v7, %v4573_v10  ;;  %v4579_v7 = vunpack.i.h.bf16 %v4577_v1  ;;  %v4583_v10 = vunpack.i.l.bf16 %v5959_v63 }
 0x3a0   : > { %v1203_v36 = vpop.xlane.xlu0 %1202 }
 0x3a1   : > { %4761 = vpow2.f32 %v1244_v30  ;;  %v1229_v16 = vsub.f32 %v5790_v19, %v1203_v36 }
 0x3a2   : > { %4763 = vpow2.f32 %v1246_v26 }
 0x3a3   : > { %v1250_v60 = vmul.f32 1.442695, %v1229_v16 }
 0x3a4   : > { %v1201_v38 = vpop.xlane.xlu0 %1200 }
 0x3a5   : > { %v1228_v9 = vsub.f32 %v5796_v54, %v1201_v38  ;;  %v4584_v38 = vunpack.i.h.bf16 %v5959_v63 }
 0x3a7   : > { %v5967_v56 = vpop.eup %4757  ;;  %v1248_v47 = vmul.f32 1.442695, %v1228_v9 }
 0x3a8   : > { %v5969_v61 = vpop.eup %4759  ;;  %3871 = vmatprep.mubr.f32.mxu0 %v5967_v56  ;;  %v1207_v4 = vpop.xlane.xlu0 %1206 }
 0x3a9   : > { %4765 = vpow2.f32 %v1248_v47  ;;  %3872 = vmatmul.mubr.f32.vlgmr.msra.gmra.mrb[16].mxu0 %v5969_v61  ;;  %v1231_v30 = vsub.f32 %v5802_v32, %v1207_v4 }
 0x3aa   : > { %4767 = vpow2.f32 %v1250_v60  ;;  %4284 = vmatpush3.bf16.xpose.msk.msra.mxu0 %vm5185_vm1, %v5730_v57  ;;  %v4291_v57 = vpack.c.bf16 %v4579_v7, %v4578_v6 }
 0x3ab   : > { %v5977_v36 = vpop.eup %4761  ;;  %4287 = vmatprep.subr.msk.bf16.mxu0 %vm5185_vm1, %v4285_v34  ;;  %v1254_v3 = vmul.f32 1.442695, %v1231_v30  ;;  %v1215_v54 = vpop.xlane.xlu1 %1214  ;;  %v4297_v30 = vpack.c.bf16 %v4584_v38, %v4583_v10 }
 0x3ac   : > { %v5981_v26 = vpop.eup %4763  ;;  %v1205_v28 = vpop.xlane.xlu0 %1204  ;;  %3874 = vmatprep.mubr.f32.mxu0 %v5977_v36 }
 0x3ad   : > { %v1230_v20 = vsub.f32 %v5813_v41, %v1205_v28  ;;  %3875 = vmatmul.mubr.f32.gmra.mrb[18].mxu0 %v5981_v26 }
 0x3af   : > { %v1252_v2 = vmul.f32 1.442695, %v1230_v20  ;;  %v1219_v47 = vpop.xlane.xlu1 %1218 }
 0x3b0   : > { %v1211_v19 = vpop.xlane.xlu0 %1210  ;;  %v1237_v6 = vsub.f32 %v5823_v12, %v1219_v47 }
 0x3b1   : > { %4769 = vpow2.f32 %v1252_v2  ;;  %v1233_v32 = vsub.f32 %v5825_v46, %v1211_v19  ;;  %v1235_v46 = vsub.f32 %v5811_v50, %v1215_v54 }
 0x3b2   : > { %4771 = vpow2.f32 %v1254_v3  ;;  %4290 = vmatpush3.bf16.xpose.msk.msra.mxu0 %vm5185_vm1, %v4285_v34  ;;  %v4588_v3 = vunpack.i.l.bf16 %v5957_v18  ;;  %v1266_v2 = vmul.f32 1.442695, %v1237_v6 }
 0x3b3   : > { %v5989_v16 = vpop.eup %4765  ;;  %4293 = vmatprep.subr.msk.bf16.mxu0 %vm5185_vm1, %v4291_v57  ;;  %v1258_v60 = vmul.f32 1.442695, %v1233_v32  ;;  %v1262_v7 = vmul.f32 1.442695, %v1235_v46 }
 0x3b4   : > { %v5993_v1 = vpop.eup %4767  ;;  %v1209_v41 = vpop.xlane.xlu0 %1208  ;;  %3877 = vmatprep.mubr.f32.mxu0 %v5989_v16 }
 0x3b5   : > { %v1232_v9 = vsub.f32 %v5832_v58, %v1209_v41  ;;  %3878 = vmatmul.mubr.f32.gmra.mrb[20].mxu0 %v5993_v1 }
 0x3b7   : > { %v1256_v4 = vmul.f32 1.442695, %v1232_v9 }
 0x3b8   : > { %v1213_v34 = vpop.xlane.xlu0 %1212 }
 0x3b9   : > { %4773 = vpow2.f32 %v1256_v4  ;;  %v1234_v28 = vsub.f32 %v5838_v22, %v1213_v34  ;;  %v4589_v22 = vunpack.i.h.bf16 %v5957_v18 }
 0x3ba   : > { %4775 = vpow2.f32 %v1258_v60  ;;  %4296 = vmatpush3.bf16.xpose.msk.msra.mxu0 %vm5185_vm1, %v4291_v57  ;;  %v4597_v60 = vpop.permute.xlu1 %4596 }
 0x3bb   : > { %v6005_v63 = vpop.eup %4769  ;;  %v1260_v58 = vmul.f32 1.442695, %v1234_v28  ;;  %4299 = vmatprep.subr.msk.bf16.mxu0 %vm5185_vm1, %v4297_v30  ;;  %v4303_v54 = vpack.c.bf16 %v4589_v22, %v4588_v3  ;;  %v4599_v34 = vunpack.i.h.bf16 %v4597_v60 }
 0x3bc   : > { %v6009_v50 = vpop.eup %4771  ;;  %v1217_v20 = vpop.xlane.xlu0 %1216  ;;  %3880 = vmatprep.mubr.f32.mxu0 %v6005_v63 }
 0x3bd   : > { %4777 = vpow2.f32 %v1260_v58  ;;  %v1236_v12 = vsub.f32 %v5847_v39, %v1217_v20  ;;  %3881 = vmatmul.mubr.f32.gmra.mrb[22].mxu0 %v6009_v50 }
 0x3be   : > { %4779 = vpow2.f32 %v1262_v7  ;;  %v4602_v7 = vpop.permute.xlu1 %4601 }
 0x3bf   : > { %v1264_v19 = vmul.f32 1.442695, %v1236_v12  ;;  %v4604_v6 = vunpack.i.h.bf16 %v4602_v7  ;;  %v4603_v58 = vunpack.i.l.bf16 %v4602_v7 }
 0x3c0   : > { %v1223_v57 = vpop.xlane.xlu0 %1222 }
 0x3c1   : > { %4781 = vpow2.f32 %v1264_v19  ;;  %v4321_v20 = vpack.c.bf16 %v4604_v6, %v4603_v58  ;;  %v1239_v3 = vsub.f32 %v5854_v24, %v1223_v57  ;;  %v5003_v58 = vld [vmem:[%s5367_s12] sm:$0xff] }
 0x3c2   : > { %4783 = vpow2.f32 %v1266_v2  ;;  %4302 = vmatpush3.bf16.xpose.msk.msra.mxu0 %vm5185_vm1, %v4297_v30  ;;  %v4598_v30 = vunpack.i.l.bf16 %v4597_v60  ;;  %v1546_v22 = vpop.permute.xlu1 %1545 }
 0x3c3   : > { %v6018_v32 = vpop.eup %4773  ;;  %4305 = vmatprep.subr.msk.bf16.mxu0 %vm5185_vm1, %v4303_v54  ;;  %v1270_v19 = vmul.f32 1.442695, %v1239_v3 }
 0x3c4   : > { %v6022_v18 = vpop.eup %4775  ;;  %3883 = vmatprep.mubr.f32.mxu0 %v6018_v32  ;;  %v4592_v39 = vpop.permute.xlu0 %4591  ;;  %v4315_v28 = vpack.c.bf16 %v4599_v34, %v4598_v30 }
 0x3c5   : > { %7159 = vst [vmem:[#allocation37_spill] sm:$0xff] %v6022_v18  ;;  %3884 = vmatmul.mubr.f32.gmra.mrb[24].mxu0 %v6022_v18  ;;  %v4594_v41 = vunpack.i.h.bf16 %v4592_v39  ;;  %v4593_v38 = vunpack.i.l.bf16 %v4592_v39 }
 0x3c7   : > { %v6026_v10 = vpop.eup %4777  ;;  %v4309_v9 = vpack.c.bf16 %v4594_v41, %v4593_v38 }
 0x3c8   : > { %v6028_v46 = vpop.eup %4779  ;;  %3886 = vmatprep.mubr.f32.mxu0 %v6026_v10  ;;  %v1552_v38 = vpop.permute.xlu0 %1551 }
 0x3c9   : > { %7160 = vst [vmem:[#allocation38_spill] sm:$0xff] %v6028_v46  ;;  %3887 = vmatmul.mubr.f32.gmra.mrb[26].mxu0 %v6028_v46 }
 0x3ca   : > { %4308 = vmatpush3.bf16.xpose.msk.msra.mxu0 %vm5185_vm1, %v4303_v54 }
 0x3cb   : > { %v6034_v47 = vpop.eup %4781  ;;  %4311 = vmatprep.subr.msk.bf16.mxu0 %vm5185_vm1, %v4309_v9 }
 0x3cc   : > { %v6038_v4 = vpop.eup %4783  ;;  %3889 = vmatprep.mubr.f32.mxu0 %v6034_v47  ;;  %v1556_v24 = vpop.permute.xlu0 %1555 }
 0x3cd   : > { %7161 = vst [vmem:[#allocation39_spill] sm:$0xff] %v6038_v4  ;;  %3890 = vmatmul.mubr.f32.gmra.mrb[28].mxu0 %v6038_v4  ;;  %v3354_v4 = vld [vmem:[%s7088_s3 + $0x148] sm:$0xff] }
 0x3d0   : > { %v1560_v57 = vpop.permute.xlu0 %1559 }
 0x3d2   : > { %4314 = vmatpush3.bf16.xpose.msk.msra.mxu0 %vm5185_vm1, %v4309_v9 }
 0x3d3   : > { %4317 = vmatprep.subr.msk.bf16.mxu0 %vm5185_vm1, %v4315_v28 }
 0x3da   : > { %4320 = vmatpush3.bf16.xpose.msk.msra.mxu0 %vm5185_vm1, %v4315_v28  ;;  %v1564_v28 = vpop.permute.xlu0 %1563 }
 0x3db   : > { %4323 = vmatprep.subr.msk.bf16.mxu0 %vm5185_vm1, %v4321_v20 }
 0x3de   : > { %v1568_v6 = vpop.permute.xlu0 %1567 }
 0x3e2   : > { %4326 = vmatpush3.bf16.xpose.msk.msra.mxu0 %vm5185_vm1, %v4321_v20  ;;  %v5004_v20 = vld [vmem:[%s5367_s12 + $0x8] sm:$0xff] }
 0x3ec   : > { %v1221_v12 = vpop.xlane.xlu1 %1220 }
 0x3ed   : > { %v1238_v2 = vsub.f32 %v5899_v27, %v1221_v12  ;;  %v1572_v12 = vpop.permute.xlu0 %1571 }
 0x3ef   : > { %v1268_v54 = vmul.f32 1.442695, %v1238_v2 }
 0x3f0   : > { %v1548_v39 = vpop.permute.xlu1 %1547 }
 0x3f1   : > { %4785 = vpow2.f32 %v1268_v54  ;;  %v5006_v54 = vld [vmem:[%s5367_s12 + $0x18] sm:$0xff] }
 0x3f2   : > { %4787 = vpow2.f32 %v1270_v19  ;;  %v5005_v19 = vld [vmem:[%s5367_s12 + $0x10] sm:$0xff] }
 0x3f4   : > { %v1550_v41 = vpop.permute.xlu1 %1549 }
 0x3f8   : > { %v1554_v60 = vpop.permute.xlu1 %1553 }
 0x3fb   : > { %v6054_v9 = vpop.eup %4785 }
 0x3fc   : > { %7162 = vst [vmem:[#allocation40_spill] sm:$0xff] %v6054_v9  ;;  %v6056_v34 = vpop.eup %4787  ;;  %3892 = vmatprep.mubr.f32.mxu0 %v6054_v9  ;;  %v1558_v27 = vpop.permute.xlu1 %1557 }
 0x3fd   : > { %7163 = vst [vmem:[#allocation41_spill] sm:$0xff] %v6056_v34  ;;  %3893 = vmatmul.mubr.f32.gmra.mrb[30].mxu0 %v6056_v34 }
 0x3fe   : > { %3927 = vmatprep.mubr.msk.f32.mxu0 %vm291_vm0, %v1546_v22  ;;  %v6072_v22 = vpack.i.bf16 %v5004_v20, %v5003_v58  ;;  %v5013_v58 = vld [vmem:[%s5367_s12 + $0x60] sm:$0xff]  ;;  %v5014_v20 = vld [vmem:[%s5367_s12 + $0x68] sm:$0xff] }
 0x400   : > { %v1562_v30 = vpop.permute.xlu1 %1561  ;;  %4606 = vrot.lane.b32.xlu1 %v6072_v22, %s5094_s28 }
 0x401   : > { %3928 = vmatmul.mubr.msk.f32.vlgmr.msra.gmra.mrb[32].mxu0 %vm291_vm0, %v1548_v39  ;;  %v6082_v39 = vpack.i.bf16 %v5006_v54, %v5005_v19  ;;  %v5017_v54 = vld [vmem:[%s5181_s5] sm:$0xff] }
 0x402   : > { %3930 = vmatprep.mubr.msk.f32.mxu0 %vm291_vm0, %v1550_v41  ;;  %v1576_v41 = vpop.permute.xlu0 %1575 }
 0x403   : > { %4611 = vrot.lane.b32.xlu0 %v6082_v39, %s5094_s28 }
 0x404   : > { %v1566_v7 = vpop.permute.xlu1 %1565 }
 0x405   : > { %3931 = vmatmul.mubr.msk.f32.gmra.mrb[34].mxu0 %vm291_vm0, %v1552_v38  ;;  %v5007_v38 = vld [vmem:[%s5367_s12 + $0x20] sm:$0xff] }
 0x406   : > { %3933 = vmatprep.mubr.msk.f32.mxu0 %vm291_vm0, %v1554_v60  ;;  %v5008_v60 = vld [vmem:[%s5367_s12 + $0x28] sm:$0xff] }
 0x408   : > { %v1570_v3 = vpop.permute.xlu1 %1569 }
 0x409   : > { %3934 = vmatmul.mubr.msk.f32.gmra.mrb[36].mxu0 %vm291_vm0, %v1556_v24  ;;  %v6089_v24 = vpack.i.bf16 %v5008_v60, %v5007_v38  ;;  %v5019_v60 = vld [vmem:[%s5367_s12 + $0x70] sm:$0xff] }
 0x40a   : > { %3936 = vmatprep.mubr.msk.f32.mxu0 %vm291_vm0, %v1558_v27  ;;  %v5009_v27 = vld [vmem:[%s5367_s12 + $0x40] sm:$0xff] }
 0x40b   : > { %4616 = vrot.lane.b32.xlu1 %v6089_v24, %s5094_s28 }
 0x40c   : > { %v1574_v2 = vpop.permute.xlu1 %1573 }
 0x40d   : > { %3937 = vmatmul.mubr.msk.f32.gmra.mrb[38].mxu0 %vm291_vm0, %v1560_v57  ;;  %v5010_v57 = vld [vmem:[%s5367_s12 + $0x48] sm:$0xff] }
 0x40e   : > { %3939 = vmatprep.mubr.msk.f32.mxu0 %vm291_vm0, %v1562_v30  ;;  %v6096_v30 = vpack.i.bf16 %v5010_v57, %v5009_v27  ;;  %v5020_v27 = vld [vmem:[%s5367_s12 + $0x78] sm:$0xff] }
 0x40f   : > { %v6122_v57 = vpack.i.bf16 %v5020_v27, %v5019_v60  ;;  %v5027_v27 = vld [vmem:[%s5181_s5 + $0x40] sm:$0xff] }
 0x410   : > { %4626 = vrot.lane.b32.xlu1 %v6096_v30, %s5094_s28 }
 0x411   : > { %3940 = vmatmul.mubr.msk.f32.gmra.mrb[40].mxu0 %vm291_vm0, %v1564_v28  ;;  %v5011_v28 = vld [vmem:[%s5367_s12 + $0x30] sm:$0xff] }
 0x412   : > { %3942 = vmatprep.mubr.msk.f32.mxu0 %vm291_vm0, %v1566_v7  ;;  %v5012_v7 = vld [vmem:[%s5367_s12 + $0x38] sm:$0xff] }
 0x415   : > { %3943 = vmatmul.mubr.msk.f32.gmra.mrb[42].mxu0 %vm291_vm0, %v1568_v6  ;;  %v6100_v6 = vpack.i.bf16 %v5012_v7, %v5011_v28  ;;  %v5021_v28 = vld [vmem:[%s5181_s5 + $0x10] sm:$0xff]  ;;  %v5022_v7 = vld [vmem:[%s5181_s5 + $0x18] sm:$0xff] }
 0x416   : > { %3945 = vmatprep.mubr.msk.f32.mxu0 %vm291_vm0, %v1570_v3  ;;  %v6106_v3 = vpack.i.bf16 %v5014_v20, %v5013_v58  ;;  %v4650_v58 = vpack.i.bf16 %v5022_v7, %v5021_v28  ;;  %v5023_v20 = vld [vmem:[%s5181_s5 + $0x30] sm:$0xff] }
 0x417   : > { %4621 = vrot.lane.b32.xlu0 %v6100_v6, %s5094_s28 }
 0x418   : > { %4636 = vrot.lane.b32.xlu1 %v6106_v3, %s5094_s28 }
 0x419   : > { %3946 = vmatmul.mubr.msk.f32.gmra.mrb[44].mxu0 %vm291_vm0, %v1572_v12  ;;  %v5015_v12 = vld [vmem:[%s5367_s12 + $0x50] sm:$0xff] }
 0x41a   : > { %3948 = vmatprep.mubr.msk.f32.mxu0 %vm291_vm0, %v1574_v2  ;;  %v5016_v2 = vld [vmem:[%s5367_s12 + $0x58] sm:$0xff]  ;;  %s5098_s12 = smov 24  }
 0x41b   : > { %v6112_v19 = vpack.i.bf16 %v5016_v2, %v5015_v12  ;;  %v5024_v12 = vld [vmem:[%s5181_s5 + $0x38] sm:$0xff] }
 0x41c   : > { %v4660_v2 = vpack.i.bf16 %v5024_v12, %v5023_v20 }
 0x41d   : > { %3949 = vmatmul.mubr.msk.f32.gmra.mrb[46].mxu0 %vm291_vm0, %v1576_v41  ;;  %v5018_v41 = vld [vmem:[%s5181_s5 + $0x8] sm:$0xff]  ;;  %4631 = vrot.lane.b32.xlu0 %v6112_v19, %s5094_s28 }
 0x41e   : > { %v4645_v38 = vpack.i.bf16 %v5018_v41, %v5017_v54  ;;  %v5025_v54 = vld [vmem:[%s5181_s5 + $0x20] sm:$0xff]  ;;  %v5026_v41 = vld [vmem:[%s5181_s5 + $0x28] sm:$0xff] }
 0x41f   : > { %v4655_v60 = vpack.i.bf16 %v5026_v41, %v5025_v54 }
 0x420   : > { %4646 = vrot.lane.b32.xlu1 %v4645_v38, %s5095_s8  ;;  %v5028_v38 = vld [vmem:[%s5181_s5 + $0x48] sm:$0xff]  ;;  %s5097_s5 = smov 16  }
 0x421   : > { %4641 = vrot.lane.b32.xlu0 %v6122_v57, %s5094_s28  ;;  %v4665_v31 = vpack.i.bf16 %v5028_v38, %v5027_v27  ;;  %s221_s28 = sand.u32 1, %s5083_s16  }
 0x422   : > { %s3226_s11 = sshll.u32 %s221_s28, 7  ;;  %s7043_s19 = scalar_lea.sflag [#allocation3], %s221_s28 }
 0x423   : > { %s6954_s13 = scalar_lea.vmem [#allocation2], %s3226_s11 }
 0x424   : > { %4651 = vrot.lane.b32.xlu1 %v4650_v58, %s5095_s8  ;;  %s3136_s20 = sshll.u32 %s6954_s13, 4  ;;  %s7036_s20 = int_to_ptr.vmem [resolvable:$true] %s3136_s20 }
 0x425   : > { %4661 = vrot.lane.b32.xlu0 %v4660_v2, %s5095_s8  ;;  %s5029_s9 = scalar_lea.vmem %s7036_s20, 2048 }
 0x426   : > { %p5030_p11 = scmp.ne.s32.totalorder %s7036_s20, %s5029_s9 }
 0x428   : > { %4656 = vrot.lane.b32.xlu1 %v4655_v60, %s5095_s8  ;;  %p5031_p12 = pnand %p5030_p11, %p5164_p5 }
 0x42a   : > { %p5032_p13 = pneg %p5031_p12 }
 0x42c   : > { %4666 = vrot.lane.b32.xlu1 %v4665_v31, %s5095_s8 }
 0x472   : > { %v4607_v58 = vpop.permute.xlu1 %4606 }
 0x473   : > { %v4609_v12 = vunpack.i.h.bf16 %v4607_v58  ;;  %v4608_v54 = vunpack.i.l.bf16 %v4607_v58 }
 0x475   : > { %v4327_v60 = vpack.c.bf16 %v4609_v12, %v4608_v54  ;;  %v4612_v27 = vpop.permute.xlu0 %4611 }
 0x476   : > { %v4614_v31 = vunpack.i.h.bf16 %v4612_v27  ;;  %v4613_v38 = vunpack.i.l.bf16 %v4612_v27 }
 0x477   : > { %4328 = vmatprep.subr.bf16.mxu1 %v4327_v60 }
 0x478   : > { %4330 = vmatpush3.bf16.msra.mxu1 %v4327_v60  ;;  %v4331_v21 = vpack.c.bf16 %v4614_v31, %v4613_v38 }
 0x47a   : > { %4332 = vmatprep.subr.bf16.mxu1 %v4331_v21 }
 0x47c   : > { %v6139_v28 = vpop.f32.mrb[16].mxu0  ;;  %4334 = vmatpush3.bf16.msra.mxu1 %v4331_v21 }
 0x47d   : > { %7164 = vst [vmem:[#allocation42_spill] sm:$0xff] %v6139_v28  ;;  %v6141_v7 = vpop.f32.mrb[17].mxu0 }
 0x47e   : > { %7165 = vst [vmem:[#allocation43_spill] sm:$0xff] %v6141_v7  ;;  %v4617_v7 = vpop.permute.xlu1 %4616 }
 0x47f   : > { %v4618_v59 = vunpack.i.l.bf16 %v4617_v7 }
 0x480   : > { %v6143_v29 = vpop.f32.mrb[18].mxu0 }
 0x481   : > { %7166 = vst [vmem:[#allocation44_spill] sm:$0xff] %v6143_v29  ;;  %v6145_v20 = vpop.f32.mrb[19].mxu0 }
 0x482   : > { %7167 = vst [vmem:[#allocation45_spill] sm:$0xff] %v6145_v20  ;;  %v4619_v20 = vunpack.i.h.bf16 %v4617_v7 }
 0x484   : > { %v4335_v58 = vpack.c.bf16 %v4619_v20, %v4618_v59 }
 0x486   : > { %4336 = vmatprep.subr.bf16.mxu1 %v4335_v58 }
 0x487   : > { %4338 = vmatpush3.bf16.msra.mxu1 %v4335_v58 }
 0x488   : > { %v6147_v41 = vpop.f32.mrb[20].mxu0 }
 0x489   : > { %7168 = vst [vmem:[#allocation46_spill] sm:$0xff] %v6147_v41  ;;  %v6149_v2 = vpop.f32.mrb[21].mxu0  ;;  %v4627_v41 = vpop.permute.xlu1 %4626 }
 0x48a   : > { %7169 = vst [vmem:[#allocation47_spill] sm:$0xff] %v6149_v2  ;;  %v4622_v15 = vpop.permute.xlu0 %4621  ;;  %v4629_v12 = vunpack.i.h.bf16 %v4627_v41  ;;  %v4628_v54 = vunpack.i.l.bf16 %v4627_v41 }
 0x48b   : > { %v4624_v2 = vunpack.i.h.bf16 %v4622_v15  ;;  %v4623_v60 = vunpack.i.l.bf16 %v4622_v15 }
 0x48c   : > { %v4343_v42 = vpack.c.bf16 %v4629_v12, %v4628_v54 }
 0x48d   : > { %v4637_v31 = vpop.permute.xlu1 %4636 }
 0x48e   : > { %v4639_v20 = vunpack.i.h.bf16 %v4637_v31  ;;  %v4638_v41 = vunpack.i.l.bf16 %v4637_v31 }
 0x490   : > { %v6151_v28 = vpop.f32.mrb[22].mxu0 }
 0x491   : > { %7170 = vst [vmem:[#allocation48_spill] sm:$0xff] %v6151_v28  ;;  %v6153_v29 = vpop.f32.mrb[23].mxu0  ;;  %v4339_v28 = vpack.c.bf16 %v4624_v2, %v4623_v60  ;;  %v4351_v60 = vpack.c.bf16 %v4639_v20, %v4638_v41 }
 0x492   : > { %7171 = vst [vmem:[#allocation49_spill] sm:$0xff] %v6153_v29  ;;  %v4632_v29 = vpop.permute.xlu0 %4631 }
 0x493   : > { %4340 = vmatprep.subr.bf16.mxu1 %v4339_v28  ;;  %v4634_v7 = vunpack.i.h.bf16 %v4632_v29  ;;  %v4633_v21 = vunpack.i.l.bf16 %v4632_v29  ;;  %v4647_v29 = vpop.permute.xlu1 %4646 }
 0x494   : > { %4342 = vmatpush3.bf16.msra.mxu1 %v4339_v28  ;;  %v4649_v28 = vunpack.i.h.bf16 %v4647_v29 }
 0x495   : > { %4344 = vmatprep.subr.bf16.mxu1 %v4343_v42  ;;  %v4347_v25 = vpack.c.bf16 %v4634_v7, %v4633_v21 }
 0x496   : > { %v4642_v58 = vpop.permute.xlu0 %4641 }
 0x497   : > { %v4644_v12 = vunpack.i.h.bf16 %v4642_v58  ;;  %v4643_v54 = vunpack.i.l.bf16 %v4642_v58 }
 0x498   : > { %v6155_v27 = vpop.f32.mrb[24].mxu0  ;;  %4346 = vmatpush3.bf16.msra.mxu1 %v4343_v42 }
 0x499   : > { %7172 = vst [vmem:[#allocation50_spill] sm:$0xff] %v6155_v27  ;;  %v6157_v38 = vpop.f32.mrb[25].mxu0  ;;  %4348 = vmatprep.subr.bf16.mxu1 %v4347_v25 }
 0x49a   : > { %7173 = vst [vmem:[#allocation51_spill] sm:$0xff] %v6157_v38  ;;  %v4355_v38 = vpack.c.bf16 %v4644_v12, %v4643_v54  ;;  %v3348_v54 = vld [vmem:[%s7088_s3 + $0x118] sm:$0xff] }
 0x49c   : > { %v6159_v59 = vpop.f32.mrb[26].mxu0  ;;  %4350 = vmatpush3.bf16.msra.mxu1 %v4347_v25  ;;  %v3346_v25 = vld [vmem:[%s7088_s3 + $0x108] sm:$0xff] }
 0x49d   : > { %7174 = vst [vmem:[#allocation52_spill] sm:$0xff] %v6159_v59  ;;  %v6161_v15 = vpop.f32.mrb[27].mxu0  ;;  %4352 = vmatprep.subr.bf16.mxu1 %v4351_v60  ;;  %v4648_v59 = vunpack.i.l.bf16 %v4647_v29 }
 0x49e   : > { %7175 = vst [vmem:[#allocation53_spill] sm:$0xff] %v6161_v15 }
 0x49f   : > { %v6167_v31 = vpack.c.bf16 %v4649_v28, %v4648_v59  ;;  %v3345_v59 = vld [vmem:[%s7088_s3 + $0x100] sm:$0xff] }
 0x4a0   : > { %v6163_v2 = vpop.f32.mrb[28].mxu0  ;;  %4354 = vmatpush3.bf16.msra.mxu1 %v4351_v60 }
 0x4a1   : > { %7176 = vst [vmem:[#allocation54_spill] sm:$0xff] %v6163_v2  ;;  %v6165_v27 = vpop.f32.mrb[29].mxu0  ;;  %4356 = vmatprep.subr.bf16.mxu1 %v4355_v38 }
 0x4a2   : > { %7177 = vst [vmem:[#allocation55_spill] sm:$0xff] %v6165_v27 }
 0x4a4   : > { %4358 = vmatpush3.bf16.msra.mxu1 %v4355_v38 }
 0x4a5   : > { %4361 = vmatprep.subr.msk.bf16.mxu1 %vm5185_vm1, %v6167_v31 }
 0x4d0   : > { %v6172_v42 = vpop.f32.mrb[30].mxu0 }
 0x4d1   : > { %7178 = vst [vmem:[#allocation56_spill] sm:$0xff] %v6172_v42  ;;  %v6174_v7 = vpop.f32.mrb[31].mxu0 }
 0x4d2   : > { %7179 = vst [vmem:[#allocation57_spill] sm:$0xff] %v6174_v7 }
 0x4d4   : > { %v3929_v21 = vpop.f32.mrb[32].mxu0 }
 0x4d5   : > { %v1819_v20 = vmul.f32 0.35355338, %v3929_v21  ;;  %v1739_v41 = vpop.f32.mrb[33].mxu0  ;;  %v3347_v21 = vld [vmem:[%s7088_s3 + $0x110] sm:$0xff] }
 0x4d6   : > { %v1818_v38 = vmul.f32 0.35355338, %v1739_v41  ;;  %v3350_v41 = vld [vmem:[%s7088_s3 + $0x128] sm:$0xff] }
 0x4d7   : > { %v6182_v58 = vadd.f32 %v3346_v25, %v1819_v20 }
 0x4d8   : > { %v3932_v12 = vpop.f32.mrb[34].mxu0  ;;  %v6187_v60 = vadd.f32 %v3345_v59, %v1818_v38 }
 0x4d9   : > { %v1821_v29 = vmul.f32 0.35355338, %v3932_v12  ;;  %1869 = vmax.xlane.f32.xlu1 %v6182_v58  ;;  %v1749_v28 = vpop.f32.mrb[35].mxu0 }
 0x4da   : > { %v1820_v42 = vmul.f32 0.35355338, %v1749_v28  ;;  %1867 = vmax.xlane.f32.xlu0 %v6187_v60 }
 0x4db   : > { %v6194_v25 = vadd.f32 %v3348_v54, %v1821_v29  ;;  %v3349_v54 = vld [vmem:[%s7088_s3 + $0x120] sm:$0xff] }
 0x4dc   : > { %v3935_v20 = vpop.f32.mrb[36].mxu0  ;;  %v6199_v59 = vadd.f32 %v3347_v21, %v1820_v42 }
 0x4dd   : > { %v1823_v38 = vmul.f32 0.35355338, %v3935_v20  ;;  %1873 = vmax.xlane.f32.xlu1 %v6194_v25  ;;  %v1759_v12 = vpop.f32.mrb[37].mxu0  ;;  %v3352_v20 = vld [vmem:[%s7088_s3 + $0x138] sm:$0xff] }
 0x4de   : > { %1871 = vmax.xlane.f32.xlu0 %v6199_v59  ;;  %v1822_v28 = vmul.f32 0.35355338, %v1759_v12 }
 0x4df   : > { %v6203_v2 = vadd.f32 %v3350_v41, %v1823_v38 }
 0x4e0   : > { %v3938_v7 = vpop.f32.mrb[38].mxu0  ;;  %v6209_v27 = vadd.f32 %v3349_v54, %v1822_v28 }
 0x4e1   : > { %v1769_v29 = vpop.f32.mrb[39].mxu0  ;;  %v1825_v42 = vmul.f32 0.35355338, %v3938_v7  ;;  %v3351_v7 = vld [vmem:[%s7088_s3 + $0x130] sm:$0xff] }
 0x4e2   : > { %1877 = vmax.xlane.f32.xlu0 %v6203_v2  ;;  %v1824_v38 = vmul.f32 0.35355338, %v1769_v29  ;;  %v3358_v29 = vld [vmem:[%s7088_s3 + $0x168] sm:$0xff] }
 0x4e3   : > { %v6215_v41 = vadd.f32 %v3352_v20, %v1825_v42 }
 0x4e4   : > { %v3941_v21 = vpop.f32.mrb[40].mxu0  ;;  %v6226_v34 = vadd.f32 %v3351_v7, %v1824_v38 }
 0x4e5   : > { %v1779_v15 = vpop.f32.mrb[41].mxu0  ;;  %v1827_v42 = vmul.f32 0.35355338, %v3941_v21 }
 0x4e6   : > { %1875 = vmax.xlane.f32.xlu0 %v6209_v27  ;;  %v1826_v21 = vmul.f32 0.35355338, %v1779_v15 }
 0x4e7   : > { %v6238_v38 = vadd.f32 %v3354_v4, %v1827_v42  ;;  %v3357_v42 = vld [vmem:[%s7088_s3 + $0x160] sm:$0xff] }
 0x4e8   : > { %v3944_v12 = vpop.f32.mrb[42].mxu0 }
 0x4e9   : > { %v1829_v28 = vmul.f32 0.35355338, %v3944_v12  ;;  %v1789_v54 = vpop.f32.mrb[43].mxu0 }
 0x4ea   : > { %1881 = vmax.xlane.f32.xlu0 %v6215_v41  ;;  %v1828_v18 = vmul.f32 0.35355338, %v1789_v54  ;;  %v3360_v54 = vld [vmem:[%s7088_s3 + $0x178] sm:$0xff] }
 0x4eb   : > { %v6224_v43 = vadd.f32 %v3356_v44, %v1829_v28  ;;  %v3353_v28 = vld [vmem:[%s7088_s3 + $0x140] sm:$0xff] }
 0x4ec   : > { %v3947_v20 = vpop.f32.mrb[44].mxu0 }
 0x4ed   : > { %v1831_v46 = vmul.f32 0.35355338, %v3947_v20  ;;  %1889 = vmax.xlane.f32.xlu1 %v6224_v43  ;;  %v1799_v12 = vpop.f32.mrb[45].mxu0  ;;  %v6245_v20 = vadd.f32 %v3353_v28, %v1826_v21 }
 0x4ee   : > { %1879 = vmax.xlane.f32.xlu0 %v6226_v34  ;;  %v1830_v15 = vmul.f32 0.35355338, %v1799_v12 }
 0x4ef   : > { %v6236_v44 = vadd.f32 %v3358_v29, %v1831_v46  ;;  %v3355_v46 = vld [vmem:[%s7088_s3 + $0x150] sm:$0xff] }
 0x4f0   : > { %v3950_v7 = vpop.f32.mrb[46].mxu0  ;;  %v6251_v4 = vadd.f32 %v3355_v46, %v1828_v18  ;;  %v6260_v21 = vadd.f32 %v3357_v42, %v1830_v15 }
 0x4f1   : > { %1893 = vmax.xlane.f32.xlu1 %v6236_v44  ;;  %v1809_v9 = vpop.f32.mrb[47].mxu0  ;;  %v1833_v29 = vmul.f32 0.35355338, %v3950_v7 }
 0x4f2   : > { %1885 = vmax.xlane.f32.xlu0 %v6238_v38 }
 0x4f3   : > { %v6262_v28 = vadd.f32 %v3360_v54, %v1833_v29 }
 0x4f6   : > { %1883 = vmax.xlane.f32.xlu0 %v6245_v20 }
 0x4fa   : > { %1887 = vmax.xlane.f32.xlu0 %v6251_v4 }
 0x4fe   : > { %1891 = vmax.xlane.f32.xlu0 %v6260_v21 }
 0x502   : > { %4676 = vrot.lane.b32.xlu1 %v5852_v8, %s5095_s8  ;;  %1897 = vmax.xlane.f32.xlu0 %v6262_v28  ;;  %v1832_v8 = vmul.f32 0.35355338, %v1809_v9 }
 0x506   : > { %4681 = vrot.lane.b32.xlu1 %v5861_v45, %s5095_s8  ;;  %v3359_v45 = vld [vmem:[%s7088_s3 + $0x170] sm:$0xff] }
 0x50a   : > { %2204 = vrot.lane.b32.xlu1 %v5866_v48, %s5095_s8  ;;  %v6285_v48 = vadd.f32 %v3359_v45, %v1832_v8 }
 0x518   : > { %4671 = vrot.lane.b32.xlu0 %v5872_v55, %s5095_s8  ;;  %v4652_v55 = vpop.permute.xlu1 %4651 }
 0x519   : > { %v4654_v12 = vunpack.i.h.bf16 %v4652_v55 }
 0x51c   : > { %2210 = vrot.lane.b32.xlu0 %v5877_v11, %s5095_s8  ;;  %v4657_v11 = vpop.permute.xlu1 %4656 }
 0x51d   : > { %v4659_v45 = vunpack.i.h.bf16 %v4657_v11 }
 0x520   : > { %2214 = vrot.lane.b32.xlu0 %v5882_v33, %s5095_s8  ;;  %v6310_v33 = vpop.permute.xlu1 %4666 }
 0x524   : > { %2218 = vrot.lane.b32.xlu0 %v5887_v35, %s5095_s8  ;;  %v6312_v35 = vpop.permute.xlu0 %4661 }
 0x528   : > { %2222 = vrot.lane.b32.xlu0 %v5892_v13, %s5095_s8 }
 0x52c   : > { %2226 = vrot.lane.b32.xlu0 %v5902_v5, %s5095_s8 }
 0x52e   : > { %1895 = vmax.xlane.f32.xlu1 %v6285_v48 }
 0x530   : > { %2230 = vrot.lane.b32.xlu0 %v5908_v51, %s5095_s8 }
 0x534   : > { %2234 = vrot.lane.b32.xlu0 %v5913_v49, %s5095_s8 }
 0x538   : > { %4696 = vrot.lane.b32.xlu0 %v6089_v24, %s5095_s8 }
 0x53c   : > { %4706 = vrot.lane.b32.xlu0 %v6096_v30, %s5095_s8 }
 0x53f   : > { %2206 = vrot.lane.b32.xlu1 %v5918_v52, %s5095_s8 }
 0x540   : > { %4711 = vrot.lane.b32.xlu0 %v6112_v19, %s5095_s8 }
 0x543   : > { %2208 = vrot.lane.b32.xlu1 %v5923_v37, %s5095_s8 }
 0x547   : > { %2212 = vrot.lane.b32.xlu1 %v5928_v40, %s5095_s8 }
 0x54b   : > { %2216 = vrot.lane.b32.xlu1 %v5933_v62, %s5095_s8 }
 0x54f   : > { %2220 = vrot.lane.b32.xlu1 %v5938_v23, %s5095_s8 }
 0x553   : > { %2224 = vrot.lane.b32.xlu1 %v5943_v14, %s5095_s8 }
 0x557   : > { %2228 = vrot.lane.b32.xlu1 %v5948_v17, %s5095_s8 }
 0x55b   : > { %2232 = vrot.lane.b32.xlu1 %v5953_v53, %s5095_s8 }
 0x55f   : > { %4686 = vrot.lane.b32.xlu1 %v6072_v22, %s5095_s8 }
 0x563   : > { %4691 = vrot.lane.b32.xlu1 %v6082_v39, %s5095_s8 }
 0x566   : > { %v1870_v13 = vpop.xlane.xlu1 %1869 }
 0x567   : > { %v1900_v62 = vsub.f32 %v6182_v58, %v1870_v13  ;;  %v1868_v5 = vpop.xlane.xlu0 %1867  ;;  %4701 = vrot.lane.b32.xlu1 %v6100_v6, %s5095_s8 }
 0x568   : > { %v1899_v23 = vsub.f32 %v6187_v60, %v1868_v5  ;;  %v4653_v60 = vunpack.i.l.bf16 %v4652_v55  ;;  %v4658_v55 = vunpack.i.l.bf16 %v4657_v11 }
 0x569   : > { %v1917_v51 = vmul.f32 1.442695, %v1900_v62 }
 0x56a   : > { %v1915_v14 = vmul.f32 1.442695, %v1899_v23  ;;  %v1874_v49 = vpop.xlane.xlu1 %1873  ;;  %v4365_v29 = vpack.c.bf16 %v4654_v12, %v4653_v60 }
 0x56b   : > { %v1902_v52 = vsub.f32 %v6194_v25, %v1874_v49  ;;  %v1872_v17 = vpop.xlane.xlu0 %1871  ;;  %v4664_v49 = vunpack.i.h.bf16 %v6312_v35  ;;  %4716 = vrot.lane.b32.xlu1 %v6106_v3, %s5095_s8 }
 0x56c   : > { %4789 = vpow2.f32 %v1915_v14  ;;  %v1901_v53 = vsub.f32 %v6199_v59, %v1872_v17 }
 0x56d   : > { %4791 = vpow2.f32 %v1917_v51  ;;  %v1921_v37 = vmul.f32 1.442695, %v1902_v52  ;;  %v4663_v52 = vunpack.i.l.bf16 %v6312_v35 }
 0x56e   : > { %v1919_v40 = vmul.f32 1.442695, %v1901_v53 }
 0x56f   : > { %v1878_v18 = vpop.xlane.xlu0 %1877 }
 0x570   : > { %4793 = vpow2.f32 %v1919_v40  ;;  %v1904_v9 = vsub.f32 %v6203_v2, %v1878_v18 }
 0x571   : > { %4795 = vpow2.f32 %v1921_v37 }
 0x572   : > { %v1925_v46 = vmul.f32 1.442695, %v1904_v9  ;;  %v4377_v9 = vpack.c.bf16 %v4664_v49, %v4663_v52 }
 0x573   : > { %v1876_v58 = vpop.xlane.xlu0 %1875 }
 0x574   : > { %v1903_v7 = vsub.f32 %v6209_v27, %v1876_v58 }
 0x576   : > { %v6320_v15 = vpop.eup %4789  ;;  %v1923_v25 = vmul.f32 1.442695, %v1903_v7 }
 0x577   : > { %v6322_v42 = vpop.eup %4791  ;;  %3983 = vmatprep.mubr.f32.mxu1 %v6320_v15  ;;  %v1882_v59 = vpop.xlane.xlu0 %1881 }
 0x578   : > { %4797 = vpow2.f32 %v1923_v25  ;;  %3984 = vmatmul.mubr.f32.vlgmr.msra.gmra.mrb[32].mxu1 %v6322_v42  ;;  %v1906_v2 = vsub.f32 %v6215_v41, %v1882_v59 }
 0x579   : > { %4799 = vpow2.f32 %v1925_v46  ;;  %4364 = vmatpush3.bf16.xpose.msk.msra.mxu1 %vm5185_vm1, %v6167_v31  ;;  %v4371_v31 = vpack.c.bf16 %v4659_v45, %v4658_v55  ;;  %v4668_v46 = vunpack.i.l.bf16 %v6310_v33 }
 0x57a   : > { %v6330_v27 = vpop.eup %4793  ;;  %4367 = vmatprep.subr.msk.bf16.mxu1 %vm5185_vm1, %v4365_v29  ;;  %v1929_v41 = vmul.f32 1.442695, %v1906_v2  ;;  %v1890_v23 = vpop.xlane.xlu1 %1889 }
 0x57b   : > { %v6334_v54 = vpop.eup %4795  ;;  %3986 = vmatprep.mubr.f32.mxu1 %v6330_v27  ;;  %v1880_v8 = vpop.xlane.xlu0 %1879 }
 0x57c   : > { %v1905_v13 = vsub.f32 %v6226_v34, %v1880_v8  ;;  %3987 = vmatmul.mubr.f32.gmra.mrb[34].mxu1 %v6334_v54 }
 0x57e   : > { %v1927_v62 = vmul.f32 1.442695, %v1905_v13  ;;  %v1894_v37 = vpop.xlane.xlu1 %1893 }
 0x57f   : > { %v1886_v5 = vpop.xlane.xlu0 %1885  ;;  %v1912_v60 = vsub.f32 %v6236_v44, %v1894_v37 }
 0x580   : > { %4801 = vpow2.f32 %v1927_v62  ;;  %v1908_v51 = vsub.f32 %v6238_v38, %v1886_v5  ;;  %v1910_v38 = vsub.f32 %v6224_v43, %v1890_v23 }
 0x581   : > { %4803 = vpow2.f32 %v1929_v41  ;;  %4370 = vmatpush3.bf16.xpose.msk.msra.mxu1 %vm5185_vm1, %v4365_v29  ;;  %v1941_v25 = vmul.f32 1.442695, %v1912_v60 }
 0x582   : > { %v6342_v14 = vpop.eup %4797  ;;  %4373 = vmatprep.subr.msk.bf16.mxu1 %vm5185_vm1, %v4371_v31  ;;  %v1933_v53 = vmul.f32 1.442695, %v1908_v51  ;;  %v1937_v12 = vmul.f32 1.442695, %v1910_v38  ;;  %v4677_v5 = vpop.permute.xlu1 %4676 }
 0x583   : > { %v6346_v34 = vpop.eup %4799  ;;  %3989 = vmatprep.mubr.f32.mxu1 %v6342_v14  ;;  %v1884_v11 = vpop.xlane.xlu0 %1883  ;;  %v4679_v51 = vunpack.i.h.bf16 %v4677_v5 }
 0x584   : > { %v1907_v17 = vsub.f32 %v6245_v20, %v1884_v11  ;;  %3990 = vmatmul.mubr.f32.gmra.mrb[36].mxu1 %v6346_v34  ;;  %v4678_v11 = vunpack.i.l.bf16 %v4677_v5 }
 0x586   : > { %v1931_v40 = vmul.f32 1.442695, %v1907_v17  ;;  %v4395_v49 = vpack.c.bf16 %v4679_v51, %v4678_v11  ;;  %v4682_v52 = vpop.permute.xlu1 %4681 }
 0x587   : > { %v1888_v18 = vpop.xlane.xlu0 %1887  ;;  %v4684_v17 = vunpack.i.h.bf16 %v4682_v52  ;;  %v4683_v38 = vunpack.i.l.bf16 %v4682_v52 }
 0x588   : > { %4805 = vpow2.f32 %v1931_v40  ;;  %v1909_v58 = vsub.f32 %v6251_v4, %v1888_v18  ;;  %v4669_v4 = vunpack.i.h.bf16 %v6310_v33 }
 0x589   : > { %4807 = vpow2.f32 %v1933_v53  ;;  %4376 = vmatpush3.bf16.xpose.msk.msra.mxu1 %vm5185_vm1, %v4371_v31  ;;  %v4401_v53 = vpack.c.bf16 %v4684_v17, %v4683_v38 }
 0x58a   : > { %v6358_v20 = vpop.eup %4801  ;;  %v1935_v35 = vmul.f32 1.442695, %v1909_v58  ;;  %4379 = vmatprep.subr.msk.bf16.mxu1 %vm5185_vm1, %v4377_v9  ;;  %v4383_v2 = vpack.c.bf16 %v4669_v4, %v4668_v46  ;;  %v2205_v37 = vpop.permute.xlu1 %2204 }
 0x58b   : > { %v6362_v43 = vpop.eup %4803  ;;  %3992 = vmatprep.mubr.f32.mxu1 %v6358_v20  ;;  %v1892_v7 = vpop.xlane.xlu0 %1891 }
 0x58c   : > { %4809 = vpow2.f32 %v1935_v35  ;;  %v1911_v44 = vsub.f32 %v6260_v21, %v1892_v7  ;;  %3993 = vmatmul.mubr.f32.gmra.mrb[38].mxu1 %v6362_v43 }
 0x58d   : > { %4811 = vpow2.f32 %v1937_v12 }
 0x58e   : > { %v1939_v59 = vmul.f32 1.442695, %v1911_v44 }
 0x58f   : > { %v1898_v29 = vpop.xlane.xlu0 %1897 }
 0x590   : > { %4813 = vpow2.f32 %v1939_v59  ;;  %v1914_v40 = vsub.f32 %v6262_v28, %v1898_v29 }
 0x591   : > { %4815 = vpow2.f32 %v1941_v25  ;;  %4382 = vmatpush3.bf16.xpose.msk.msra.mxu1 %vm5185_vm1, %v4377_v9 }
 0x592   : > { %v6371_v8 = vpop.eup %4805  ;;  %4385 = vmatprep.subr.msk.bf16.mxu1 %vm5185_vm1, %v4383_v2  ;;  %v1945_v58 = vmul.f32 1.442695, %v1914_v40 }
 0x593   : > { %v6375_v33 = vpop.eup %4807  ;;  %3995 = vmatprep.mubr.f32.mxu1 %v6371_v8  ;;  %v4672_v21 = vpop.permute.xlu0 %4671 }
 0x594   : > { %3996 = vmatmul.mubr.f32.gmra.mrb[40].mxu1 %v6375_v33  ;;  %v4674_v45 = vunpack.i.h.bf16 %v4672_v21  ;;  %v4673_v55 = vunpack.i.l.bf16 %v4672_v21 }
 0x596   : > { %v6379_v13 = vpop.eup %4809  ;;  %v4389_v41 = vpack.c.bf16 %v4674_v45, %v4673_v55 }
 0x597   : > { %v6381_v62 = vpop.eup %4811  ;;  %3998 = vmatprep.mubr.f32.mxu1 %v6379_v13  ;;  %v2211_v7 = vpop.permute.xlu0 %2210 }
 0x598   : > { %3999 = vmatmul.mubr.f32.gmra.mrb[42].mxu1 %v6381_v62 }
 0x599   : > { %4388 = vmatpush3.bf16.xpose.msk.msra.mxu1 %vm5185_vm1, %v4383_v2 }
 0x59a   : > { %v6387_v31 = vpop.eup %4813  ;;  %4391 = vmatprep.subr.msk.bf16.mxu1 %vm5185_vm1, %v4389_v41 }
 0x59b   : > { %v6391_v23 = vpop.eup %4815  ;;  %4001 = vmatprep.mubr.f32.mxu1 %v6387_v31  ;;  %v2215_v28 = vpop.permute.xlu0 %2214 }
 0x59c   : > { %4002 = vmatmul.mubr.f32.gmra.mrb[44].mxu1 %v6391_v23 }
 0x59f   : > { %v2219_v44 = vpop.permute.xlu0 %2218 }
 0x5a1   : > { %4394 = vmatpush3.bf16.xpose.msk.msra.mxu1 %vm5185_vm1, %v4389_v41 }
 0x5a2   : > { %4397 = vmatprep.subr.msk.bf16.mxu1 %vm5185_vm1, %v4395_v49 }
 0x5a3   : > { %v2223_v59 = vpop.permute.xlu0 %2222 }
 0x5a7   : > { %v2227_v2 = vpop.permute.xlu0 %2226 }
 0x5a9   : > { %4400 = vmatpush3.bf16.xpose.msk.msra.mxu1 %vm5185_vm1, %v4395_v49 }
 0x5aa   : > { %4403 = vmatprep.subr.msk.bf16.mxu1 %vm5185_vm1, %v4401_v53 }
 0x5ab   : > { %v2231_v45 = vpop.permute.xlu0 %2230 }
 0x5af   : > { %v2235_v41 = vpop.permute.xlu0 %2234 }
 0x5b1   : > { %4406 = vmatpush3.bf16.xpose.msk.msra.mxu1 %vm5185_vm1, %v4401_v53 }
 0x5bb   : > { %v1896_v18 = vpop.xlane.xlu1 %1895 }
 0x5bc   : > { %v1913_v9 = vsub.f32 %v6285_v48, %v1896_v18 }
 0x5be   : > { %v1943_v12 = vmul.f32 1.442695, %v1913_v9 }
 0x5bf   : > { %v2207_v60 = vpop.permute.xlu1 %2206 }
 0x5c0   : > { %4817 = vpow2.f32 %v1943_v12 }
 0x5c1   : > { %4819 = vpow2.f32 %v1945_v58  ;;  %v4697_v58 = vpop.permute.xlu0 %4696 }
 0x5c3   : > { %v2209_v35 = vpop.permute.xlu1 %2208 }
 0x5c7   : > { %v2213_v0 = vpop.permute.xlu1 %2212 }
 0x5ca   : > { %v6407_v4 = vpop.eup %4817 }
 0x5cb   : > { %v6409_v46 = vpop.eup %4819  ;;  %4004 = vmatprep.mubr.f32.mxu1 %v6407_v4  ;;  %v2217_v48 = vpop.permute.xlu1 %2216 }
 0x5cc   : > { %4005 = vmatmul.mubr.f32.gmra.mrb[46].mxu1 %v6409_v46 }
 0x5cd   : > { %4039 = vmatprep.mubr.msk.f32.mxu1 %vm291_vm0, %v2205_v37 }
 0x5cf   : > { %v2221_v25 = vpop.permute.xlu1 %2220 }
 0x5d0   : > { %4040 = vmatmul.mubr.msk.f32.vlgmr.msra.gmra.mrb[48].mxu1 %vm291_vm0, %v2207_v60 }
 0x5d1   : > { %4042 = vmatprep.mubr.msk.f32.mxu1 %vm291_vm0, %v2209_v35  ;;  %v4699_v35 = vunpack.i.h.bf16 %v4697_v58 }
 0x5d3   : > { %v2225_v29 = vpop.permute.xlu1 %2224 }
 0x5d4   : > { %4043 = vmatmul.mubr.msk.f32.gmra.mrb[50].mxu1 %vm291_vm0, %v2211_v7  ;;  %v4698_v7 = vunpack.i.l.bf16 %v4697_v58 }
 0x5d5   : > { %4045 = vmatprep.mubr.msk.f32.mxu1 %vm291_vm0, %v2213_v0 }
 0x5d7   : > { %v2229_v21 = vpop.permute.xlu1 %2228 }
 0x5d8   : > { %4046 = vmatmul.mubr.msk.f32.gmra.mrb[52].mxu1 %vm291_vm0, %v2215_v28 }
 0x5d9   : > { %4048 = vmatprep.mubr.msk.f32.mxu1 %vm291_vm0, %v2217_v48  ;;  %v4415_v48 = vpack.c.bf16 %v4699_v35, %v4698_v7  ;;  %v3394_v35 = vld [vmem:[%s7088_s3 + $0x188] sm:$0xff] }
 0x5db   : > { %v2233_v55 = vpop.permute.xlu1 %2232 }
 0x5dc   : > { %4049 = vmatmul.mubr.msk.f32.gmra.mrb[54].mxu1 %vm291_vm0, %v2219_v44 }
 0x5dd   : > { %4051 = vmatprep.mubr.msk.f32.mxu1 %vm291_vm0, %v2221_v25 }
 0x5df   : > { %v4687_v19 = vpop.permute.xlu1 %4686 }
 0x5e0   : > { %4052 = vmatmul.mubr.msk.f32.gmra.mrb[56].mxu1 %vm291_vm0, %v2223_v59  ;;  %v4689_v3 = vunpack.i.h.bf16 %v4687_v19  ;;  %v4688_v52 = vunpack.i.l.bf16 %v4687_v19  ;;  %v4707_v59 = vpop.permute.xlu0 %4706 }
 0x5e1   : > { %4054 = vmatprep.mubr.msk.f32.mxu1 %vm291_vm0, %v2225_v29 }
 0x5e2   : > { %v4407_v53 = vpack.c.bf16 %v4689_v3, %v4688_v52 }
 0x5e3   : > { %v4692_v38 = vpop.permute.xlu1 %4691 }
 0x5e4   : > { %4055 = vmatmul.mubr.msk.f32.gmra.mrb[58].mxu1 %vm291_vm0, %v2227_v2  ;;  %v4694_v40 = vunpack.i.h.bf16 %v4692_v38  ;;  %v4693_v18 = vunpack.i.l.bf16 %v4692_v38  ;;  %4408 = vmatprep.subr.bf16.mxu0 %v4407_v53  ;;  %v4709_v2 = vunpack.i.h.bf16 %v4707_v59 }
 0x5e5   : > { %4057 = vmatprep.mubr.msk.f32.mxu1 %vm291_vm0, %v2229_v21  ;;  %4410 = vmatpush3.bf16.msra.mxu0 %v4407_v53  ;;  %v4708_v21 = vunpack.i.l.bf16 %v4707_v59 }
 0x5e6   : > { %v4411_v12 = vpack.c.bf16 %v4694_v40, %v4693_v18 }
 0x5e7   : > { %v4702_v28 = vpop.permute.xlu1 %4701 }
 0x5e8   : > { %4058 = vmatmul.mubr.msk.f32.gmra.mrb[60].mxu1 %vm291_vm0, %v2231_v45  ;;  %4412 = vmatprep.subr.bf16.mxu0 %v4411_v12  ;;  %v4704_v44 = vunpack.i.h.bf16 %v4702_v28  ;;  %v4703_v25 = vunpack.i.l.bf16 %v4702_v28  ;;  %v4712_v45 = vpop.permute.xlu0 %4711 }
 0x5e9   : > { %4060 = vmatprep.mubr.msk.f32.mxu1 %vm291_vm0, %v2233_v55  ;;  %4414 = vmatpush3.bf16.msra.mxu0 %v4411_v12  ;;  %v4423_v55 = vpack.c.bf16 %v4709_v2, %v4708_v21  ;;  %v4713_v19 = vunpack.i.l.bf16 %v4712_v45  ;;  %v3396_v2 = vld [vmem:[%s7088_s3 + $0x198] sm:$0xff] }
 0x5ea   : > { %4416 = vmatprep.subr.bf16.mxu0 %v4415_v48  ;;  %v4419_v29 = vpack.c.bf16 %v4704_v44, %v4703_v25 }
 0x5eb   : > { %v4717_v3 = vpop.permute.xlu1 %4716 }
 0x5ec   : > { %4061 = vmatmul.mubr.msk.f32.gmra.mrb[62].mxu1 %vm291_vm0, %v2235_v41  ;;  %v4714_v41 = vunpack.i.h.bf16 %v4712_v45  ;;  %v4719_v38 = vunpack.i.h.bf16 %v4717_v3  ;;  %v4718_v53 = vunpack.i.l.bf16 %v4717_v3 }
 0x5ed   : > { %4418 = vmatpush3.bf16.msra.mxu0 %v4415_v48  ;;  %v3393_v48 = vld [vmem:[%s7088_s3 + $0x180] sm:$0xff] }
 0x5ee   : > { %4420 = vmatprep.subr.bf16.mxu0 %v4419_v29  ;;  %v4427_v52 = vpack.c.bf16 %v4714_v41, %v4713_v19  ;;  %v4431_v40 = vpack.c.bf16 %v4719_v38, %v4718_v53  ;;  %v3398_v38 = vld [vmem:[%s7088_s3 + $0x1a8] sm:$0xff] }
 0x5f1   : > { %4422 = vmatpush3.bf16.msra.mxu0 %v4419_v29 }
 0x5f2   : > { %4424 = vmatprep.subr.bf16.mxu0 %v4423_v55 }
 0x5f5   : > { %4426 = vmatpush3.bf16.msra.mxu0 %v4423_v55  ;;  %v3395_v55 = vld [vmem:[%s7088_s3 + $0x190] sm:$0xff] }
 0x5f6   : > { %4428 = vmatprep.subr.bf16.mxu0 %v4427_v52 }
 0x5f9   : > { %4430 = vmatpush3.bf16.msra.mxu0 %v4427_v52 }
 0x5fa   : > { %4432 = vmatprep.subr.bf16.mxu0 %v4431_v40 }
 0x5fd   : > { %4434 = vmatpush3.bf16.msra.mxu0 %v4431_v40 }
 0x64b   : > { %v6443_v5 = vpop.f32.mrb[32].mxu1 }
 0x64c   : > { %v6445_v22 = vpop.f32.mrb[33].mxu1 }
 0x64f   : > { %v6447_v24 = vpop.f32.mrb[34].mxu1 }
 0x650   : > { %v6449_v51 = vpop.f32.mrb[35].mxu1 }
 0x657   : > { %v6451_v39 = vpop.f32.mrb[36].mxu1 }
 0x658   : > { %v6453_v30 = vpop.f32.mrb[37].mxu1 }
 0x65f   : > { %v6455_v11 = vpop.f32.mrb[38].mxu1 }
 0x660   : > { %v6457_v6 = vpop.f32.mrb[39].mxu1 }
 0x667   : > { %v6459_v49 = vpop.f32.mrb[40].mxu1 }
 0x668   : > { %v6461_v17 = vpop.f32.mrb[41].mxu1 }
 0x66b   : > { %v6463_v37 = vpop.f32.mrb[42].mxu1 }
 0x66c   : > { %7180 = vst [vmem:[#allocation58_spill] sm:$0xff] %v6463_v37  ;;  %v6465_v9 = vpop.f32.mrb[43].mxu1  ;;  %v3406_v37 = vld [vmem:[%s7088_s3 + $0x1e8] sm:$0xff] }
 0x66f   : > { %v6467_v60 = vpop.f32.mrb[44].mxu1 }
 0x670   : > { %7181 = vst [vmem:[#allocation59_spill] sm:$0xff] %v6467_v60  ;;  %v6469_v0 = vpop.f32.mrb[45].mxu1 }
 0x69f   : > { %v6471_v18 = vpop.f32.mrb[46].mxu1 }
 0x6a0   : > { %7182 = vst [vmem:[#allocation60_spill] sm:$0xff] %v6471_v18  ;;  %v6473_v58 = vpop.f32.mrb[47].mxu1  ;;  %v3404_v18 = vld [vmem:[%s7088_s3 + $0x1d8] sm:$0xff] }
 0x6a3   : > { %v4041_v12 = vpop.f32.mrb[48].mxu1 }
 0x6a4   : > { %v2478_v7 = vmul.f32 0.35355338, %v4041_v12  ;;  %v2398_v28 = vpop.f32.mrb[49].mxu1  ;;  %v3397_v12 = vld [vmem:[%s7088_s3 + $0x1a0] sm:$0xff] }
 0x6a5   : > { %v2477_v44 = vmul.f32 0.35355338, %v2398_v28 }
 0x6a6   : > { %v6481_v25 = vadd.f32 %v3394_v35, %v2478_v7 }
 0x6a7   : > { %v6483_v59 = vadd.f32 %v3393_v48, %v2477_v44  ;;  %v4044_v29 = vpop.f32.mrb[50].mxu1  ;;  %v3400_v44 = vld [vmem:[%s7088_s3 + $0x1b8] sm:$0xff] }
 0x6a8   : > { %v2480_v21 = vmul.f32 0.35355338, %v4044_v29  ;;  %2528 = vmax.xlane.f32.xlu1 %v6481_v25  ;;  %v2408_v45 = vpop.f32.mrb[51].mxu1 }
 0x6a9   : > { %v2479_v41 = vmul.f32 0.35355338, %v2408_v45  ;;  %2526 = vmax.xlane.f32.xlu0 %v6483_v59 }
 0x6aa   : > { %v6493_v19 = vadd.f32 %v3396_v2, %v2480_v21 }
 0x6ab   : > { %v6495_v3 = vadd.f32 %v3395_v55, %v2479_v41  ;;  %v4047_v52 = vpop.f32.mrb[52].mxu1  ;;  %v3399_v55 = vld [vmem:[%s7088_s3 + $0x1b0] sm:$0xff] }
 0x6ac   : > { %v2482_v53 = vmul.f32 0.35355338, %v4047_v52  ;;  %2532 = vmax.xlane.f32.xlu1 %v6493_v19  ;;  %v2418_v40 = vpop.f32.mrb[53].mxu1 }
 0x6ad   : > { %v2481_v35 = vmul.f32 0.35355338, %v2418_v40  ;;  %2530 = vmax.xlane.f32.xlu0 %v6495_v3  ;;  %v3402_v40 = vld [vmem:[%s7088_s3 + $0x1c8] sm:$0xff] }
 0x6ae   : > { %v6505_v7 = vadd.f32 %v3398_v38, %v2482_v53 }
 0x6af   : > { %v6507_v28 = vadd.f32 %v3397_v12, %v2481_v35  ;;  %v4050_v48 = vpop.f32.mrb[54].mxu1 }
 0x6b0   : > { %v2484_v29 = vmul.f32 0.35355338, %v4050_v48  ;;  %v2428_v2 = vpop.f32.mrb[55].mxu1 }
 0x6b1   : > { %2536 = vmax.xlane.f32.xlu0 %v6505_v7  ;;  %2534 = vmax.xlane.f32.xlu1 %v6507_v28  ;;  %v2483_v21 = vmul.f32 0.35355338, %v2428_v2 }
 0x6b2   : > { %v6514_v45 = vadd.f32 %v3400_v44, %v2484_v29  ;;  %v3401_v29 = vld [vmem:[%s7088_s3 + $0x1c0] sm:$0xff] }
 0x6b3   : > { %v4053_v41 = vpop.f32.mrb[56].mxu1  ;;  %v6519_v38 = vadd.f32 %v3399_v55, %v2483_v21 }
 0x6b4   : > { %v2438_v52 = vpop.f32.mrb[57].mxu1  ;;  %v2486_v53 = vmul.f32 0.35355338, %v4053_v41 }
 0x6b5   : > { %2540 = vmax.xlane.f32.xlu1 %v6514_v45  ;;  %v2485_v44 = vmul.f32 0.35355338, %v2438_v52 }
 0x6b6   : > { %v6525_v48 = vadd.f32 %v3402_v40, %v2486_v53 }
 0x6b7   : > { %v4056_v12 = vpop.f32.mrb[58].mxu1  ;;  %v6531_v55 = vadd.f32 %v3401_v29, %v2485_v44  ;;  %v3408_v29 = vld [vmem:[%s7088_s3 + $0x1f8] sm:$0xff] }
 0x6b8   : > { %v2448_v35 = vpop.f32.mrb[59].mxu1  ;;  %v2488_v41 = vmul.f32 0.35355338, %v4056_v12 }
 0x6b9   : > { %2538 = vmax.xlane.f32.xlu1 %v6519_v38 }
 0x6ba   : > { %v6537_v60 = vadd.f32 %v3404_v18, %v2488_v41 }
 0x6bb   : > { %v4059_v2 = vpop.f32.mrb[60].mxu1 }
 0x6bc   : > { %v2458_v21 = vpop.f32.mrb[61].mxu1  ;;  %v2490_v52 = vmul.f32 0.35355338, %v4059_v2  ;;  %v3403_v2 = vld [vmem:[%s7088_s3 + $0x1d0] sm:$0xff] }
 0x6bd   : > { %2544 = vmax.xlane.f32.xlu1 %v6525_v48  ;;  %v2489_v41 = vmul.f32 0.35355338, %v2458_v21  ;;  %v7185_v21 = vld [vmem:[#allocation38_spill] sm:$0xff] }
 0x6be   : > { %v6543_v44 = vadd.f32 %v3406_v37, %v2490_v52  ;;  %v2487_v37 = vmul.f32 0.35355338, %v2448_v35  ;;  %v7184_v35 = vld [vmem:[#allocation40_spill] sm:$0xff] }
 0x6bf   : > { %v4062_v53 = vpop.f32.mrb[62].mxu1 }
 0x6c0   : > { %v2468_v40 = vpop.f32.mrb[63].mxu1  ;;  %v2492_v12 = vmul.f32 0.35355338, %v4062_v53 }
 0x6c1   : > { %2542 = vmax.xlane.f32.xlu1 %v6531_v55 }
 0x6c2   : > { %v6551_v18 = vadd.f32 %v3408_v29, %v2492_v12 }
 0x6c5   : > { %2548 = vmax.xlane.f32.xlu1 %v6537_v60 }
 0x6c7   : > { %4721 = vrot.lane.b32.xlu0 %v6122_v57, %s5095_s8  ;;  %v6563_v57 = vadd.f32 %v3403_v2, %v2487_v37  ;;  %s5033_s8 = sshll.u32 %s5099_s29, 4  ;;  %s5034_s8 = int_to_ptr.vmem [resolvable:$false] %s5033_s8 }
 0x6c8   : > { %s5035_s30 = scalar_lea.vmem %s5034_s8, 4096  ;;  %p5036_p0 = scmp.lt.s32.totalorder %s7036_s20, %s5034_s8 }
 0x6c9   : > { %2552 = vmax.xlane.f32.xlu1 %v6543_v44  ;;  %p5037_p1 = scmp.lt.s32.totalorder %s5035_s30, %s5029_s9 }
 0x6cb   : > { %p5038_p2 = por %p5037_p1, %p5036_p0 }
 0x6cd   : > { %2556 = vmax.xlane.f32.xlu1 %v6551_v18  ;;  %p5039_p3 = pnand %p5038_p2, %p5032_p13 }
 0x6d1   : > { %1272 = vadd.xlane.f32.xlu1 %v5967_v56  ;;  %v3405_v56 = vld [vmem:[%s7088_s3 + $0x1e0] sm:$0xff] }
 0x6d5   : > { %1274 = vadd.xlane.f32.xlu1 %v5969_v61  ;;  %v6570_v61 = vadd.f32 %v3405_v56, %v2489_v41  ;;  %v7202_v41 = vld [vmem:[#allocation22_spill] sm:$0xff] }
 0x6d9   : > { %1276 = vadd.xlane.f32.xlu1 %v5977_v36  ;;  %v2491_v36 = vmul.f32 0.35355338, %v2468_v40  ;;  %v7201_v40 = vld [vmem:[#allocation20_spill] sm:$0xff] }
 0x6dd   : > { %1278 = vadd.xlane.f32.xlu1 %v5981_v26  ;;  %v3407_v26 = vld [vmem:[%s7088_s3 + $0x1f0] sm:$0xff] }
 0x6e1   : > { %1280 = vadd.xlane.f32.xlu1 %v5989_v16  ;;  %v6577_v16 = vadd.f32 %v3407_v26, %v2491_v36 }
 0x6e5   : > { %1282 = vadd.xlane.f32.xlu1 %v5993_v1  ;;  %v7183_v1 = vld [vmem:[#allocation37_spill] sm:$0xff] }
 0x6e6   : > { %2546 = vmax.xlane.f32.xlu0 %v6563_v57 }
 0x6e9   : > { %1284 = vadd.xlane.f32.xlu1 %v6005_v63  ;;  %v7186_v63 = vld [vmem:[#allocation39_spill] sm:$0xff] }
 0x6ea   : > { %2550 = vmax.xlane.f32.xlu0 %v6570_v61 }
 0x6ed   : > { %1288 = vadd.xlane.f32.xlu1 %v6018_v32  ;;  %v7187_v32 = vld [vmem:[#allocation41_spill] sm:$0xff] }
 0x6ee   : > { %2554 = vmax.xlane.f32.xlu0 %v6577_v16 }
 0x6f1   : > { %1292 = vadd.xlane.f32.xlu1 %v6026_v10  ;;  %v7189_v10 = vld [vmem:[#allocation11_spill] sm:$0xff] }
 0x6f2   : > { %1286 = vadd.xlane.f32.xlu0 %v6009_v50  ;;  %v7188_v50 = vld [vmem:[#allocation10_spill] sm:$0xff] }
 0x6f5   : > { %1296 = vadd.xlane.f32.xlu1 %v6034_v47  ;;  %v7190_v47 = vld [vmem:[#allocation13_spill] sm:$0xff] }
 0x6f6   : > { %1290 = vadd.xlane.f32.xlu0 %v7183_v1 }
 0x6f9   : > { %1300 = vadd.xlane.f32.xlu1 %v7184_v35  ;;  %v7203_v35 = vld [vmem:[#allocation24_spill] sm:$0xff] }
 0x6fa   : > { %1294 = vadd.xlane.f32.xlu0 %v7185_v21 }
 0x6fd   : > { %1947 = vadd.xlane.f32.xlu1 %v6320_v15  ;;  %v7191_v15 = vld [vmem:[#allocation9_spill] sm:$0xff] }
 0x6fe   : > { %1298 = vadd.xlane.f32.xlu0 %v7186_v63 }
 0x701   : > { %1951 = vadd.xlane.f32.xlu1 %v6330_v27  ;;  %v7193_v27 = vld [vmem:[#allocation12_spill] sm:$0xff] }
 0x702   : > { %1302 = vadd.xlane.f32.xlu0 %v7187_v32 }
 0x705   : > { %1955 = vadd.xlane.f32.xlu1 %v6342_v14  ;;  %v7195_v14 = vld [vmem:[#allocation14_spill] sm:$0xff] }
 0x706   : > { %1949 = vadd.xlane.f32.xlu0 %v6322_v42  ;;  %v7192_v42 = vld [vmem:[#allocation15_spill] sm:$0xff] }
 0x709   : > { %1959 = vadd.xlane.f32.xlu1 %v6358_v20  ;;  %v7197_v20 = vld [vmem:[#allocation16_spill] sm:$0xff] }
 0x70a   : > { %1953 = vadd.xlane.f32.xlu0 %v6334_v54  ;;  %v7194_v54 = vld [vmem:[#allocation17_spill] sm:$0xff] }
 0x70d   : > { %1963 = vadd.xlane.f32.xlu1 %v6371_v8 }
 0x70e   : > { %1957 = vadd.xlane.f32.xlu0 %v6346_v34  ;;  %v7196_v34 = vld [vmem:[#allocation19_spill] sm:$0xff] }
 0x711   : > { %1967 = vadd.xlane.f32.xlu1 %v6379_v13  ;;  %v7199_v13 = vld [vmem:[#allocation18_spill] sm:$0xff] }
 0x712   : > { %1961 = vadd.xlane.f32.xlu0 %v6362_v43  ;;  %v7198_v43 = vld [vmem:[#allocation21_spill] sm:$0xff] }
 0x715   : > { %1971 = vadd.xlane.f32.xlu1 %v6387_v31 }
 0x716   : > { %1965 = vadd.xlane.f32.xlu0 %v6375_v33 }
 0x719   : > { %1975 = vadd.xlane.f32.xlu1 %v6407_v4  ;;  %v7200_v4 = vld [vmem:[#allocation23_spill] sm:$0xff] }
 0x71a   : > { %1969 = vadd.xlane.f32.xlu0 %v6381_v62 }
 0x71d   : > { %661 = vadd.xlane.f32.xlu1 %v7188_v50 }
 0x71e   : > { %1973 = vadd.xlane.f32.xlu0 %v6391_v23 }
 0x721   : > { %665 = vadd.xlane.f32.xlu1 %v7189_v10 }
 0x722   : > { %1977 = vadd.xlane.f32.xlu0 %v6409_v46 }
 0x725   : > { %669 = vadd.xlane.f32.xlu1 %v7190_v47 }
 0x726   : > { %663 = vadd.xlane.f32.xlu0 %v7191_v15 }
 0x729   : > { %673 = vadd.xlane.f32.xlu1 %v7192_v42 }
 0x72a   : > { %667 = vadd.xlane.f32.xlu0 %v7193_v27 }
 0x72d   : > { %677 = vadd.xlane.f32.xlu1 %v7194_v54 }
 0x72e   : > { %671 = vadd.xlane.f32.xlu0 %v7195_v14 }
 0x731   : > { %681 = vadd.xlane.f32.xlu1 %v7196_v34 }
 0x732   : > { %675 = vadd.xlane.f32.xlu0 %v7197_v20 }
 0x735   : > { %685 = vadd.xlane.f32.xlu1 %v7198_v43  ;;  %v2529_v8 = vpop.xlane.xlu1 %2528 }
 0x736   : > { %v2527_v33 = vpop.xlane.xlu0 %2526  ;;  %679 = vadd.xlane.f32.xlu0 %v7199_v13  ;;  %v2559_v31 = vsub.f32 %v6481_v25, %v2529_v8 }
 0x737   : > { %v2558_v62 = vsub.f32 %v6483_v59, %v2527_v33 }
 0x738   : > { %v2576_v12 = vmul.f32 1.442695, %v2559_v31 }
 0x739   : > { %v2574_v23 = vmul.f32 1.442695, %v2558_v62  ;;  %689 = vadd.xlane.f32.xlu1 %v7200_v4  ;;  %v2533_v46 = vpop.xlane.xlu1 %2532 }
 0x73a   : > { %v2531_v53 = vpop.xlane.xlu0 %2530  ;;  %683 = vadd.xlane.f32.xlu0 %v7201_v40  ;;  %v2561_v29 = vsub.f32 %v6493_v19, %v2533_v46 }
 0x73b   : > { %4821 = vpow2.f32 %v2574_v23  ;;  %v2560_v52 = vsub.f32 %v6495_v3, %v2531_v53 }
 0x73c   : > { %4823 = vpow2.f32 %v2576_v12  ;;  %v2580_v56 = vmul.f32 1.442695, %v2561_v29  ;;  %v7204_v29 = vld [vmem:[#allocation43_spill] sm:$0xff] }
 0x73d   : > { %v2578_v37 = vmul.f32 1.442695, %v2560_v52 }
 0x73e   : > { %v2537_v2 = vpop.xlane.xlu0 %2536  ;;  %687 = vadd.xlane.f32.xlu0 %v7202_v41  ;;  %v2535_v59 = vpop.xlane.xlu1 %2534 }
 0x73f   : > { %v2562_v25 = vsub.f32 %v6507_v28, %v2535_v59  ;;  %v2563_v36 = vsub.f32 %v6505_v7, %v2537_v2  ;;  %4825 = vpow2.f32 %v2578_v37  ;;  %v7205_v59 = vld [vmem:[#allocation42_spill] sm:$0xff] }
 0x740   : > { %4827 = vpow2.f32 %v2580_v56 }
 0x741   : > { %v2582_v26 = vmul.f32 1.442695, %v2562_v25  ;;  %v2584_v19 = vmul.f32 1.442695, %v2563_v36 }
 0x742   : > { %v4722_v1 = vpop.permute.xlu0 %4721  ;;  %691 = vadd.xlane.f32.xlu0 %v7203_v35  ;;  %v2541_v3 = vpop.xlane.xlu1 %2540 }
 0x743   : > { %v4724_v21 = vunpack.i.h.bf16 %v4722_v1  ;;  %v4723_v63 = vunpack.i.l.bf16 %v4722_v1  ;;  %v2565_v32 = vsub.f32 %v6514_v45, %v2541_v3  ;;  %4829 = vpow2.f32 %v2582_v26  ;;  %v7206_v1 = vld [vmem:[#allocation45_spill] sm:$0xff] }
 0x744   : > { %4831 = vpow2.f32 %v2584_v19 }
 0x745   : > { %v6628_v50 = vpop.eup %4821  ;;  %v4435_v28 = vpack.c.bf16 %v4724_v21, %v4723_v63  ;;  %v2588_v47 = vmul.f32 1.442695, %v2565_v32 }
 0x746   : > { %4095 = vmatprep.mubr.f32.mxu0 %v6628_v50  ;;  %v2539_v10 = vpop.xlane.xlu1 %2538  ;;  %v6632_v42 = vpop.eup %4823 }
 0x747   : > { %v2564_v7 = vsub.f32 %v6519_v38, %v2539_v10  ;;  %4436 = vmatprep.subr.bf16.mxu0 %v4435_v28 }
 0x748   : > { %4438 = vmatpush3.bf16.msra.mxu0 %v4435_v28 }
 0x749   : > { %v2586_v15 = vmul.f32 1.442695, %v2564_v7  ;;  %v6634_v54 = vpop.eup %4825 }
 0x74a   : > { %v2545_v27 = vpop.xlane.xlu1 %2544  ;;  %v6639_v14 = vpop.eup %4827 }
 0x74b   : > { %4833 = vpow2.f32 %v2586_v15  ;;  %4096 = vmatmul.mubr.f32.vlgmr.msra.gmra.mrb[48].mxu0 %v6632_v42  ;;  %v2567_v45 = vsub.f32 %v6525_v48, %v2545_v27 }
 0x74c   : > { %4835 = vpow2.f32 %v2588_v47  ;;  %4098 = vmatprep.mubr.f32.mxu0 %v6634_v54  ;;  %v7207_v47 = vld [vmem:[#allocation44_spill] sm:$0xff] }
 0x74d   : > { %v6641_v34 = vpop.eup %4829  ;;  %v2592_v43 = vmul.f32 1.442695, %v2567_v45 }
 0x74e   : > { %v2543_v38 = vpop.xlane.xlu1 %2542  ;;  %v6646_v33 = vpop.eup %4831 }
 0x74f   : > { %v2566_v20 = vsub.f32 %v6531_v55, %v2543_v38  ;;  %4099 = vmatmul.mubr.f32.gmra.mrb[50].mxu0 %v6639_v14 }
 0x750   : > { %4101 = vmatprep.mubr.f32.mxu0 %v6641_v34 }
 0x751   : > { %v2590_v8 = vmul.f32 1.442695, %v2566_v20 }
 0x752   : > { %v2549_v13 = vpop.xlane.xlu1 %2548 }
 0x753   : > { %4837 = vpow2.f32 %v2590_v8  ;;  %4102 = vmatmul.mubr.f32.gmra.mrb[52].mxu0 %v6646_v33  ;;  %v2569_v36 = vsub.f32 %v6537_v60, %v2549_v13 }
 0x754   : > { %4839 = vpow2.f32 %v2592_v43 }
 0x755   : > { %v6649_v48 = vpop.eup %4833  ;;  %v2596_v19 = vmul.f32 1.442695, %v2569_v36  ;;  %v7211_v36 = vld [vmem:[#allocation51_spill] sm:$0xff] }
 0x756   : > { %v6651_v62 = vpop.eup %4835  ;;  %v2553_v31 = vpop.xlane.xlu1 %2552  ;;  %4104 = vmatprep.mubr.f32.mxu0 %v6649_v48 }
 0x757   : > { %4105 = vmatmul.mubr.f32.gmra.mrb[54].mxu0 %v6651_v62  ;;  %v2571_v32 = vsub.f32 %v6543_v44, %v2553_v31  ;;  %v7208_v44 = vld [vmem:[#allocation47_spill] sm:$0xff] }
 0x759   : > { %v2600_v45 = vmul.f32 1.442695, %v2571_v32  ;;  %v7212_v32 = vld [vmem:[#allocation53_spill] sm:$0xff] }
 0x75a   : > { %v2557_v55 = vpop.xlane.xlu1 %2556 }
 0x75b   : > { %v2573_v28 = vsub.f32 %v6551_v18, %v2557_v55 }
 0x75d   : > { %v6655_v23 = vpop.eup %4837  ;;  %v2604_v38 = vmul.f32 1.442695, %v2573_v28 }
 0x75e   : > { %v6657_v4 = vpop.eup %4839  ;;  %v1273_v46 = vpop.xlane.xlu1 %1272  ;;  %4107 = vmatprep.mubr.f32.mxu0 %v6655_v23 }
 0x75f   : > { %4108 = vmatmul.mubr.f32.gmra.mrb[56].mxu0 %v6657_v4  ;;  %4841 = vrcp.f32 %v1273_v46  ;;  %v7209_v46 = vld [vmem:[#allocation46_spill] sm:$0xff] }
 0x762   : > { %v1275_v53 = vpop.xlane.xlu1 %1274 }
 0x763   : > { %4843 = vrcp.f32 %v1275_v53 }
 0x766   : > { %v1277_v40 = vpop.xlane.xlu1 %1276 }
 0x767   : > { %4845 = vrcp.f32 %v1277_v40 }
 0x769   : > { %v4842_v52 = vpop.eup %4841 }
 0x76a   : > { %v1279_v12 = vpop.xlane.xlu1 %1278  ;;  %v1514_v37 = vmul.f32 %v4842_v52, %v7204_v29 }
 0x76b   : > { %4847 = vrcp.f32 %v1279_v12 }
 0x76c   : > { %2879 = vrot.lane.b32.xlu1 %v1514_v37, %s5096_s10 }
 0x76d   : > { %v4844_v2 = vpop.eup %4843 }
 0x76e   : > { %v1281_v41 = vpop.xlane.xlu1 %1280  ;;  %v1516_v25 = vmul.f32 %v4844_v2, %v7205_v59 }
 0x76f   : > { %4849 = vrcp.f32 %v1281_v41 }
 0x770   : > { %2881 = vrot.lane.b32.xlu0 %v1516_v25, %s5096_s10 }
 0x771   : > { %v4846_v56 = vpop.eup %4845 }
 0x772   : > { %v1283_v26 = vpop.xlane.xlu1 %1282  ;;  %v1518_v35 = vmul.f32 %v4846_v56, %v7206_v1 }
 0x773   : > { %4851 = vrcp.f32 %v1283_v26  ;;  %v2547_v3 = vpop.xlane.xlu0 %2546 }
 0x774   : > { %v2568_v21 = vsub.f32 %v6563_v57, %v2547_v3  ;;  %2883 = vrot.lane.b32.xlu1 %v1518_v35, %s5096_s10 }
 0x775   : > { %v4848_v63 = vpop.eup %4847 }
 0x776   : > { %v2594_v10 = vmul.f32 1.442695, %v2568_v21  ;;  %v1285_v7 = vpop.xlane.xlu1 %1284  ;;  %v1520_v15 = vmul.f32 %v4848_v63, %v7207_v47  ;;  %v7213_v47 = vld [vmem:[#allocation48_spill] sm:$0xff] }
 0x777   : > { %4853 = vrcp.f32 %v1285_v7  ;;  %v2551_v60 = vpop.xlane.xlu0 %2550 }
 0x778   : > { %4855 = vpow2.f32 %v2594_v10  ;;  %v2570_v27 = vsub.f32 %v6570_v61, %v2551_v60  ;;  %2885 = vrot.lane.b32.xlu1 %v1520_v15, %s5096_s10 }
 0x779   : > { %v4850_v57 = vpop.eup %4849  ;;  %4857 = vpow2.f32 %v2596_v19 }
 0x77a   : > { %v2598_v20 = vmul.f32 1.442695, %v2570_v27  ;;  %v1289_v43 = vpop.xlane.xlu1 %1288  ;;  %v1522_v8 = vmul.f32 %v4850_v57, %v7208_v44 }
 0x77b   : > { %4859 = vrcp.f32 %v1289_v43  ;;  %v2555_v18 = vpop.xlane.xlu0 %2554  ;;  %v7215_v43 = vld [vmem:[#allocation50_spill] sm:$0xff] }
 0x77c   : > { %4861 = vpow2.f32 %v2598_v20  ;;  %v2572_v13 = vsub.f32 %v6577_v16, %v2555_v18  ;;  %2887 = vrot.lane.b32.xlu0 %v1522_v8, %s5096_s10  ;;  %v7210_v16 = vld [vmem:[#allocation49_spill] sm:$0xff] }
 0x77d   : > { %v4852_v31 = vpop.eup %4851  ;;  %4863 = vpow2.f32 %v2600_v45  ;;  %v7214_v45 = vld [vmem:[#allocation55_spill] sm:$0xff] }
 0x77e   : > { %4865 = vpow2.f32 %v2604_v38  ;;  %v2602_v61 = vmul.f32 1.442695, %v2572_v13  ;;  %v1293_v55 = vpop.xlane.xlu1 %1292  ;;  %v1524_v53 = vmul.f32 %v4852_v31, %v7209_v46  ;;  %v7216_v31 = vld [vmem:[#allocation57_spill] sm:$0xff]  ;;  %v7217_v46 = vld [vmem:[#allocation52_spill] sm:$0xff] }
 0x77f   : > { %4867 = vrcp.f32 %v1293_v55  ;;  %v1287_v40 = vpop.xlane.xlu0 %1286 }
 0x780   : > { %4869 = vpow2.f32 %v2602_v61  ;;  %2889 = vrot.lane.b32.xlu1 %v1524_v53, %s5096_s10 }
 0x781   : > { %v4854_v52 = vpop.eup %4853  ;;  %4871 = vrcp.f32 %v1287_v40 }
 0x782   : > { %v6679_v12 = vpop.eup %4855  ;;  %v1297_v29 = vpop.xlane.xlu1 %1296  ;;  %v1526_v37 = vmul.f32 %v4854_v52, %v7210_v16 }
 0x783   : > { %v6682_v2 = vpop.eup %4857  ;;  %4873 = vrcp.f32 %v1297_v29  ;;  %v1291_v41 = vpop.xlane.xlu0 %1290  ;;  %4110 = vmatprep.mubr.f32.mxu0 %v6679_v12 }
 0x784   : > { %4875 = vrcp.f32 %v1291_v41  ;;  %2891 = vrot.lane.b32.xlu0 %v1526_v37, %s5096_s10  ;;  %4111 = vmatmul.mubr.f32.gmra.mrb[58].mxu0 %v6682_v2  ;;  %v7218_v41 = vld [vmem:[#allocation54_spill] sm:$0xff] }
 0x785   : > { %v4860_v59 = vpop.eup %4859 }
 0x786   : > { %v6687_v25 = vpop.eup %4861  ;;  %v1301_v56 = vpop.xlane.xlu1 %1300  ;;  %v1530_v26 = vmul.f32 %v4860_v59, %v7211_v36 }
 0x787   : > { %v6690_v1 = vpop.eup %4863  ;;  %4877 = vrcp.f32 %v1301_v56  ;;  %v1295_v35 = vpop.xlane.xlu0 %1294  ;;  %4113 = vmatprep.mubr.f32.mxu0 %v6687_v25 }
 0x788   : > { %v6693_v3 = vpop.eup %4865  ;;  %4879 = vrcp.f32 %v1295_v35  ;;  %2895 = vrot.lane.b32.xlu0 %v1530_v26, %s5096_s10  ;;  %4114 = vmatmul.mubr.f32.gmra.mrb[60].mxu0 %v6690_v1  ;;  %v7219_v35 = vld [vmem:[#allocation56_spill] sm:$0xff] }
 0x789   : > { %v4868_v21 = vpop.eup %4867 }
 0x78a   : > { %v6697_v63 = vpop.eup %4869  ;;  %v1948_v19 = vpop.xlane.xlu1 %1947  ;;  %v1534_v28 = vmul.f32 %v4868_v21, %v7212_v32 }
 0x78b   : > { %v4872_v10 = vpop.eup %4871  ;;  %4881 = vrcp.f32 %v1948_v19  ;;  %v1299_v7 = vpop.xlane.xlu0 %1298  ;;  %4116 = vmatprep.mubr.f32.mxu0 %v6697_v63 }
 0x78c   : > { %4883 = vrcp.f32 %v1299_v7  ;;  %2899 = vrot.lane.b32.xlu0 %v1534_v28, %s5096_s10  ;;  %4117 = vmatmul.mubr.f32.gmra.mrb[62].mxu0 %v6693_v3  ;;  %v1528_v15 = vmul.f32 %v4872_v10, %v7213_v47 }
 0x78d   : > { %v4874_v60 = vpop.eup %4873 }
 0x78e   : > { %v4876_v27 = vpop.eup %4875  ;;  %2893 = vrot.lane.b32.xlu1 %v1528_v15, %s5096_s10  ;;  %v6705_v57 = vpop.xlane.xlu1 %1951  ;;  %v1538_v38 = vmul.f32 %v4874_v60, %v7214_v45 }
 0x78f   : > { %v1303_v20 = vpop.xlane.xlu0 %1302  ;;  %v1532_v44 = vmul.f32 %v4876_v27, %v7215_v43 }
 0x790   : > { %4885 = vrcp.f32 %v1303_v20  ;;  %2903 = vrot.lane.b32.xlu0 %v1538_v38, %s5096_s10 }
 0x791   : > { %v4878_v8 = vpop.eup %4877 }
 0x792   : > { %v4880_v18 = vpop.eup %4879  ;;  %2897 = vrot.lane.b32.xlu1 %v1532_v44, %s5096_s10  ;;  %v6711_v13 = vpop.xlane.xlu1 %1955  ;;  %v1542_v61 = vmul.f32 %v4878_v8, %v7216_v31  ;;  %v7220_v8 = vld [vmem:[#allocation7_spill] sm:$0xff] }
 0x793   : > { %v1950_v55 = vpop.xlane.xlu0 %1949  ;;  %v1536_v53 = vmul.f32 %v4880_v18, %v7217_v46  ;;  %v7221_v46 = vld [vmem:[#allocation6_spill] sm:$0xff] }
 0x794   : > { %4887 = vrcp.f32 %v1950_v55  ;;  %2907 = vrot.lane.b32.xlu0 %v1542_v61, %s5096_s10 }
 0x795   : > { %v4882_v40 = vpop.eup %4881 }
 0x796   : > { %v4884_v52 = vpop.eup %4883  ;;  %2901 = vrot.lane.b32.xlu1 %v1536_v53, %s5096_s10  ;;  %v6717_v29 = vpop.xlane.xlu1 %1959  ;;  %v2173_v16 = vmul.f32 %v4882_v40, %v6445_v22 }
 0x797   : > { %v6720_v37 = vpop.xlane.xlu0 %1953  ;;  %v1540_v59 = vmul.f32 %v4884_v52, %v7218_v41 }
 0x798   : > { %2943 = vrot.lane.b32.xlu0 %v2173_v16, %s5097_s5 }
 0x79a   : > { %v4886_v56 = vpop.eup %4885  ;;  %2905 = vrot.lane.b32.xlu1 %v1540_v59, %s5096_s10  ;;  %v6725_v36 = vpop.xlane.xlu1 %1963  ;;  %v7222_v59 = vld [vmem:[#allocation26_spill] sm:$0xff] }
 0x79b   : > { %v6727_v26 = vpop.xlane.xlu0 %1957  ;;  %v1544_v21 = vmul.f32 %v4886_v56, %v7219_v35 }
 0x79e   : > { %v4888_v19 = vpop.eup %4887  ;;  %2909 = vrot.lane.b32.xlu1 %v1544_v21, %s5096_s10  ;;  %v6731_v22 = vpop.xlane.xlu1 %1967 }
 0x79f   : > { %v6733_v32 = vpop.xlane.xlu0 %1961  ;;  %v2175_v28 = vmul.f32 %v4888_v19, %v6443_v5 }
 0x7a2   : > { %2945 = vrot.lane.b32.xlu1 %v2175_v28, %s5097_s5  ;;  %v6737_v10 = vpop.xlane.xlu1 %1971 }
 0x7a3   : > { %v6739_v7 = vpop.xlane.xlu0 %1965 }
 0x7a6   : > { %v6741_v47 = vpop.xlane.xlu1 %1975 }
 0x7a7   : > { %v6743_v15 = vpop.xlane.xlu0 %1969 }
 0x7aa   : > { %v662_v60 = vpop.xlane.xlu1 %661 }
 0x7ab   : > { %4889 = vrcp.f32 %v662_v60  ;;  %v6745_v27 = vpop.xlane.xlu0 %1973 }
 0x7ae   : > { %v666_v45 = vpop.xlane.xlu1 %665 }
 0x7af   : > { %4891 = vrcp.f32 %v666_v45  ;;  %v6747_v38 = vpop.xlane.xlu0 %1977  ;;  %v7224_v45 = vld [vmem:[#allocation28_spill] sm:$0xff] }
 0x7b2   : > { %v670_v20 = vpop.xlane.xlu1 %669 }
 0x7b3   : > { %4893 = vrcp.f32 %v670_v20  ;;  %v664_v5 = vpop.xlane.xlu0 %663 }
 0x7b4   : > { %4895 = vrcp.f32 %v664_v5  ;;  %v7225_v5 = vld [vmem:[#allocation8_spill] sm:$0xff] }
 0x7b5   : > { %v4890_v43 = vpop.eup %4889 }
 0x7b6   : > { %v674_v44 = vpop.xlane.xlu1 %673  ;;  %v6750_v18 = vmul.f32 %v4890_v43, %v7220_v8 }
 0x7b7   : > { %4897 = vrcp.f32 %v674_v44  ;;  %v668_v31 = vpop.xlane.xlu0 %667  ;;  %2608 = vadd.xlane.f32.xlu0 %v6632_v42  ;;  %v7223_v42 = vld [vmem:[#allocation5_spill] sm:$0xff] }
 0x7b8   : > { %4899 = vrcp.f32 %v668_v31  ;;  %v7226_v31 = vld [vmem:[#allocation30_spill] sm:$0xff] }
 0x7b9   : > { %v4892_v61 = vpop.eup %4891 }
 0x7ba   : > { %v678_v55 = vpop.xlane.xlu1 %677  ;;  %v6754_v53 = vmul.f32 %v4892_v61, %v7221_v46  ;;  %v7227_v46 = vld [vmem:[#allocation25_spill] sm:$0xff] }
 0x7bb   : > { %4901 = vrcp.f32 %v678_v55  ;;  %v672_v40 = vpop.xlane.xlu0 %671  ;;  %2612 = vadd.xlane.f32.xlu0 %v6639_v14 }
 0x7bc   : > { %4903 = vrcp.f32 %v672_v40 }
 0x7bd   : > { %v4894_v52 = vpop.eup %4893 }
 0x7be   : > { %v4896_v16 = vpop.eup %4895  ;;  %v682_v41 = vpop.xlane.xlu1 %681  ;;  %v6758_v56 = vmul.f32 %v4894_v52, %v7222_v59  ;;  %v7229_v59 = vld [vmem:[#allocation27_spill] sm:$0xff] }
 0x7bf   : > { %4905 = vrcp.f32 %v682_v41  ;;  %v676_v35 = vpop.xlane.xlu0 %675  ;;  %2616 = vadd.xlane.f32.xlu0 %v6646_v33  ;;  %v841_v21 = vmul.f32 %v4896_v16, %v7223_v42  ;;  %v7228_v16 = vld [vmem:[#allocation32_spill] sm:$0xff] }
 0x7c0   : > { %4907 = vrcp.f32 %v676_v35 }
 0x7c1   : > { %v4898_v19 = vpop.eup %4897 }
 0x7c2   : > { %v4900_v28 = vpop.eup %4899  ;;  %v686_v60 = vpop.xlane.xlu1 %685  ;;  %v6763_v20 = vmul.f32 %v4898_v19, %v7224_v45  ;;  %v7230_v19 = vld [vmem:[#allocation34_spill] sm:$0xff] }
 0x7c3   : > { %4909 = vrcp.f32 %v686_v60  ;;  %v680_v14 = vpop.xlane.xlu0 %679  ;;  %2620 = vadd.xlane.f32.xlu0 %v6651_v62  ;;  %v845_v43 = vmul.f32 %v4900_v28, %v7225_v5  ;;  %v7232_v5 = vld [vmem:[#allocation36_spill] sm:$0xff] }
 0x7c4   : > { %4911 = vrcp.f32 %v680_v14 }
 0x7c5   : > { %v4902_v44 = vpop.eup %4901 }
 0x7c6   : > { %v4904_v8 = vpop.eup %4903  ;;  %2606 = vadd.xlane.f32.xlu1 %v6628_v50  ;;  %v690_v33 = vpop.xlane.xlu1 %689  ;;  %v6769_v61 = vmul.f32 %v4902_v44, %v7226_v31 }
 0x7c7   : > { %4913 = vrcp.f32 %v690_v33  ;;  %v684_v55 = vpop.xlane.xlu0 %683  ;;  %2624 = vadd.xlane.f32.xlu0 %v6657_v4  ;;  %v6773_v40 = vmul.f32 %v4904_v8, %v7227_v46 }
 0x7c8   : > { %4915 = vrcp.f32 %v684_v55 }
 0x7c9   : > { %v4906_v62 = vpop.eup %4905 }
 0x7ca   : > { %v4908_v52 = vpop.eup %4907  ;;  %2610 = vadd.xlane.f32.xlu1 %v6634_v54  ;;  %v6777_v41 = vmul.f32 %v4906_v62, %v7228_v16  ;;  %v7231_v54 = vld [vmem:[#allocation29_spill] sm:$0xff] }
 0x7cb   : > { %v688_v50 = vpop.xlane.xlu0 %687  ;;  %2628 = vadd.xlane.f32.xlu0 %v6682_v2  ;;  %v6781_v35 = vmul.f32 %v4908_v52, %v7229_v59 }
 0x7cc   : > { %4917 = vrcp.f32 %v688_v50 }
 0x7cd   : > { %v4910_v42 = vpop.eup %4909 }
 0x7ce   : > { %v4912_v4 = vpop.eup %4911  ;;  %2614 = vadd.xlane.f32.xlu1 %v6641_v34  ;;  %v6785_v28 = vmul.f32 %v4910_v42, %v7230_v19  ;;  %v7233_v34 = vld [vmem:[#allocation31_spill] sm:$0xff] }
 0x7cf   : > { %v692_v60 = vpop.xlane.xlu0 %691  ;;  %2632 = vadd.xlane.f32.xlu0 %v6690_v1  ;;  %v6789_v45 = vmul.f32 %v4912_v4, %v7231_v54  ;;  %v7234_v1 = vld [vmem:[#allocation33_spill] sm:$0xff] }
 0x7d0   : > { %4919 = vrcp.f32 %v692_v60 }
 0x7d1   : > { %v4914_v14 = vpop.eup %4913  ;;  %4921 = vrcp.f32 %v6705_v57 }
 0x7d2   : > { %v4916_v2 = vpop.eup %4915  ;;  %2618 = vadd.xlane.f32.xlu1 %v6649_v48  ;;  %v6793_v44 = vmul.f32 %v4914_v14, %v7232_v5  ;;  %v7235_v48 = vld [vmem:[#allocation35_spill] sm:$0xff]  ;;  %4923 = vrcp.f32 %v6711_v13 }
 0x7d3   : > { %2636 = vadd.xlane.f32.xlu0 %v6693_v3  ;;  %v6797_v8 = vmul.f32 %v4916_v2, %v7233_v34  ;;  %4925 = vrcp.f32 %v6720_v37 }
 0x7d4   : > { %4927 = vrcp.f32 %v6717_v29 }
 0x7d5   : > { %4929 = vrcp.f32 %v6725_v36 }
 0x7d6   : > { %v4918_v33 = vpop.eup %4917  ;;  %2622 = vadd.xlane.f32.xlu1 %v6655_v23  ;;  %4931 = vrcp.f32 %v6731_v22 }
 0x7d7   : > { %v6801_v31 = vmul.f32 %v4918_v33, %v7234_v1  ;;  %4933 = vrcp.f32 %v6737_v10 }
 0x7d8   : > { %4935 = vrcp.f32 %v6741_v47 }
 0x7d9   : > { %4937 = vrcp.f32 %v6727_v26 }
 0x7da   : > { %v4920_v55 = vpop.eup %4919  ;;  %2626 = vadd.xlane.f32.xlu1 %v6679_v12  ;;  %4939 = vrcp.f32 %v6733_v32 }
 0x7db   : > { %v6806_v46 = vmul.f32 %v4920_v55, %v7235_v48  ;;  %v4922_v12 = vpop.eup %4921  ;;  %4941 = vrcp.f32 %v6739_v7 }
 0x7dc   : > { %v4924_v37 = vpop.eup %4923  ;;  %4943 = vrcp.f32 %v6743_v15 }
 0x7dd   : > { %v2181_v16 = vmul.f32 %v4924_v37, %v6453_v30  ;;  %4945 = vrcp.f32 %v6745_v27  ;;  %v7236_v37 = vld [vmem:[#allocation58_spill] sm:$0xff] }
 0x7de   : > { %2630 = vadd.xlane.f32.xlu1 %v6687_v25  ;;  %v2880_v3 = vpop.permute.xlu1 %2879  ;;  %v2177_v25 = vmul.f32 %v4922_v12, %v6449_v51  ;;  %4947 = vrcp.f32 %v6747_v38  ;;  %v7238_v38 = vld [vmem:[#allocation60_spill] sm:$0xff] }
 0x7df   : > { %v3055_v23 = vsel %vm291_vm0, %v6750_v18, %v2880_v3  ;;  %v4926_v18 = vpop.eup %4925 }
 0x7e0   : > { %v4928_v36 = vpop.eup %4927 }
 0x7e1   : > { %v2185_v22 = vmul.f32 %v4928_v36, %v6457_v6 }
 0x7e2   : > { %v2882_v62 = vpop.permute.xlu0 %2881 }
 0x7e3   : > { %v6815_v57 = vsel %vm291_vm0, %v841_v21, %v2882_v62 }
 0x7e6   : > { %v2884_v52 = vpop.permute.xlu1 %2883 }
 0x7e7   : > { %v6820_v13 = vsel %vm291_vm0, %v6754_v53, %v2884_v52  ;;  %v2179_v53 = vmul.f32 %v4926_v18, %v6447_v24 }
 0x7e9   : > { %2947 = vrot.lane.b32.xlu0 %v2177_v25, %s5097_s5 }
 0x7ea   : > { %v2886_v29 = vpop.permute.xlu1 %2885 }
 0x7eb   : > { %v6826_v21 = vsel %vm291_vm0, %v845_v43, %v2886_v29  ;;  %v4930_v43 = vpop.eup %4929  ;;  %v7237_v29 = vld [vmem:[#allocation59_spill] sm:$0xff] }
 0x7ec   : > { %v2189_v10 = vmul.f32 %v4930_v43, %v6461_v17  ;;  %v4932_v59 = vpop.eup %4931 }
 0x7ed   : > { %2951 = vrot.lane.b32.xlu0 %v2181_v16, %s5097_s5  ;;  %v2193_v6 = vmul.f32 %v4932_v59, %v6465_v9  ;;  %v4934_v4 = vpop.eup %4933 }
 0x7ee   : > { %v2888_v51 = vpop.permute.xlu0 %2887  ;;  %v2197_v17 = vmul.f32 %v4934_v4, %v6469_v0  ;;  %v4936_v19 = vpop.eup %4935 }
 0x7ef   : > { %v6834_v50 = vsel %vm291_vm0, %v6758_v56, %v2888_v51  ;;  %2949 = vrot.lane.b32.xlu1 %v2179_v53, %s5097_s5  ;;  %v2201_v9 = vmul.f32 %v4936_v19, %v6473_v58  ;;  %v4938_v3 = vpop.eup %4937 }
 0x7f0   : > { %v4940_v62 = vpop.eup %4939 }
 0x7f1   : > { %2955 = vrot.lane.b32.xlu0 %v2185_v22, %s5097_s5  ;;  %v2187_v32 = vmul.f32 %v4940_v62, %v6455_v11  ;;  %v4942_v7 = vpop.eup %4941 }
 0x7f2   : > { %v2890_v30 = vpop.permute.xlu1 %2889  ;;  %v4944_v52 = vpop.eup %4943 }
 0x7f3   : > { %v6842_v24 = vsel %vm291_vm0, %v6773_v40, %v2890_v30  ;;  %v2195_v27 = vmul.f32 %v4944_v52, %v7236_v37  ;;  %v4946_v18 = vpop.eup %4945 }
 0x7f4   : > { %v2199_v16 = vmul.f32 %v4946_v18, %v7237_v29  ;;  %v4948_v36 = vpop.eup %4947 }
 0x7f5   : > { %2959 = vrot.lane.b32.xlu0 %v2189_v10, %s5097_s5 }
 0x7f6   : > { %v2892_v56 = vpop.permute.xlu0 %2891 }
 0x7f7   : > { %v6848_v42 = vsel %vm291_vm0, %v6763_v20, %v2892_v56 }
 0x7f9   : > { %2963 = vrot.lane.b32.xlu0 %v2193_v6, %s5097_s5 }
 0x7fa   : > { %v2896_v47 = vpop.permute.xlu0 %2895 }
 0x7fb   : > { %v6854_v40 = vsel %vm291_vm0, %v6769_v61, %v2896_v47 }
 0x7fd   : > { %2967 = vrot.lane.b32.xlu0 %v2197_v17, %s5097_s5 }
 0x7fe   : > { %v2900_v60 = vpop.permute.xlu0 %2899 }
 0x7ff   : > { %v6860_v20 = vsel %vm291_vm0, %v6777_v41, %v2900_v60 }
 0x800   : > { %v2894_v54 = vpop.permute.xlu1 %2893 }
 0x801   : > { %v6865_v14 = vsel %vm291_vm0, %v6781_v35, %v2894_v54  ;;  %2971 = vrot.lane.b32.xlu0 %v2201_v9, %s5097_s5 }
 0x802   : > { %v2904_v61 = vpop.permute.xlu0 %2903 }
 0x803   : > { %v6870_v0 = vsel %vm291_vm0, %v6785_v28, %v2904_v61 }
 0x804   : > { %v2898_v2 = vpop.permute.xlu1 %2897 }
 0x805   : > { %v6874_v5 = vsel %vm291_vm0, %v6789_v45, %v2898_v2 }
 0x806   : > { %v2908_v41 = vpop.permute.xlu0 %2907 }
 0x807   : > { %v6878_v58 = vsel %vm291_vm0, %v6793_v44, %v2908_v41 }
 0x808   : > { %v2902_v34 = vpop.permute.xlu1 %2901 }
 0x809   : > { %v6882_v35 = vsel %vm291_vm0, %v6797_v8, %v2902_v34 }
 0x80a   : > { %v2944_v33 = vpop.permute.xlu0 %2943 }
 0x80b   : > { %v6885_v28 = vsel %vm3071_vm2, %v3055_v23, %v2944_v33 }
 0x80c   : > { %v2906_v1 = vpop.permute.xlu1 %2905 }
 0x80d   : > { %v6889_v45 = vsel %vm291_vm0, %v6801_v31, %v2906_v1 }
 0x810   : > { %v2910_v55 = vpop.permute.xlu1 %2909 }
 0x811   : > { %v6893_v44 = vsel %vm291_vm0, %v6806_v46, %v2910_v55 }
 0x813   : > { %2634 = vadd.xlane.f32.xlu1 %v6697_v63  ;;  %v2183_v63 = vmul.f32 %v4938_v3, %v6451_v39  ;;  %v2191_v39 = vmul.f32 %v4942_v7, %v6459_v49  ;;  %v2203_v49 = vmul.f32 %v4948_v36, %v7238_v38 }
 0x814   : > { %v2946_v48 = vpop.permute.xlu1 %2945 }
 0x815   : > { %v6899_v8 = vsel %vm3071_vm2, %v6815_v57, %v2946_v48 }
 0x81e   : > { %v4097_v31 = vpop.f32.mrb[48].mxu0 }
 0x81f   : > { %v6903_v23 = vpop.f32.mrb[49].mxu0 }
 0x822   : > { %v4100_v46 = vpop.f32.mrb[50].mxu0 }
 0x823   : > { %v6907_v12 = vpop.f32.mrb[51].mxu0 }
 0x824   : > { %2953 = vrot.lane.b32.xlu1 %v2183_v63, %s5097_s5 }
 0x826   : > { %v4103_v26 = vpop.f32.mrb[52].mxu0 }
 0x827   : > { %v6912_v57 = vpop.f32.mrb[53].mxu0 }
 0x828   : > { %2957 = vrot.lane.b32.xlu1 %v2187_v32, %s5097_s5 }
 0x82a   : > { %v4106_v15 = vpop.f32.mrb[54].mxu0 }
 0x82b   : > { %v6917_v25 = vpop.f32.mrb[55].mxu0 }
 0x82c   : > { %2961 = vrot.lane.b32.xlu1 %v2191_v39, %s5097_s5 }
 0x830   : > { %2965 = vrot.lane.b32.xlu1 %v2195_v27, %s5097_s5 }
 0x832   : > { %v4109_v11 = vpop.f32.mrb[56].mxu0 }
 0x833   : > { %v6923_v53 = vpop.f32.mrb[57].mxu0 }
 0x834   : > { %2969 = vrot.lane.b32.xlu1 %v2199_v16, %s5097_s5 }
 0x838   : > { %2973 = vrot.lane.b32.xlu1 %v2203_v49, %s5097_s5 }
 0x844   : > { %v2609_v51 = vpop.xlane.xlu0 %2608 }
 0x845   : > { %4949 = vrcp.f32 %v2609_v51 }
 0x848   : > { %v2613_v22 = vpop.xlane.xlu0 %2612 }
 0x849   : > { %4951 = vrcp.f32 %v2613_v22 }
 0x84c   : > { %v2617_v43 = vpop.xlane.xlu0 %2616 }
 0x84d   : > { %4953 = vrcp.f32 %v2617_v43 }
 0x84f   : > { %v4950_v30 = vpop.eup %4949 }
 0x850   : > { %v2621_v10 = vpop.xlane.xlu0 %2620  ;;  %v2834_v59 = vmul.f32 %v4950_v30, %v4097_v31 }
 0x851   : > { %4955 = vrcp.f32 %v2621_v10 }
 0x852   : > { %3009 = vrot.lane.b32.xlu1 %v2834_v59, %s5098_s12 }
 0x853   : > { %v4952_v56 = vpop.eup %4951  ;;  %v2607_v6 = vpop.xlane.xlu1 %2606 }
 0x854   : > { %4957 = vrcp.f32 %v2607_v6  ;;  %v2625_v4 = vpop.xlane.xlu0 %2624  ;;  %v2838_v47 = vmul.f32 %v4952_v56, %v4100_v46 }
 0x855   : > { %4959 = vrcp.f32 %v2625_v4 }
 0x856   : > { %3013 = vrot.lane.b32.xlu1 %v2838_v47, %s5098_s12 }
 0x857   : > { %v4954_v17 = vpop.eup %4953  ;;  %v2611_v19 = vpop.xlane.xlu1 %2610 }
 0x858   : > { %v4112_v60 = vpop.f32.mrb[58].mxu0  ;;  %4961 = vrcp.f32 %v2611_v19  ;;  %v2629_v9 = vpop.xlane.xlu0 %2628  ;;  %v2842_v61 = vmul.f32 %v4954_v17, %v4103_v26 }
 0x859   : > { %v2802_v54 = vpop.f32.mrb[59].mxu0  ;;  %4963 = vrcp.f32 %v2629_v9 }
 0x85a   : > { %3017 = vrot.lane.b32.xlu1 %v2842_v61, %s5098_s12 }
 0x85b   : > { %v4956_v2 = vpop.eup %4955  ;;  %v2615_v41 = vpop.xlane.xlu1 %2614 }
 0x85c   : > { %v4115_v34 = vpop.f32.mrb[60].mxu0  ;;  %4965 = vrcp.f32 %v2615_v41  ;;  %v2633_v33 = vpop.xlane.xlu0 %2632  ;;  %v2846_v55 = vmul.f32 %v4956_v2, %v4106_v15 }
 0x85d   : > { %v2812_v1 = vpop.f32.mrb[61].mxu0  ;;  %4967 = vrcp.f32 %v2633_v33 }
 0x85e   : > { %v4958_v48 = vpop.eup %4957  ;;  %3021 = vrot.lane.b32.xlu1 %v2846_v55, %s5098_s12 }
 0x85f   : > { %v4960_v31 = vpop.eup %4959  ;;  %v2619_v3 = vpop.xlane.xlu1 %2618  ;;  %v2832_v63 = vmul.f32 %v4958_v48, %v6903_v23 }
 0x860   : > { %v4118_v46 = vpop.f32.mrb[62].mxu0  ;;  %4969 = vrcp.f32 %v2619_v3  ;;  %v2637_v62 = vpop.xlane.xlu0 %2636  ;;  %v2850_v32 = vmul.f32 %v4960_v31, %v4109_v11 }
 0x861   : > { %v2822_v26 = vpop.f32.mrb[63].mxu0  ;;  %4971 = vrcp.f32 %v2637_v62  ;;  %3007 = vrot.lane.b32.xlu0 %v2832_v63, %s5098_s12 }
 0x862   : > { %v4962_v7 = vpop.eup %4961  ;;  %3025 = vrot.lane.b32.xlu1 %v2850_v32, %s5098_s12 }
 0x863   : > { %v4964_v15 = vpop.eup %4963  ;;  %v2623_v39 = vpop.xlane.xlu1 %2622  ;;  %v2836_v52 = vmul.f32 %v4962_v7, %v6907_v12 }
 0x864   : > { %4973 = vrcp.f32 %v2623_v39  ;;  %v2854_v37 = vmul.f32 %v4964_v15, %v4112_v60  ;;  %v2948_v47 = vpop.permute.xlu0 %2947 }
 0x865   : > { %3011 = vrot.lane.b32.xlu0 %v2836_v52, %s5098_s12  ;;  %v3074_v39 = vsel %vm3071_vm2, %v6820_v13, %v2948_v47 }
 0x866   : > { %v4966_v27 = vpop.eup %4965  ;;  %3029 = vrot.lane.b32.xlu1 %v2854_v37, %s5098_s12 }
 0x867   : > { %v4968_v23 = vpop.eup %4967  ;;  %v2627_v18 = vpop.xlane.xlu1 %2626  ;;  %v2840_v11 = vmul.f32 %v4966_v27, %v6912_v57 }
 0x868   : > { %4975 = vrcp.f32 %v2627_v18  ;;  %v2858_v29 = vmul.f32 %v4968_v23, %v4115_v34  ;;  %v2952_v19 = vpop.permute.xlu0 %2951 }
 0x869   : > { %3015 = vrot.lane.b32.xlu0 %v2840_v11, %s5098_s12  ;;  %v3076_v23 = vsel %vm3071_vm2, %v6834_v50, %v2952_v19 }
 0x86a   : > { %v4970_v16 = vpop.eup %4969  ;;  %3033 = vrot.lane.b32.xlu1 %v2858_v29, %s5098_s12 }
 0x86b   : > { %v4972_v36 = vpop.eup %4971  ;;  %v2631_v12 = vpop.xlane.xlu1 %2630  ;;  %v2844_v38 = vmul.f32 %v4970_v16, %v6917_v25 }
 0x86c   : > { %4977 = vrcp.f32 %v2631_v12  ;;  %v2862_v49 = vmul.f32 %v4972_v36, %v4118_v46  ;;  %v2956_v9 = vpop.permute.xlu0 %2955 }
 0x86d   : > { %3019 = vrot.lane.b32.xlu0 %v2844_v38, %s5098_s12  ;;  %v3078_v16 = vsel %vm3071_vm2, %v6848_v42, %v2956_v9 }
 0x86e   : > { %v4974_v51 = vpop.eup %4973  ;;  %3037 = vrot.lane.b32.xlu1 %v2862_v49, %s5098_s12 }
 0x86f   : > { %v2848_v57 = vmul.f32 %v4974_v51, %v6923_v53  ;;  %v2950_v25 = vpop.permute.xlu1 %2949 }
 0x870   : > { %v2960_v61 = vpop.permute.xlu0 %2959 }
 0x871   : > { %3023 = vrot.lane.b32.xlu0 %v2848_v57, %s5098_s12  ;;  %v3080_v49 = vsel %vm3071_vm2, %v6854_v40, %v2960_v61 }
 0x872   : > { %v4976_v22 = vpop.eup %4975 }
 0x873   : > { %v2852_v43 = vmul.f32 %v4976_v22, %v2802_v54 }
 0x874   : > { %v2964_v41 = vpop.permute.xlu0 %2963 }
 0x875   : > { %3027 = vrot.lane.b32.xlu0 %v2852_v43, %s5098_s12 }
 0x876   : > { %v4978_v30 = vpop.eup %4977 }
 0x877   : > { %v2856_v10 = vmul.f32 %v4978_v30, %v2812_v1  ;;  %v3075_v1 = vsel %vm3071_vm2, %v6826_v21, %v2950_v25 }
 0x878   : > { %v2968_v48 = vpop.permute.xlu0 %2967 }
 0x879   : > { %3031 = vrot.lane.b32.xlu0 %v2856_v10, %s5098_s12  ;;  %v3084_v43 = vsel %vm3071_vm2, %v6870_v0, %v2968_v48 }
 0x87c   : > { %v2972_v63 = vpop.permute.xlu0 %2971 }
 0x8a0   : > { %v2635_v59 = vpop.xlane.xlu1 %2634 }
 0x8a1   : > { %4979 = vrcp.f32 %v2635_v59 }
 0x8a4   : > { %v2954_v56 = vpop.permute.xlu1 %2953 }
 0x8a8   : > { %v2958_v6 = vpop.permute.xlu1 %2957 }
 0x8a9   : > { %v3079_v21 = vsel %vm3071_vm2, %v6865_v14, %v2958_v6 }
 0x8ab   : > { %v4980_v4 = vpop.eup %4979 }
 0x8ac   : > { %v2860_v53 = vmul.f32 %v4980_v4, %v2822_v26  ;;  %v2962_v17 = vpop.permute.xlu1 %2961 }
 0x8ae   : > { %3035 = vrot.lane.b32.xlu0 %v2860_v53, %s5098_s12 }
 0x8b0   : > { %v2966_v60 = vpop.permute.xlu1 %2965 }
 0x8b1   : > { %v3083_v37 = vsel %vm3071_vm2, %v6882_v35, %v2966_v60 }
 0x8b4   : > { %v2970_v54 = vpop.permute.xlu1 %2969 }
 0x8b5   : > { %v3085_v13 = vsel %vm3071_vm2, %v6889_v45, %v2970_v54 }
 0x8b8   : > { %v2974_v2 = vpop.permute.xlu1 %2973 }
 0x8b9   : > { %v3087_v50 = vsel %vm3071_vm2, %v6893_v44, %v2974_v2  ;;  %v3082_v44 = vsel %vm3071_vm2, %v6860_v20, %v2964_v41  ;;  %v3086_v20 = vsel %vm3071_vm2, %v6878_v58, %v2972_v63 }
 0x8c4   : > { %v3010_v34 = vpop.permute.xlu1 %3009 }
 0x8c5   : > { %v3090_v33 = vsel %vm3088_vm3, %v6899_v8, %v3010_v34  ;;  %v3077_v8 = vsel %vm3071_vm2, %v6842_v24, %v2954_v56  ;;  %v3081_v24 = vsel %vm3071_vm2, %v6874_v5, %v2962_v17 }
 0x8c6   : > { %3107 = vst.msk [vmem:[%s6954_s13 + $0x8] sm:$0xff] %vm3105_vm4, %v3090_v33 }
 0x8c8   : > { %v3014_v55 = vpop.permute.xlu1 %3013 }
 0x8c9   : > { %v3092_v31 = vsel %vm3088_vm3, %v3075_v1, %v3014_v55 }
 0x8ca   : > { %3109 = vst.msk [vmem:[%s6954_s13 + $0x18] sm:$0xff] %vm3105_vm4, %v3092_v31 }
 0x8cc   : > { %v3018_v3 = vpop.permute.xlu1 %3017 }
 0x8cd   : > { %v3094_v46 = vsel %vm3088_vm3, %v3077_v8, %v3018_v3 }
 0x8ce   : > { %3111 = vst.msk [vmem:[%s6954_s13 + $0x28] sm:$0xff] %vm3105_vm4, %v3094_v46 }
 0x8d0   : > { %v3022_v62 = vpop.permute.xlu1 %3021 }
 0x8d1   : > { %v3096_v26 = vsel %vm3088_vm3, %v3079_v21, %v3022_v62 }
 0x8d2   : > { %3113 = vst.msk [vmem:[%s6954_s13 + $0x38] sm:$0xff] %vm3105_vm4, %v3096_v26 }
 0x8d3   : > { %v3008_v32 = vpop.permute.xlu0 %3007 }
 0x8d4   : > { %v3089_v7 = vsel %vm3088_vm3, %v6885_v28, %v3008_v32  ;;  %v3026_v15 = vpop.permute.xlu1 %3025 }
 0x8d5   : > { %3106 = vst.msk [vmem:[%s6954_s13] sm:$0xff] %vm3105_vm4, %v3089_v7  ;;  %v3098_v14 = vsel %vm3088_vm3, %v3081_v24, %v3026_v15 }
 0x8d6   : > { %3115 = vst.msk [vmem:[%s6954_s13 + $0x48] sm:$0xff] %vm3105_vm4, %v3098_v14 }
 0x8d7   : > { %v3012_v52 = vpop.permute.xlu0 %3011 }
 0x8d8   : > { %v3091_v5 = vsel %vm3088_vm3, %v3074_v39, %v3012_v52  ;;  %v3030_v27 = vpop.permute.xlu1 %3029 }
 0x8d9   : > { %3108 = vst.msk [vmem:[%s6954_s13 + $0x10] sm:$0xff] %vm3105_vm4, %v3091_v5  ;;  %v3100_v28 = vsel %vm3088_vm3, %v3083_v37, %v3030_v27 }
 0x8da   : > { %3117 = vst.msk [vmem:[%s6954_s13 + $0x58] sm:$0xff] %vm3105_vm4, %v3100_v28 }
 0x8db   : > { %v3016_v18 = vpop.permute.xlu0 %3015 }
 0x8dc   : > { %v3093_v35 = vsel %vm3088_vm3, %v3076_v23, %v3016_v18  ;;  %v3034_v11 = vpop.permute.xlu1 %3033 }
 0x8dd   : > { %3110 = vst.msk [vmem:[%s6954_s13 + $0x20] sm:$0xff] %vm3105_vm4, %v3093_v35  ;;  %v3102_v29 = vsel %vm3088_vm3, %v3085_v13, %v3034_v11 }
 0x8de   : > { %3119 = vst.msk [vmem:[%s6954_s13 + $0x68] sm:$0xff] %vm3105_vm4, %v3102_v29 }
 0x8df   : > { %v3020_v36 = vpop.permute.xlu0 %3019 }
 0x8e0   : > { %v3095_v45 = vsel %vm3088_vm3, %v3078_v16, %v3020_v36  ;;  %v3038_v12 = vpop.permute.xlu1 %3037 }
 0x8e1   : > { %3112 = vst.msk [vmem:[%s6954_s13 + $0x30] sm:$0xff] %vm3105_vm4, %v3095_v45  ;;  %v3104_v38 = vsel %vm3088_vm3, %v3087_v50, %v3038_v12 }
 0x8e2   : > { %3121 = vst.msk [vmem:[%s6954_s13 + $0x78] sm:$0xff] %vm3105_vm4, %v3104_v38 }
 0x8e3   : > { %v3024_v42 = vpop.permute.xlu0 %3023 }
 0x8e4   : > { %v3097_v51 = vsel %vm3088_vm3, %v3080_v49, %v3024_v42 }
 0x8e5   : > { %3114 = vst.msk [vmem:[%s6954_s13 + $0x40] sm:$0xff] %vm3105_vm4, %v3097_v51 }
 0x8e7   : > { %v3028_v57 = vpop.permute.xlu0 %3027 }
 0x8e8   : > { %v3099_v22 = vsel %vm3088_vm3, %v3082_v44, %v3028_v57 }
 0x8e9   : > { %3116 = vst.msk [vmem:[%s6954_s13 + $0x50] sm:$0xff] %vm3105_vm4, %v3099_v22 }
 0x8eb   : > { %v3032_v40 = vpop.permute.xlu0 %3031 }
 0x8ec   : > { %v3101_v30 = vsel %vm3088_vm3, %v3084_v43, %v3032_v40 }
 0x8ed   : > { %3118 = vst.msk [vmem:[%s6954_s13 + $0x60] sm:$0xff] %vm3105_vm4, %v3101_v30 }
 0x920   : > { %v3036_v10 = vpop.permute.xlu0 %3035 }
 0x921   : > { %v3103_v0 = vsel %vm3088_vm3, %v3086_v20, %v3036_v10 }
 0x922   : > { %3120 = vst.msk [vmem:[%s6954_s13 + $0x70] sm:$0xff] %vm3105_vm4, %v3103_v0 }
 0x923   : > { %5042 = shalt.err (!%p5039_p3)
}
 0x924   : > { %s5043_s6 = scalar_lea.hbm %s7032_s27, 2048  ;;  %s5047_s12 = scalar_lea.hbm %s7089_s4, 8192 }
 0x925   : > { %p5044_p4 = scmp.ne.s32.totalorder %s7032_s27, %s5043_s6  ;;  %p5048_p9 = scmp.lt.u32.totalorder %s7032_s27, %s7089_s4 }
 0x926   : > { %p5049_p10 = scmp.lt.u32.totalorder %s5047_s12, %s5043_s6  ;;  %p5051_p12 = scmp.lt.u32.totalorder %s5043_s6, %s7032_s27 }
 0x927   : > { %p5045_p7 = pnand %p5044_p4, %p5164_p5 }
 0x928   : > { %p5050_p11 = por %p5049_p10, %p5048_p9 }
 0x929   : > { %p5046_p8 = pneg %p5045_p7 }
 0x92a   : > { %p5052_p13 = por %p5051_p12, %p5050_p11 }
 0x92c   : > { %p5053_p0 = pnand %p5052_p13, %p5046_p8 }
 0x92e   : > { %5056 = shalt.err (!%p5053_p0)
}
 0x92f   : > { %s5100_s13 = smov 128  }
 0x930   : > { %4439 = dma.vmem_to_hbm [thread:$0]  (%p5164_p5), %s7036_s20, 2048, %s7032_s27, %s7043_s19, %s5100_s13, %s5100_s13, %s5096_s10  }
 0x931 PF: > { %p4445_p1 = scmp.ge.s32.totalorder %s5091_s18, 2  ;;  %s3151_s14 = sand.u32 1, %s5079_s15  }
 0x932   : > { %s3152_s22 = scalar_lea.sflag [#allocation3], %s3151_s14 }
 0x933   : > { %p4442_p2 = pnand %p4445_p1, %p5168_p6 }
 0x935   : > { %5074 = dma.done.wait (!%p4442_p2), %s3152_s22, 2048  }
 0x936   : > { %5076 = vsyncadd (!%p4442_p2), %s3152_s22, 4294965248  ;;  %p14_p3 = scmp.ge.s32.totalorder %s5151_s21, 6   ;;  %s7239_s15 = smov %s5083_s16 }
 0x937   : > { %s7240_s16 = smov %s5087_s17  ;;  %s7241_s17 = smov %s5162_s24 }
 0x938   : > { %s7242_s18 = smov %s5151_s21  ;;  %16 = sbr.rel (!%p14_p3) target bundleno = 3 (0x3), region = 80 }
 0x93f   :  { %3157 = vsyncpa [#allocation3], 1 }
 0x940   :  { %3159 = vsyncpa [#allocation3 + $0x1], 1 }

</bundles_post_ra>
